<compile_context>
chip_gen: v7x
topology: tpu7x:2x2x1
jax: 0.10.0
libtpu: 0.0.40
codegen_flags: <defaults>
</compile_context>

<pallas_src>
import functools
import itertools

import numpy as np
import jax
import jax.numpy as jnp
from jax.experimental import pallas as pl
from jax.experimental.pallas import tpu as pltpu

# ----------------------------- config (LevitConfig defaults, small image) -----------------------------
BATCH = 2
IMAGE_SIZE = 64              # small stand-in for 224 (must be divisible by PATCH_SIZE)
PATCH_SIZE = 16
NUM_CHANNELS = 1
HIDDEN_SIZES = [128, 256, 384]
NUM_HEADS = [4, 8, 12]
DEPTHS = [4, 4, 4]
KEY_DIM = [16, 16, 16]
MLP_RATIO = [2, 2, 2]
ATTN_RATIO = [2, 2, 2]
DOWN_OPS = [
    ["Subsample", KEY_DIM[0], HIDDEN_SIZES[0] // KEY_DIM[0], 4, 2, 2],
    ["Subsample", KEY_DIM[0], HIDDEN_SIZES[1] // KEY_DIM[0], 4, 2, 2],
    [""],
]
NUM_LABELS = 3
BN_EPS = 1e-5

# thresholds below which a Pallas launch is pure overhead -> plain jnp inside the jit
MIN_PALLAS_M = 32            # rows of a linear
MIN_PALLAS_ATTN = 256        # b*h*nq*nk elements of the score matrix


def _hardswish(y):
    return y * jnp.clip(y + 3.0, 0.0, 6.0) * (1.0 / 6.0)


# ----------------------------- Pallas kernels -----------------------------
def _linear_bn_kernel(x_ref, w_ref, shift_ref, o_ref, *, apply_hardswish):
    """y = hardswish?( x @ w + shift )  -- BN scale already folded into w, shift = BN beta."""
    y = jnp.dot(x_ref[...], w_ref[...], preferred_element_type=jnp.float32)
    y = y + shift_ref[...]
    if apply_hardswish:
        y = _hardswish(y)
    o_ref[...] = y.astype(o_ref.dtype)


def _linear_bn_res_kernel(x_ref, w_ref, shift_ref, res_ref, o_ref, *, apply_hardswish):
    """Same as above but with the residual add fused in (projection / MLP-down paths)."""
    y = jnp.dot(x_ref[...], w_ref[...], preferred_element_type=jnp.float32)
    y = y + shift_ref[...]
    if apply_hardswish:
        y = _hardswish(y)
    y = y + res_ref[...].astype(jnp.float32)
    o_ref[...] = y.astype(o_ref.dtype)


def _attention_kernel(q_ref, k_ref, v_ref, bias_ref, o_ref, *, scale, batch):
    """All (batch*head) slices in one step: hardswish(softmax(q k^T * scale + bias) @ v).
    q/k/v are (b*h, n, d) bf16; bias is (h, nq, nk) f32 and is replicated over batch
    in VMEM only (never materialized in HBM)."""
    q = q_ref[...]                                    # (bh, nq, d)   bf16
    k = k_ref[...]                                    # (bh, nk, d)   bf16
    v = v_ref[...]                                    # (bh, nk, dv)  bf16
    bias = jnp.tile(bias_ref[...], (batch, 1, 1))     # (bh, nq, nk)  f32
    s = jnp.einsum('bqd,bkd->bqk', q, k,
                   preferred_element_type=jnp.float32) * scale + bias
    s = s - jnp.max(s, axis=-1, keepdims=True)
    p = jnp.exp(s)
    p = p * pl.reciprocal(jnp.sum(p, axis=-1, keepdims=True), approx=True)
    ctx = jnp.einsum('bqk,bkd->bqd', p.astype(v.dtype), v,
                     preferred_element_type=jnp.float32)
    o_ref[...] = _hardswish(ctx).astype(o_ref.dtype)  # LeViT: Hardswish before projection


# ----------------------------- cached pallas_call builders -----------------------------
@functools.lru_cache(maxsize=None)
def _build_linear_bn(pad_m, tm, k, n, apply_hardswish, has_residual, out_dtype_name):
    out_dtype = jnp.dtype(out_dtype_name)
    if has_residual:
        kernel = functools.partial(_linear_bn_res_kernel, apply_hardswish=apply_hardswish)
    else:
        kernel = functools.partial(_linear_bn_kernel, apply_hardswish=apply_hardswish)
    in_specs = [
        pl.BlockSpec((tm, k), lambda i: (i, 0)),
        pl.BlockSpec((k, n), lambda i: (0, 0)),
        pl.BlockSpec((1, n), lambda i: (0, 0)),
    ]
    if has_residual:
        in_specs.append(pl.BlockSpec((tm, n), lambda i: (i, 0)))
    return pl.pallas_call(
        kernel,
        out_shape=jax.ShapeDtypeStruct((pad_m, n), out_dtype),
        grid_spec=pltpu.PrefetchScalarGridSpec(
            num_scalar_prefetch=0,
            grid=(pad_m // tm,),
            in_specs=in_specs,
            out_specs=pl.BlockSpec((tm, n), lambda i: (i, 0)),
        ),
        compiler_params=pltpu.CompilerParams(dimension_semantics=("parallel",)),
    )


@functools.lru_cache(maxsize=None)
def _build_attention(b, h, nq, nk, d, dv, scale):
    kernel = functools.partial(_attention_kernel, scale=scale, batch=b)
    # grid=() -> single step, whole tensors resident in VMEM (tiny shapes).
    return pl.pallas_call(
        kernel,
        out_shape=jax.ShapeDtypeStruct((b * h, nq, dv), jnp.float32),
    )


# ----------------------------- wrappers -----------------------------
def _round_up(x, m):
    return ((x + m - 1) // m) * m


def fused_linear_bn(x2d, w_bf16, shift, activation, residual=None, out_dtype=jnp.float32):
    """x2d: (M, K) @ w: (K, N) bf16 (BN scale folded in), + shift, optional Hardswish,
    optional fused residual add (residual: (M, N) f32). Output dtype selectable."""
    m, k = x2d.shape
    n = w_bf16.shape[1]
    x_bf = x2d.astype(jnp.bfloat16)
    if m < MIN_PALLAS_M:
        # launch-overhead dominated (stage-2/3 token paths, classifier-sized matmuls):
        # let XLA fuse it with the surrounding reshapes.
        y = jnp.dot(x_bf, w_bf16, preferred_element_type=jnp.float32) + shift[None, :]
        if activation:
            y = _hardswish(y)
        if residual is not None:
            y = y + residual
        return y.astype(out_dtype)
    if m >= 2048:
        tm = 1024            # >=2 parallel grid steps -> both v7x TensorCores get work
    elif m >= 512:
        tm = 256
    else:
        tm = _round_up(m, 8)
    pad_m = _round_up(m, tm)
    if pad_m != m:
        x_bf = jnp.pad(x_bf, ((0, pad_m - m), (0, 0)))
        if residual is not None:
            residual = jnp.pad(residual, ((0, pad_m - m), (0, 0)))
    call = _build_linear_bn(pad_m, tm, k, n, bool(activation),
                            residual is not None, jnp.dtype(out_dtype).name)
    args = [x_bf, w_bf16, shift.reshape(1, n)]
    if residual is not None:
        args.append(residual.astype(jnp.float32))
    y = call(*args)
    return y[:m]


def attention_block(q, k, v, bias, scale):
    """q,k,v: (b, h, n, d); bias: (h, nq, nk) f32.  Returns (b, h, nq, dv) f32 (Hardswish fused)."""
    b, h, nq, d = q.shape
    nk = k.shape[2]
    dv = v.shape[3]
    q = q.astype(jnp.bfloat16)
    k = k.astype(jnp.bfloat16)
    v = v.astype(jnp.bfloat16)
    if b * h * nq * nk < MIN_PALLAS_ATTN:
        # 1-token / tiny attention (stage 3 & last subsample): plain XLA, fuses for free.
        s = jnp.einsum('bhqd,bhkd->bhqk', q, k,
                       preferred_element_type=jnp.float32) * scale + bias[None]
        s = s - jnp.max(s, axis=-1, keepdims=True)
        p = jnp.exp(s)
        p = p / jnp.sum(p, axis=-1, keepdims=True)
        ctx = jnp.einsum('bhqk,bhkd->bhqd', p.astype(v.dtype), v,
                         preferred_element_type=jnp.float32)
        return _hardswish(ctx)
    call = _build_attention(b, h, nq, nk, d, dv, float(scale))
    out = call(q.reshape(b * h, nq, d),
               k.reshape(b * h, nk, d),
               v.reshape(b * h, nk, dv),
               bias)
    return out.reshape(b, h, nq, dv)


def im2col_3x3_s2_p1(x_nchw):
    """3x3 conv, stride 2, padding 1 -> patch matrix (B*Ho*Wo, Cin*9), feature order (c, kh, kw)."""
    b, c, h, w = x_nchw.shape
    ho = (h + 2 - 3) // 2 + 1
    wo = (w + 2 - 3) // 2 + 1
    xp = jnp.pad(x_nchw, ((0, 0), (0, 0), (1, 1), (1, 1)))
    cols = []
    for kh in range(3):
        for kw in range(3):
            cols.append(xp[:, :, kh:kh + 2 * (ho - 1) + 1:2, kw:kw + 2 * (wo - 1) + 1:2])
    patches = jnp.stack(cols, axis=2)                       # (B, C, 9, Ho, Wo)
    patches = patches.transpose(0, 3, 4, 1, 2).reshape(b * ho * wo, c * 9)
    return patches, ho, wo


# ----------------------------- attention bias index tables (exactly as HF LeViT) -----------------------------
def attention_bias_idxs(resolution):
    points = list(itertools.product(range(resolution), range(resolution)))
    offsets, indices = {}, []
    for p1 in points:
        for p2 in points:
            off = (abs(p1[0] - p2[0]), abs(p1[1] - p2[1]))
            if off not in offsets:
                offsets[off] = len(offsets)
            indices.append(offsets[off])
    return np.array(indices, dtype=np.int32).reshape(len(points), len(points)), len(offsets)


def attention_bias_idxs_subsample(resolution_in, resolution_out, stride):
    points = list(itertools.product(range(resolution_in), range(resolution_in)))
    points_ = list(itertools.product(range(resolution_out), range(resolution_out)))
    offsets, indices = {}, []
    for p1 in points_:
        for p2 in points:
            off = (abs(p1[0] * stride - p2[0]), abs(p1[1] * stride - p2[1]))
            if off not in offsets:
                offsets[off] = len(offsets)
            indices.append(offsets[off])
    return np.array(indices, dtype=np.int32).reshape(len(points_), len(points)), len(offsets)


# ----------------------------- static block plan (NOT a jit argument) -----------------------------
def build_plan():
    plan = []
    resolution = IMAGE_SIZE // PATCH_SIZE
    for si in range(len(DEPTHS)):
        blocks = []
        hs, kd, nh, ar, mr = HIDDEN_SIZES[si], KEY_DIM[si], NUM_HEADS[si], ATTN_RATIO[si], MLP_RATIO[si]
        for _ in range(DEPTHS[si]):
            blocks.append(dict(type="attn", dim=hs, num_heads=nh, key_dim=kd,
                               attn_ratio=ar, resolution=resolution))
            if mr > 0:
                blocks.append(dict(type="mlp", dim=hs, hidden_dim=hs * mr))
        if DOWN_OPS[si][0] == "Subsample":
            _, kdd, nhd, ard, mrd, stride = DOWN_OPS[si]
            r_out = (resolution - 1) // stride + 1
            in_dim, out_dim = HIDDEN_SIZES[si], HIDDEN_SIZES[si + 1]
            blocks.append(dict(type="subsample", in_dim=in_dim, out_dim=out_dim,
                               num_heads=nhd, key_dim=kdd, attn_ratio=ard,
                               resolution_in=resolution, resolution_out=r_out, stride=stride))
            resolution = r_out
            if mrd > 0:
                blocks.append(dict(type="mlp", dim=out_dim, hidden_dim=out_dim * mrd))
        plan.append(blocks)
    return plan


PLAN = build_plan()


# ----------------------------- parameter construction (synthetic, deterministic) -----------------------------
class ParamGen:
    def __init__(self, key):
        self._key = key

    def normal(self, shape, std):
        self._key, sub = jax.random.split(self._key)
        return std * jax.random.normal(sub, shape, dtype=jnp.float32)


def make_bn(pg, n):
    # inference-mode BN with running_mean=0, running_var=1, gamma/beta slightly randomized
    gamma = 1.0 + 0.05 * pg.normal((n,), 1.0)
    beta = 0.02 * pg.normal((n,), 1.0)
    scale = gamma / jnp.sqrt(jnp.ones((n,), jnp.float32) + BN_EPS)
    shift = beta
    return scale, shift


def _fold(w, scale):
    """Fold BN scale into the weight columns; store as bf16 for the MXU."""
    return (w * scale[None, :]).astype(jnp.bfloat16)


def build_params(key):
    """Array-only pytree (jit argument); static metadata lives in PLAN."""
    pg = ParamGen(key)
    params = {}

    # patch embeddings: 4 x (Conv2d 3x3 s2 p1, no bias) + BN2d, Hardswish after layers 1-3
    chans = [NUM_CHANNELS, HIDDEN_SIZES[0] // 8, HIDDEN_SIZES[0] // 4,
             HIDDEN_SIZES[0] // 2, HIDDEN_SIZES[0]]
    pe = []
    for i in range(4):
        cin, cout = chans[i], chans[i + 1]
        w = pg.normal((cout, cin, 3, 3), std=(cin * 9) ** -0.5)   # PyTorch (Cout, Cin, kh, kw)
        scale, shift = make_bn(pg, cout)
        pe.append(dict(w=_fold(w.reshape(cout, cin * 9).T, scale), shift=shift))
    params["patch_embed"] = pe

    stages = []
    for plan_blocks in PLAN:
        blocks = []
        for bp in plan_blocks:
            if bp["type"] == "attn":
                hs, kd, nh, ar = bp["dim"], bp["key_dim"], bp["num_heads"], bp["attn_ratio"]
                dv = ar * kd
                out_kv = nh * (2 * kd + dv)
                out_proj = nh * dv
                idxs, n_off = attention_bias_idxs(bp["resolution"])
                biases = pg.normal((nh, n_off), std=0.02)
                qkv_s, qkv_b = make_bn(pg, out_kv)
                pj_s, pj_b = make_bn(pg, hs)
                blocks.append(dict(
                    qkv_w=_fold(pg.normal((hs, out_kv), std=hs ** -0.5), qkv_s), qkv_shift=qkv_b,
                    proj_w=_fold(pg.normal((out_proj, hs), std=out_proj ** -0.5), pj_s), proj_shift=pj_b,
                    att_bias=biases[:, idxs]))                      # (nh, nq, nk)
            elif bp["type"] == "mlp":
                hs, hd = bp["dim"], bp["hidden_dim"]
                u_s, u_b = make_bn(pg, hd)
                d_s, d_b = make_bn(pg, hs)
                blocks.append(dict(
                    up_w=_fold(pg.normal((hs, hd), std=hs ** -0.5), u_s), up_shift=u_b,
                    down_w=_fold(pg.normal((hd, hs), std=hd ** -0.5), d_s), down_shift=d_b))
            else:  # subsample attention
                in_dim, out_dim = bp["in_dim"], bp["out_dim"]
                kd, nh, ar = bp["key_dim"], bp["num_heads"], bp["attn_ratio"]
                dv = ar * kd
                out_kv = nh * (kd + dv)
                out_proj = nh * dv
                idxs, n_off = attention_bias_idxs_subsample(
                    bp["resolution_in"], bp["resolution_out"], bp["stride"])
                biases = pg.normal((nh, n_off), std=0.02)
                kv_s, kv_b = make_bn(pg, out_kv)
                q_s, q_b = make_bn(pg, kd * nh)
                pj_s, pj_b = make_bn(pg, out_dim)
                blocks.append(dict(
                    kv_w=_fold(pg.normal((in_dim, out_kv), std=in_dim ** -0.5), kv_s), kv_shift=kv_b,
                    q_w=_fold(pg.normal((in_dim, kd * nh), std=in_dim ** -0.5), q_s), q_shift=q_b,
                    proj_w=_fold(pg.normal((out_proj, out_dim), std=out_proj ** -0.5), pj_s),
                    proj_shift=pj_b,
                    att_bias=biases[:, idxs]))                      # (nh, nq, nk)
        stages.append(blocks)
    params["stages"] = stages

    params["classifier"] = dict(
        w=pg.normal((HIDDEN_SIZES[-1], NUM_LABELS), std=HIDDEN_SIZES[-1] ** -0.5),
        b=pg.normal((NUM_LABELS,), std=0.02))
    return params


# ----------------------------- model blocks (glue around the Pallas kernels) -----------------------------
def levit_attention(bp, p, hidden):
    """Returns hidden + Attention(hidden); the residual add is fused into the proj kernel."""
    b, s, c = hidden.shape
    h, kd, ar = bp["num_heads"], bp["key_dim"], bp["attn_ratio"]
    dv = ar * kd
    x2d = hidden.reshape(b * s, c)
    qkv = fused_linear_bn(x2d, p["qkv_w"], p["qkv_shift"], False, out_dtype=jnp.bfloat16)
    qkv = qkv.reshape(b, s, h, 2 * kd + dv).transpose(0, 2, 1, 3)       # (b, h, s, 2kd+dv)
    q, k, v = qkv[..., :kd], qkv[..., kd:2 * kd], qkv[..., 2 * kd:]
    ctx = attention_block(q, k, v, p["att_bias"], kd ** -0.5)           # Hardswish fused
    ctx = ctx.transpose(0, 2, 1, 3).reshape(b * s, h * dv)
    out = fused_linear_bn(ctx, p["proj_w"], p["proj_shift"], False,
                          residual=x2d, out_dtype=jnp.float32)          # residual fused
    return out.reshape(b, s, c)


def levit_attention_subsample(bp, p, hidden):
    b, s, c = hidden.shape
    h, kd, ar = bp["num_heads"], bp["key_dim"], bp["attn_ratio"]
    dv = ar * kd
    r_in, r_out, stride = bp["resolution_in"], bp["resolution_out"], bp["stride"]
    sq = r_out * r_out
    kv = fused_linear_bn(hidden.reshape(b * s, c), p["kv_w"], p["kv_shift"], False,
                         out_dtype=jnp.bfloat16)
    kv = kv.reshape(b, s, h, kd + dv).transpose(0, 2, 1, 3)             # (b, h, s, kd+dv)
    k, v = kv[..., :kd], kv[..., kd:]
    hq = hidden.reshape(b, r_in, r_in, c)[:, ::stride, ::stride].reshape(b * sq, c)
    q = fused_linear_bn(hq, p["q_w"], p["q_shift"], False, out_dtype=jnp.bfloat16)
    q = q.reshape(b, sq, h, kd).transpose(0, 2, 1, 3)                   # (b, h, sq, kd)
    ctx = attention_block(q, k, v, p["att_bias"], kd ** -0.5)           # Hardswish fused
    ctx = ctx.transpose(0, 2, 1, 3).reshape(b * sq, h * dv)
    out = fused_linear_bn(ctx, p["proj_w"], p["proj_shift"], False, out_dtype=jnp.float32)
    return out.reshape(b, sq, bp["out_dim"])


def levit_mlp(p, hidden):
    """Returns hidden + MLP(hidden); the residual add is fused into the down-proj kernel."""
    b, s, c = hidden.shape
    x2d = hidden.reshape(b * s, c)
    y = fused_linear_bn(x2d, p["up_w"], p["up_shift"], True, out_dtype=jnp.bfloat16)
    y = fused_linear_bn(y, p["down_w"], p["down_shift"], False,
                        residual=x2d, out_dtype=jnp.float32)            # residual fused
    return y.reshape(b, s, c)


def custom_levit_forward(params, x):
    """x: (B, 1, H, W) NCHW float32 -> logits (B, NUM_LABELS). Entire body runs under one jit."""
    b = x.shape[0]
    h = x
    hidden = None
    for i, layer in enumerate(params["patch_embed"]):
        patches, ho, wo = im2col_3x3_s2_p1(h)
        cout = layer["w"].shape[1]
        out_dt = jnp.bfloat16 if i < 3 else jnp.float32   # intermediates feed the next matmul
        y = fused_linear_bn(patches, layer["w"], layer["shift"], activation=(i < 3),
                            out_dtype=out_dt)
        if i < 3:
            h = y.reshape(b, ho, wo, cout).transpose(0, 3, 1, 2)
        else:
            hidden = y.reshape(b, ho * wo, cout)   # == .flatten(2).transpose(1, 2)

    for plan_blocks, param_blocks in zip(PLAN, params["stages"]):
        for bp, p in zip(plan_blocks, param_blocks):
            if bp["type"] == "attn":
                hidden = levit_attention(bp, p, hidden)        # residual already added
            elif bp["type"] == "mlp":
                hidden = levit_mlp(p, hidden)                  # residual already added
            else:  # subsample attention: no residual (changes seq length & width)
                hidden = levit_attention_subsample(bp, p, hidden)

    pooled = jnp.mean(hidden, axis=1)                               # pooler_output
    cls = params["classifier"]
    logits = jnp.dot(pooled, cls["w"]) + cls["b"]                   # tiny: plain XLA, fuses
    return logits


# ----------------------------- main -----------------------------
if __name__ == "__main__":
    root = jax.random.PRNGKey(0)
    pkey, xkey = jax.random.split(root)
    params = build_params(pkey)
    x = jax.random.normal(xkey, (BATCH, NUM_CHANNELS, IMAGE_SIZE, IMAGE_SIZE), dtype=jnp.float32)

    forward = jax.jit(custom_levit_forward)        # one jitted graph for the whole model
    logits = forward(params, x)
    logits = jax.block_until_ready(logits)

    assert logits.shape == (BATCH, NUM_LABELS), logits.shape
    assert bool(jnp.all(jnp.isfinite(logits)))
    print("KERNEL_OK")
</pallas_src>

<mosaic_0001>
module attributes {stable_mosaic.version = 11 : i64} {
  func.func @_linear_bn_kernel(%arg0: i32, %arg1: memref<1024x9xbf16, #tpu.memory_space<vmem>>, %arg2: memref<9x16xbf16, #tpu.memory_space<vmem>>, %arg3: memref<1x16xf32, #tpu.memory_space<vmem>>, %arg4: memref<1024x16xbf16, #tpu.memory_space<vmem>>) attributes {dimension_semantics = [#tpu.dimension_semantics<parallel>], iteration_bounds = array<i64: 2>, scalar_prefetch = 0 : i64, scratch_operands = 0 : i64, tpu.core_type = #tpu.core_type<tc>, window_params = [{transform_indices = @transform_0, window_bounds = array<i64: 1024, 9>}, {pipeline_mode = #tpu.pipeline_mode<synchronous>, transform_indices = @transform_1, window_bounds = array<i64: 9, 16>}, {pipeline_mode = #tpu.pipeline_mode<synchronous>, transform_indices = @transform_2, window_bounds = array<i64: 1, 16>}, {transform_indices = @transform_3, window_bounds = array<i64: 1024, 16>}]} {
    %c0 = arith.constant 0 : index
    %c0_0 = arith.constant 0 : index
    %0 = vector.load %arg1[%c0, %c0_0] : memref<1024x9xbf16, #tpu.memory_space<vmem>>, vector<1024x9xbf16>
    %c0_1 = arith.constant 0 : index
    %c0_2 = arith.constant 0 : index
    %1 = vector.load %arg2[%c0_1, %c0_2] : memref<9x16xbf16, #tpu.memory_space<vmem>>, vector<9x16xbf16>
    %cst = arith.constant dense<0.000000e+00> : vector<1024x16xf32>
    %2 = tpu.matmul %0, %1, %cst {dimension_numbers = #tpu.dot_dimension_numbers<[1], [0], [0], [1], [0, 0, 1, 1], [], []>} : vector<1024x9xbf16>, vector<9x16xbf16>, vector<1024x16xf32> -> vector<1024x16xf32>
    %c0_3 = arith.constant 0 : index
    %c0_4 = arith.constant 0 : index
    %3 = vector.load %arg3[%c0_3, %c0_4] : memref<1x16xf32, #tpu.memory_space<vmem>>, vector<1x16xf32>
    %4 = vector.broadcast %3 : vector<1x16xf32> to vector<1024x16xf32>
    %5 = arith.addf %2, %4 : vector<1024x16xf32>
    %cst_5 = arith.constant 3.000000e+00 : f32
    %6 = vector.broadcast %cst_5 : f32 to vector<1024x16xf32>
    %7 = arith.addf %5, %6 : vector<1024x16xf32>
    %cst_6 = arith.constant 0.000000e+00 : f32
    %cst_7 = arith.constant 6.000000e+00 : f32
    %8 = vector.broadcast %cst_6 : f32 to vector<1024x16xf32>
    %9 = arith.maximumf %8, %7 : vector<1024x16xf32>
    %10 = vector.broadcast %cst_7 : f32 to vector<1024x16xf32>
    %11 = arith.minimumf %10, %9 : vector<1024x16xf32>
    %12 = arith.mulf %5, %11 : vector<1024x16xf32>
    %cst_8 = arith.constant 0.166666672 : f32
    %13 = vector.broadcast %cst_8 : f32 to vector<1024x16xf32>
    %14 = arith.mulf %12, %13 : vector<1024x16xf32>
    %15 = arith.truncf %14 : vector<1024x16xf32> to vector<1024x16xbf16>
    %c0_9 = arith.constant 0 : index
    %c0_10 = arith.constant 0 : index
    %16 = vector.load %arg4[%c0_9, %c0_10] : memref<1024x16xbf16, #tpu.memory_space<vmem>>, vector<1024x16xbf16>
    tpu.vector_store %arg4[%c0_9, %c0_10], %15 {strides = array<i32>} : memref<1024x16xbf16, #tpu.memory_space<vmem>>, vector<1024x16xbf16>,
    return
  }
  func.func @transform_0(%arg0: i32) -> (i32, i32) {
    %c0_i32 = arith.constant 0 : i32
    %c0_i32_0 = arith.constant 0 : i32
    return %arg0, %c0_i32 : i32, i32
  }
  func.func @transform_1(%arg0: i32) -> (i32, i32) {
    %c0_i32 = arith.constant 0 : i32
    %c0_i32_0 = arith.constant 0 : i32
    %c0_i32_1 = arith.constant 0 : i32
    return %c0_i32, %c0_i32_0 : i32, i32
  }
  func.func @transform_2(%arg0: i32) -> (i32, i32) {
    %c0_i32 = arith.constant 0 : i32
    %c0_i32_0 = arith.constant 0 : i32
    %c0_i32_1 = arith.constant 0 : i32
    return %c0_i32, %c0_i32_0 : i32, i32
  }
  func.func @transform_3(%arg0: i32) -> (i32, i32) {
    %c0_i32 = arith.constant 0 : i32
    %c0_i32_0 = arith.constant 0 : i32
    return %arg0, %c0_i32 : i32, i32
  }
}

module attributes {stable_mosaic.version = 11 : i64} {
  func.func @_linear_bn_kernel(%arg0: i32, %arg1: memref<256x144xbf16, #tpu.memory_space<vmem>>, %arg2: memref<144x32xbf16, #tpu.memory_space<vmem>>, %arg3: memref<1x32xf32, #tpu.memory_space<vmem>>, %arg4: memref<256x32xbf16, #tpu.memory_space<vmem>>) attributes {dimension_semantics = [#tpu.dimension_semantics<parallel>], iteration_bounds = array<i64: 2>, scalar_prefetch = 0 : i64, scratch_operands = 0 : i64, tpu.core_type = #tpu.core_type<tc>, window_params = [{transform_indices = @transform_0, window_bounds = array<i64: 256, 144>}, {pipeline_mode = #tpu.pipeline_mode<synchronous>, transform_indices = @transform_1, window_bounds = array<i64: 144, 32>}, {pipeline_mode = #tpu.pipeline_mode<synchronous>, transform_indices = @transform_2, window_bounds = array<i64: 1, 32>}, {transform_indices = @transform_3, window_bounds = array<i64: 256, 32>}]} {
    %c0 = arith.constant 0 : index
    %c0_0 = arith.constant 0 : index
    %0 = vector.load %arg1[%c0, %c0_0] : memref<256x144xbf16, #tpu.memory_space<vmem>>, vector<256x144xbf16>
    %c0_1 = arith.constant 0 : index
    %c0_2 = arith.constant 0 : index
    %1 = vector.load %arg2[%c0_1, %c0_2] : memref<144x32xbf16, #tpu.memory_space<vmem>>, vector<144x32xbf16>
    %cst = arith.constant dense<0.000000e+00> : vector<256x32xf32>
    %2 = tpu.matmul %0, %1, %cst {dimension_numbers = #tpu.dot_dimension_numbers<[1], [0], [0], [1], [0, 0, 1, 1], [], []>} : vector<256x144xbf16>, vector<144x32xbf16>, vector<256x32xf32> -> vector<256x32xf32>
    %c0_3 = arith.constant 0 : index
    %c0_4 = arith.constant 0 : index
    %3 = vector.load %arg3[%c0_3, %c0_4] : memref<1x32xf32, #tpu.memory_space<vmem>>, vector<1x32xf32>
    %4 = vector.broadcast %3 : vector<1x32xf32> to vector<256x32xf32>
    %5 = arith.addf %2, %4 : vector<256x32xf32>
    %cst_5 = arith.constant 3.000000e+00 : f32
    %6 = vector.broadcast %cst_5 : f32 to vector<256x32xf32>
    %7 = arith.addf %5, %6 : vector<256x32xf32>
    %cst_6 = arith.constant 0.000000e+00 : f32
    %cst_7 = arith.constant 6.000000e+00 : f32
    %8 = vector.broadcast %cst_6 : f32 to vector<256x32xf32>
    %9 = arith.maximumf %8, %7 : vector<256x32xf32>
    %10 = vector.broadcast %cst_7 : f32 to vector<256x32xf32>
    %11 = arith.minimumf %10, %9 : vector<256x32xf32>
    %12 = arith.mulf %5, %11 : vector<256x32xf32>
    %cst_8 = arith.constant 0.166666672 : f32
    %13 = vector.broadcast %cst_8 : f32 to vector<256x32xf32>
    %14 = arith.mulf %12, %13 : vector<256x32xf32>
    %15 = arith.truncf %14 : vector<256x32xf32> to vector<256x32xbf16>
    %c0_9 = arith.constant 0 : index
    %c0_10 = arith.constant 0 : index
    %16 = vector.load %arg4[%c0_9, %c0_10] : memref<256x32xbf16, #tpu.memory_space<vmem>>, vector<256x32xbf16>
    tpu.vector_store %arg4[%c0_9, %c0_10], %15 {strides = array<i32>} : memref<256x32xbf16, #tpu.memory_space<vmem>>, vector<256x32xbf16>,
    return
  }
  func.func @transform_0(%arg0: i32) -> (i32, i32) {
    %c0_i32 = arith.constant 0 : i32
    %c0_i32_0 = arith.constant 0 : i32
    return %arg0, %c0_i32 : i32, i32
  }
  func.func @transform_1(%arg0: i32) -> (i32, i32) {
    %c0_i32 = arith.constant 0 : i32
    %c0_i32_0 = arith.constant 0 : i32
    %c0_i32_1 = arith.constant 0 : i32
    return %c0_i32, %c0_i32_0 : i32, i32
  }
  func.func @transform_2(%arg0: i32) -> (i32, i32) {
    %c0_i32 = arith.constant 0 : i32
    %c0_i32_0 = arith.constant 0 : i32
    %c0_i32_1 = arith.constant 0 : i32
    return %c0_i32, %c0_i32_0 : i32, i32
  }
  func.func @transform_3(%arg0: i32) -> (i32, i32) {
    %c0_i32 = arith.constant 0 : i32
    %c0_i32_0 = arith.constant 0 : i32
    return %arg0, %c0_i32 : i32, i32
  }
}

module attributes {stable_mosaic.version = 11 : i64} {
  func.func @_linear_bn_kernel(%arg0: i32, %arg1: memref<128x288xbf16, #tpu.memory_space<vmem>>, %arg2: memref<288x64xbf16, #tpu.memory_space<vmem>>, %arg3: memref<1x64xf32, #tpu.memory_space<vmem>>, %arg4: memref<128x64xbf16, #tpu.memory_space<vmem>>) attributes {dimension_semantics = [#tpu.dimension_semantics<parallel>], iteration_bounds = array<i64: 1>, scalar_prefetch = 0 : i64, scratch_operands = 0 : i64, tpu.core_type = #tpu.core_type<tc>, window_params = [{transform_indices = @transform_0, window_bounds = array<i64: 128, 288>}, {pipeline_mode = #tpu.pipeline_mode<synchronous>, transform_indices = @transform_1, window_bounds = array<i64: 288, 64>}, {pipeline_mode = #tpu.pipeline_mode<synchronous>, transform_indices = @transform_2, window_bounds = array<i64: 1, 64>}, {transform_indices = @transform_3, window_bounds = array<i64: 128, 64>}]} {
    %c0 = arith.constant 0 : index
    %c0_0 = arith.constant 0 : index
    %0 = vector.load %arg1[%c0, %c0_0] : memref<128x288xbf16, #tpu.memory_space<vmem>>, vector<128x288xbf16>
    %c0_1 = arith.constant 0 : index
    %c0_2 = arith.constant 0 : index
    %1 = vector.load %arg2[%c0_1, %c0_2] : memref<288x64xbf16, #tpu.memory_space<vmem>>, vector<288x64xbf16>
    %cst = arith.constant dense<0.000000e+00> : vector<128x64xf32>
    %2 = tpu.matmul %0, %1, %cst {dimension_numbers = #tpu.dot_dimension_numbers<[1], [0], [0], [1], [0, 0, 1, 1], [], []>} : vector<128x288xbf16>, vector<288x64xbf16>, vector<128x64xf32> -> vector<128x64xf32>
    %c0_3 = arith.constant 0 : index
    %c0_4 = arith.constant 0 : index
    %3 = vector.load %arg3[%c0_3, %c0_4] : memref<1x64xf32, #tpu.memory_space<vmem>>, vector<1x64xf32>
    %4 = vector.broadcast %3 : vector<1x64xf32> to vector<128x64xf32>
    %5 = arith.addf %2, %4 : vector<128x64xf32>
    %cst_5 = arith.constant 3.000000e+00 : f32
    %6 = vector.broadcast %cst_5 : f32 to vector<128x64xf32>
    %7 = arith.addf %5, %6 : vector<128x64xf32>
    %cst_6 = arith.constant 0.000000e+00 : f32
    %cst_7 = arith.constant 6.000000e+00 : f32
    %8 = vector.broadcast %cst_6 : f32 to vector<128x64xf32>
    %9 = arith.maximumf %8, %7 : vector<128x64xf32>
    %10 = vector.broadcast %cst_7 : f32 to vector<128x64xf32>
    %11 = arith.minimumf %10, %9 : vector<128x64xf32>
    %12 = arith.mulf %5, %11 : vector<128x64xf32>
    %cst_8 = arith.constant 0.166666672 : f32
    %13 = vector.broadcast %cst_8 : f32 to vector<128x64xf32>
    %14 = arith.mulf %12, %13 : vector<128x64xf32>
    %15 = arith.truncf %14 : vector<128x64xf32> to vector<128x64xbf16>
    %c0_9 = arith.constant 0 : index
    %c0_10 = arith.constant 0 : index
    %16 = vector.load %arg4[%c0_9, %c0_10] : memref<128x64xbf16, #tpu.memory_space<vmem>>, vector<128x64xbf16>
    tpu.vector_store %arg4[%c0_9, %c0_10], %15 {strides = array<i32>} : memref<128x64xbf16, #tpu.memory_space<vmem>>, vector<128x64xbf16>,
    return
  }
  func.func @transform_0(%arg0: i32) -> (i32, i32) {
    %c0_i32 = arith.constant 0 : i32
    %c0_i32_0 = arith.constant 0 : i32
    return %arg0, %c0_i32 : i32, i32
  }
  func.func @transform_1(%arg0: i32) -> (i32, i32) {
    %c0_i32 = arith.constant 0 : i32
    %c0_i32_0 = arith.constant 0 : i32
    %c0_i32_1 = arith.constant 0 : i32
    return %c0_i32, %c0_i32_0 : i32, i32
  }
  func.func @transform_2(%arg0: i32) -> (i32, i32) {
    %c0_i32 = arith.constant 0 : i32
    %c0_i32_0 = arith.constant 0 : i32
    %c0_i32_1 = arith.constant 0 : i32
    return %c0_i32, %c0_i32_0 : i32, i32
  }
  func.func @transform_3(%arg0: i32) -> (i32, i32) {
    %c0_i32 = arith.constant 0 : i32
    %c0_i32_0 = arith.constant 0 : i32
    return %arg0, %c0_i32 : i32, i32
  }
}

module attributes {stable_mosaic.version = 11 : i64} {
  func.func @_linear_bn_kernel(%arg0: i32, %arg1: memref<32x576xbf16, #tpu.memory_space<vmem>>, %arg2: memref<576x128xbf16, #tpu.memory_space<vmem>>, %arg3: memref<1x128xf32, #tpu.memory_space<vmem>>, %arg4: memref<32x128xf32, #tpu.memory_space<vmem>>) attributes {dimension_semantics = [#tpu.dimension_semantics<parallel>], iteration_bounds = array<i64: 1>, scalar_prefetch = 0 : i64, scratch_operands = 0 : i64, tpu.core_type = #tpu.core_type<tc>, window_params = [{transform_indices = @transform_0, window_bounds = array<i64: 32, 576>}, {pipeline_mode = #tpu.pipeline_mode<synchronous>, transform_indices = @transform_1, window_bounds = array<i64: 576, 128>}, {pipeline_mode = #tpu.pipeline_mode<synchronous>, transform_indices = @transform_2, window_bounds = array<i64: 1, 128>}, {transform_indices = @transform_3, window_bounds = array<i64: 32, 128>}]} {
    %c0 = arith.constant 0 : index
    %c0_0 = arith.constant 0 : index
    %0 = vector.load %arg1[%c0, %c0_0] : memref<32x576xbf16, #tpu.memory_space<vmem>>, vector<32x576xbf16>
    %c0_1 = arith.constant 0 : index
    %c0_2 = arith.constant 0 : index
    %1 = vector.load %arg2[%c0_1, %c0_2] : memref<576x128xbf16, #tpu.memory_space<vmem>>, vector<576x128xbf16>
    %cst = arith.constant dense<0.000000e+00> : vector<32x128xf32>
    %2 = tpu.matmul %0, %1, %cst {dimension_numbers = #tpu.dot_dimension_numbers<[1], [0], [0], [1], [0, 0, 1, 1], [], []>} : vector<32x576xbf16>, vector<576x128xbf16>, vector<32x128xf32> -> vector<32x128xf32>
    %c0_3 = arith.constant 0 : index
    %c0_4 = arith.constant 0 : index
    %3 = vector.load %arg3[%c0_3, %c0_4] : memref<1x128xf32, #tpu.memory_space<vmem>>, vector<1x128xf32>
    %4 = vector.broadcast %3 : vector<1x128xf32> to vector<32x128xf32>
    %5 = arith.addf %2, %4 : vector<32x128xf32>
    %c0_5 = arith.constant 0 : index
    %c0_6 = arith.constant 0 : index
    %6 = vector.load %arg4[%c0_5, %c0_6] : memref<32x128xf32, #tpu.memory_space<vmem>>, vector<32x128xf32>
    tpu.vector_store %arg4[%c0_5, %c0_6], %5 {strides = array<i32>} : memref<32x128xf32, #tpu.memory_space<vmem>>, vector<32x128xf32>,
    return
  }
  func.func @transform_0(%arg0: i32) -> (i32, i32) {
    %c0_i32 = arith.constant 0 : i32
    %c0_i32_0 = arith.constant 0 : i32
    return %arg0, %c0_i32 : i32, i32
  }
  func.func @transform_1(%arg0: i32) -> (i32, i32) {
    %c0_i32 = arith.constant 0 : i32
    %c0_i32_0 = arith.constant 0 : i32
    %c0_i32_1 = arith.constant 0 : i32
    return %c0_i32, %c0_i32_0 : i32, i32
  }
  func.func @transform_2(%arg0: i32) -> (i32, i32) {
    %c0_i32 = arith.constant 0 : i32
    %c0_i32_0 = arith.constant 0 : i32
    %c0_i32_1 = arith.constant 0 : i32
    return %c0_i32, %c0_i32_0 : i32, i32
  }
  func.func @transform_3(%arg0: i32) -> (i32, i32) {
    %c0_i32 = arith.constant 0 : i32
    %c0_i32_0 = arith.constant 0 : i32
    return %arg0, %c0_i32 : i32, i32
  }
}

module attributes {stable_mosaic.version = 11 : i64} {
  func.func @_linear_bn_kernel(%arg0: i32, %arg1: memref<32x128xbf16, #tpu.memory_space<vmem>>, %arg2: memref<128x256xbf16, #tpu.memory_space<vmem>>, %arg3: memref<1x256xf32, #tpu.memory_space<vmem>>, %arg4: memref<32x256xbf16, #tpu.memory_space<vmem>>) attributes {dimension_semantics = [#tpu.dimension_semantics<parallel>], iteration_bounds = array<i64: 1>, scalar_prefetch = 0 : i64, scratch_operands = 0 : i64, tpu.core_type = #tpu.core_type<tc>, window_params = [{transform_indices = @transform_0, window_bounds = array<i64: 32, 128>}, {pipeline_mode = #tpu.pipeline_mode<synchronous>, transform_indices = @transform_1, window_bounds = array<i64: 128, 256>}, {pipeline_mode = #tpu.pipeline_mode<synchronous>, transform_indices = @transform_2, window_bounds = array<i64: 1, 256>}, {transform_indices = @transform_3, window_bounds = array<i64: 32, 256>}]} {
    %c0 = arith.constant 0 : index
    %c0_0 = arith.constant 0 : index
    %0 = vector.load %arg1[%c0, %c0_0] : memref<32x128xbf16, #tpu.memory_space<vmem>>, vector<32x128xbf16>
    %c0_1 = arith.constant 0 : index
    %c0_2 = arith.constant 0 : index
    %1 = vector.load %arg2[%c0_1, %c0_2] : memref<128x256xbf16, #tpu.memory_space<vmem>>, vector<128x256xbf16>
    %cst = arith.constant dense<0.000000e+00> : vector<32x256xf32>
    %2 = tpu.matmul %0, %1, %cst {dimension_numbers = #tpu.dot_dimension_numbers<[1], [0], [0], [1], [0, 0, 1, 1], [], []>} : vector<32x128xbf16>, vector<128x256xbf16>, vector<32x256xf32> -> vector<32x256xf32>
    %c0_3 = arith.constant 0 : index
    %c0_4 = arith.constant 0 : index
    %3 = vector.load %arg3[%c0_3, %c0_4] : memref<1x256xf32, #tpu.memory_space<vmem>>, vector<1x256xf32>
    %4 = vector.broadcast %3 : vector<1x256xf32> to vector<32x256xf32>
    %5 = arith.addf %2, %4 : vector<32x256xf32>
    %6 = arith.truncf %5 : vector<32x256xf32> to vector<32x256xbf16>
    %c0_5 = arith.constant 0 : index
    %c0_6 = arith.constant 0 : index
    %7 = vector.load %arg4[%c0_5, %c0_6] : memref<32x256xbf16, #tpu.memory_space<vmem>>, vector<32x256xbf16>
    tpu.vector_store %arg4[%c0_5, %c0_6], %6 {strides = array<i32>} : memref<32x256xbf16, #tpu.memory_space<vmem>>, vector<32x256xbf16>,
    return
  }
  func.func @transform_0(%arg0: i32) -> (i32, i32) {
    %c0_i32 = arith.constant 0 : i32
    %c0_i32_0 = arith.constant 0 : i32
    return %arg0, %c0_i32 : i32, i32
  }
  func.func @transform_1(%arg0: i32) -> (i32, i32) {
    %c0_i32 = arith.constant 0 : i32
    %c0_i32_0 = arith.constant 0 : i32
    %c0_i32_1 = arith.constant 0 : i32
    return %c0_i32, %c0_i32_0 : i32, i32
  }
  func.func @transform_2(%arg0: i32) -> (i32, i32) {
    %c0_i32 = arith.constant 0 : i32
    %c0_i32_0 = arith.constant 0 : i32
    %c0_i32_1 = arith.constant 0 : i32
    return %c0_i32, %c0_i32_0 : i32, i32
  }
  func.func @transform_3(%arg0: i32) -> (i32, i32) {
    %c0_i32 = arith.constant 0 : i32
    %c0_i32_0 = arith.constant 0 : i32
    return %arg0, %c0_i32 : i32, i32
  }
}

module attributes {stable_mosaic.version = 11 : i64} {
  func.func @_attention_kernel(%arg0: memref<8x16x16xbf16, #tpu.memory_space<vmem>>, %arg1: memref<8x16x16xbf16, #tpu.memory_space<vmem>>, %arg2: memref<8x16x32xbf16, #tpu.memory_space<vmem>>, %arg3: memref<4x16x16xf32, #tpu.memory_space<vmem>>, %arg4: memref<8x16x32xf32, #tpu.memory_space<vmem>>) attributes {dimension_semantics = [], scalar_prefetch = 0 : i64, scratch_operands = 0 : i64, tpu.core_type = #tpu.core_type<tc>} {
    %c0 = arith.constant 0 : index
    %c0_0 = arith.constant 0 : index
    %c0_1 = arith.constant 0 : index
    %0 = vector.load %arg0[%c0, %c0_0, %c0_1] : memref<8x16x16xbf16, #tpu.memory_space<vmem>>, vector<8x16x16xbf16>
    %c0_2 = arith.constant 0 : index
    %c0_3 = arith.constant 0 : index
    %c0_4 = arith.constant 0 : index
    %1 = vector.load %arg1[%c0_2, %c0_3, %c0_4] : memref<8x16x16xbf16, #tpu.memory_space<vmem>>, vector<8x16x16xbf16>
    %c0_5 = arith.constant 0 : index
    %c0_6 = arith.constant 0 : index
    %c0_7 = arith.constant 0 : index
    %2 = vector.load %arg2[%c0_5, %c0_6, %c0_7] : memref<8x16x32xbf16, #tpu.memory_space<vmem>>, vector<8x16x32xbf16>
    %c0_8 = arith.constant 0 : index
    %c0_9 = arith.constant 0 : index
    %c0_10 = arith.constant 0 : index
    %3 = vector.load %arg3[%c0_8, %c0_9, %c0_10] : memref<4x16x16xf32, #tpu.memory_space<vmem>>, vector<4x16x16xf32>
    %4 = tpu.concatenate %3, %3 in 0 : vector<4x16x16xf32>, vector<4x16x16xf32> -> vector<8x16x16xf32>
    "tpu.trace_start"() <{level = 10 : i32, message = "bqd,bkd->bqk"}> : () -> ()
    %cst = arith.constant dense<0.000000e+00> : vector<8x16x16xf32>
    %5 = tpu.matmul %0, %1, %cst {dimension_numbers = #tpu.dot_dimension_numbers<[2], [2], [1], [1], [0, 0, 0, 1, 1, 1], [0], [0]>} : vector<8x16x16xbf16>, vector<8x16x16xbf16>, vector<8x16x16xf32> -> vector<8x16x16xf32>
    "tpu.trace_stop"() : () -> ()
    %cst_11 = arith.constant 2.500000e-01 : f32
    %6 = vector.broadcast %cst_11 : f32 to vector<8x16x16xf32>
    %7 = arith.mulf %5, %6 : vector<8x16x16xf32>
    %8 = arith.addf %7, %4 : vector<8x16x16xf32>
    %cst_12 = arith.constant dense<0xFF800000> : vector<8x16xf32>
    %9 = vector.multi_reduction <maximumf>, %8, %cst_12 [2] : vector<8x16x16xf32> to vector<8x16xf32>
    %10 = vector.shape_cast %9 : vector<8x16xf32> to vector<8x16x1xf32>
    %11 = vector.broadcast %10 : vector<8x16x1xf32> to vector<8x16x16xf32>
    %12 = arith.subf %8, %11 : vector<8x16x16xf32>
    %13 = math.exp %12 : vector<8x16x16xf32>
    %cst_13 = arith.constant dense<0.000000e+00> : vector<8x16xf32>
    %14 = vector.multi_reduction <add>, %13, %cst_13 [2] : vector<8x16x16xf32> to vector<8x16xf32>
    %15 = vector.shape_cast %14 : vector<8x16xf32> to vector<8x16x1xf32>
    %16 = tpu.reciprocal %15 {approx = true} : vector<8x16x1xf32> -> vector<8x16x1xf32>
    %17 = vector.broadcast %16 : vector<8x16x1xf32> to vector<8x16x16xf32>
    %18 = arith.mulf %13, %17 : vector<8x16x16xf32>
    %19 = arith.truncf %18 : vector<8x16x16xf32> to vector<8x16x16xbf16>
    "tpu.trace_start"() <{level = 10 : i32, message = "bqk,bkd->bqd"}> : () -> ()
    %cst_14 = arith.constant dense<0.000000e+00> : vector<8x16x32xf32>
    %20 = tpu.matmul %19, %2, %cst_14 {dimension_numbers = #tpu.dot_dimension_numbers<[2], [1], [1], [2], [0, 0, 0, 1, 1, 2], [0], [0]>} : vector<8x16x16xbf16>, vector<8x16x32xbf16>, vector<8x16x32xf32> -> vector<8x16x32xf32>
    "tpu.trace_stop"() : () -> ()
    %cst_15 = arith.constant 3.000000e+00 : f32
    %21 = vector.broadcast %cst_15 : f32 to vector<8x16x32xf32>
    %22 = arith.addf %20, %21 : vector<8x16x32xf32>
    %cst_16 = arith.constant 0.000000e+00 : f32
    %cst_17 = arith.constant 6.000000e+00 : f32
    %23 = vector.broadcast %cst_16 : f32 to vector<8x16x32xf32>
    %24 = arith.maximumf %23, %22 : vector<8x16x32xf32>
    %25 = vector.broadcast %cst_17 : f32 to vector<8x16x32xf32>
    %26 = arith.minimumf %25, %24 : vector<8x16x32xf32>
    %27 = arith.mulf %20, %26 : vector<8x16x32xf32>
    %cst_18 = arith.constant 0.166666672 : f32
    %28 = vector.broadcast %cst_18 : f32 to vector<8x16x32xf32>
    %29 = arith.mulf %27, %28 : vector<8x16x32xf32>
    %c0_19 = arith.constant 0 : index
    %c0_20 = arith.constant 0 : index
    %c0_21 = arith.constant 0 : index
    %30 = vector.load %arg4[%c0_19, %c0_20, %c0_21] : memref<8x16x32xf32, #tpu.memory_space<vmem>>, vector<8x16x32xf32>
    tpu.vector_store %arg4[%c0_19, %c0_20, %c0_21], %29 {strides = array<i32>} : memref<8x16x32xf32, #tpu.memory_space<vmem>>, vector<8x16x32xf32>,
    return
  }
}

module attributes {stable_mosaic.version = 11 : i64} {
  func.func @_linear_bn_res_kernel(%arg0: i32, %arg1: memref<32x128xbf16, #tpu.memory_space<vmem>>, %arg2: memref<128x128xbf16, #tpu.memory_space<vmem>>, %arg3: memref<1x128xf32, #tpu.memory_space<vmem>>, %arg4: memref<32x128xf32, #tpu.memory_space<vmem>>, %arg5: memref<32x128xf32, #tpu.memory_space<vmem>>) attributes {dimension_semantics = [#tpu.dimension_semantics<parallel>], iteration_bounds = array<i64: 1>, scalar_prefetch = 0 : i64, scratch_operands = 0 : i64, tpu.core_type = #tpu.core_type<tc>, window_params = [{transform_indices = @transform_0, window_bounds = array<i64: 32, 128>}, {pipeline_mode = #tpu.pipeline_mode<synchronous>, transform_indices = @transform_1, window_bounds = array<i64: 128, 128>}, {pipeline_mode = #tpu.pipeline_mode<synchronous>, transform_indices = @transform_2, window_bounds = array<i64: 1, 128>}, {transform_indices = @transform_3, window_bounds = array<i64: 32, 128>}, {transform_indices = @transform_4, window_bounds = array<i64: 32, 128>}]} {
    %c0 = arith.constant 0 : index
    %c0_0 = arith.constant 0 : index
    %0 = vector.load %arg1[%c0, %c0_0] : memref<32x128xbf16, #tpu.memory_space<vmem>>, vector<32x128xbf16>
    %c0_1 = arith.constant 0 : index
    %c0_2 = arith.constant 0 : index
    %1 = vector.load %arg2[%c0_1, %c0_2] : memref<128x128xbf16, #tpu.memory_space<vmem>>, vector<128x128xbf16>
    %cst = arith.constant dense<0.000000e+00> : vector<32x128xf32>
    %2 = tpu.matmul %0, %1, %cst {dimension_numbers = #tpu.dot_dimension_numbers<[1], [0], [0], [1], [0, 0, 1, 1], [], []>} : vector<32x128xbf16>, vector<128x128xbf16>, vector<32x128xf32> -> vector<32x128xf32>
    %c0_3 = arith.constant 0 : index
    %c0_4 = arith.constant 0 : index
    %3 = vector.load %arg3[%c0_3, %c0_4] : memref<1x128xf32, #tpu.memory_space<vmem>>, vector<1x128xf32>
    %4 = vector.broadcast %3 : vector<1x128xf32> to vector<32x128xf32>
    %5 = arith.addf %2, %4 : vector<32x128xf32>
    %c0_5 = arith.constant 0 : index
    %c0_6 = arith.constant 0 : index
    %6 = vector.load %arg4[%c0_5, %c0_6] : memref<32x128xf32, #tpu.memory_space<vmem>>, vector<32x128xf32>
    %7 = arith.addf %5, %6 : vector<32x128xf32>
    %c0_7 = arith.constant 0 : index
    %c0_8 = arith.constant 0 : index
    %8 = vector.load %arg5[%c0_7, %c0_8] : memref<32x128xf32, #tpu.memory_space<vmem>>, vector<32x128xf32>
    tpu.vector_store %arg5[%c0_7, %c0_8], %7 {strides = array<i32>} : memref<32x128xf32, #tpu.memory_space<vmem>>, vector<32x128xf32>,
    return
  }
  func.func @transform_0(%arg0: i32) -> (i32, i32) {
    %c0_i32 = arith.constant 0 : i32
    %c0_i32_0 = arith.constant 0 : i32
    return %arg0, %c0_i32 : i32, i32
  }
  func.func @transform_1(%arg0: i32) -> (i32, i32) {
    %c0_i32 = arith.constant 0 : i32
    %c0_i32_0 = arith.constant 0 : i32
    %c0_i32_1 = arith.constant 0 : i32
    return %c0_i32, %c0_i32_0 : i32, i32
  }
  func.func @transform_2(%arg0: i32) -> (i32, i32) {
    %c0_i32 = arith.constant 0 : i32
    %c0_i32_0 = arith.constant 0 : i32
    %c0_i32_1 = arith.constant 0 : i32
    return %c0_i32, %c0_i32_0 : i32, i32
  }
  func.func @transform_3(%arg0: i32) -> (i32, i32) {
    %c0_i32 = arith.constant 0 : i32
    %c0_i32_0 = arith.constant 0 : i32
    return %arg0, %c0_i32 : i32, i32
  }
  func.func @transform_4(%arg0: i32) -> (i32, i32) {
    %c0_i32 = arith.constant 0 : i32
    %c0_i32_0 = arith.constant 0 : i32
    return %arg0, %c0_i32 : i32, i32
  }
}

module attributes {stable_mosaic.version = 11 : i64} {
  func.func @_linear_bn_kernel(%arg0: i32, %arg1: memref<32x128xbf16, #tpu.memory_space<vmem>>, %arg2: memref<128x256xbf16, #tpu.memory_space<vmem>>, %arg3: memref<1x256xf32, #tpu.memory_space<vmem>>, %arg4: memref<32x256xbf16, #tpu.memory_space<vmem>>) attributes {dimension_semantics = [#tpu.dimension_semantics<parallel>], iteration_bounds = array<i64: 1>, scalar_prefetch = 0 : i64, scratch_operands = 0 : i64, tpu.core_type = #tpu.core_type<tc>, window_params = [{transform_indices = @transform_0, window_bounds = array<i64: 32, 128>}, {pipeline_mode = #tpu.pipeline_mode<synchronous>, transform_indices = @transform_1, window_bounds = array<i64: 128, 256>}, {pipeline_mode = #tpu.pipeline_mode<synchronous>, transform_indices = @transform_2, window_bounds = array<i64: 1, 256>}, {transform_indices = @transform_3, window_bounds = array<i64: 32, 256>}]} {
    %c0 = arith.constant 0 : index
    %c0_0 = arith.constant 0 : index
    %0 = vector.load %arg1[%c0, %c0_0] : memref<32x128xbf16, #tpu.memory_space<vmem>>, vector<32x128xbf16>
    %c0_1 = arith.constant 0 : index
    %c0_2 = arith.constant 0 : index
    %1 = vector.load %arg2[%c0_1, %c0_2] : memref<128x256xbf16, #tpu.memory_space<vmem>>, vector<128x256xbf16>
    %cst = arith.constant dense<0.000000e+00> : vector<32x256xf32>
    %2 = tpu.matmul %0, %1, %cst {dimension_numbers = #tpu.dot_dimension_numbers<[1], [0], [0], [1], [0, 0, 1, 1], [], []>} : vector<32x128xbf16>, vector<128x256xbf16>, vector<32x256xf32> -> vector<32x256xf32>
    %c0_3 = arith.constant 0 : index
    %c0_4 = arith.constant 0 : index
    %3 = vector.load %arg3[%c0_3, %c0_4] : memref<1x256xf32, #tpu.memory_space<vmem>>, vector<1x256xf32>
    %4 = vector.broadcast %3 : vector<1x256xf32> to vector<32x256xf32>
    %5 = arith.addf %2, %4 : vector<32x256xf32>
    %cst_5 = arith.constant 3.000000e+00 : f32
    %6 = vector.broadcast %cst_5 : f32 to vector<32x256xf32>
    %7 = arith.addf %5, %6 : vector<32x256xf32>
    %cst_6 = arith.constant 0.000000e+00 : f32
    %cst_7 = arith.constant 6.000000e+00 : f32
    %8 = vector.broadcast %cst_6 : f32 to vector<32x256xf32>
    %9 = arith.maximumf %8, %7 : vector<32x256xf32>
    %10 = vector.broadcast %cst_7 : f32 to vector<32x256xf32>
    %11 = arith.minimumf %10, %9 : vector<32x256xf32>
    %12 = arith.mulf %5, %11 : vector<32x256xf32>
    %cst_8 = arith.constant 0.166666672 : f32
    %13 = vector.broadcast %cst_8 : f32 to vector<32x256xf32>
    %14 = arith.mulf %12, %13 : vector<32x256xf32>
    %15 = arith.truncf %14 : vector<32x256xf32> to vector<32x256xbf16>
    %c0_9 = arith.constant 0 : index
    %c0_10 = arith.constant 0 : index
    %16 = vector.load %arg4[%c0_9, %c0_10] : memref<32x256xbf16, #tpu.memory_space<vmem>>, vector<32x256xbf16>
    tpu.vector_store %arg4[%c0_9, %c0_10], %15 {strides = array<i32>} : memref<32x256xbf16, #tpu.memory_space<vmem>>, vector<32x256xbf16>,
    return
  }
  func.func @transform_0(%arg0: i32) -> (i32, i32) {
    %c0_i32 = arith.constant 0 : i32
    %c0_i32_0 = arith.constant 0 : i32
    return %arg0, %c0_i32 : i32, i32
  }
  func.func @transform_1(%arg0: i32) -> (i32, i32) {
    %c0_i32 = arith.constant 0 : i32
    %c0_i32_0 = arith.constant 0 : i32
    %c0_i32_1 = arith.constant 0 : i32
    return %c0_i32, %c0_i32_0 : i32, i32
  }
  func.func @transform_2(%arg0: i32) -> (i32, i32) {
    %c0_i32 = arith.constant 0 : i32
    %c0_i32_0 = arith.constant 0 : i32
    %c0_i32_1 = arith.constant 0 : i32
    return %c0_i32, %c0_i32_0 : i32, i32
  }
  func.func @transform_3(%arg0: i32) -> (i32, i32) {
    %c0_i32 = arith.constant 0 : i32
    %c0_i32_0 = arith.constant 0 : i32
    return %arg0, %c0_i32 : i32, i32
  }
}

module attributes {stable_mosaic.version = 11 : i64} {
  func.func @_linear_bn_res_kernel(%arg0: i32, %arg1: memref<32x256xbf16, #tpu.memory_space<vmem>>, %arg2: memref<256x128xbf16, #tpu.memory_space<vmem>>, %arg3: memref<1x128xf32, #tpu.memory_space<vmem>>, %arg4: memref<32x128xf32, #tpu.memory_space<vmem>>, %arg5: memref<32x128xf32, #tpu.memory_space<vmem>>) attributes {dimension_semantics = [#tpu.dimension_semantics<parallel>], iteration_bounds = array<i64: 1>, scalar_prefetch = 0 : i64, scratch_operands = 0 : i64, tpu.core_type = #tpu.core_type<tc>, window_params = [{transform_indices = @transform_0, window_bounds = array<i64: 32, 256>}, {pipeline_mode = #tpu.pipeline_mode<synchronous>, transform_indices = @transform_1, window_bounds = array<i64: 256, 128>}, {pipeline_mode = #tpu.pipeline_mode<synchronous>, transform_indices = @transform_2, window_bounds = array<i64: 1, 128>}, {transform_indices = @transform_3, window_bounds = array<i64: 32, 128>}, {transform_indices = @transform_4, window_bounds = array<i64: 32, 128>}]} {
    %c0 = arith.constant 0 : index
    %c0_0 = arith.constant 0 : index
    %0 = vector.load %arg1[%c0, %c0_0] : memref<32x256xbf16, #tpu.memory_space<vmem>>, vector<32x256xbf16>
    %c0_1 = arith.constant 0 : index
    %c0_2 = arith.constant 0 : index
    %1 = vector.load %arg2[%c0_1, %c0_2] : memref<256x128xbf16, #tpu.memory_space<vmem>>, vector<256x128xbf16>
    %cst = arith.constant dense<0.000000e+00> : vector<32x128xf32>
    %2 = tpu.matmul %0, %1, %cst {dimension_numbers = #tpu.dot_dimension_numbers<[1], [0], [0], [1], [0, 0, 1, 1], [], []>} : vector<32x256xbf16>, vector<256x128xbf16>, vector<32x128xf32> -> vector<32x128xf32>
    %c0_3 = arith.constant 0 : index
    %c0_4 = arith.constant 0 : index
    %3 = vector.load %arg3[%c0_3, %c0_4] : memref<1x128xf32, #tpu.memory_space<vmem>>, vector<1x128xf32>
    %4 = vector.broadcast %3 : vector<1x128xf32> to vector<32x128xf32>
    %5 = arith.addf %2, %4 : vector<32x128xf32>
    %c0_5 = arith.constant 0 : index
    %c0_6 = arith.constant 0 : index
    %6 = vector.load %arg4[%c0_5, %c0_6] : memref<32x128xf32, #tpu.memory_space<vmem>>, vector<32x128xf32>
    %7 = arith.addf %5, %6 : vector<32x128xf32>
    %c0_7 = arith.constant 0 : index
    %c0_8 = arith.constant 0 : index
    %8 = vector.load %arg5[%c0_7, %c0_8] : memref<32x128xf32, #tpu.memory_space<vmem>>, vector<32x128xf32>
    tpu.vector_store %arg5[%c0_7, %c0_8], %7 {strides = array<i32>} : memref<32x128xf32, #tpu.memory_space<vmem>>, vector<32x128xf32>,
    return
  }
  func.func @transform_0(%arg0: i32) -> (i32, i32) {
    %c0_i32 = arith.constant 0 : i32
    %c0_i32_0 = arith.constant 0 : i32
    return %arg0, %c0_i32 : i32, i32
  }
  func.func @transform_1(%arg0: i32) -> (i32, i32) {
    %c0_i32 = arith.constant 0 : i32
    %c0_i32_0 = arith.constant 0 : i32
    %c0_i32_1 = arith.constant 0 : i32
    return %c0_i32, %c0_i32_0 : i32, i32
  }
  func.func @transform_2(%arg0: i32) -> (i32, i32) {
    %c0_i32 = arith.constant 0 : i32
    %c0_i32_0 = arith.constant 0 : i32
    %c0_i32_1 = arith.constant 0 : i32
    return %c0_i32, %c0_i32_0 : i32, i32
  }
  func.func @transform_3(%arg0: i32) -> (i32, i32) {
    %c0_i32 = arith.constant 0 : i32
    %c0_i32_0 = arith.constant 0 : i32
    return %arg0, %c0_i32 : i32, i32
  }
  func.func @transform_4(%arg0: i32) -> (i32, i32) {
    %c0_i32 = arith.constant 0 : i32
    %c0_i32_0 = arith.constant 0 : i32
    return %arg0, %c0_i32 : i32, i32
  }
}

module attributes {stable_mosaic.version = 11 : i64} {
  func.func @_linear_bn_kernel(%arg0: i32, %arg1: memref<32x128xbf16, #tpu.memory_space<vmem>>, %arg2: memref<128x640xbf16, #tpu.memory_space<vmem>>, %arg3: memref<1x640xf32, #tpu.memory_space<vmem>>, %arg4: memref<32x640xbf16, #tpu.memory_space<vmem>>) attributes {dimension_semantics = [#tpu.dimension_semantics<parallel>], iteration_bounds = array<i64: 1>, scalar_prefetch = 0 : i64, scratch_operands = 0 : i64, tpu.core_type = #tpu.core_type<tc>, window_params = [{transform_indices = @transform_0, window_bounds = array<i64: 32, 128>}, {pipeline_mode = #tpu.pipeline_mode<synchronous>, transform_indices = @transform_1, window_bounds = array<i64: 128, 640>}, {pipeline_mode = #tpu.pipeline_mode<synchronous>, transform_indices = @transform_2, window_bounds = array<i64: 1, 640>}, {transform_indices = @transform_3, window_bounds = array<i64: 32, 640>}]} {
    %c0 = arith.constant 0 : index
    %c0_0 = arith.constant 0 : index
    %0 = vector.load %arg1[%c0, %c0_0] : memref<32x128xbf16, #tpu.memory_space<vmem>>, vector<32x128xbf16>
    %c0_1 = arith.constant 0 : index
    %c0_2 = arith.constant 0 : index
    %1 = vector.load %arg2[%c0_1, %c0_2] : memref<128x640xbf16, #tpu.memory_space<vmem>>, vector<128x640xbf16>
    %cst = arith.constant dense<0.000000e+00> : vector<32x640xf32>
    %2 = tpu.matmul %0, %1, %cst {dimension_numbers = #tpu.dot_dimension_numbers<[1], [0], [0], [1], [0, 0, 1, 1], [], []>} : vector<32x128xbf16>, vector<128x640xbf16>, vector<32x640xf32> -> vector<32x640xf32>
    %c0_3 = arith.constant 0 : index
    %c0_4 = arith.constant 0 : index
    %3 = vector.load %arg3[%c0_3, %c0_4] : memref<1x640xf32, #tpu.memory_space<vmem>>, vector<1x640xf32>
    %4 = vector.broadcast %3 : vector<1x640xf32> to vector<32x640xf32>
    %5 = arith.addf %2, %4 : vector<32x640xf32>
    %6 = arith.truncf %5 : vector<32x640xf32> to vector<32x640xbf16>
    %c0_5 = arith.constant 0 : index
    %c0_6 = arith.constant 0 : index
    %7 = vector.load %arg4[%c0_5, %c0_6] : memref<32x640xbf16, #tpu.memory_space<vmem>>, vector<32x640xbf16>
    tpu.vector_store %arg4[%c0_5, %c0_6], %6 {strides = array<i32>} : memref<32x640xbf16, #tpu.memory_space<vmem>>, vector<32x640xbf16>,
    return
  }
  func.func @transform_0(%arg0: i32) -> (i32, i32) {
    %c0_i32 = arith.constant 0 : i32
    %c0_i32_0 = arith.constant 0 : i32
    return %arg0, %c0_i32 : i32, i32
  }
  func.func @transform_1(%arg0: i32) -> (i32, i32) {
    %c0_i32 = arith.constant 0 : i32
    %c0_i32_0 = arith.constant 0 : i32
    %c0_i32_1 = arith.constant 0 : i32
    return %c0_i32, %c0_i32_0 : i32, i32
  }
  func.func @transform_2(%arg0: i32) -> (i32, i32) {
    %c0_i32 = arith.constant 0 : i32
    %c0_i32_0 = arith.constant 0 : i32
    %c0_i32_1 = arith.constant 0 : i32
    return %c0_i32, %c0_i32_0 : i32, i32
  }
  func.func @transform_3(%arg0: i32) -> (i32, i32) {
    %c0_i32 = arith.constant 0 : i32
    %c0_i32_0 = arith.constant 0 : i32
    return %arg0, %c0_i32 : i32, i32
  }
}

module attributes {stable_mosaic.version = 11 : i64} {
  func.func @_attention_kernel(%arg0: memref<16x4x16xbf16, #tpu.memory_space<vmem>>, %arg1: memref<16x16x16xbf16, #tpu.memory_space<vmem>>, %arg2: memref<16x16x64xbf16, #tpu.memory_space<vmem>>, %arg3: memref<8x4x16xf32, #tpu.memory_space<vmem>>, %arg4: memref<16x4x64xf32, #tpu.memory_space<vmem>>) attributes {dimension_semantics = [], scalar_prefetch = 0 : i64, scratch_operands = 0 : i64, tpu.core_type = #tpu.core_type<tc>} {
    %c0 = arith.constant 0 : index
    %c0_0 = arith.constant 0 : index
    %c0_1 = arith.constant 0 : index
    %0 = vector.load %arg0[%c0, %c0_0, %c0_1] : memref<16x4x16xbf16, #tpu.memory_space<vmem>>, vector<16x4x16xbf16>
    %c0_2 = arith.constant 0 : index
    %c0_3 = arith.constant 0 : index
    %c0_4 = arith.constant 0 : index
    %1 = vector.load %arg1[%c0_2, %c0_3, %c0_4] : memref<16x16x16xbf16, #tpu.memory_space<vmem>>, vector<16x16x16xbf16>
    %c0_5 = arith.constant 0 : index
    %c0_6 = arith.constant 0 : index
    %c0_7 = arith.constant 0 : index
    %2 = vector.load %arg2[%c0_5, %c0_6, %c0_7] : memref<16x16x64xbf16, #tpu.memory_space<vmem>>, vector<16x16x64xbf16>
    %c0_8 = arith.constant 0 : index
    %c0_9 = arith.constant 0 : index
    %c0_10 = arith.constant 0 : index
    %3 = vector.load %arg3[%c0_8, %c0_9, %c0_10] : memref<8x4x16xf32, #tpu.memory_space<vmem>>, vector<8x4x16xf32>
    %4 = tpu.concatenate %3, %3 in 0 : vector<8x4x16xf32>, vector<8x4x16xf32> -> vector<16x4x16xf32>
    "tpu.trace_start"() <{level = 10 : i32, message = "bqd,bkd->bqk"}> : () -> ()
    %cst = arith.constant dense<0.000000e+00> : vector<16x4x16xf32>
    %5 = tpu.matmul %0, %1, %cst {dimension_numbers = #tpu.dot_dimension_numbers<[2], [2], [1], [1], [0, 0, 0, 1, 1, 1], [0], [0]>} : vector<16x4x16xbf16>, vector<16x16x16xbf16>, vector<16x4x16xf32> -> vector<16x4x16xf32>
    "tpu.trace_stop"() : () -> ()
    %cst_11 = arith.constant 2.500000e-01 : f32
    %6 = vector.broadcast %cst_11 : f32 to vector<16x4x16xf32>
    %7 = arith.mulf %5, %6 : vector<16x4x16xf32>
    %8 = arith.addf %7, %4 : vector<16x4x16xf32>
    %cst_12 = arith.constant dense<0xFF800000> : vector<16x4xf32>
    %9 = vector.multi_reduction <maximumf>, %8, %cst_12 [2] : vector<16x4x16xf32> to vector<16x4xf32>
    %10 = vector.shape_cast %9 : vector<16x4xf32> to vector<16x4x1xf32>
    %11 = vector.broadcast %10 : vector<16x4x1xf32> to vector<16x4x16xf32>
    %12 = arith.subf %8, %11 : vector<16x4x16xf32>
    %13 = math.exp %12 : vector<16x4x16xf32>
    %cst_13 = arith.constant dense<0.000000e+00> : vector<16x4xf32>
    %14 = vector.multi_reduction <add>, %13, %cst_13 [2] : vector<16x4x16xf32> to vector<16x4xf32>
    %15 = vector.shape_cast %14 : vector<16x4xf32> to vector<16x4x1xf32>
    %16 = tpu.reciprocal %15 {approx = true} : vector<16x4x1xf32> -> vector<16x4x1xf32>
    %17 = vector.broadcast %16 : vector<16x4x1xf32> to vector<16x4x16xf32>
    %18 = arith.mulf %13, %17 : vector<16x4x16xf32>
    %19 = arith.truncf %18 : vector<16x4x16xf32> to vector<16x4x16xbf16>
    "tpu.trace_start"() <{level = 10 : i32, message = "bqk,bkd->bqd"}> : () -> ()
    %cst_14 = arith.constant dense<0.000000e+00> : vector<16x4x64xf32>
    %20 = tpu.matmul %19, %2, %cst_14 {dimension_numbers = #tpu.dot_dimension_numbers<[2], [1], [1], [2], [0, 0, 0, 1, 1, 2], [0], [0]>} : vector<16x4x16xbf16>, vector<16x16x64xbf16>, vector<16x4x64xf32> -> vector<16x4x64xf32>
    "tpu.trace_stop"() : () -> ()
    %cst_15 = arith.constant 3.000000e+00 : f32
    %21 = vector.broadcast %cst_15 : f32 to vector<16x4x64xf32>
    %22 = arith.addf %20, %21 : vector<16x4x64xf32>
    %cst_16 = arith.constant 0.000000e+00 : f32
    %cst_17 = arith.constant 6.000000e+00 : f32
    %23 = vector.broadcast %cst_16 : f32 to vector<16x4x64xf32>
    %24 = arith.maximumf %23, %22 : vector<16x4x64xf32>
    %25 = vector.broadcast %cst_17 : f32 to vector<16x4x64xf32>
    %26 = arith.minimumf %25, %24 : vector<16x4x64xf32>
    %27 = arith.mulf %20, %26 : vector<16x4x64xf32>
    %cst_18 = arith.constant 0.166666672 : f32
    %28 = vector.broadcast %cst_18 : f32 to vector<16x4x64xf32>
    %29 = arith.mulf %27, %28 : vector<16x4x64xf32>
    %c0_19 = arith.constant 0 : index
    %c0_20 = arith.constant 0 : index
    %c0_21 = arith.constant 0 : index
    %30 = vector.load %arg4[%c0_19, %c0_20, %c0_21] : memref<16x4x64xf32, #tpu.memory_space<vmem>>, vector<16x4x64xf32>
    tpu.vector_store %arg4[%c0_19, %c0_20, %c0_21], %29 {strides = array<i32>} : memref<16x4x64xf32, #tpu.memory_space<vmem>>, vector<16x4x64xf32>,
    return
  }
}

module attributes {stable_mosaic.version = 11 : i64} {
  func.func @_attention_kernel(%arg0: memref<16x4x16xbf16, #tpu.memory_space<vmem>>, %arg1: memref<16x4x16xbf16, #tpu.memory_space<vmem>>, %arg2: memref<16x4x32xbf16, #tpu.memory_space<vmem>>, %arg3: memref<8x4x4xf32, #tpu.memory_space<vmem>>, %arg4: memref<16x4x32xf32, #tpu.memory_space<vmem>>) attributes {dimension_semantics = [], scalar_prefetch = 0 : i64, scratch_operands = 0 : i64, tpu.core_type = #tpu.core_type<tc>} {
    %c0 = arith.constant 0 : index
    %c0_0 = arith.constant 0 : index
    %c0_1 = arith.constant 0 : index
    %0 = vector.load %arg0[%c0, %c0_0, %c0_1] : memref<16x4x16xbf16, #tpu.memory_space<vmem>>, vector<16x4x16xbf16>
    %c0_2 = arith.constant 0 : index
    %c0_3 = arith.constant 0 : index
    %c0_4 = arith.constant 0 : index
    %1 = vector.load %arg1[%c0_2, %c0_3, %c0_4] : memref<16x4x16xbf16, #tpu.memory_space<vmem>>, vector<16x4x16xbf16>
    %c0_5 = arith.constant 0 : index
    %c0_6 = arith.constant 0 : index
    %c0_7 = arith.constant 0 : index
    %2 = vector.load %arg2[%c0_5, %c0_6, %c0_7] : memref<16x4x32xbf16, #tpu.memory_space<vmem>>, vector<16x4x32xbf16>
    %c0_8 = arith.constant 0 : index
    %c0_9 = arith.constant 0 : index
    %c0_10 = arith.constant 0 : index
    %3 = vector.load %arg3[%c0_8, %c0_9, %c0_10] : memref<8x4x4xf32, #tpu.memory_space<vmem>>, vector<8x4x4xf32>
    %4 = tpu.concatenate %3, %3 in 0 : vector<8x4x4xf32>, vector<8x4x4xf32> -> vector<16x4x4xf32>
    "tpu.trace_start"() <{level = 10 : i32, message = "bqd,bkd->bqk"}> : () -> ()
    %cst = arith.constant dense<0.000000e+00> : vector<16x4x4xf32>
    %5 = tpu.matmul %0, %1, %cst {dimension_numbers = #tpu.dot_dimension_numbers<[2], [2], [1], [1], [0, 0, 0, 1, 1, 1], [0], [0]>} : vector<16x4x16xbf16>, vector<16x4x16xbf16>, vector<16x4x4xf32> -> vector<16x4x4xf32>
    "tpu.trace_stop"() : () -> ()
    %cst_11 = arith.constant 2.500000e-01 : f32
    %6 = vector.broadcast %cst_11 : f32 to vector<16x4x4xf32>
    %7 = arith.mulf %5, %6 : vector<16x4x4xf32>
    %8 = arith.addf %7, %4 : vector<16x4x4xf32>
    %cst_12 = arith.constant dense<0xFF800000> : vector<16x4xf32>
    %9 = vector.multi_reduction <maximumf>, %8, %cst_12 [2] : vector<16x4x4xf32> to vector<16x4xf32>
    %10 = vector.shape_cast %9 : vector<16x4xf32> to vector<16x4x1xf32>
    %11 = vector.broadcast %10 : vector<16x4x1xf32> to vector<16x4x4xf32>
    %12 = arith.subf %8, %11 : vector<16x4x4xf32>
    %13 = math.exp %12 : vector<16x4x4xf32>
    %cst_13 = arith.constant dense<0.000000e+00> : vector<16x4xf32>
    %14 = vector.multi_reduction <add>, %13, %cst_13 [2] : vector<16x4x4xf32> to vector<16x4xf32>
    %15 = vector.shape_cast %14 : vector<16x4xf32> to vector<16x4x1xf32>
    %16 = tpu.reciprocal %15 {approx = true} : vector<16x4x1xf32> -> vector<16x4x1xf32>
    %17 = vector.broadcast %16 : vector<16x4x1xf32> to vector<16x4x4xf32>
    %18 = arith.mulf %13, %17 : vector<16x4x4xf32>
    %19 = arith.truncf %18 : vector<16x4x4xf32> to vector<16x4x4xbf16>
    "tpu.trace_start"() <{level = 10 : i32, message = "bqk,bkd->bqd"}> : () -> ()
    %cst_14 = arith.constant dense<0.000000e+00> : vector<16x4x32xf32>
    %20 = tpu.matmul %19, %2, %cst_14 {dimension_numbers = #tpu.dot_dimension_numbers<[2], [1], [1], [2], [0, 0, 0, 1, 1, 2], [0], [0]>} : vector<16x4x4xbf16>, vector<16x4x32xbf16>, vector<16x4x32xf32> -> vector<16x4x32xf32>
    "tpu.trace_stop"() : () -> ()
    %cst_15 = arith.constant 3.000000e+00 : f32
    %21 = vector.broadcast %cst_15 : f32 to vector<16x4x32xf32>
    %22 = arith.addf %20, %21 : vector<16x4x32xf32>
    %cst_16 = arith.constant 0.000000e+00 : f32
    %cst_17 = arith.constant 6.000000e+00 : f32
    %23 = vector.broadcast %cst_16 : f32 to vector<16x4x32xf32>
    %24 = arith.maximumf %23, %22 : vector<16x4x32xf32>
    %25 = vector.broadcast %cst_17 : f32 to vector<16x4x32xf32>
    %26 = arith.minimumf %25, %24 : vector<16x4x32xf32>
    %27 = arith.mulf %20, %26 : vector<16x4x32xf32>
    %cst_18 = arith.constant 0.166666672 : f32
    %28 = vector.broadcast %cst_18 : f32 to vector<16x4x32xf32>
    %29 = arith.mulf %27, %28 : vector<16x4x32xf32>
    %c0_19 = arith.constant 0 : index
    %c0_20 = arith.constant 0 : index
    %c0_21 = arith.constant 0 : index
    %30 = vector.load %arg4[%c0_19, %c0_20, %c0_21] : memref<16x4x32xf32, #tpu.memory_space<vmem>>, vector<16x4x32xf32>
    tpu.vector_store %arg4[%c0_19, %c0_20, %c0_21], %29 {strides = array<i32>} : memref<16x4x32xf32, #tpu.memory_space<vmem>>, vector<16x4x32xf32>,
    return
  }
}

</mosaic_0001>

<bundles_post_ra>
// kernel: custom_levit_forward.30
= control target key start
LH: loop header
LB: loop body
LE: loop exit
PB: predicated region body
PF: predicated region fallthrough
CT: control target
= control target key end

     0   :  { %s3418_s12 = smov 0   ;;  %s4302_s0 = inlined_call_operand.vmem [shape: bf16[2048,9], index: 0, kind: input, shape index: {}]   ;;  %s4303_s1 = inlined_call_operand.vmem [shape: bf16[9,16], index: 1, kind: input, shape index: {}]   ;;  %s4304_s2 = inlined_call_operand.vmem [shape: f32[1,16], index: 2, kind: input, shape index: {}]   ;;  %s4305_s3 = inlined_call_operand.vmem [shape: bf16[2048,16], index: 3, kind: output, shape index: {}]  }
   0x1 LB: > { %s2719_s13 = sadd.s32 4294967295, %s3395_s12   ;;  %p2723_p0 = scmp.ge.s32.totalorder %s3395_s12, 1  ;;  %s3395_s12 = sphi %s3418_s12, %s13_s12  }
   0x2   : > { %p138_p1 = scmp.lt.s32.totalorder %s3395_s12, 3 }
   0x4   : > { %p139_p2 = pnand %p2723_p0, %p138_p1 }
   0x6   : > { %142 = sbr.rel (%p139_p2) target bundleno = 466 (0x1d2), region = 32 }
   0xd   : > { %v3322_v0 = vld [vmem:[%s4303_s1] sm:$0x1f]   ;;  %vm830_vm0 = vcmask 1043456   ;;  %vm831_vm1 = vcmask 1044480   ;;  %s2724_s16 = sshll.u32 %s2719_s13, 7  ;;  %v3397_v1 = vmov 65535  }
   0xe   : > { %v832_v2 = vsel %vm830_vm0, 4294967295, %v3397_v1  ;;  %p163_p3 = scmp.lt.s32.totalorder %s2724_s16, 255  ;;  %vm637_vm2 = vcmask 72704   ;;  %vm2534_vm3 = vcmask 125952  }
   0xf   : > { %v833_v3 = vsel %vm831_vm1, %v832_v2, 0 }
  0x10   : > { %v835_v4 = vand.u32 %v3322_v0, %v833_v3  ;;  %s4351_s16 = smov (!%p163_p3, %s2724_s16), 255 }
  0x11   : > { %s2725_s17 = sshll.u32 %s4351_s16, 2 }
  0x12   : > { %3181 = vmatprep.subr.bf16.mxu0 %v835_v4  ;;  %3311 = vmatprep.subr.bf16.mxu1 %v835_v4  ;;  %s3437_s20 = scalar_lea.vmem %s4302_s0, %s2725_s17  ;;  %s3585_s25 = scalar_lea.vmem %s4305_s3, %s2725_s17 }
  0x13   : > { %3182 = vmatpush3.bf16.msra.mxu0 %v835_v4  ;;  %3312 = vmatpush3.bf16.msra.mxu1 %v835_v4  ;;  %v3323_v5 = vld [vmem:[%s3437_s20] sm:$0xff]   ;;  %v3325_v7 = vld [vmem:[%s3437_s20 + $0x8] sm:$0xff]   ;;  %v3327_v9 = vld [vmem:[%s3437_s20 + $0x10] sm:$0xff]  }
  0x14   : > { %v3324_v6 = vld [vmem:[%s3437_s20 + $0x100] sm:$0xff]   ;;  %3183 = vmatprep.mubr.msk.bf16.mxu0 %vm637_vm2, %v3323_v5  ;;  %v3326_v8 = vld [vmem:[%s3437_s20 + $0x108] sm:$0xff]   ;;  %v3328_v10 = vld [vmem:[%s3437_s20 + $0x110] sm:$0xff]  }
  0x15   : > { %3247 = vmatprep.mubr.msk.bf16.mxu1 %vm637_vm2, %v3324_v6  ;;  %v3329_v11 = vld [vmem:[%s3437_s20 + $0x18] sm:$0xff]   ;;  %v3331_v13 = vld [vmem:[%s3437_s20 + $0x20] sm:$0xff]   ;;  %v3333_v15 = vld [vmem:[%s3437_s20 + $0x28] sm:$0xff]  }
  0x16   : > { %3184 = vmatmul.mubr.msk.bf16.vlgmr.msra.gmra.mrb[0].mxu0 %vm637_vm2, %v3325_v7  ;;  %3248 = vmatmul.mubr.msk.bf16.vlgmr.msra.gmra.mrb[0].mxu1 %vm637_vm2, %v3326_v8  ;;  %v3330_v12 = vld [vmem:[%s3437_s20 + $0x118] sm:$0xff]   ;;  %v3332_v14 = vld [vmem:[%s3437_s20 + $0x120] sm:$0xff]   ;;  %v3334_v16 = vld [vmem:[%s3437_s20 + $0x128] sm:$0xff]  }
  0x17   : > { %3187 = vmatprep.mubr.msk.bf16.mxu0 %vm637_vm2, %v3327_v9  ;;  %3251 = vmatprep.mubr.msk.bf16.mxu1 %vm637_vm2, %v3328_v10  ;;  %v3335_v17 = vld [vmem:[%s3437_s20 + $0x30] sm:$0xff]   ;;  %v3337_v19 = vld [vmem:[%s3437_s20 + $0x38] sm:$0xff]   ;;  %v3339_v21 = vld [vmem:[%s3437_s20 + $0x40] sm:$0xff]  }
  0x18   : > { %v3336_v18 = vld [vmem:[%s3437_s20 + $0x130] sm:$0xff]   ;;  %v3338_v20 = vld [vmem:[%s3437_s20 + $0x138] sm:$0xff]   ;;  %v3340_v22 = vld [vmem:[%s3437_s20 + $0x140] sm:$0xff]  }
  0x19   : > { %v3341_v23 = vld [vmem:[%s3437_s20 + $0x48] sm:$0xff]   ;;  %v3343_v25 = vld [vmem:[%s3437_s20 + $0x50] sm:$0xff]   ;;  %v3345_v27 = vld [vmem:[%s3437_s20 + $0x58] sm:$0xff]  }
  0x1a   : > { %v3342_v24 = vld [vmem:[%s3437_s20 + $0x148] sm:$0xff]   ;;  %v3344_v26 = vld [vmem:[%s3437_s20 + $0x150] sm:$0xff]   ;;  %v3346_v28 = vld [vmem:[%s3437_s20 + $0x158] sm:$0xff]  }
  0x1b   : > { %v3347_v29 = vld [vmem:[%s3437_s20 + $0x60] sm:$0xff]   ;;  %v3349_v31 = vld [vmem:[%s3437_s20 + $0x68] sm:$0xff]   ;;  %v3351_v33 = vld [vmem:[%s3437_s20 + $0x70] sm:$0xff]  }
  0x1c   : > { %v3348_v30 = vld [vmem:[%s3437_s20 + $0x160] sm:$0xff]   ;;  %v3350_v32 = vld [vmem:[%s3437_s20 + $0x168] sm:$0xff]   ;;  %v3352_v34 = vld [vmem:[%s3437_s20 + $0x170] sm:$0xff]  }
  0x1d   : > { %v3353_v35 = vld [vmem:[%s3437_s20 + $0x78] sm:$0xff]   ;;  %v3355_v37 = vld [vmem:[%s3437_s20 + $0x80] sm:$0xff]   ;;  %v3357_v39 = vld [vmem:[%s3437_s20 + $0x88] sm:$0xff]  }
  0x1e   : > { %3188 = vmatmul.mubr.msk.bf16.gmra.mrb[4].mxu0 %vm637_vm2, %v3329_v11  ;;  %3252 = vmatmul.mubr.msk.bf16.gmra.mrb[4].mxu1 %vm637_vm2, %v3330_v12  ;;  %v3354_v36 = vld [vmem:[%s3437_s20 + $0x178] sm:$0xff]   ;;  %v3356_v38 = vld [vmem:[%s3437_s20 + $0x180] sm:$0xff]   ;;  %v3358_v40 = vld [vmem:[%s3437_s20 + $0x188] sm:$0xff]  }
  0x1f   : > { %3191 = vmatprep.mubr.msk.bf16.mxu0 %vm637_vm2, %v3331_v13  ;;  %3255 = vmatprep.mubr.msk.bf16.mxu1 %vm637_vm2, %v3332_v14  ;;  %v3359_v41 = vld [vmem:[%s3437_s20 + $0x90] sm:$0xff]   ;;  %v3361_v43 = vld [vmem:[%s3437_s20 + $0x98] sm:$0xff]   ;;  %v3363_v45 = vld [vmem:[%s3437_s20 + $0xa0] sm:$0xff]  }
  0x20   : > { %v3360_v42 = vld [vmem:[%s3437_s20 + $0x190] sm:$0xff]   ;;  %v3362_v44 = vld [vmem:[%s3437_s20 + $0x198] sm:$0xff]   ;;  %v3364_v46 = vld [vmem:[%s3437_s20 + $0x1a0] sm:$0xff]  }
  0x21   : > { %v3365_v47 = vld [vmem:[%s3437_s20 + $0xa8] sm:$0xff]   ;;  %v3367_v49 = vld [vmem:[%s3437_s20 + $0xb0] sm:$0xff]   ;;  %v3369_v51 = vld [vmem:[%s3437_s20 + $0xb8] sm:$0xff]  }
  0x22   : > { %v3366_v48 = vld [vmem:[%s3437_s20 + $0x1a8] sm:$0xff]   ;;  %v3368_v50 = vld [vmem:[%s3437_s20 + $0x1b0] sm:$0xff]   ;;  %v3370_v52 = vld [vmem:[%s3437_s20 + $0x1b8] sm:$0xff]  }
  0x23   : > { %v3371_v53 = vld [vmem:[%s3437_s20 + $0xc0] sm:$0xff]   ;;  %v3373_v55 = vld [vmem:[%s3437_s20 + $0xc8] sm:$0xff]   ;;  %v3375_v57 = vld [vmem:[%s3437_s20 + $0xd0] sm:$0xff]  }
  0x24   : > { %v3372_v54 = vld [vmem:[%s3437_s20 + $0x1c0] sm:$0xff]   ;;  %v3374_v56 = vld [vmem:[%s3437_s20 + $0x1c8] sm:$0xff]   ;;  %v3376_v58 = vld [vmem:[%s3437_s20 + $0x1d0] sm:$0xff]  }
  0x25   : > { %v3377_v59 = vld [vmem:[%s3437_s20 + $0xd8] sm:$0xff]   ;;  %v3379_v61 = vld [vmem:[%s3437_s20 + $0xe0] sm:$0xff]   ;;  %v3381_v63 = vld [vmem:[%s3437_s20 + $0xe8] sm:$0xff]  }
  0x26   : > { %3192 = vmatmul.mubr.msk.bf16.gmra.mrb[8].mxu0 %vm637_vm2, %v3333_v15  ;;  %3256 = vmatmul.mubr.msk.bf16.gmra.mrb[8].mxu1 %vm637_vm2, %v3334_v16  ;;  %v3378_v60 = vld [vmem:[%s3437_s20 + $0x1d8] sm:$0xff]   ;;  %v3380_v62 = vld [vmem:[%s3437_s20 + $0x1e0] sm:$0xff]   ;;  %v3382_v0 = vld [vmem:[%s3437_s20 + $0x1e8] sm:$0xff]  }
  0x27   : > { %3195 = vmatprep.mubr.msk.bf16.mxu0 %vm637_vm2, %v3335_v17  ;;  %3259 = vmatprep.mubr.msk.bf16.mxu1 %vm637_vm2, %v3336_v18  ;;  %v3383_v1 = vld [vmem:[%s3437_s20 + $0xf0] sm:$0xff]   ;;  %v3385_v3 = vld [vmem:[%s3437_s20 + $0xf8] sm:$0xff]   ;;  %v3570_v5 = vld [vmem:[%s4304_s2] ss:$0 sm:$0xff] }
  0x28   : > { %v3384_v2 = vld [vmem:[%s3437_s20 + $0x1f0] sm:$0xff]   ;;  %v3386_v4 = vld [vmem:[%s3437_s20 + $0x1f8] sm:$0xff]  }
  0x2e   : > { %3196 = vmatmul.mubr.msk.bf16.gmra.mrb[12].mxu0 %vm637_vm2, %v3337_v19  ;;  %3260 = vmatmul.mubr.msk.bf16.gmra.mrb[12].mxu1 %vm637_vm2, %v3338_v20 }
  0x2f   : > { %3199 = vmatprep.mubr.msk.bf16.mxu0 %vm637_vm2, %v3339_v21  ;;  %3263 = vmatprep.mubr.msk.bf16.mxu1 %vm637_vm2, %v3340_v22 }
  0x36   : > { %3200 = vmatmul.mubr.msk.bf16.gmra.mrb[16].mxu0 %vm637_vm2, %v3341_v23  ;;  %3264 = vmatmul.mubr.msk.bf16.gmra.mrb[16].mxu1 %vm637_vm2, %v3342_v24 }
  0x37   : > { %3203 = vmatprep.mubr.msk.bf16.mxu0 %vm637_vm2, %v3343_v25  ;;  %3267 = vmatprep.mubr.msk.bf16.mxu1 %vm637_vm2, %v3344_v26 }
  0x3e   : > { %3204 = vmatmul.mubr.msk.bf16.gmra.mrb[20].mxu0 %vm637_vm2, %v3345_v27  ;;  %3268 = vmatmul.mubr.msk.bf16.gmra.mrb[20].mxu1 %vm637_vm2, %v3346_v28 }
  0x3f   : > { %3207 = vmatprep.mubr.msk.bf16.mxu0 %vm637_vm2, %v3347_v29  ;;  %3271 = vmatprep.mubr.msk.bf16.mxu1 %vm637_vm2, %v3348_v30 }
  0x46   : > { %3208 = vmatmul.mubr.msk.bf16.gmra.mrb[24].mxu0 %vm637_vm2, %v3349_v31  ;;  %3272 = vmatmul.mubr.msk.bf16.gmra.mrb[24].mxu1 %vm637_vm2, %v3350_v32 }
  0x47   : > { %3211 = vmatprep.mubr.msk.bf16.mxu0 %vm637_vm2, %v3351_v33  ;;  %3275 = vmatprep.mubr.msk.bf16.mxu1 %vm637_vm2, %v3352_v34 }
  0x4e   : > { %3212 = vmatmul.mubr.msk.bf16.gmra.mrb[28].mxu0 %vm637_vm2, %v3353_v35  ;;  %3276 = vmatmul.mubr.msk.bf16.gmra.mrb[28].mxu1 %vm637_vm2, %v3354_v36 }
  0x4f   : > { %3215 = vmatprep.mubr.msk.bf16.mxu0 %vm637_vm2, %v3355_v37  ;;  %3279 = vmatprep.mubr.msk.bf16.mxu1 %vm637_vm2, %v3356_v38 }
  0x56   : > { %3216 = vmatmul.mubr.msk.bf16.gmra.mrb[32].mxu0 %vm637_vm2, %v3357_v39  ;;  %3280 = vmatmul.mubr.msk.bf16.gmra.mrb[32].mxu1 %vm637_vm2, %v3358_v40 }
  0x57   : > { %3219 = vmatprep.mubr.msk.bf16.mxu0 %vm637_vm2, %v3359_v41  ;;  %3283 = vmatprep.mubr.msk.bf16.mxu1 %vm637_vm2, %v3360_v42 }
  0x5e   : > { %3220 = vmatmul.mubr.msk.bf16.gmra.mrb[36].mxu0 %vm637_vm2, %v3361_v43  ;;  %3284 = vmatmul.mubr.msk.bf16.gmra.mrb[36].mxu1 %vm637_vm2, %v3362_v44 }
  0x5f   : > { %3223 = vmatprep.mubr.msk.bf16.mxu0 %vm637_vm2, %v3363_v45  ;;  %3287 = vmatprep.mubr.msk.bf16.mxu1 %vm637_vm2, %v3364_v46 }
  0x66   : > { %3224 = vmatmul.mubr.msk.bf16.gmra.mrb[40].mxu0 %vm637_vm2, %v3365_v47  ;;  %3288 = vmatmul.mubr.msk.bf16.gmra.mrb[40].mxu1 %vm637_vm2, %v3366_v48 }
  0x67   : > { %3227 = vmatprep.mubr.msk.bf16.mxu0 %vm637_vm2, %v3367_v49  ;;  %3291 = vmatprep.mubr.msk.bf16.mxu1 %vm637_vm2, %v3368_v50 }
  0x6e   : > { %3228 = vmatmul.mubr.msk.bf16.gmra.mrb[44].mxu0 %vm637_vm2, %v3369_v51  ;;  %3292 = vmatmul.mubr.msk.bf16.gmra.mrb[44].mxu1 %vm637_vm2, %v3370_v52 }
  0x6f   : > { %3231 = vmatprep.mubr.msk.bf16.mxu0 %vm637_vm2, %v3371_v53  ;;  %3295 = vmatprep.mubr.msk.bf16.mxu1 %vm637_vm2, %v3372_v54 }
  0x76   : > { %3232 = vmatmul.mubr.msk.bf16.gmra.mrb[48].mxu0 %vm637_vm2, %v3373_v55  ;;  %3296 = vmatmul.mubr.msk.bf16.gmra.mrb[48].mxu1 %vm637_vm2, %v3374_v56 }
  0x77   : > { %3235 = vmatprep.mubr.msk.bf16.mxu0 %vm637_vm2, %v3375_v57  ;;  %3299 = vmatprep.mubr.msk.bf16.mxu1 %vm637_vm2, %v3376_v58 }
  0x7e   : > { %3236 = vmatmul.mubr.msk.bf16.gmra.mrb[52].mxu0 %vm637_vm2, %v3377_v59  ;;  %3300 = vmatmul.mubr.msk.bf16.gmra.mrb[52].mxu1 %vm637_vm2, %v3378_v60 }
  0x7f   : > { %3239 = vmatprep.mubr.msk.bf16.mxu0 %vm637_vm2, %v3379_v61  ;;  %3303 = vmatprep.mubr.msk.bf16.mxu1 %vm637_vm2, %v3380_v62 }
  0x86   : > { %3240 = vmatmul.mubr.msk.bf16.gmra.mrb[56].mxu0 %vm637_vm2, %v3381_v63  ;;  %3304 = vmatmul.mubr.msk.bf16.gmra.mrb[56].mxu1 %vm637_vm2, %v3382_v0 }
  0x87   : > { %3243 = vmatprep.mubr.msk.bf16.mxu0 %vm637_vm2, %v3383_v1  ;;  %3307 = vmatprep.mubr.msk.bf16.mxu1 %vm637_vm2, %v3384_v2 }
  0x8e   : > { %3244 = vmatmul.mubr.msk.bf16.gmra.mrb[60].mxu0 %vm637_vm2, %v3385_v3  ;;  %3308 = vmatmul.mubr.msk.bf16.gmra.mrb[60].mxu1 %vm637_vm2, %v3386_v4 }
  0xe9   : > { %v3185_v6 = vpop.f32.mrb[0].mxu0  ;;  %v3249_v8 = vpop.f32.mrb[0].mxu1 }
  0xea   : > { %v880_v7 = vadd.f32 %v3185_v6, %v3570_v5  ;;  %v871_v9 = vpop.f32.mrb[1].mxu0  ;;  %v1136_v10 = vadd.f32 %v3249_v8, %v3570_v5  ;;  %v1127_v12 = vpop.f32.mrb[1].mxu1 }
  0xeb   : > { %v872_v11 = vadd.f32 %v3570_v5, %v871_v9  ;;  %v3186_v13 = vpop.f32.mrb[2].mxu0  ;;  %v1128_v15 = vadd.f32 %v3570_v5, %v1127_v12  ;;  %v3250_v17 = vpop.f32.mrb[2].mxu1 }
  0xec   : > { %v1384_v14 = vadd.f32 3.0, %v880_v7  ;;  %v883_v16 = vadd.f32 %v3186_v13, %v3570_v5  ;;  %v874_v18 = vpop.f32.mrb[3].mxu0  ;;  %v1448_v19 = vadd.f32 3.0, %v1136_v10  ;;  %v1139_v21 = vadd.f32 %v3250_v17, %v3570_v5  ;;  %v1130_v23 = vpop.f32.mrb[3].mxu1 }
  0xed   : > { %v1382_v20 = vadd.f32 3.0, %v872_v11  ;;  %v875_v22 = vadd.f32 %v3570_v5, %v874_v18  ;;  %v1446_v25 = vadd.f32 3.0, %v1128_v15  ;;  %v1131_v27 = vadd.f32 %v3570_v5, %v1130_v23 }
  0xee   : > { %v1512_v24 = vmax.f32 %v1384_v14, 0.0  ;;  %v1385_v26 = vadd.f32 3.0, %v883_v16  ;;  %v1576_v28 = vmax.f32 %v1448_v19, 0.0  ;;  %v1449_v30 = vadd.f32 3.0, %v1139_v21 }
  0xef   : > { %v1510_v29 = vmax.f32 %v1382_v20, 0.0  ;;  %v1383_v31 = vadd.f32 3.0, %v875_v22  ;;  %v1574_v33 = vmax.f32 %v1446_v25, 0.0  ;;  %v1447_v35 = vadd.f32 3.0, %v1131_v27 }
  0xf0   : > { %v1640_v32 = vmin.f32 %v1512_v24, 6.0  ;;  %v1513_v34 = vmax.f32 %v1385_v26, 0.0  ;;  %v1704_v36 = vmin.f32 %v1576_v28, 6.0  ;;  %v1577_v38 = vmax.f32 %v1449_v30, 0.0 }
  0xf1   : > { %v1638_v37 = vmin.f32 %v1510_v29, 6.0  ;;  %v1511_v39 = vmax.f32 %v1383_v31, 0.0  ;;  %v3189_v40 = vpop.f32.mrb[4].mxu0  ;;  %v1702_v42 = vmin.f32 %v1574_v33, 6.0  ;;  %v1575_v44 = vmax.f32 %v1447_v35, 0.0  ;;  %v3253_v45 = vpop.f32.mrb[4].mxu1 }
  0xf2   : > { %v1768_v41 = vmul.f32 %v1640_v32, %v880_v7  ;;  %v1641_v43 = vmin.f32 %v1513_v34, 6.0  ;;  %v887_v46 = vpop.f32.mrb[5].mxu0  ;;  %v1832_v47 = vmul.f32 %v1704_v36, %v1136_v10  ;;  %v1705_v49 = vmin.f32 %v1577_v38, 6.0  ;;  %v1143_v51 = vpop.f32.mrb[5].mxu1 }
  0xf3   : > { %v1766_v48 = vmul.f32 %v1638_v37, %v872_v11  ;;  %v1639_v50 = vmin.f32 %v1511_v39, 6.0  ;;  %v3190_v52 = vpop.f32.mrb[6].mxu0  ;;  %v1830_v54 = vmul.f32 %v1702_v42, %v1128_v15  ;;  %v1703_v56 = vmin.f32 %v1575_v44, 6.0  ;;  %v3254_v57 = vpop.f32.mrb[6].mxu1 }
  0xf4   : > { %v1896_v53 = vmul.f32 0.16666667, %v1768_v41  ;;  %v1769_v55 = vmul.f32 %v1641_v43, %v883_v16  ;;  %v890_v58 = vpop.f32.mrb[7].mxu0  ;;  %v1960_v59 = vmul.f32 0.16666667, %v1832_v47  ;;  %v1833_v61 = vmul.f32 %v1705_v49, %v1139_v21  ;;  %v1146_v63 = vpop.f32.mrb[7].mxu1 }
  0xf5   : > { %v1894_v60 = vmul.f32 0.16666667, %v1766_v48  ;;  %v1767_v62 = vmul.f32 %v1639_v50, %v875_v22  ;;  %v1958_v1 = vmul.f32 0.16666667, %v1830_v54  ;;  %v1831_v3 = vmul.f32 %v1703_v56, %v1131_v27 }
  0xf6   : > { %v2990_v0 = vpack.c.bf16 %v1896_v53, %v1896_v53  ;;  %v1897_v2 = vmul.f32 0.16666667, %v1769_v55  ;;  %v3054_v4 = vpack.c.bf16 %v1960_v59, %v1960_v59  ;;  %v1961_v7 = vmul.f32 0.16666667, %v1833_v61 }
  0xf7   : > { %v2988_v6 = vpack.c.bf16 %v1894_v60, %v1894_v60  ;;  %v1895_v8 = vmul.f32 0.16666667, %v1767_v62  ;;  %v3052_v9 = vpack.c.bf16 %v1958_v1, %v1958_v1  ;;  %v1959_v11 = vmul.f32 0.16666667, %v1831_v3 }
  0xf8   : > { %2537 = vst.msk [vmem:[%s3585_s25 + $0x8] sm:$0xf] %vm2534_vm3, %v2990_v0  ;;  %v2991_v10 = vpack.c.bf16 %v1897_v2, %v1897_v2  ;;  %v896_v12 = vadd.f32 %v3189_v40, %v3570_v5  ;;  %2601 = vst.msk [vmem:[%s3585_s25 + $0x108] sm:$0xf] %vm2534_vm3, %v3054_v4  ;;  %v3055_v13 = vpack.c.bf16 %v1961_v7, %v1961_v7 }
  0xf9   : > { %2535 = vst.msk [vmem:[%s3585_s25] sm:$0xf] %vm2534_vm3, %v2988_v6  ;;  %v2989_v14 = vpack.c.bf16 %v1895_v8, %v1895_v8  ;;  %v1152_v15 = vadd.f32 %v3253_v45, %v3570_v5  ;;  %v888_v16 = vadd.f32 %v3570_v5, %v887_v46  ;;  %v3596_v17 = vpop.f32.mrb[8].mxu0  ;;  %2599 = vst.msk [vmem:[%s3585_s25 + $0x100] sm:$0xf] %vm2534_vm3, %v3052_v9  ;;  %v3604_v22 = vpop.f32.mrb[8].mxu1 }
  0xfa   : > { %2538 = vst.msk [vmem:[%s3585_s25 + $0xc] sm:$0xf] %vm2534_vm3, %v2991_v10  ;;  %v3053_v18 = vpack.c.bf16 %v1959_v11, %v1959_v11  ;;  %v1388_v19 = vadd.f32 3.0, %v896_v12  ;;  %v1144_v20 = vadd.f32 %v3570_v5, %v1143_v51  ;;  %v899_v21 = vadd.f32 %v3190_v52, %v3570_v5  ;;  %v3606_v23 = vpop.f32.mrb[9].mxu0  ;;  %2602 = vst.msk [vmem:[%s3585_s25 + $0x10c] sm:$0xf] %vm2534_vm3, %v3055_v13 }
  0xfb   : > { %2536 = vst.msk [vmem:[%s3585_s25 + $0x4] sm:$0xf] %vm2534_vm3, %v2989_v14  ;;  %v1452_v24 = vadd.f32 3.0, %v1152_v15  ;;  %v1386_v25 = vadd.f32 3.0, %v888_v16  ;;  %v1155_v26 = vadd.f32 %v3254_v57, %v3570_v5  ;;  %v891_v27 = vadd.f32 %v3570_v5, %v890_v58  ;;  %v3614_v28 = vpop.f32.mrb[9].mxu1  ;;  %v3616_v29 = vpop.f32.mrb[10].mxu0 }
  0xfc   : > { %2600 = vst.msk [vmem:[%s3585_s25 + $0x104] sm:$0xf] %vm2534_vm3, %v3053_v18  ;;  %v1516_v30 = vmax.f32 %v1388_v19, 0.0  ;;  %v1450_v31 = vadd.f32 3.0, %v1144_v20  ;;  %v1389_v32 = vadd.f32 3.0, %v899_v21  ;;  %v1147_v33 = vadd.f32 %v3570_v5, %v1146_v63  ;;  %v3621_v34 = vpop.f32.mrb[10].mxu1 }
  0xfd   : > { %v3623_v35 = vpop.f32.mrb[11].mxu0  ;;  %v1580_v36 = vmax.f32 %v1452_v24, 0.0  ;;  %v1514_v37 = vmax.f32 %v1386_v25, 0.0  ;;  %v1453_v38 = vadd.f32 3.0, %v1155_v26  ;;  %v1387_v39 = vadd.f32 3.0, %v891_v27  ;;  %v3625_v40 = vpop.f32.mrb[11].mxu1 }
  0xfe   : > { %v1644_v41 = vmin.f32 %v1516_v30, 6.0  ;;  %v1578_v42 = vmax.f32 %v1450_v31, 0.0  ;;  %v1517_v43 = vmax.f32 %v1389_v32, 0.0  ;;  %v1451_v44 = vadd.f32 3.0, %v1147_v33 }
  0xff   : > { %v1708_v45 = vmin.f32 %v1580_v36, 6.0  ;;  %v1642_v46 = vmin.f32 %v1514_v37, 6.0  ;;  %v1581_v47 = vmax.f32 %v1453_v38, 0.0  ;;  %v1515_v48 = vmax.f32 %v1387_v39, 0.0 }
 0x100   : > { %v1772_v49 = vmul.f32 %v1644_v41, %v896_v12  ;;  %v1706_v50 = vmin.f32 %v1578_v42, 6.0  ;;  %v1645_v51 = vmin.f32 %v1517_v43, 6.0  ;;  %v1579_v52 = vmax.f32 %v1451_v44, 0.0 }
 0x101   : > { %v1836_v53 = vmul.f32 %v1708_v45, %v1152_v15  ;;  %v1770_v54 = vmul.f32 %v1642_v46, %v888_v16  ;;  %v1709_v55 = vmin.f32 %v1581_v47, 6.0  ;;  %v1643_v56 = vmin.f32 %v1515_v48, 6.0  ;;  %v3627_v57 = vpop.f32.mrb[12].mxu0  ;;  %v3629_v62 = vpop.f32.mrb[12].mxu1 }
 0x102   : > { %v1900_v58 = vmul.f32 0.16666667, %v1772_v49  ;;  %v1834_v59 = vmul.f32 %v1706_v50, %v1144_v20  ;;  %v1773_v60 = vmul.f32 %v1645_v51, %v899_v21  ;;  %v1707_v61 = vmin.f32 %v1579_v52, 6.0  ;;  %v3631_v63 = vpop.f32.mrb[13].mxu0  ;;  %v3633_v4 = vpop.f32.mrb[13].mxu1 }
 0x103   : > { %v1964_v0 = vmul.f32 0.16666667, %v1836_v53  ;;  %v1898_v1 = vmul.f32 0.16666667, %v1770_v54  ;;  %v1837_v2 = vmul.f32 %v1709_v55, %v1155_v26  ;;  %v1771_v3 = vmul.f32 %v1643_v56, %v891_v27  ;;  %v3635_v6 = vpop.f32.mrb[14].mxu0  ;;  %v3637_v11 = vpop.f32.mrb[14].mxu1 }
 0x104   : > { %v2994_v7 = vpack.c.bf16 %v1900_v58, %v1900_v58  ;;  %v1962_v8 = vmul.f32 0.16666667, %v1834_v59  ;;  %v1901_v9 = vmul.f32 0.16666667, %v1773_v60  ;;  %v1835_v10 = vmul.f32 %v1707_v61, %v1147_v33  ;;  %v3639_v12 = vpop.f32.mrb[15].mxu0  ;;  %v3641_v18 = vpop.f32.mrb[15].mxu1 }
 0x105   : > { %v3058_v13 = vpack.c.bf16 %v1964_v0, %v1964_v0  ;;  %v2992_v14 = vpack.c.bf16 %v1898_v1, %v1898_v1  ;;  %v1965_v15 = vmul.f32 0.16666667, %v1837_v2  ;;  %v1899_v16 = vmul.f32 0.16666667, %v1771_v3 }
 0x106   : > { %2541 = vst.msk [vmem:[%s3585_s25 + $0x18] sm:$0xf] %vm2534_vm3, %v2994_v7  ;;  %v3056_v19 = vpack.c.bf16 %v1962_v8, %v1962_v8  ;;  %v2995_v20 = vpack.c.bf16 %v1901_v9, %v1901_v9  ;;  %v1963_v21 = vmul.f32 0.16666667, %v1835_v10  ;;  %v912_v24 = vadd.f32 %v3596_v17, %v3570_v5 }
 0x107   : > { %2605 = vst.msk [vmem:[%s3585_s25 + $0x118] sm:$0xf] %vm2534_vm3, %v3058_v13  ;;  %2539 = vst.msk [vmem:[%s3585_s25 + $0x10] sm:$0xf] %vm2534_vm3, %v2992_v14  ;;  %v3059_v25 = vpack.c.bf16 %v1965_v15, %v1965_v15  ;;  %v2993_v26 = vpack.c.bf16 %v1899_v16, %v1899_v16  ;;  %v1168_v27 = vadd.f32 %v3604_v22, %v3570_v5 }
 0x108   : > { %v904_v30 = vadd.f32 %v3570_v5, %v3606_v23  ;;  %2603 = vst.msk [vmem:[%s3585_s25 + $0x110] sm:$0xf] %vm2534_vm3, %v3056_v19  ;;  %2542 = vst.msk [vmem:[%s3585_s25 + $0x1c] sm:$0xf] %vm2534_vm3, %v2995_v20  ;;  %v3057_v31 = vpack.c.bf16 %v1963_v21, %v1963_v21  ;;  %v1392_v32 = vadd.f32 3.0, %v912_v24  ;;  %v1160_v17 = vadd.f32 %v3570_v5, %v3614_v28 }
 0x109   : > { %v915_v33 = vadd.f32 %v3616_v29, %v3570_v5  ;;  %2606 = vst.msk [vmem:[%s3585_s25 + $0x11c] sm:$0xf] %vm2534_vm3, %v3059_v25  ;;  %2540 = vst.msk [vmem:[%s3585_s25 + $0x14] sm:$0xf] %vm2534_vm3, %v2993_v26  ;;  %v1456_v22 = vadd.f32 3.0, %v1168_v27  ;;  %v1171_v23 = vadd.f32 %v3621_v34, %v3570_v5  ;;  %v907_v37 = vadd.f32 %v3570_v5, %v3623_v35  ;;  %v3671_v38 = vpop.f32.mrb[16].mxu0 }
 0x10a   : > { %v1390_v36 = vadd.f32 3.0, %v904_v30  ;;  %2604 = vst.msk [vmem:[%s3585_s25 + $0x114] sm:$0xf] %vm2534_vm3, %v3057_v31  ;;  %v1520_v28 = vmax.f32 %v1392_v32, 0.0  ;;  %v1454_v39 = vadd.f32 3.0, %v1160_v17  ;;  %v1163_v29 = vadd.f32 %v3570_v5, %v3625_v40  ;;  %v3677_v42 = vpop.f32.mrb[16].mxu1 }
 0x10b   : > { %v1393_v41 = vadd.f32 3.0, %v915_v33  ;;  %v3679_v43 = vpop.f32.mrb[17].mxu0  ;;  %v1584_v44 = vmax.f32 %v1456_v22, 0.0  ;;  %v1457_v34 = vadd.f32 3.0, %v1171_v23  ;;  %v1391_v46 = vadd.f32 3.0, %v907_v37  ;;  %v3681_v47 = vpop.f32.mrb[17].mxu1 }
 0x10c   : > { %v1518_v45 = vmax.f32 %v1390_v36, 0.0  ;;  %v3683_v35 = vpop.f32.mrb[18].mxu0  ;;  %v1648_v48 = vmin.f32 %v1520_v28, 6.0  ;;  %v1582_v49 = vmax.f32 %v1454_v39, 0.0  ;;  %v1455_v51 = vadd.f32 3.0, %v1163_v29  ;;  %v3685_v52 = vpop.f32.mrb[18].mxu1 }
 0x10d   : > { %v1521_v50 = vmax.f32 %v1393_v41, 0.0  ;;  %v3687_v53 = vpop.f32.mrb[19].mxu0  ;;  %v1712_v40 = vmin.f32 %v1584_v44, 6.0  ;;  %v1585_v55 = vmax.f32 %v1457_v34, 0.0  ;;  %v1519_v56 = vmax.f32 %v1391_v46, 0.0  ;;  %v3689_v58 = vpop.f32.mrb[19].mxu1 }
 0x10e   : > { %v1646_v54 = vmin.f32 %v1518_v45, 6.0  ;;  %v1776_v59 = vmul.f32 %v1648_v48, %v912_v24  ;;  %v1710_v60 = vmin.f32 %v1582_v49, 6.0  ;;  %v1583_v0 = vmax.f32 %v1455_v51, 0.0 }
 0x10f   : > { %v1649_v61 = vmin.f32 %v1521_v50, 6.0  ;;  %v1840_v1 = vmul.f32 %v1712_v40, %v1168_v27  ;;  %v1713_v3 = vmin.f32 %v1585_v55, 6.0  ;;  %v1647_v7 = vmin.f32 %v1519_v56, 6.0 }
 0x110   : > { %v1774_v2 = vmul.f32 %v1646_v54, %v904_v30  ;;  %v1904_v8 = vmul.f32 0.16666667, %v1776_v59  ;;  %v1838_v9 = vmul.f32 %v1710_v60, %v1160_v17  ;;  %v1711_v13 = vmin.f32 %v1583_v0, 6.0 }
 0x111   : > { %v1777_v10 = vmul.f32 %v1649_v61, %v915_v33  ;;  %v1968_v14 = vmul.f32 0.16666667, %v1840_v1  ;;  %v1841_v16 = vmul.f32 %v1713_v3, %v1171_v23  ;;  %v1775_v19 = vmul.f32 %v1647_v7, %v907_v37  ;;  %v3691_v20 = vpop.f32.mrb[20].mxu0  ;;  %v3693_v27 = vpop.f32.mrb[20].mxu1 }
 0x112   : > { %v1902_v15 = vmul.f32 0.16666667, %v1774_v2  ;;  %v2998_v21 = vpack.c.bf16 %v1904_v8, %v1904_v8  ;;  %v1966_v24 = vmul.f32 0.16666667, %v1838_v9  ;;  %v1839_v26 = vmul.f32 %v1711_v13, %v1163_v29  ;;  %v3695_v30 = vpop.f32.mrb[21].mxu0  ;;  %v3697_v22 = vpop.f32.mrb[21].mxu1 }
 0x113   : > { %v1905_v25 = vmul.f32 0.16666667, %v1777_v10  ;;  %v3062_v31 = vpack.c.bf16 %v1968_v14, %v1968_v14  ;;  %v1969_v17 = vmul.f32 0.16666667, %v1841_v16  ;;  %v1903_v33 = vmul.f32 0.16666667, %v1775_v19 }
 0x114   : > { %v2996_v32 = vpack.c.bf16 %v1902_v15, %v1902_v15  ;;  %v3699_v36 = vpop.f32.mrb[22].mxu0  ;;  %2545 = vst.msk [vmem:[%s3585_s25 + $0x28] sm:$0xf] %vm2534_vm3, %v2998_v21  ;;  %v3060_v23 = vpack.c.bf16 %v1966_v24, %v1966_v24  ;;  %v1967_v28 = vmul.f32 0.16666667, %v1839_v26  ;;  %v928_v39 = vadd.f32 %v3627_v57, %v3570_v5  ;;  %v3705_v41 = vpop.f32.mrb[22].mxu1 }
 0x115   : > { %v2999_v37 = vpack.c.bf16 %v1905_v25, %v1905_v25  ;;  %v3707_v29 = vpop.f32.mrb[23].mxu0  ;;  %2609 = vst.msk [vmem:[%s3585_s25 + $0x128] sm:$0xf] %vm2534_vm3, %v3062_v31  ;;  %v3063_v44 = vpack.c.bf16 %v1969_v17, %v1969_v17  ;;  %v2997_v45 = vpack.c.bf16 %v1903_v33, %v1903_v33  ;;  %v1184_v34 = vadd.f32 %v3629_v62, %v3570_v5  ;;  %v3717_v57 = vpop.f32.mrb[23].mxu1 }
 0x116   : > { %2543 = vst.msk [vmem:[%s3585_s25 + $0x20] sm:$0xf] %vm2534_vm3, %v2996_v32  ;;  %v920_v46 = vadd.f32 %v3570_v5, %v3631_v63  ;;  %2607 = vst.msk [vmem:[%s3585_s25 + $0x120] sm:$0xf] %vm2534_vm3, %v3060_v23  ;;  %v3061_v48 = vpack.c.bf16 %v1967_v28, %v1967_v28  ;;  %v1396_v49 = vadd.f32 3.0, %v928_v39  ;;  %v1176_v50 = vadd.f32 %v3570_v5, %v3633_v4 }
 0x117   : > { %2546 = vst.msk [vmem:[%s3585_s25 + $0x2c] sm:$0xf] %vm2534_vm3, %v2999_v37  ;;  %v931_v51 = vadd.f32 %v3635_v6, %v3570_v5  ;;  %2610 = vst.msk [vmem:[%s3585_s25 + $0x12c] sm:$0xf] %vm2534_vm3, %v3063_v44  ;;  %v1460_v62 = vadd.f32 3.0, %v1184_v34  ;;  %v1187_v40 = vadd.f32 %v3637_v11, %v3570_v5  ;;  %v923_v54 = vadd.f32 %v3570_v5, %v3639_v12 }
 0x118   : > { %2544 = vst.msk [vmem:[%s3585_s25 + $0x24] sm:$0xf] %vm2534_vm3, %v2997_v45  ;;  %v1394_v63 = vadd.f32 3.0, %v920_v46  ;;  %2608 = vst.msk [vmem:[%s3585_s25 + $0x124] sm:$0xf] %vm2534_vm3, %v3061_v48  ;;  %v1524_v55 = vmax.f32 %v1396_v49, 0.0  ;;  %v1179_v6 = vadd.f32 %v3570_v5, %v3641_v18 }
 0x119   : > { %v1458_v56 = vadd.f32 3.0, %v1176_v50  ;;  %v1397_v4 = vadd.f32 3.0, %v931_v51  ;;  %v1588_v59 = vmax.f32 %v1460_v62, 0.0  ;;  %v1461_v61 = vadd.f32 3.0, %v1187_v40  ;;  %v3739_v1 = vpop.f32.mrb[24].mxu0  ;;  %v3741_v8 = vpop.f32.mrb[24].mxu1 }
 0x11a   : > { %v1522_v60 = vmax.f32 %v1394_v63, 0.0  ;;  %v1395_v0 = vadd.f32 3.0, %v923_v54  ;;  %v1652_v2 = vmin.f32 %v1524_v55, 6.0  ;;  %v1459_v7 = vadd.f32 3.0, %v1179_v6  ;;  %v3743_v12 = vpop.f32.mrb[25].mxu0  ;;  %v3745_v15 = vpop.f32.mrb[25].mxu1 }
 0x11b   : > { %v1586_v3 = vmax.f32 %v1458_v56, 0.0  ;;  %v1525_v11 = vmax.f32 %v1397_v4, 0.0  ;;  %v1716_v9 = vmin.f32 %v1588_v59, 6.0  ;;  %v1589_v13 = vmax.f32 %v1461_v61, 0.0  ;;  %v3747_v18 = vpop.f32.mrb[26].mxu0  ;;  %v3749_v25 = vpop.f32.mrb[26].mxu1 }
 0x11c   : > { %v1650_v10 = vmin.f32 %v1522_v60, 6.0  ;;  %v1523_v14 = vmax.f32 %v1395_v0, 0.0  ;;  %v1780_v16 = vmul.f32 %v1652_v2, %v928_v39  ;;  %v1587_v24 = vmax.f32 %v1459_v7, 0.0  ;;  %v3751_v26 = vpop.f32.mrb[27].mxu0  ;;  %v3753_v23 = vpop.f32.mrb[27].mxu1 }
 0x11d   : > { %v1714_v19 = vmin.f32 %v1586_v3, 6.0  ;;  %v1653_v21 = vmin.f32 %v1525_v11, 6.0  ;;  %v1844_v31 = vmul.f32 %v1716_v9, %v1184_v34  ;;  %v1717_v17 = vmin.f32 %v1589_v13, 6.0 }
 0x11e   : > { %v1778_v32 = vmul.f32 %v1650_v10, %v920_v46  ;;  %v1651_v33 = vmin.f32 %v1523_v14, 6.0  ;;  %v1908_v37 = vmul.f32 0.16666667, %v1780_v16  ;;  %v1715_v45 = vmin.f32 %v1587_v24, 6.0 }
 0x11f   : > { %v1842_v28 = vmul.f32 %v1714_v19, %v1176_v50  ;;  %v1781_v44 = vmul.f32 %v1653_v21, %v931_v51  ;;  %v1972_v48 = vmul.f32 0.16666667, %v1844_v31  ;;  %v1845_v49 = vmul.f32 %v1717_v17, %v1187_v40 }
 0x120   : > { %v1906_v39 = vmul.f32 0.16666667, %v1778_v32  ;;  %v1779_v62 = vmul.f32 %v1651_v33, %v923_v54  ;;  %v3002_v63 = vpack.c.bf16 %v1908_v37, %v1908_v37  ;;  %v1843_v34 = vmul.f32 %v1715_v45, %v1179_v6 }
 0x121   : > { %v1970_v55 = vmul.f32 0.16666667, %v1842_v28  ;;  %v1909_v56 = vmul.f32 0.16666667, %v1781_v44  ;;  %v3066_v46 = vpack.c.bf16 %v1972_v48, %v1972_v48  ;;  %v1973_v59 = vmul.f32 0.16666667, %v1845_v49 }
 0x122   : > { %v3000_v4 = vpack.c.bf16 %v1906_v39, %v1906_v39  ;;  %v1907_v60 = vmul.f32 0.16666667, %v1779_v62  ;;  %v3755_v61 = vpop.f32.mrb[28].mxu0  ;;  %2549 = vst.msk [vmem:[%s3585_s25 + $0x38] sm:$0xf] %vm2534_vm3, %v3002_v63  ;;  %v944_v54 = vadd.f32 %v3671_v38, %v3570_v5  ;;  %v3761_v0 = vpop.f32.mrb[28].mxu1  ;;  %v1200_v11 = vadd.f32 %v3677_v42, %v3570_v5 }
 0x123   : > { %v3064_v50 = vpack.c.bf16 %v1970_v55, %v1970_v55  ;;  %v3003_v51 = vpack.c.bf16 %v1909_v56, %v1909_v56  ;;  %v1971_v40 = vmul.f32 0.16666667, %v1843_v34  ;;  %v3763_v2 = vpop.f32.mrb[29].mxu0  ;;  %2613 = vst.msk [vmem:[%s3585_s25 + $0x138] sm:$0xf] %vm2534_vm3, %v3066_v46  ;;  %v3067_v6 = vpack.c.bf16 %v1973_v59, %v1973_v59  ;;  %v3773_v9 = vpop.f32.mrb[29].mxu1 }
 0x124   : > { %2547 = vst.msk [vmem:[%s3585_s25 + $0x30] sm:$0xf] %vm2534_vm3, %v3000_v4  ;;  %v3001_v3 = vpack.c.bf16 %v1907_v60, %v1907_v60  ;;  %v936_v7 = vadd.f32 %v3570_v5, %v3679_v43  ;;  %v3775_v38 = vpop.f32.mrb[30].mxu0  ;;  %v1400_v13 = vadd.f32 3.0, %v944_v54  ;;  %v1192_v14 = vadd.f32 %v3570_v5, %v3681_v47  ;;  %v3785_v16 = vpop.f32.mrb[30].mxu1 }
 0x125   : > { %2611 = vst.msk [vmem:[%s3585_s25 + $0x130] sm:$0xf] %vm2534_vm3, %v3064_v50  ;;  %2550 = vst.msk [vmem:[%s3585_s25 + $0x3c] sm:$0xf] %vm2534_vm3, %v3003_v51  ;;  %v3065_v10 = vpack.c.bf16 %v1971_v40, %v1971_v40  ;;  %v947_v42 = vadd.f32 %v3683_v35, %v3570_v5  ;;  %v3787_v43 = vpop.f32.mrb[31].mxu0  ;;  %v1464_v19 = vadd.f32 3.0, %v1200_v11  ;;  %v1203_v24 = vadd.f32 %v3685_v52, %v3570_v5 }
 0x126   : > { %2614 = vst.msk [vmem:[%s3585_s25 + $0x13c] sm:$0xf] %vm2534_vm3, %v3067_v6  ;;  %2548 = vst.msk [vmem:[%s3585_s25 + $0x34] sm:$0xf] %vm2534_vm3, %v3001_v3  ;;  %v1398_v21 = vadd.f32 3.0, %v936_v7  ;;  %v939_v31 = vadd.f32 %v3570_v5, %v3687_v53  ;;  %v3797_v47 = vpop.f32.mrb[31].mxu1  ;;  %v1195_v33 = vadd.f32 %v3570_v5, %v3689_v58 }
 0x127   : > { %2612 = vst.msk [vmem:[%s3585_s25 + $0x134] sm:$0xf] %vm2534_vm3, %v3065_v10  ;;  %v1528_v35 = vmax.f32 %v1400_v13, 0.0  ;;  %v1462_v32 = vadd.f32 3.0, %v1192_v14  ;;  %v1401_v17 = vadd.f32 3.0, %v947_v42  ;;  %v1592_v37 = vmax.f32 %v1464_v19, 0.0 }
 0x128   : > { %v1526_v28 = vmax.f32 %v1398_v21, 0.0  ;;  %v1465_v44 = vadd.f32 3.0, %v1203_v24  ;;  %v1399_v45 = vadd.f32 3.0, %v939_v31  ;;  %v1463_v49 = vadd.f32 3.0, %v1195_v33 }
 0x129   : > { %v1656_v48 = vmin.f32 %v1528_v35, 6.0  ;;  %v1590_v39 = vmax.f32 %v1462_v32, 0.0  ;;  %v1529_v52 = vmax.f32 %v1401_v17, 0.0  ;;  %v1720_v62 = vmin.f32 %v1592_v37, 6.0  ;;  %v3803_v56 = vpop.f32.mrb[32].mxu0  ;;  %v3805_v60 = vpop.f32.mrb[32].mxu1 }
 0x12a   : > { %v1654_v53 = vmin.f32 %v1526_v28, 6.0  ;;  %v1593_v63 = vmax.f32 %v1465_v44, 0.0  ;;  %v1527_v55 = vmax.f32 %v1399_v45, 0.0  ;;  %v1591_v59 = vmax.f32 %v1463_v49, 0.0  ;;  %v3807_v58 = vpop.f32.mrb[33].mxu0  ;;  %v3809_v3 = vpop.f32.mrb[33].mxu1 }
 0x12b   : > { %v1784_v34 = vmul.f32 %v1656_v48, %v944_v54  ;;  %v1718_v46 = vmin.f32 %v1590_v39, 6.0  ;;  %v1657_v4 = vmin.f32 %v1529_v52, 6.0  ;;  %v1848_v50 = vmul.f32 %v1720_v62, %v1200_v11  ;;  %v3811_v10 = vpop.f32.mrb[34].mxu0  ;;  %v3813_v54 = vpop.f32.mrb[34].mxu1 }
 0x12c   : > { %v1782_v51 = vmul.f32 %v1654_v53, %v936_v7  ;;  %v1721_v40 = vmin.f32 %v1593_v63, 6.0  ;;  %v1655_v6 = vmin.f32 %v1527_v55, 6.0  ;;  %v1719_v35 = vmin.f32 %v1591_v59, 6.0  ;;  %v3815_v32 = vpop.f32.mrb[35].mxu0  ;;  %v3817_v7 = vpop.f32.mrb[35].mxu1 }
 0x12d   : > { %v1912_v13 = vmul.f32 0.16666667, %v1784_v34  ;;  %v1846_v19 = vmul.f32 %v1718_v46, %v1192_v14  ;;  %v1785_v21 = vmul.f32 %v1657_v4, %v947_v42  ;;  %v1976_v17 = vmul.f32 0.16666667, %v1848_v50 }
 0x12e   : > { %v1910_v37 = vmul.f32 0.16666667, %v1782_v51  ;;  %v1849_v28 = vmul.f32 %v1721_v40, %v1203_v24  ;;  %v1783_v11 = vmul.f32 %v1655_v6, %v939_v31  ;;  %v1847_v39 = vmul.f32 %v1719_v35, %v1195_v33 }
 0x12f   : > { %v3006_v44 = vpack.c.bf16 %v1912_v13, %v1912_v13  ;;  %v1974_v45 = vmul.f32 0.16666667, %v1846_v19  ;;  %v1913_v48 = vmul.f32 0.16666667, %v1785_v21  ;;  %v3070_v14 = vpack.c.bf16 %v1976_v17, %v1976_v17 }
 0x130   : > { %v3004_v42 = vpack.c.bf16 %v1910_v37, %v1910_v37  ;;  %v1977_v52 = vmul.f32 0.16666667, %v1849_v28  ;;  %v1911_v49 = vmul.f32 0.16666667, %v1783_v11  ;;  %v1975_v24 = vmul.f32 0.16666667, %v1847_v39 }
 0x131   : > { %2553 = vst.msk [vmem:[%s3585_s25 + $0x48] sm:$0xf] %vm2534_vm3, %v3006_v44  ;;  %v3068_v62 = vpack.c.bf16 %v1974_v45, %v1974_v45  ;;  %v3007_v53 = vpack.c.bf16 %v1913_v48, %v1913_v48  ;;  %v960_v31 = vadd.f32 %v3691_v20, %v3570_v5  ;;  %2617 = vst.msk [vmem:[%s3585_s25 + $0x148] sm:$0xf] %vm2534_vm3, %v3070_v14  ;;  %v3831_v46 = vpop.f32.mrb[36].mxu0  ;;  %v3841_v51 = vpop.f32.mrb[36].mxu1 }
 0x132   : > { %2551 = vst.msk [vmem:[%s3585_s25 + $0x40] sm:$0xf] %vm2534_vm3, %v3004_v42  ;;  %v3071_v33 = vpack.c.bf16 %v1977_v52, %v1977_v52  ;;  %v3005_v63 = vpack.c.bf16 %v1911_v49, %v1911_v49  ;;  %v1216_v55 = vadd.f32 %v3693_v27, %v3570_v5  ;;  %v952_v34 = vadd.f32 %v3570_v5, %v3695_v30  ;;  %v3843_v27 = vpop.f32.mrb[37].mxu0 }
 0x133   : > { %2615 = vst.msk [vmem:[%s3585_s25 + $0x140] sm:$0xf] %vm2534_vm3, %v3068_v62  ;;  %2554 = vst.msk [vmem:[%s3585_s25 + $0x4c] sm:$0xf] %vm2534_vm3, %v3007_v53  ;;  %v3069_v20 = vpack.c.bf16 %v1975_v24, %v1975_v24  ;;  %v1404_v4 = vadd.f32 3.0, %v960_v31  ;;  %v1208_v59 = vadd.f32 %v3570_v5, %v3697_v22  ;;  %v963_v50 = vadd.f32 %v3699_v36, %v3570_v5  ;;  %v3853_v22 = vpop.f32.mrb[37].mxu1 }
 0x134   : > { %2618 = vst.msk [vmem:[%s3585_s25 + $0x14c] sm:$0xf] %vm2534_vm3, %v3071_v33  ;;  %2552 = vst.msk [vmem:[%s3585_s25 + $0x44] sm:$0xf] %vm2534_vm3, %v3005_v63  ;;  %v1468_v30 = vadd.f32 3.0, %v1216_v55  ;;  %v1402_v40 = vadd.f32 3.0, %v952_v34  ;;  %v1219_v6 = vadd.f32 %v3705_v41, %v3570_v5  ;;  %v955_v13 = vadd.f32 %v3570_v5, %v3707_v29 }
 0x135   : > { %v3855_v19 = vpop.f32.mrb[38].mxu0  ;;  %2616 = vst.msk [vmem:[%s3585_s25 + $0x144] sm:$0xf] %vm2534_vm3, %v3069_v20  ;;  %v1532_v36 = vmax.f32 %v1404_v4, 0.0  ;;  %v1466_v21 = vadd.f32 3.0, %v1208_v59  ;;  %v1405_v35 = vadd.f32 3.0, %v963_v50  ;;  %v1211_v17 = vadd.f32 %v3570_v5, %v3717_v57 }
 0x136   : > { %v3861_v37 = vpop.f32.mrb[38].mxu1  ;;  %v3863_v28 = vpop.f32.mrb[39].mxu0  ;;  %v1596_v41 = vmax.f32 %v1468_v30, 0.0  ;;  %v1530_v11 = vmax.f32 %v1402_v40, 0.0  ;;  %v1469_v44 = vadd.f32 3.0, %v1219_v6  ;;  %v1403_v29 = vadd.f32 3.0, %v955_v13 }
 0x137   : > { %4306 = vst [vmem:[#allocation2_spill] sm:$0xff] %v3861_v37  ;;  %4307 = vst [vmem:[#allocation3_spill] sm:$0xff] %v3863_v28  ;;  %v3865_v45 = vpop.f32.mrb[39].mxu1  ;;  %v1660_v48 = vmin.f32 %v1532_v36, 6.0  ;;  %v1594_v39 = vmax.f32 %v1466_v21, 0.0  ;;  %v1533_v14 = vmax.f32 %v1405_v35, 0.0 }
 0x138   : > { %4308 = vst [vmem:[#allocation4_spill] sm:$0xff] %v3865_v45  ;;  %v1467_v42 = vadd.f32 3.0, %v1211_v17  ;;  %v1724_v52 = vmin.f32 %v1596_v41, 6.0  ;;  %v1658_v49 = vmin.f32 %v1530_v11, 6.0  ;;  %v1597_v62 = vmax.f32 %v1469_v44, 0.0 }
 0x139   : > { %v1531_v53 = vmax.f32 %v1403_v29, 0.0  ;;  %v1788_v24 = vmul.f32 %v1660_v48, %v960_v31  ;;  %v1722_v57 = vmin.f32 %v1594_v39, 6.0  ;;  %v1661_v33 = vmin.f32 %v1533_v14, 6.0  ;;  %v3867_v28 = vpop.f32.mrb[40].mxu0  ;;  %v3869_v35 = vpop.f32.mrb[40].mxu1 }
 0x13a   : > { %v1595_v63 = vmax.f32 %v1467_v42, 0.0  ;;  %v1852_v20 = vmul.f32 %v1724_v52, %v1216_v55  ;;  %v1786_v4 = vmul.f32 %v1658_v49, %v952_v34  ;;  %v1725_v30 = vmin.f32 %v1597_v62, 6.0  ;;  %v3871_v41 = vpop.f32.mrb[41].mxu0  ;;  %v3873_v48 = vpop.f32.mrb[41].mxu1 }
 0x13b   : > { %v1659_v40 = vmin.f32 %v1531_v53, 6.0  ;;  %v1916_v37 = vmul.f32 0.16666667, %v1788_v24  ;;  %v1850_v45 = vmul.f32 %v1722_v57, %v1208_v59  ;;  %v1789_v36 = vmul.f32 %v1661_v33, %v963_v50  ;;  %v3875_v55 = vpop.f32.mrb[42].mxu0  ;;  %v3877_v14 = vpop.f32.mrb[42].mxu1 }
 0x13c   : > { %v1723_v21 = vmin.f32 %v1595_v63, 6.0  ;;  %v1980_v11 = vmul.f32 0.16666667, %v1852_v20  ;;  %v1914_v44 = vmul.f32 0.16666667, %v1786_v4  ;;  %v1853_v31 = vmul.f32 %v1725_v30, %v1219_v6  ;;  %v3879_v42 = vpop.f32.mrb[43].mxu0 }
 0x13d   : > { %v1787_v29 = vmul.f32 %v1659_v40, %v955_v13  ;;  %v3010_v34 = vpack.c.bf16 %v1916_v37, %v1916_v37  ;;  %v1978_v39 = vmul.f32 0.16666667, %v1850_v45  ;;  %v1917_v59 = vmul.f32 0.16666667, %v1789_v36  ;;  %v3881_v62 = vpop.f32.mrb[43].mxu1 }
 0x13e   : > { %v1851_v50 = vmul.f32 %v1723_v21, %v1211_v17  ;;  %v3074_v52 = vpack.c.bf16 %v1980_v11, %v1980_v11  ;;  %v3008_v49 = vpack.c.bf16 %v1914_v44, %v1914_v44  ;;  %v1981_v6 = vmul.f32 0.16666667, %v1853_v31 }
 0x13f   : > { %v1915_v13 = vmul.f32 0.16666667, %v1787_v29  ;;  %2557 = vst.msk [vmem:[%s3585_s25 + $0x58] sm:$0xf] %vm2534_vm3, %v3010_v34  ;;  %v3072_v37 = vpack.c.bf16 %v1978_v39, %v1978_v39  ;;  %v3011_v45 = vpack.c.bf16 %v1917_v59, %v1917_v59  ;;  %v976_v17 = vadd.f32 %v3739_v1, %v3570_v5 }
 0x140   : > { %v1979_v53 = vmul.f32 0.16666667, %v1851_v50  ;;  %2621 = vst.msk [vmem:[%s3585_s25 + $0x158] sm:$0xf] %vm2534_vm3, %v3074_v52  ;;  %2555 = vst.msk [vmem:[%s3585_s25 + $0x50] sm:$0xf] %vm2534_vm3, %v3008_v49  ;;  %v3075_v24 = vpack.c.bf16 %v1981_v6, %v1981_v6  ;;  %v1232_v33 = vadd.f32 %v3741_v8, %v3570_v5  ;;  %v968_v63 = vadd.f32 %v3570_v5, %v3743_v12 }
 0x141   : > { %v3009_v57 = vpack.c.bf16 %v1915_v13, %v1915_v13  ;;  %2619 = vst.msk [vmem:[%s3585_s25 + $0x150] sm:$0xf] %vm2534_vm3, %v3072_v37  ;;  %2558 = vst.msk [vmem:[%s3585_s25 + $0x5c] sm:$0xf] %vm2534_vm3, %v3011_v45  ;;  %v1408_v4 = vadd.f32 3.0, %v976_v17  ;;  %v1224_v1 = vadd.f32 %v3570_v5, %v3745_v15  ;;  %v979_v30 = vadd.f32 %v3747_v18, %v3570_v5  ;;  %v3911_v21 = vpop.f32.mrb[44].mxu0 }
 0x142   : > { %v3073_v20 = vpack.c.bf16 %v1979_v53, %v1979_v53  ;;  %2622 = vst.msk [vmem:[%s3585_s25 + $0x15c] sm:$0xf] %vm2534_vm3, %v3075_v24  ;;  %v1472_v8 = vadd.f32 3.0, %v1232_v33  ;;  %v1406_v40 = vadd.f32 3.0, %v968_v63  ;;  %v1235_v12 = vadd.f32 %v3749_v25, %v3570_v5  ;;  %4309 = vst [vmem:[#allocation5_spill] sm:$0xff] %v3911_v21  ;;  %v3917_v31 = vpop.f32.mrb[44].mxu1 }
 0x143   : > { %2556 = vst.msk [vmem:[%s3585_s25 + $0x54] sm:$0xf] %vm2534_vm3, %v3009_v57  ;;  %v971_v36 = vadd.f32 %v3570_v5, %v3751_v26  ;;  %v1536_v15 = vmax.f32 %v1408_v4, 0.0  ;;  %v1470_v11 = vadd.f32 3.0, %v1224_v1  ;;  %v1409_v44 = vadd.f32 3.0, %v979_v30  ;;  %4310 = vst [vmem:[#allocation6_spill] sm:$0xff] %v3917_v31 }
 0x144   : > { %2620 = vst.msk [vmem:[%s3585_s25 + $0x154] sm:$0xf] %vm2534_vm3, %v3073_v20  ;;  %v1227_v18 = vadd.f32 %v3570_v5, %v3753_v23  ;;  %v3919_v29 = vpop.f32.mrb[45].mxu0  ;;  %v1600_v34 = vmax.f32 %v1472_v8, 0.0  ;;  %v1534_v39 = vmax.f32 %v1406_v40, 0.0  ;;  %v1473_v25 = vadd.f32 3.0, %v1235_v12 }
 0x145   : > { %4311 = vst [vmem:[#allocation7_spill] sm:$0xff] %v3919_v29  ;;  %v1407_v59 = vadd.f32 3.0, %v971_v36  ;;  %v3921_v50 = vpop.f32.mrb[45].mxu1  ;;  %v3923_v26 = vpop.f32.mrb[46].mxu0  ;;  %v1664_v52 = vmin.f32 %v1536_v15, 6.0  ;;  %v1598_v49 = vmax.f32 %v1470_v11, 0.0 }
 0x146   : > { %4312 = vst [vmem:[#allocation8_spill] sm:$0xff] %v3921_v50  ;;  %4313 = vst [vmem:[#allocation9_spill] sm:$0xff] %v3923_v26  ;;  %v1537_v6 = vmax.f32 %v1409_v44, 0.0  ;;  %v1471_v13 = vadd.f32 3.0, %v1227_v18  ;;  %v3925_v37 = vpop.f32.mrb[46].mxu1  ;;  %v3927_v45 = vpop.f32.mrb[47].mxu0 }
 0x147   : > { %4314 = vst [vmem:[#allocation10_spill] sm:$0xff] %v3925_v37  ;;  %4315 = vst [vmem:[#allocation11_spill] sm:$0xff] %v3927_v45  ;;  %v1728_v5 = vmin.f32 %v1600_v34, 6.0  ;;  %v1662_v23 = vmin.f32 %v1534_v39, 6.0  ;;  %v1601_v53 = vmax.f32 %v1473_v25, 0.0  ;;  %v1535_v24 = vmax.f32 %v1407_v59, 0.0 }
 0x148   : > { %v3929_v57 = vpop.f32.mrb[47].mxu1  ;;  %v1792_v20 = vmul.f32 %v1664_v52, %v976_v17  ;;  %v1726_v4 = vmin.f32 %v1598_v49, 6.0  ;;  %v1665_v8 = vmin.f32 %v1537_v6, 6.0  ;;  %v1599_v40 = vmax.f32 %v1471_v13, 0.0 }
 0x149   : > { %v1856_v50 = vmul.f32 %v1728_v5, %v1232_v33  ;;  %v1790_v26 = vmul.f32 %v1662_v23, %v968_v63  ;;  %v1729_v15 = vmin.f32 %v1601_v53, 6.0  ;;  %v1663_v11 = vmin.f32 %v1535_v24, 6.0  ;;  %v3931_v25 = vpop.f32.mrb[48].mxu0  ;;  %v3933_v6 = vpop.f32.mrb[48].mxu1 }
 0x14a   : > { %v1920_v44 = vmul.f32 0.16666667, %v1792_v20  ;;  %v1854_v29 = vmul.f32 %v1726_v4, %v1224_v1  ;;  %v1793_v31 = vmul.f32 %v1665_v8, %v979_v30  ;;  %v1727_v37 = vmin.f32 %v1599_v40, 6.0  ;;  %v3935_v33 = vpop.f32.mrb[49].mxu0 }
 0x14b   : > { %v1984_v21 = vmul.f32 0.16666667, %v1856_v50  ;;  %v1918_v45 = vmul.f32 0.16666667, %v1790_v26  ;;  %v1857_v34 = vmul.f32 %v1729_v15, %v1235_v12  ;;  %v1791_v39 = vmul.f32 %v1663_v11, %v971_v36  ;;  %v3937_v26 = vpop.f32.mrb[49].mxu1  ;;  %v3939_v12 = vpop.f32.mrb[50].mxu0 }
 0x14c   : > { %v3014_v59 = vpack.c.bf16 %v1920_v44, %v1920_v44  ;;  %v1982_v17 = vmul.f32 0.16666667, %v1854_v29  ;;  %v1921_v52 = vmul.f32 0.16666667, %v1793_v31  ;;  %v1855_v49 = vmul.f32 %v1727_v37, %v1227_v18  ;;  %v3946_v29 = vld [vmem:[%s4304_s2] ss:$0 sm:$0xff] }
 0x14d   : > { %v3078_v63 = vpack.c.bf16 %v1984_v21, %v1984_v21  ;;  %v3012_v1 = vpack.c.bf16 %v1918_v45, %v1918_v45  ;;  %v1985_v30 = vmul.f32 0.16666667, %v1857_v34  ;;  %v1919_v50 = vmul.f32 0.16666667, %v1791_v39  ;;  %v3950_v13 = vpop.f32.mrb[50].mxu1  ;;  %v3952_v37 = vpop.f32.mrb[51].mxu0 }
 0x14e   : > { %2561 = vst.msk [vmem:[%s3585_s25 + $0x68] sm:$0xf] %vm2534_vm3, %v3014_v59  ;;  %v3076_v36 = vpack.c.bf16 %v1982_v17, %v1982_v17  ;;  %v3015_v18 = vpack.c.bf16 %v1921_v52, %v1921_v52  ;;  %v1983_v31 = vmul.f32 0.16666667, %v1855_v49  ;;  %v992_v21 = vadd.f32 %v3946_v29, %v3755_v61  ;;  %v3962_v61 = vpop.f32.mrb[51].mxu1 }
 0x14f   : > { %2625 = vst.msk [vmem:[%s3585_s25 + $0x168] sm:$0xf] %vm2534_vm3, %v3078_v63  ;;  %2559 = vst.msk [vmem:[%s3585_s25 + $0x60] sm:$0xf] %vm2534_vm3, %v3012_v1  ;;  %v3079_v45 = vpack.c.bf16 %v1985_v30, %v1985_v30  ;;  %v3013_v5 = vpack.c.bf16 %v1919_v50, %v1919_v50  ;;  %v1248_v23 = vadd.f32 %v3946_v29, %v3761_v0 }
 0x150   : > { %v984_v53 = vadd.f32 %v3946_v29, %v3763_v2  ;;  %2623 = vst.msk [vmem:[%s3585_s25 + $0x160] sm:$0xf] %vm2534_vm3, %v3076_v36  ;;  %2562 = vst.msk [vmem:[%s3585_s25 + $0x6c] sm:$0xf] %vm2534_vm3, %v3015_v18  ;;  %v3077_v24 = vpack.c.bf16 %v1983_v31, %v1983_v31  ;;  %v1412_v20 = vadd.f32 3.0, %v992_v21  ;;  %v1240_v4 = vadd.f32 %v3946_v29, %v3773_v9 }
 0x151   : > { %v995_v8 = vadd.f32 %v3946_v29, %v3775_v38  ;;  %2626 = vst.msk [vmem:[%s3585_s25 + $0x16c] sm:$0xf] %vm2534_vm3, %v3079_v45  ;;  %2560 = vst.msk [vmem:[%s3585_s25 + $0x64] sm:$0xf] %vm2534_vm3, %v3013_v5  ;;  %v1476_v0 = vadd.f32 3.0, %v1248_v23  ;;  %v1251_v40 = vadd.f32 %v3946_v29, %v3785_v16  ;;  %v987_v15 = vadd.f32 %v3946_v29, %v3787_v43  ;;  %v3984_v52 = vpop.f32.mrb[52].mxu0 }
 0x152   : > { %v1410_v2 = vadd.f32 3.0, %v984_v53  ;;  %2624 = vst.msk [vmem:[%s3585_s25 + $0x164] sm:$0xf] %vm2534_vm3, %v3077_v24  ;;  %v1540_v11 = vmax.f32 %v1412_v20, 0.0  ;;  %v1474_v44 = vadd.f32 3.0, %v1240_v4  ;;  %v1243_v38 = vadd.f32 %v3946_v29, %v3797_v47  ;;  %v3986_v30 = vpop.f32.mrb[52].mxu1 }
 0x153   : > { %v1413_v9 = vadd.f32 3.0, %v995_v8  ;;  %v1604_v34 = vmax.f32 %v1476_v0, 0.0  ;;  %v1477_v59 = vadd.f32 3.0, %v1251_v40  ;;  %v1411_v17 = vadd.f32 3.0, %v987_v15  ;;  %4316 = vst [vmem:[#allocation12_spill] sm:$0xff] %v3986_v30  ;;  %v3988_v43 = vpop.f32.mrb[53].mxu0 }
 0x154   : > { %v1538_v39 = vmax.f32 %v1410_v2, 0.0  ;;  %v1668_v49 = vmin.f32 %v1540_v11, 6.0  ;;  %v1602_v63 = vmax.f32 %v1474_v44, 0.0  ;;  %v1475_v1 = vadd.f32 3.0, %v1243_v38  ;;  %4317 = vst [vmem:[#allocation13_spill] sm:$0xff] %v3988_v43  ;;  %v3990_v45 = vpop.f32.mrb[53].mxu1 }
 0x155   : > { %v1541_v16 = vmax.f32 %v1413_v9, 0.0  ;;  %v1732_v50 = vmin.f32 %v1604_v34, 6.0  ;;  %v1605_v18 = vmax.f32 %v1477_v59, 0.0  ;;  %v1539_v31 = vmax.f32 %v1411_v17, 0.0  ;;  %4318 = vst [vmem:[#allocation14_spill] sm:$0xff] %v3990_v45  ;;  %v3992_v47 = vpop.f32.mrb[54].mxu0 }
 0x156   : > { %v1666_v36 = vmin.f32 %v1538_v39, 6.0  ;;  %4319 = vst [vmem:[#allocation15_spill] sm:$0xff] %v3992_v47  ;;  %v1796_v5 = vmul.f32 %v1668_v49, %v992_v21  ;;  %v1730_v24 = vmin.f32 %v1602_v63, 6.0  ;;  %v1603_v0 = vmax.f32 %v1475_v1, 0.0  ;;  %v3994_v2 = vpop.f32.mrb[54].mxu1  ;;  %v3996_v11 = vpop.f32.mrb[55].mxu0 }
 0x157   : > { %v1669_v20 = vmin.f32 %v1541_v16, 6.0  ;;  %4320 = vst [vmem:[#allocation16_spill] sm:$0xff] %v3996_v11  ;;  %v1860_v44 = vmul.f32 %v1732_v50, %v1248_v23  ;;  %v1733_v30 = vmin.f32 %v1605_v18, 6.0  ;;  %v1667_v43 = vmin.f32 %v1539_v31, 6.0  ;;  %v3998_v34 = vpop.f32.mrb[55].mxu1 }
 0x158   : > { %v1794_v9 = vmul.f32 %v1666_v36, %v984_v53  ;;  %v1924_v39 = vmul.f32 0.16666667, %v1796_v5  ;;  %v1858_v59 = vmul.f32 %v1730_v24, %v1240_v4  ;;  %v1731_v45 = vmin.f32 %v1603_v0, 6.0 }
 0x159   : > { %v1797_v17 = vmul.f32 %v1669_v20, %v995_v8  ;;  %v1988_v47 = vmul.f32 0.16666667, %v1860_v44  ;;  %v1861_v49 = vmul.f32 %v1733_v30, %v1251_v40  ;;  %v1795_v63 = vmul.f32 %v1667_v43, %v987_v15  ;;  %v4000_v31 = vpop.f32.mrb[56].mxu0  ;;  %v4006_v30 = vpop.f32.mrb[56].mxu1 }
 0x15a   : > { %v1922_v21 = vmul.f32 0.16666667, %v1794_v9  ;;  %v3018_v16 = vpack.c.bf16 %v1924_v39, %v1924_v39  ;;  %v1986_v1 = vmul.f32 0.16666667, %v1858_v59  ;;  %v1859_v23 = vmul.f32 %v1731_v45, %v1243_v38  ;;  %v4008_v43 = vpop.f32.mrb[57].mxu0  ;;  %v4018_v24 = vpop.f32.mrb[57].mxu1 }
 0x15b   : > { %v1925_v11 = vmul.f32 0.16666667, %v1797_v17  ;;  %v3082_v53 = vpack.c.bf16 %v1988_v47, %v1988_v47  ;;  %v1989_v36 = vmul.f32 0.16666667, %v1861_v49  ;;  %v1923_v18 = vmul.f32 0.16666667, %v1795_v63 }
 0x15c   : > { %v3016_v50 = vpack.c.bf16 %v1922_v21, %v1922_v21  ;;  %2565 = vst.msk [vmem:[%s3585_s25 + $0x78] sm:$0xf] %vm2534_vm3, %v3018_v16  ;;  %v3080_v4 = vpack.c.bf16 %v1986_v1, %v1986_v1  ;;  %v1987_v40 = vmul.f32 0.16666667, %v1859_v23  ;;  %v1008_v15 = vadd.f32 %v3946_v29, %v3803_v56  ;;  %v4020_v56 = vpop.f32.mrb[58].mxu0  ;;  %v4030_v44 = vpop.f32.mrb[58].mxu1 }
 0x15d   : > { %v3019_v8 = vpack.c.bf16 %v1925_v11, %v1925_v11  ;;  %2629 = vst.msk [vmem:[%s3585_s25 + $0x178] sm:$0xf] %vm2534_vm3, %v3082_v53  ;;  %v3083_v38 = vpack.c.bf16 %v1989_v36, %v1989_v36  ;;  %v3017_v45 = vpack.c.bf16 %v1923_v18, %v1923_v18  ;;  %v1264_v47 = vadd.f32 %v3946_v29, %v3805_v60 }
 0x15e   : > { %2563 = vst.msk [vmem:[%s3585_s25 + $0x70] sm:$0xf] %vm2534_vm3, %v3016_v50  ;;  %v1000_v5 = vadd.f32 %v3946_v29, %v3807_v58  ;;  %2627 = vst.msk [vmem:[%s3585_s25 + $0x170] sm:$0xf] %vm2534_vm3, %v3080_v4  ;;  %v3081_v20 = vpack.c.bf16 %v1987_v40, %v1987_v40  ;;  %v1416_v0 = vadd.f32 3.0, %v1008_v15  ;;  %v1256_v11 = vadd.f32 %v3946_v29, %v3809_v3  ;;  %v4032_v58 = vpop.f32.mrb[59].mxu0 }
 0x15f   : > { %2566 = vst.msk [vmem:[%s3585_s25 + $0x7c] sm:$0xf] %vm2534_vm3, %v3019_v8  ;;  %v1011_v60 = vadd.f32 %v3946_v29, %v3811_v10  ;;  %4321 = vst [vmem:[#allocation17_spill] sm:$0xff] %v4032_v58  ;;  %v1480_v9 = vadd.f32 3.0, %v1264_v47  ;;  %v1267_v59 = vadd.f32 %v3946_v29, %v3813_v54  ;;  %v1003_v17 = vadd.f32 %v3946_v29, %v3815_v32  ;;  %v4042_v3 = vpop.f32.mrb[59].mxu1 }
 0x160   : > { %2630 = vst.msk [vmem:[%s3585_s25 + $0x17c] sm:$0xf] %vm2534_vm3, %v3083_v38  ;;  %2564 = vst.msk [vmem:[%s3585_s25 + $0x74] sm:$0xf] %vm2534_vm3, %v3017_v45  ;;  %v1414_v39 = vadd.f32 3.0, %v1000_v5  ;;  %v1544_v10 = vmax.f32 %v1416_v0, 0.0  ;;  %v1259_v63 = vadd.f32 %v3946_v29, %v3817_v7 }
 0x161   : > { %4322 = vst [vmem:[#allocation18_spill] sm:$0xff] %v4042_v3  ;;  %2628 = vst.msk [vmem:[%s3585_s25 + $0x174] sm:$0xf] %vm2534_vm3, %v3081_v20  ;;  %v1478_v21 = vadd.f32 3.0, %v1256_v11  ;;  %v1417_v49 = vadd.f32 3.0, %v1011_v60  ;;  %v1608_v16 = vmax.f32 %v1480_v9, 0.0 }
 0x162   : > { %v1542_v1 = vmax.f32 %v1414_v39, 0.0  ;;  %v1481_v23 = vadd.f32 3.0, %v1267_v59  ;;  %v1415_v53 = vadd.f32 3.0, %v1003_v17  ;;  %v1672_v50 = vmin.f32 %v1544_v10, 6.0  ;;  %v4048_v38 = vpop.f32.mrb[60].mxu0  ;;  %v4050_v58 = vpop.f32.mrb[60].mxu1 }
 0x163   : > { %v1606_v36 = vmax.f32 %v1478_v21, 0.0  ;;  %v1545_v54 = vmax.f32 %v1417_v49, 0.0  ;;  %v1479_v18 = vadd.f32 3.0, %v1259_v63  ;;  %v1736_v4 = vmin.f32 %v1608_v16, 6.0  ;;  %4323 = vst [vmem:[#allocation19_spill] sm:$0xff] %v4048_v38  ;;  %v4052_v7 = vpop.f32.mrb[61].mxu0 }
 0x164   : > { %v1670_v32 = vmin.f32 %v1542_v1, 6.0  ;;  %v1609_v8 = vmax.f32 %v1481_v23, 0.0  ;;  %v1543_v40 = vmax.f32 %v1415_v53, 0.0  ;;  %v1800_v45 = vmul.f32 %v1672_v50, %v1008_v15  ;;  %v4054_v49 = vpop.f32.mrb[61].mxu1  ;;  %v4056_v16 = vpop.f32.mrb[62].mxu0 }
 0x165   : > { %v1734_v20 = vmin.f32 %v1606_v36, 6.0  ;;  %v1673_v0 = vmin.f32 %v1545_v54, 6.0  ;;  %v1607_v3 = vmax.f32 %v1479_v18, 0.0  ;;  %v1864_v9 = vmul.f32 %v1736_v4, %v1264_v47  ;;  %4324 = vst [vmem:[#allocation20_spill] sm:$0xff] %v4056_v16  ;;  %v4058_v15 = vpop.f32.mrb[62].mxu1  ;;  %v4060_v50 = vpop.f32.mrb[63].mxu0 }
 0x166   : > { %v1798_v39 = vmul.f32 %v1670_v32, %v1000_v5  ;;  %v1737_v10 = vmin.f32 %v1609_v8, 6.0  ;;  %v1671_v21 = vmin.f32 %v1543_v40, 6.0  ;;  %v1928_v1 = vmul.f32 0.16666667, %v1800_v45  ;;  %4325 = vst [vmem:[#allocation21_spill] sm:$0xff] %v4058_v15  ;;  %4326 = vst [vmem:[#allocation22_spill] sm:$0xff] %v4060_v50 }
 0x167   : > { %v1862_v23 = vmul.f32 %v1734_v20, %v1256_v11  ;;  %v1801_v53 = vmul.f32 %v1673_v0, %v1011_v60  ;;  %v1735_v38 = vmin.f32 %v1607_v3, 6.0  ;;  %v1992_v36 = vmul.f32 0.16666667, %v1864_v9  ;;  %v4062_v5 = vpop.f32.mrb[63].mxu1 }
 0x168   : > { %v1926_v54 = vmul.f32 0.16666667, %v1798_v39  ;;  %v1865_v18 = vmul.f32 %v1737_v10, %v1267_v59  ;;  %v1799_v47 = vmul.f32 %v1671_v21, %v1003_v17  ;;  %4327 = vst [vmem:[#allocation23_spill] sm:$0xff] %v4062_v5  ;;  %v3022_v4 = vpack.c.bf16 %v1928_v1, %v1928_v1 }
 0x169   : > { %v1990_v32 = vmul.f32 0.16666667, %v1862_v23  ;;  %v1929_v8 = vmul.f32 0.16666667, %v1801_v53  ;;  %v1863_v40 = vmul.f32 %v1735_v38, %v1259_v63  ;;  %v3086_v11 = vpack.c.bf16 %v1992_v36, %v1992_v36  ;;  %v4328_v53 = vld [vmem:[#allocation2_spill] sm:$0xff]  ;;  %v4329_v36 = vld [vmem:[#allocation3_spill] sm:$0xff] }
 0x16a   : > { %v3020_v60 = vpack.c.bf16 %v1926_v54, %v1926_v54  ;;  %v1993_v3 = vmul.f32 0.16666667, %v1865_v18  ;;  %v1927_v45 = vmul.f32 0.16666667, %v1799_v47  ;;  %2569 = vst.msk [vmem:[%s3585_s25 + $0x88] sm:$0xf] %vm2534_vm3, %v3022_v4  ;;  %v1024_v0 = vadd.f32 %v3946_v29, %v3831_v46 }
 0x16b   : > { %v3084_v20 = vpack.c.bf16 %v1990_v32, %v1990_v32  ;;  %v3023_v59 = vpack.c.bf16 %v1929_v8, %v1929_v8  ;;  %v1991_v17 = vmul.f32 0.16666667, %v1863_v40  ;;  %2633 = vst.msk [vmem:[%s3585_s25 + $0x188] sm:$0xf] %vm2534_vm3, %v3086_v11  ;;  %v1280_v9 = vadd.f32 %v3946_v29, %v3841_v51  ;;  %v4330_v4 = vld [vmem:[#allocation4_spill] sm:$0xff] }
 0x16c   : > { %2567 = vst.msk [vmem:[%s3585_s25 + $0x80] sm:$0xf] %vm2534_vm3, %v3020_v60  ;;  %v3087_v63 = vpack.c.bf16 %v1993_v3, %v1993_v3  ;;  %v3021_v38 = vpack.c.bf16 %v1927_v45, %v1927_v45  ;;  %v1016_v39 = vadd.f32 %v3946_v29, %v3843_v27  ;;  %v1420_v21 = vadd.f32 3.0, %v1024_v0 }
 0x16d   : > { %2631 = vst.msk [vmem:[%s3585_s25 + $0x180] sm:$0xf] %vm2534_vm3, %v3084_v20  ;;  %2570 = vst.msk [vmem:[%s3585_s25 + $0x8c] sm:$0xf] %vm2534_vm3, %v3023_v59  ;;  %v3085_v10 = vpack.c.bf16 %v1991_v17, %v1991_v17  ;;  %v1272_v46 = vadd.f32 %v3946_v29, %v3853_v22  ;;  %v1027_v1 = vadd.f32 %v3946_v29, %v3855_v19  ;;  %v1484_v51 = vadd.f32 3.0, %v1280_v9 }
 0x16e   : > { %2634 = vst.msk [vmem:[%s3585_s25 + $0x18c] sm:$0xf] %vm2534_vm3, %v3087_v63  ;;  %2568 = vst.msk [vmem:[%s3585_s25 + $0x84] sm:$0xf] %vm2534_vm3, %v3021_v38  ;;  %v1418_v23 = vadd.f32 3.0, %v1016_v39  ;;  %v1283_v27 = vadd.f32 %v3946_v29, %v4328_v53  ;;  %v1019_v54 = vadd.f32 %v3946_v29, %v4329_v36  ;;  %v1548_v18 = vmax.f32 %v1420_v21, 0.0 }
 0x16f   : > { %2632 = vst.msk [vmem:[%s3585_s25 + $0x184] sm:$0xf] %vm2534_vm3, %v3085_v10  ;;  %v1482_v47 = vadd.f32 3.0, %v1272_v46  ;;  %v1421_v22 = vadd.f32 3.0, %v1027_v1  ;;  %v1275_v19 = vadd.f32 %v3946_v29, %v4330_v4  ;;  %v1612_v32 = vmax.f32 %v1484_v51, 0.0 }
 0x170   : > { %v1546_v8 = vmax.f32 %v1418_v23, 0.0  ;;  %v1485_v40 = vadd.f32 3.0, %v1283_v27  ;;  %v1419_v11 = vadd.f32 3.0, %v1019_v54  ;;  %v1676_v60 = vmin.f32 %v1548_v18, 6.0 }
 0x171   : > { %v1610_v3 = vmax.f32 %v1482_v47, 0.0  ;;  %v1549_v45 = vmax.f32 %v1421_v22, 0.0  ;;  %v1483_v20 = vadd.f32 3.0, %v1275_v19  ;;  %v1740_v59 = vmin.f32 %v1612_v32, 6.0 }
 0x172   : > { %v1674_v17 = vmin.f32 %v1546_v8, 6.0  ;;  %v1613_v63 = vmax.f32 %v1485_v40, 0.0  ;;  %v1547_v38 = vmax.f32 %v1419_v11, 0.0  ;;  %v1804_v53 = vmul.f32 %v1676_v60, %v1024_v0 }
 0x173   : > { %v1738_v10 = vmin.f32 %v1610_v3, 6.0  ;;  %v1677_v21 = vmin.f32 %v1549_v45, 6.0  ;;  %v1611_v36 = vmax.f32 %v1483_v20, 0.0  ;;  %v1868_v5 = vmul.f32 %v1740_v59, %v1280_v9 }
 0x174   : > { %v1802_v50 = vmul.f32 %v1674_v17, %v1016_v39  ;;  %v1741_v15 = vmin.f32 %v1613_v63, 6.0  ;;  %v1675_v4 = vmin.f32 %v1547_v38, 6.0  ;;  %v1932_v51 = vmul.f32 0.16666667, %v1804_v53 }
 0x175   : > { %v1866_v23 = vmul.f32 %v1738_v10, %v1272_v46  ;;  %v1805_v16 = vmul.f32 %v1677_v21, %v1027_v1  ;;  %v1739_v18 = vmin.f32 %v1611_v36, 6.0  ;;  %v1996_v47 = vmul.f32 0.16666667, %v1868_v5 }
 0x176   : > { %v1930_v22 = vmul.f32 0.16666667, %v1802_v50  ;;  %v1869_v32 = vmul.f32 %v1741_v15, %v1283_v27  ;;  %v1803_v8 = vmul.f32 %v1675_v4, %v1019_v54  ;;  %v3026_v40 = vpack.c.bf16 %v1932_v51, %v1932_v51 }
 0x177   : > { %v1994_v0 = vmul.f32 0.16666667, %v1866_v23  ;;  %v1933_v11 = vmul.f32 0.16666667, %v1805_v16  ;;  %v1867_v60 = vmul.f32 %v1739_v18, %v1275_v19  ;;  %v3090_v9 = vpack.c.bf16 %v1996_v47, %v1996_v47 }
 0x178   : > { %v3024_v39 = vpack.c.bf16 %v1930_v22, %v1930_v22  ;;  %v1997_v3 = vmul.f32 0.16666667, %v1869_v32  ;;  %v1931_v45 = vmul.f32 0.16666667, %v1803_v8  ;;  %2573 = vst.msk [vmem:[%s3585_s25 + $0x98] sm:$0xf] %vm2534_vm3, %v3026_v40  ;;  %v1040_v15 = vadd.f32 %v3946_v29, %v3867_v28 }
 0x179   : > { %v3088_v46 = vpack.c.bf16 %v1994_v0, %v1994_v0  ;;  %v3027_v5 = vpack.c.bf16 %v1933_v11, %v1933_v11  ;;  %v1995_v50 = vmul.f32 0.16666667, %v1867_v60  ;;  %2637 = vst.msk [vmem:[%s3585_s25 + $0x198] sm:$0xf] %vm2534_vm3, %v3090_v9  ;;  %v1296_v27 = vadd.f32 %v3946_v29, %v3869_v35 }
 0x17a   : > { %2571 = vst.msk [vmem:[%s3585_s25 + $0x90] sm:$0xf] %vm2534_vm3, %v3024_v39  ;;  %v3091_v16 = vpack.c.bf16 %v1997_v3, %v1997_v3  ;;  %v3025_v1 = vpack.c.bf16 %v1931_v45, %v1931_v45  ;;  %v1032_v54 = vadd.f32 %v3946_v29, %v3871_v41  ;;  %v1424_v20 = vadd.f32 3.0, %v1040_v15 }
 0x17b   : > { %2635 = vst.msk [vmem:[%s3585_s25 + $0x190] sm:$0xf] %vm2534_vm3, %v3088_v46  ;;  %2574 = vst.msk [vmem:[%s3585_s25 + $0x9c] sm:$0xf] %vm2534_vm3, %v3027_v5  ;;  %v3089_v19 = vpack.c.bf16 %v1995_v50, %v1995_v50  ;;  %v1288_v28 = vadd.f32 %v3946_v29, %v3873_v48  ;;  %v1043_v59 = vadd.f32 %v3946_v29, %v3875_v55  ;;  %v1488_v35 = vadd.f32 3.0, %v1296_v27 }
 0x17c   : > { %2638 = vst.msk [vmem:[%s3585_s25 + $0x19c] sm:$0xf] %vm2534_vm3, %v3091_v16  ;;  %2572 = vst.msk [vmem:[%s3585_s25 + $0x94] sm:$0xf] %vm2534_vm3, %v3025_v1  ;;  %v1422_v17 = vadd.f32 3.0, %v1032_v54  ;;  %v1299_v41 = vadd.f32 %v3946_v29, %v3877_v14  ;;  %v1035_v63 = vadd.f32 %v3946_v29, %v3879_v42  ;;  %v1552_v38 = vmax.f32 %v1424_v20, 0.0 }
 0x17d   : > { %2636 = vst.msk [vmem:[%s3585_s25 + $0x194] sm:$0xf] %vm2534_vm3, %v3089_v19  ;;  %v1486_v53 = vadd.f32 3.0, %v1288_v28  ;;  %v1425_v48 = vadd.f32 3.0, %v1043_v59  ;;  %v1291_v55 = vadd.f32 %v3946_v29, %v3881_v62  ;;  %v1616_v10 = vmax.f32 %v1488_v35, 0.0 }
 0x17e   : > { %v1550_v21 = vmax.f32 %v1422_v17, 0.0  ;;  %v1489_v36 = vadd.f32 3.0, %v1299_v41  ;;  %v1423_v4 = vadd.f32 3.0, %v1035_v63  ;;  %v1680_v51 = vmin.f32 %v1552_v38, 6.0 }
 0x17f   : > { %v1614_v23 = vmax.f32 %v1486_v53, 0.0  ;;  %v1553_v18 = vmax.f32 %v1425_v48, 0.0  ;;  %v1487_v47 = vadd.f32 3.0, %v1291_v55  ;;  %v1744_v14 = vmin.f32 %v1616_v10, 6.0 }
 0x180   : > { %v1678_v22 = vmin.f32 %v1550_v21, 6.0  ;;  %v1617_v32 = vmax.f32 %v1489_v36, 0.0  ;;  %v1551_v42 = vmax.f32 %v1423_v4, 0.0  ;;  %v1808_v8 = vmul.f32 %v1680_v51, %v1040_v15  ;;  %v4332_v21 = vld [vmem:[#allocation6_spill] sm:$0xff]  ;;  %v4333_v4 = vld [vmem:[#allocation7_spill] sm:$0xff] }
 0x181   : > { %v1742_v40 = vmin.f32 %v1614_v23, 6.0  ;;  %v1681_v0 = vmin.f32 %v1553_v18, 6.0  ;;  %v1615_v11 = vmax.f32 %v1487_v47, 0.0  ;;  %v1872_v60 = vmul.f32 %v1744_v14, %v1296_v27  ;;  %v4334_v47 = vld [vmem:[#allocation8_spill] sm:$0xff] }
 0x182   : > { %v1806_v9 = vmul.f32 %v1678_v22, %v1032_v54  ;;  %v1745_v39 = vmin.f32 %v1617_v32, 6.0  ;;  %v1679_v62 = vmin.f32 %v1551_v42, 6.0  ;;  %v1936_v3 = vmul.f32 0.16666667, %v1808_v8  ;;  %v4335_v22 = vld [vmem:[#allocation9_spill] sm:$0xff] }
 0x183   : > { %v1870_v45 = vmul.f32 %v1742_v40, %v1288_v28  ;;  %v1809_v46 = vmul.f32 %v1681_v0, %v1043_v59  ;;  %v1743_v5 = vmin.f32 %v1615_v11, 6.0  ;;  %v2000_v50 = vmul.f32 0.16666667, %v1872_v60  ;;  %v4336_v40 = vld [vmem:[#allocation10_spill] sm:$0xff]  ;;  %v4337_v11 = vld [vmem:[#allocation11_spill] sm:$0xff] }
 0x184   : > { %v1934_v16 = vmul.f32 0.16666667, %v1806_v9  ;;  %v1873_v1 = vmul.f32 %v1745_v39, %v1299_v41  ;;  %v1807_v19 = vmul.f32 %v1679_v62, %v1035_v63  ;;  %v3030_v20 = vpack.c.bf16 %v1936_v3, %v1936_v3  ;;  %v4331_v41 = vld [vmem:[#allocation5_spill] sm:$0xff] }
 0x185   : > { %v1998_v15 = vmul.f32 0.16666667, %v1870_v45  ;;  %v1937_v35 = vmul.f32 0.16666667, %v1809_v46  ;;  %v1871_v17 = vmul.f32 %v1743_v5, %v1291_v55  ;;  %v3094_v27 = vpack.c.bf16 %v2000_v50, %v2000_v50 }
 0x186   : > { %v3028_v54 = vpack.c.bf16 %v1934_v16, %v1934_v16  ;;  %v2001_v38 = vmul.f32 0.16666667, %v1873_v1  ;;  %v1935_v53 = vmul.f32 0.16666667, %v1807_v19  ;;  %2577 = vst.msk [vmem:[%s3585_s25 + $0xa8] sm:$0xf] %vm2534_vm3, %v3030_v20  ;;  %v1056_v63 = vadd.f32 %v3946_v29, %v4331_v41 }
 0x187   : > { %v3092_v28 = vpack.c.bf16 %v1998_v15, %v1998_v15  ;;  %v3031_v59 = vpack.c.bf16 %v1937_v35, %v1937_v35  ;;  %v1999_v48 = vmul.f32 0.16666667, %v1871_v17  ;;  %2641 = vst.msk [vmem:[%s3585_s25 + $0x1a8] sm:$0xf] %vm2534_vm3, %v3094_v27  ;;  %v1312_v36 = vadd.f32 %v3946_v29, %v4332_v21 }
 0x188   : > { %2575 = vst.msk [vmem:[%s3585_s25 + $0xa0] sm:$0xf] %vm2534_vm3, %v3028_v54  ;;  %v3095_v55 = vpack.c.bf16 %v2001_v38, %v2001_v38  ;;  %v3029_v10 = vpack.c.bf16 %v1935_v53, %v1935_v53  ;;  %v1048_v51 = vadd.f32 %v3946_v29, %v4333_v4  ;;  %v1428_v18 = vadd.f32 3.0, %v1056_v63 }
 0x189   : > { %2639 = vst.msk [vmem:[%s3585_s25 + $0x1a0] sm:$0xf] %vm2534_vm3, %v3092_v28  ;;  %2578 = vst.msk [vmem:[%s3585_s25 + $0xac] sm:$0xf] %vm2534_vm3, %v3031_v59  ;;  %v3093_v23 = vpack.c.bf16 %v1999_v48, %v1999_v48  ;;  %v1304_v14 = vadd.f32 %v3946_v29, %v4334_v47  ;;  %v1059_v32 = vadd.f32 %v3946_v29, %v4335_v22  ;;  %v1492_v42 = vadd.f32 3.0, %v1312_v36 }
 0x18a   : > { %2642 = vst.msk [vmem:[%s3585_s25 + $0x1ac] sm:$0xf] %vm2534_vm3, %v3095_v55  ;;  %2576 = vst.msk [vmem:[%s3585_s25 + $0xa4] sm:$0xf] %vm2534_vm3, %v3029_v10  ;;  %v1426_v8 = vadd.f32 3.0, %v1048_v51  ;;  %v1315_v0 = vadd.f32 %v3946_v29, %v4336_v40  ;;  %v1051_v60 = vadd.f32 %v3946_v29, %v4337_v11  ;;  %v1556_v9 = vmax.f32 %v1428_v18, 0.0 }
 0x18b   : > { %2640 = vst.msk [vmem:[%s3585_s25 + $0x1a4] sm:$0xf] %vm2534_vm3, %v3093_v23  ;;  %v1490_v39 = vadd.f32 3.0, %v1304_v14  ;;  %v1429_v62 = vadd.f32 3.0, %v1059_v32  ;;  %v1307_v3 = vadd.f32 %v3946_v29, %v3929_v57  ;;  %v1620_v45 = vmax.f32 %v1492_v42, 0.0 }
 0x18c   : > { %v1554_v46 = vmax.f32 %v1426_v8, 0.0  ;;  %v1493_v5 = vadd.f32 3.0, %v1315_v0  ;;  %v1427_v50 = vadd.f32 3.0, %v1051_v60  ;;  %v1684_v16 = vmin.f32 %v1556_v9, 6.0 }
 0x18d   : > { %v1618_v1 = vmax.f32 %v1490_v39, 0.0  ;;  %v1557_v19 = vmax.f32 %v1429_v62, 0.0  ;;  %v1491_v20 = vadd.f32 3.0, %v1307_v3  ;;  %v1748_v15 = vmin.f32 %v1620_v45, 6.0 }
 0x18e   : > { %v1682_v35 = vmin.f32 %v1554_v46, 6.0  ;;  %v1621_v17 = vmax.f32 %v1493_v5, 0.0  ;;  %v1555_v27 = vmax.f32 %v1427_v50, 0.0  ;;  %v1812_v54 = vmul.f32 %v1684_v16, %v1056_v63 }
 0x18f   : > { %v1746_v38 = vmin.f32 %v1618_v1, 6.0  ;;  %v1685_v53 = vmin.f32 %v1557_v19, 6.0  ;;  %v1619_v28 = vmax.f32 %v1491_v20, 0.0  ;;  %v1876_v59 = vmul.f32 %v1748_v15, %v1312_v36 }
 0x190   : > { %v1810_v48 = vmul.f32 %v1682_v35, %v1048_v51  ;;  %v1749_v41 = vmin.f32 %v1621_v17, 6.0  ;;  %v1683_v57 = vmin.f32 %v1555_v27, 6.0  ;;  %v1940_v55 = vmul.f32 0.16666667, %v1812_v54 }
 0x191   : > { %v1874_v10 = vmul.f32 %v1746_v38, %v1304_v14  ;;  %v1813_v21 = vmul.f32 %v1685_v53, %v1059_v32  ;;  %v1747_v4 = vmin.f32 %v1619_v28, 6.0  ;;  %v2004_v23 = vmul.f32 0.16666667, %v1876_v59 }
 0x192   : > { %v1938_v18 = vmul.f32 0.16666667, %v1810_v48  ;;  %v1877_v47 = vmul.f32 %v1749_v41, %v1315_v0  ;;  %v1811_v22 = vmul.f32 %v1683_v57, %v1051_v60  ;;  %v3034_v42 = vpack.c.bf16 %v1940_v55, %v1940_v55 }
 0x193   : > { %v2002_v63 = vmul.f32 0.16666667, %v1874_v10  ;;  %v1941_v8 = vmul.f32 0.16666667, %v1813_v21  ;;  %v1875_v40 = vmul.f32 %v1747_v4, %v1307_v3  ;;  %v3098_v36 = vpack.c.bf16 %v2004_v23, %v2004_v23 }
 0x194   : > { %v3032_v51 = vpack.c.bf16 %v1938_v18, %v1938_v18  ;;  %v2005_v11 = vmul.f32 0.16666667, %v1877_v47  ;;  %v1939_v9 = vmul.f32 0.16666667, %v1811_v22  ;;  %2581 = vst.msk [vmem:[%s3585_s25 + $0xb8] sm:$0xf] %vm2534_vm3, %v3034_v42  ;;  %v1072_v0 = vadd.f32 %v3946_v29, %v3931_v25 }
 0x195   : > { %v3096_v14 = vpack.c.bf16 %v2002_v63, %v2002_v63  ;;  %v3035_v32 = vpack.c.bf16 %v1941_v8, %v1941_v8  ;;  %v2003_v39 = vmul.f32 0.16666667, %v1875_v40  ;;  %2645 = vst.msk [vmem:[%s3585_s25 + $0x1b8] sm:$0xf] %vm2534_vm3, %v3098_v36  ;;  %v1328_v3 = vadd.f32 %v3946_v29, %v3933_v6 }
 0x196   : > { %2579 = vst.msk [vmem:[%s3585_s25 + $0xb0] sm:$0xf] %vm2534_vm3, %v3032_v51  ;;  %v3099_v60 = vpack.c.bf16 %v2005_v11, %v2005_v11  ;;  %v3033_v62 = vpack.c.bf16 %v1939_v9, %v1939_v9  ;;  %v1064_v45 = vadd.f32 %v3946_v29, %v3935_v33  ;;  %v1432_v5 = vadd.f32 3.0, %v1072_v0 }
 0x197   : > { %2643 = vst.msk [vmem:[%s3585_s25 + $0x1b0] sm:$0xf] %vm2534_vm3, %v3096_v14  ;;  %2582 = vst.msk [vmem:[%s3585_s25 + $0xbc] sm:$0xf] %vm2534_vm3, %v3035_v32  ;;  %v3097_v46 = vpack.c.bf16 %v2003_v39, %v2003_v39  ;;  %v1320_v25 = vadd.f32 %v3946_v29, %v3937_v26  ;;  %v1075_v50 = vadd.f32 %v3946_v29, %v3939_v12  ;;  %v1496_v6 = vadd.f32 3.0, %v1328_v3 }
 0x198   : > { %2646 = vst.msk [vmem:[%s3585_s25 + $0x1bc] sm:$0xf] %vm2534_vm3, %v3099_v60  ;;  %2580 = vst.msk [vmem:[%s3585_s25 + $0xb4] sm:$0xf] %vm2534_vm3, %v3033_v62  ;;  %v1430_v16 = vadd.f32 3.0, %v1064_v45  ;;  %v1331_v33 = vadd.f32 %v3946_v29, %v3950_v13  ;;  %v1067_v1 = vadd.f32 %v3946_v29, %v3952_v37  ;;  %v1560_v19 = vmax.f32 %v1432_v5, 0.0 }
 0x199   : > { %2644 = vst.msk [vmem:[%s3585_s25 + $0x1b4] sm:$0xf] %vm2534_vm3, %v3097_v46  ;;  %v1494_v20 = vadd.f32 3.0, %v1320_v25  ;;  %v1433_v26 = vadd.f32 3.0, %v1075_v50  ;;  %v1323_v12 = vadd.f32 %v3946_v29, %v3962_v61  ;;  %v1624_v15 = vmax.f32 %v1496_v6, 0.0 }
 0x19a   : > { %v1558_v35 = vmax.f32 %v1430_v16, 0.0  ;;  %v1497_v17 = vadd.f32 3.0, %v1331_v33  ;;  %v1431_v27 = vadd.f32 3.0, %v1067_v1  ;;  %v1688_v54 = vmin.f32 %v1560_v19, 6.0  ;;  %v4339_v16 = vld [vmem:[#allocation13_spill] sm:$0xff] }
 0x19b   : > { %v1622_v38 = vmax.f32 %v1494_v20, 0.0  ;;  %v1561_v53 = vmax.f32 %v1433_v26, 0.0  ;;  %v1495_v28 = vadd.f32 3.0, %v1323_v12  ;;  %v1752_v13 = vmin.f32 %v1624_v15, 6.0  ;;  %v4341_v26 = vld [vmem:[#allocation15_spill] sm:$0xff] }
 0x19c   : > { %v1686_v59 = vmin.f32 %v1558_v35, 6.0  ;;  %v1625_v48 = vmax.f32 %v1497_v17, 0.0  ;;  %v1559_v37 = vmax.f32 %v1431_v27, 0.0  ;;  %v1816_v41 = vmul.f32 %v1688_v54, %v1072_v0  ;;  %v4342_v27 = vld [vmem:[#allocation16_spill] sm:$0xff] }
 0x19d   : > { %v1750_v57 = vmin.f32 %v1622_v38, 6.0  ;;  %v1689_v55 = vmin.f32 %v1561_v53, 6.0  ;;  %v1623_v10 = vmax.f32 %v1495_v28, 0.0  ;;  %v1880_v21 = vmul.f32 %v1752_v13, %v1328_v3 }
 0x19e   : > { %v1814_v4 = vmul.f32 %v1686_v59, %v1064_v45  ;;  %v1753_v23 = vmin.f32 %v1625_v48, 6.0  ;;  %v1687_v61 = vmin.f32 %v1559_v37, 6.0  ;;  %v1944_v18 = vmul.f32 0.16666667, %v1816_v41 }
 0x19f   : > { %v1878_v47 = vmul.f32 %v1750_v57, %v1320_v25  ;;  %v1817_v22 = vmul.f32 %v1689_v55, %v1075_v50  ;;  %v1751_v42 = vmin.f32 %v1623_v10, 6.0  ;;  %v2008_v63 = vmul.f32 0.16666667, %v1880_v21  ;;  %v4338_v50 = vld [vmem:[#allocation12_spill] sm:$0xff] }
 0x1a0   : > { %v1942_v8 = vmul.f32 0.16666667, %v1814_v4  ;;  %v1881_v40 = vmul.f32 %v1753_v23, %v1331_v33  ;;  %v1815_v36 = vmul.f32 %v1687_v61, %v1067_v1  ;;  %v3038_v51 = vpack.c.bf16 %v1944_v18, %v1944_v18 }
 0x1a1   : > { %v2006_v11 = vmul.f32 0.16666667, %v1878_v47  ;;  %v1945_v9 = vmul.f32 0.16666667, %v1817_v22  ;;  %v1879_v14 = vmul.f32 %v1751_v42, %v1323_v12  ;;  %v3102_v32 = vpack.c.bf16 %v2008_v63, %v2008_v63 }
 0x1a2   : > { %v3036_v39 = vpack.c.bf16 %v1942_v8, %v1942_v8  ;;  %v2009_v0 = vmul.f32 0.16666667, %v1881_v40  ;;  %v1943_v60 = vmul.f32 0.16666667, %v1815_v36  ;;  %2585 = vst.msk [vmem:[%s3585_s25 + $0xc8] sm:$0xf] %vm2534_vm3, %v3038_v51  ;;  %v1088_v46 = vadd.f32 %v3946_v29, %v3984_v52 }
 0x1a3   : > { %v3100_v62 = vpack.c.bf16 %v2006_v11, %v2006_v11  ;;  %v3039_v3 = vpack.c.bf16 %v1945_v9, %v1945_v9  ;;  %v2007_v45 = vmul.f32 0.16666667, %v1879_v14  ;;  %2649 = vst.msk [vmem:[%s3585_s25 + $0x1c8] sm:$0xf] %vm2534_vm3, %v3102_v32  ;;  %v1344_v6 = vadd.f32 %v3946_v29, %v4338_v50  ;;  %v4340_v52 = vld [vmem:[#allocation14_spill] sm:$0xff] }
 0x1a4   : > { %2583 = vst.msk [vmem:[%s3585_s25 + $0xc0] sm:$0xf] %vm2534_vm3, %v3036_v39  ;;  %v3103_v5 = vpack.c.bf16 %v2009_v0, %v2009_v0  ;;  %v3037_v25 = vpack.c.bf16 %v1943_v60, %v1943_v60  ;;  %v1080_v33 = vadd.f32 %v3946_v29, %v4339_v16  ;;  %v1436_v19 = vadd.f32 3.0, %v1088_v46 }
 0x1a5   : > { %2647 = vst.msk [vmem:[%s3585_s25 + $0x1c0] sm:$0xf] %vm2534_vm3, %v3100_v62  ;;  %2586 = vst.msk [vmem:[%s3585_s25 + $0xcc] sm:$0xf] %vm2534_vm3, %v3039_v3  ;;  %v3101_v1 = vpack.c.bf16 %v2007_v45, %v2007_v45  ;;  %v1336_v20 = vadd.f32 %v3946_v29, %v4340_v52  ;;  %v1091_v12 = vadd.f32 %v3946_v29, %v4341_v26  ;;  %v1500_v15 = vadd.f32 3.0, %v1344_v6 }
 0x1a6   : > { %2650 = vst.msk [vmem:[%s3585_s25 + $0x1cc] sm:$0xf] %vm2534_vm3, %v3103_v5  ;;  %2584 = vst.msk [vmem:[%s3585_s25 + $0xc4] sm:$0xf] %vm2534_vm3, %v3037_v25  ;;  %v1434_v35 = vadd.f32 3.0, %v1080_v33  ;;  %v1347_v17 = vadd.f32 %v3946_v29, %v3994_v2  ;;  %v1083_v54 = vadd.f32 %v3946_v29, %v4342_v27  ;;  %v1564_v38 = vmax.f32 %v1436_v19, 0.0 }
 0x1a7   : > { %2648 = vst.msk [vmem:[%s3585_s25 + $0x1c4] sm:$0xf] %vm2534_vm3, %v3101_v1  ;;  %v1498_v53 = vadd.f32 3.0, %v1336_v20  ;;  %v1437_v28 = vadd.f32 3.0, %v1091_v12  ;;  %v1339_v13 = vadd.f32 %v3946_v29, %v3998_v34  ;;  %v1628_v59 = vmax.f32 %v1500_v15, 0.0  ;;  %v4343_v27 = vld [vmem:[#allocation17_spill] sm:$0xff] }
 0x1a8   : > { %v1562_v48 = vmax.f32 %v1434_v35, 0.0  ;;  %v1501_v37 = vadd.f32 3.0, %v1347_v17  ;;  %v1435_v41 = vadd.f32 3.0, %v1083_v54  ;;  %v1692_v57 = vmin.f32 %v1564_v38, 6.0 }
 0x1a9   : > { %v1626_v55 = vmax.f32 %v1498_v53, 0.0  ;;  %v1565_v10 = vmax.f32 %v1437_v28, 0.0  ;;  %v1499_v21 = vadd.f32 3.0, %v1339_v13  ;;  %v1756_v2 = vmin.f32 %v1628_v59, 6.0  ;;  %v4344_v28 = vld [vmem:[#allocation18_spill] sm:$0xff] }
 0x1aa   : > { %v1690_v4 = vmin.f32 %v1562_v48, 6.0  ;;  %v1629_v23 = vmax.f32 %v1501_v37, 0.0  ;;  %v1563_v61 = vmax.f32 %v1435_v41, 0.0  ;;  %v1820_v18 = vmul.f32 %v1692_v57, %v1088_v46 }
 0x1ab   : > { %v1754_v47 = vmin.f32 %v1626_v55, 6.0  ;;  %v1693_v22 = vmin.f32 %v1565_v10, 6.0  ;;  %v1627_v42 = vmax.f32 %v1499_v21, 0.0  ;;  %v1884_v63 = vmul.f32 %v1756_v2, %v1344_v6 }
 0x1ac   : > { %v1818_v8 = vmul.f32 %v1690_v4, %v1080_v33  ;;  %v1757_v40 = vmin.f32 %v1629_v23, 6.0  ;;  %v1691_v34 = vmin.f32 %v1563_v61, 6.0  ;;  %v1948_v36 = vmul.f32 0.16666667, %v1820_v18 }
 0x1ad   : > { %v1882_v51 = vmul.f32 %v1754_v47, %v1336_v20  ;;  %v1821_v11 = vmul.f32 %v1693_v22, %v1091_v12  ;;  %v1755_v9 = vmin.f32 %v1627_v42, 6.0  ;;  %v2012_v14 = vmul.f32 0.16666667, %v1884_v63 }
 0x1ae   : > { %v1946_v32 = vmul.f32 0.16666667, %v1818_v8  ;;  %v1885_v39 = vmul.f32 %v1757_v40, %v1347_v17  ;;  %v1819_v0 = vmul.f32 %v1691_v34, %v1083_v54  ;;  %v3042_v60 = vpack.c.bf16 %v1948_v36, %v1948_v36 }
 0x1af   : > { %v2010_v62 = vmul.f32 0.16666667, %v1882_v51  ;;  %v1949_v3 = vmul.f32 0.16666667, %v1821_v11  ;;  %v1883_v45 = vmul.f32 %v1755_v9, %v1339_v13  ;;  %v3106_v46 = vpack.c.bf16 %v2012_v14, %v2012_v14 }
 0x1b0   : > { %v3040_v5 = vpack.c.bf16 %v1946_v32, %v1946_v32  ;;  %v2013_v25 = vmul.f32 0.16666667, %v1885_v39  ;;  %v1947_v50 = vmul.f32 0.16666667, %v1819_v0  ;;  %2589 = vst.msk [vmem:[%s3585_s25 + $0xd8] sm:$0xf] %vm2534_vm3, %v3042_v60  ;;  %v1104_v1 = vadd.f32 %v3946_v29, %v4000_v31 }
 0x1b1   : > { %v3104_v6 = vpack.c.bf16 %v2010_v62, %v2010_v62  ;;  %v3043_v16 = vpack.c.bf16 %v1949_v3, %v1949_v3  ;;  %v2011_v33 = vmul.f32 0.16666667, %v1883_v45  ;;  %2653 = vst.msk [vmem:[%s3585_s25 + $0x1d8] sm:$0xf] %vm2534_vm3, %v3106_v46  ;;  %v1360_v20 = vadd.f32 %v3946_v29, %v4006_v30 }
 0x1b2   : > { %2587 = vst.msk [vmem:[%s3585_s25 + $0xd0] sm:$0xf] %vm2534_vm3, %v3040_v5  ;;  %v3107_v19 = vpack.c.bf16 %v2013_v25, %v2013_v25  ;;  %v3041_v52 = vpack.c.bf16 %v1947_v50, %v1947_v50  ;;  %v1096_v26 = vadd.f32 %v3946_v29, %v4008_v43  ;;  %v1440_v15 = vadd.f32 3.0, %v1104_v1 }
 0x1b3   : > { %2651 = vst.msk [vmem:[%s3585_s25 + $0x1d0] sm:$0xf] %vm2534_vm3, %v3104_v6  ;;  %2590 = vst.msk [vmem:[%s3585_s25 + $0xdc] sm:$0xf] %vm2534_vm3, %v3043_v16  ;;  %v3105_v12 = vpack.c.bf16 %v2011_v33, %v2011_v33  ;;  %v1352_v31 = vadd.f32 %v3946_v29, %v4018_v24  ;;  %v1107_v35 = vadd.f32 %v3946_v29, %v4020_v56  ;;  %v1504_v30 = vadd.f32 3.0, %v1360_v20  ;;  %v4345_v16 = vld [vmem:[#allocation19_spill] sm:$0xff] }
 0x1b4   : > { %2654 = vst.msk [vmem:[%s3585_s25 + $0x1dc] sm:$0xf] %vm2534_vm3, %v3107_v19  ;;  %2588 = vst.msk [vmem:[%s3585_s25 + $0xd4] sm:$0xf] %vm2534_vm3, %v3041_v52  ;;  %v1438_v17 = vadd.f32 3.0, %v1096_v26  ;;  %v1363_v43 = vadd.f32 %v3946_v29, %v4030_v44  ;;  %v1099_v54 = vadd.f32 %v3946_v29, %v4343_v27  ;;  %v1568_v38 = vmax.f32 %v1440_v15, 0.0 }
 0x1b5   : > { %2652 = vst.msk [vmem:[%s3585_s25 + $0x1d4] sm:$0xf] %vm2534_vm3, %v3105_v12  ;;  %v1502_v53 = vadd.f32 3.0, %v1352_v31  ;;  %v1441_v24 = vadd.f32 3.0, %v1107_v35  ;;  %v1355_v56 = vadd.f32 %v3946_v29, %v4344_v28  ;;  %v1632_v13 = vmax.f32 %v1504_v30, 0.0  ;;  %v4348_v27 = vld [vmem:[#allocation22_spill] sm:$0xff] }
 0x1b6   : > { %v1566_v59 = vmax.f32 %v1438_v17, 0.0  ;;  %v1505_v48 = vadd.f32 3.0, %v1363_v43  ;;  %v1439_v37 = vadd.f32 3.0, %v1099_v54  ;;  %v1696_v41 = vmin.f32 %v1568_v38, 6.0  ;;  %v3388_v6 = vld [vmem:[%s4304_s2] ss:$0 sm:$0xff] }
 0x1b7   : > { %v1630_v57 = vmax.f32 %v1502_v53, 0.0  ;;  %v1569_v55 = vmax.f32 %v1441_v24, 0.0  ;;  %v1503_v10 = vadd.f32 3.0, %v1355_v56  ;;  %v1760_v44 = vmin.f32 %v1632_v13, 6.0  ;;  %v4349_v24 = vld [vmem:[#allocation23_spill] sm:$0xff] }
 0x1b8   : > { %v1694_v21 = vmin.f32 %v1566_v59, 6.0  ;;  %v1633_v2 = vmax.f32 %v1505_v48, 0.0  ;;  %v1567_v4 = vmax.f32 %v1439_v37, 0.0  ;;  %v1824_v23 = vmul.f32 %v1696_v41, %v1104_v1 }
 0x1b9   : > { %v1758_v61 = vmin.f32 %v1630_v57, 6.0  ;;  %v1697_v18 = vmin.f32 %v1569_v55, 6.0  ;;  %v1631_v47 = vmax.f32 %v1503_v10, 0.0  ;;  %v1888_v22 = vmul.f32 %v1760_v44, %v1360_v20 }
 0x1ba   : > { %v1822_v42 = vmul.f32 %v1694_v21, %v1096_v26  ;;  %v1761_v63 = vmin.f32 %v1633_v2, 6.0  ;;  %v1695_v29 = vmin.f32 %v1567_v4, 6.0  ;;  %v1952_v8 = vmul.f32 0.16666667, %v1824_v23 }
 0x1bb   : > { %v1886_v40 = vmul.f32 %v1758_v61, %v1352_v31  ;;  %v1825_v34 = vmul.f32 %v1697_v18, %v1107_v35  ;;  %v1759_v36 = vmin.f32 %v1631_v47, 6.0  ;;  %v2016_v51 = vmul.f32 0.16666667, %v1888_v22  ;;  %v4346_v31 = vld [vmem:[#allocation20_spill] sm:$0xff] }
 0x1bc   : > { %v1950_v11 = vmul.f32 0.16666667, %v1822_v42  ;;  %v1889_v9 = vmul.f32 %v1761_v63, %v1363_v43  ;;  %v1823_v14 = vmul.f32 %v1695_v29, %v1099_v54  ;;  %v3046_v32 = vpack.c.bf16 %v1952_v8, %v1952_v8  ;;  %v4347_v43 = vld [vmem:[#allocation21_spill] sm:$0xff] }
 0x1bd   : > { %v2014_v39 = vmul.f32 0.16666667, %v1886_v40  ;;  %v1953_v0 = vmul.f32 0.16666667, %v1825_v34  ;;  %v1887_v60 = vmul.f32 %v1759_v36, %v1355_v56  ;;  %v3110_v62 = vpack.c.bf16 %v2016_v51, %v2016_v51 }
 0x1be   : > { %v3044_v3 = vpack.c.bf16 %v1950_v11, %v1950_v11  ;;  %v2017_v45 = vmul.f32 0.16666667, %v1889_v9  ;;  %v1951_v46 = vmul.f32 0.16666667, %v1823_v14  ;;  %2593 = vst.msk [vmem:[%s3585_s25 + $0xe8] sm:$0xf] %vm2534_vm3, %v3046_v32  ;;  %v1120_v33 = vadd.f32 %v3388_v6, %v4345_v16 }
 0x1bf   : > { %v3108_v5 = vpack.c.bf16 %v2014_v39, %v2014_v39  ;;  %v3047_v25 = vpack.c.bf16 %v1953_v0, %v1953_v0  ;;  %v2015_v50 = vmul.f32 0.16666667, %v1887_v60  ;;  %2657 = vst.msk [vmem:[%s3585_s25 + $0x1e8] sm:$0xf] %vm2534_vm3, %v3110_v62  ;;  %v1376_v52 = vadd.f32 %v3388_v6, %v4050_v58 }
 0x1c0   : > { %2591 = vst.msk [vmem:[%s3585_s25 + $0xe0] sm:$0xf] %vm2534_vm3, %v3044_v3  ;;  %v3111_v1 = vpack.c.bf16 %v2017_v45, %v2017_v45  ;;  %v3045_v19 = vpack.c.bf16 %v1951_v46, %v1951_v46  ;;  %v1112_v20 = vadd.f32 %v3388_v6, %v4052_v7  ;;  %v1444_v12 = vadd.f32 3.0, %v1120_v33 }
 0x1c1   : > { %2655 = vst.msk [vmem:[%s3585_s25 + $0x1e0] sm:$0xf] %vm2534_vm3, %v3108_v5  ;;  %2594 = vst.msk [vmem:[%s3585_s25 + $0xec] sm:$0xf] %vm2534_vm3, %v3047_v25  ;;  %v3109_v26 = vpack.c.bf16 %v2015_v50, %v2015_v50  ;;  %v1368_v15 = vadd.f32 %v3388_v6, %v4054_v49  ;;  %v1123_v35 = vadd.f32 %v3388_v6, %v4346_v31  ;;  %v1508_v30 = vadd.f32 3.0, %v1376_v52 }
 0x1c2   : > { %2658 = vst.msk [vmem:[%s3585_s25 + $0x1ec] sm:$0xf] %vm2534_vm3, %v3111_v1  ;;  %2592 = vst.msk [vmem:[%s3585_s25 + $0xe4] sm:$0xf] %vm2534_vm3, %v3045_v19  ;;  %v1442_v17 = vadd.f32 3.0, %v1112_v20  ;;  %v1379_v58 = vadd.f32 %v3388_v6, %v4347_v43  ;;  %v1115_v7 = vadd.f32 %v3388_v6, %v4348_v27  ;;  %v1572_v54 = vmax.f32 %v1444_v12, 0.0 }
 0x1c3   : > { %2656 = vst.msk [vmem:[%s3585_s25 + $0x1e4] sm:$0xf] %vm2534_vm3, %v3109_v26  ;;  %v1506_v38 = vadd.f32 3.0, %v1368_v15  ;;  %v1445_v53 = vadd.f32 3.0, %v1123_v35  ;;  %v1371_v28 = vadd.f32 %v3388_v6, %v4349_v24  ;;  %v1636_v49 = vmax.f32 %v1508_v30, 0.0 }
 0x1c4   : > { %v1570_v56 = vmax.f32 %v1442_v17, 0.0  ;;  %v1509_v13 = vadd.f32 3.0, %v1379_v58  ;;  %v1443_v59 = vadd.f32 3.0, %v1115_v7  ;;  %v1700_v48 = vmin.f32 %v1572_v54, 6.0 }
 0x1c5   : > { %v1634_v37 = vmax.f32 %v1506_v38, 0.0  ;;  %v1573_v41 = vmax.f32 %v1445_v53, 0.0  ;;  %v1507_v57 = vadd.f32 3.0, %v1371_v28  ;;  %v1764_v55 = vmin.f32 %v1636_v49, 6.0 }
 0x1c6   : > { %v1698_v10 = vmin.f32 %v1570_v56, 6.0  ;;  %v1637_v44 = vmax.f32 %v1509_v13, 0.0  ;;  %v1571_v21 = vmax.f32 %v1443_v59, 0.0  ;;  %v1828_v2 = vmul.f32 %v1700_v48, %v1120_v33 }
 0x1c7   : > { %v1762_v4 = vmin.f32 %v1634_v37, 6.0  ;;  %v1701_v23 = vmin.f32 %v1573_v41, 6.0  ;;  %v1635_v61 = vmax.f32 %v1507_v57, 0.0  ;;  %v1892_v18 = vmul.f32 %v1764_v55, %v1376_v52 }
 0x1c8   : > { %v1826_v47 = vmul.f32 %v1698_v10, %v1112_v20  ;;  %v1765_v22 = vmin.f32 %v1637_v44, 6.0  ;;  %v1699_v42 = vmin.f32 %v1571_v21, 6.0  ;;  %v1956_v63 = vmul.f32 0.16666667, %v1828_v2 }
 0x1c9   : > { %v1890_v29 = vmul.f32 %v1762_v4, %v1368_v15  ;;  %v1829_v8 = vmul.f32 %v1701_v23, %v1123_v35  ;;  %v1763_v40 = vmin.f32 %v1635_v61, 6.0  ;;  %v2020_v34 = vmul.f32 0.16666667, %v1892_v18 }
 0x1ca   : > { %v1954_v36 = vmul.f32 0.16666667, %v1826_v47  ;;  %v1893_v51 = vmul.f32 %v1765_v22, %v1379_v58  ;;  %v1827_v11 = vmul.f32 %v1699_v42, %v1115_v7  ;;  %v3050_v9 = vpack.c.bf16 %v1956_v63, %v1956_v63 }
 0x1cb   : > { %v2018_v14 = vmul.f32 0.16666667, %v1890_v29  ;;  %v1957_v32 = vmul.f32 0.16666667, %v1829_v8  ;;  %v1891_v39 = vmul.f32 %v1763_v40, %v1371_v28  ;;  %v3114_v0 = vpack.c.bf16 %v2020_v34, %v2020_v34 }
 0x1cc   : > { %v3048_v60 = vpack.c.bf16 %v1954_v36, %v1954_v36  ;;  %v2021_v62 = vmul.f32 0.16666667, %v1893_v51  ;;  %v1955_v3 = vmul.f32 0.16666667, %v1827_v11  ;;  %2597 = vst.msk [vmem:[%s3585_s25 + $0xf8] sm:$0xf] %vm2534_vm3, %v3050_v9 }
 0x1cd   : > { %v3112_v45 = vpack.c.bf16 %v2018_v14, %v2018_v14  ;;  %v3051_v46 = vpack.c.bf16 %v1957_v32, %v1957_v32  ;;  %v2019_v5 = vmul.f32 0.16666667, %v1891_v39  ;;  %2661 = vst.msk [vmem:[%s3585_s25 + $0x1f8] sm:$0xf] %vm2534_vm3, %v3114_v0 }
 0x1ce   : > { %2595 = vst.msk [vmem:[%s3585_s25 + $0xf0] sm:$0xf] %vm2534_vm3, %v3048_v60  ;;  %v3115_v25 = vpack.c.bf16 %v2021_v62, %v2021_v62  ;;  %v3049_v50 = vpack.c.bf16 %v1955_v3, %v1955_v3 }
 0x1cf   : > { %2659 = vst.msk [vmem:[%s3585_s25 + $0x1f0] sm:$0xf] %vm2534_vm3, %v3112_v45  ;;  %2598 = vst.msk [vmem:[%s3585_s25 + $0xfc] sm:$0xf] %vm2534_vm3, %v3051_v46  ;;  %v3113_v6 = vpack.c.bf16 %v2019_v5, %v2019_v5 }
 0x1d0   : > { %2662 = vst.msk [vmem:[%s3585_s25 + $0x1fc] sm:$0xf] %vm2534_vm3, %v3115_v25  ;;  %2596 = vst.msk [vmem:[%s3585_s25 + $0xf4] sm:$0xf] %vm2534_vm3, %v3049_v50 }
 0x1d1   : > { %2660 = vst.msk [vmem:[%s3585_s25 + $0x1f4] sm:$0xf] %vm2534_vm3, %v3113_v6 }
 0x1d2 PF: > { %s13_s12 = sadd.s32 1, %s3395_s12  }
 0x1d3   : > { %p10_p4 = scmp.ge.s32.totalorder %s13_s12, 4  }
 0x1d5   :  { %12 = sbr.rel (!%p10_p4) target bundleno = 1 (0x1), region = 62 }

// kernel: custom_levit_forward.31
= control target key start
LH: loop header
LB: loop body
LE: loop exit
PB: predicated region body
PF: predicated region fallthrough
CT: control target
= control target key end

     0   :  { %s1268_s12 = smov 0   ;;  %s1469_s0 = inlined_call_operand.vmem [shape: bf16[512,144], index: 0, kind: input, shape index: {}]   ;;  %s1470_s1 = inlined_call_operand.vmem [shape: bf16[144,32], index: 1, kind: input, shape index: {}]   ;;  %s1471_s2 = inlined_call_operand.vmem [shape: f32[1,32], index: 2, kind: input, shape index: {}]   ;;  %s1472_s3 = inlined_call_operand.vmem [shape: bf16[512,32], index: 3, kind: output, shape index: {}]  }
   0x1 LB: > { %s1020_s13 = sadd.s32 4294967295, %s1245_s12   ;;  %p1024_p0 = scmp.ge.s32.totalorder %s1245_s12, 1  ;;  %s1245_s12 = sphi %s1268_s12, %s13_s12  }
   0x2   : > { %p139_p1 = scmp.lt.s32.totalorder %s1245_s12, 3 }
   0x4   : > { %p140_p2 = pnand %p1024_p0, %p139_p1 }
   0x5   : > { %v1182_v0 = vld [vmem:[%s1470_s1] sm:$0xff] (!%p140_p2)   ;;  %v1247_v1 = vmov (!%p140_p2), 0   ;;  %s1025_s16 = sshll.u32 (!%p140_p2), %s1020_s13, 5  ;;  %v1183_v2 = vld [vmem:[%s1470_s1 + $0x8] sm:$0xff] (!%p140_p2)   ;;  %v1184_v3 = vld [vmem:[%s1470_s1 + $0x10] sm:$0xff] (!%p140_p2)   ;;  %vm433_vm0 = vcmask (!%p140_p2), 130048  }
   0x6   : > { %143 = sbr.rel (%p140_p2) target bundleno = 328 (0x148), region = 32  ;;  %482 = vmatprep.subr.bf16.mxu0 (!%p140_p2), %v1247_v1  ;;  %1155 = vmatprep.subr.bf16.mxu1 (!%p140_p2), %v1247_v1  ;;  %p165_p3 = scmp.lt.s32.totalorder (!%p140_p2), %s1025_s16, 63  ;;  %v1185_v4 = vld [vmem:[%s1470_s1 + $0x18] sm:$0xff] (!%p140_p2)   ;;  %v1186_v7 = vld [vmem:[%s1470_s1 + $0x20] sm:$0xff] (!%p140_p2)   ;;  %v1187_v8 = vld [vmem:[%s1470_s1 + $0x28] sm:$0xff] (!%p140_p2)   ;;  %vm931_vm1 = vcmask (!%p140_p2), 257024  }
   0x7   : > { %483 = vmatpush1.bf16.msra.mxu0 (!%p140_p2), %v1182_v0  ;;  %1164 = vmatpush1.bf16.msra.mxu1 (!%p140_p2), %v1182_v0  ;;  %v1188_v9 = vld [vmem:[%s1470_s1 + $0x30] sm:$0xff] (!%p140_p2)   ;;  %v1189_v10 = vld [vmem:[%s1470_s1 + $0x38] sm:$0xff] (!%p140_p2)   ;;  %v1190_v11 = vld [vmem:[%s1470_s1 + $0x40] sm:$0xff] (!%p140_p2)  }
   0x8   : > { %484 = vmatprep.subr.bf16.mxu0 (!%p140_p2), %v1247_v1  ;;  %1156 = vmatprep.subr.bf16.mxu1 (!%p140_p2), %v1247_v1  ;;  %v1362_v42 = vld [vmem:[%s1471_s2] ss:$0 sm:$0xff] (!%p140_p2) }
   0xb   : > { %485 = vmatpush1.bf16.msra.mxu0 (!%p140_p2), %v1183_v2  ;;  %1165 = vmatpush1.bf16.msra.mxu1 (!%p140_p2), %v1183_v2 }
   0xc   : > { %486 = vmatprep.subr.bf16.mxu0 (!%p140_p2), %v1247_v1  ;;  %1157 = vmatprep.subr.bf16.mxu1 (!%p140_p2), %v1247_v1 }
   0xd   : > { %s1474_s16 = smov (!%p165_p3, %s1025_s16), 63 }
   0xe   : > { %s1122_s21 = sshll.u32 %s1474_s16, 3  ;;  %s1029_s13 = sshll.u32 %s1474_s16, 2 }
   0xf   : > { %s1291_s24 = scalar_lea.vmem %s1469_s0, %s1122_s21  ;;  %487 = vmatpush1.bf16.msra.mxu0 %v1184_v3  ;;  %1166 = vmatpush1.bf16.msra.mxu1 %v1184_v3  ;;  %s1374_s16 = scalar_lea.vmem %s1472_s3, %s1029_s13 }
  0x10   : > { %v1193_v5 = vld [vmem:[%s1291_s24 + $0x4] ss:$8 sps:$4 sm:$0xff]   ;;  %488 = vmatprep.subr.bf16.mxu0 %v1247_v1  ;;  %1158 = vmatprep.subr.bf16.mxu1 %v1247_v1  ;;  %v1191_v12 = vld [vmem:[%s1291_s24] ss:$8 sps:$4 sm:$0xff]   ;;  %v1197_v14 = vld [vmem:[%s1291_s24 + $0x14] ss:$8 sps:$4 sm:$0xff]  }
  0x11   : > { %v1196_v6 = vld [vmem:[%s1291_s24 + $0x84] ss:$8 sps:$4 sm:$0xff]   ;;  %1072 = vmatprep.mubr.msk.bf16.mxu0 %vm433_vm0, %v1193_v5  ;;  %v1194_v13 = vld [vmem:[%s1291_s24 + $0x80] ss:$8 sps:$4 sm:$0xff]   ;;  %v1199_v15 = vld [vmem:[%s1291_s24 + $0x94] ss:$8 sps:$4 sm:$0xff]  }
  0x12   : > { %1080 = vmatprep.mubr.msk.bf16.mxu1 %vm433_vm0, %v1196_v6  ;;  %v1201_v16 = vld [vmem:[%s1291_s24 + $0x10] ss:$8 sps:$4 sm:$0xff]   ;;  %v1203_v18 = vld [vmem:[%s1291_s24 + $0x24] ss:$8 sps:$4 sm:$0xff]   ;;  %v1207_v20 = vld [vmem:[%s1291_s24 + $0x20] ss:$8 sps:$4 sm:$0xff]  }
  0x13   : > { %489 = vmatpush1.bf16.msra.mxu0 %v1185_v4  ;;  %1167 = vmatpush1.bf16.msra.mxu1 %v1185_v4  ;;  %v1202_v17 = vld [vmem:[%s1291_s24 + $0x90] ss:$8 sps:$4 sm:$0xff]   ;;  %v1205_v19 = vld [vmem:[%s1291_s24 + $0xa4] ss:$8 sps:$4 sm:$0xff]   ;;  %v1208_v21 = vld [vmem:[%s1291_s24 + $0xa0] ss:$8 sps:$4 sm:$0xff]  }
  0x14   : > { %490 = vmatprep.subr.bf16.mxu0 %v1247_v1  ;;  %1159 = vmatprep.subr.bf16.mxu1 %v1247_v1  ;;  %v1209_v22 = vld [vmem:[%s1291_s24 + $0x34] ss:$8 sps:$4 sm:$0xff]   ;;  %v1213_v24 = vld [vmem:[%s1291_s24 + $0x30] ss:$8 sps:$4 sm:$0xff]   ;;  %v1215_v26 = vld [vmem:[%s1291_s24 + $0x44] ss:$8 sps:$4 sm:$0xff]  }
  0x15   : > { %v1211_v23 = vld [vmem:[%s1291_s24 + $0xb4] ss:$8 sps:$4 sm:$0xff]   ;;  %v1214_v25 = vld [vmem:[%s1291_s24 + $0xb0] ss:$8 sps:$4 sm:$0xff]   ;;  %v1217_v27 = vld [vmem:[%s1291_s24 + $0xc4] ss:$8 sps:$4 sm:$0xff]  }
  0x16   : > { %v1219_v28 = vld [vmem:[%s1291_s24 + $0x40] ss:$8 sps:$4 sm:$0xff]   ;;  %v1221_v30 = vld [vmem:[%s1291_s24 + $0x54] ss:$8 sps:$4 sm:$0xff]   ;;  %v1225_v32 = vld [vmem:[%s1291_s24 + $0x50] ss:$8 sps:$4 sm:$0xff]  }
  0x17   : > { %491 = vmatpush1.bf16.msra.mxu0 %v1186_v7  ;;  %1168 = vmatpush1.bf16.msra.mxu1 %v1186_v7  ;;  %v1220_v29 = vld [vmem:[%s1291_s24 + $0xc0] ss:$8 sps:$4 sm:$0xff]   ;;  %v1223_v31 = vld [vmem:[%s1291_s24 + $0xd4] ss:$8 sps:$4 sm:$0xff]   ;;  %v1226_v33 = vld [vmem:[%s1291_s24 + $0xd0] ss:$8 sps:$4 sm:$0xff]  }
  0x18   : > { %492 = vmatprep.subr.bf16.mxu0 %v1247_v1  ;;  %1160 = vmatprep.subr.bf16.mxu1 %v1247_v1  ;;  %v1227_v34 = vld [vmem:[%s1291_s24 + $0x64] ss:$8 sps:$4 sm:$0xff]   ;;  %v1231_v36 = vld [vmem:[%s1291_s24 + $0x60] ss:$8 sps:$4 sm:$0xff]   ;;  %v1233_v38 = vld [vmem:[%s1291_s24 + $0x74] ss:$8 sps:$4 sm:$0xff]  }
  0x19   : > { %v1229_v35 = vld [vmem:[%s1291_s24 + $0xe4] ss:$8 sps:$4 sm:$0xff]   ;;  %v1232_v37 = vld [vmem:[%s1291_s24 + $0xe0] ss:$8 sps:$4 sm:$0xff]   ;;  %v1235_v39 = vld [vmem:[%s1291_s24 + $0xf4] ss:$8 sps:$4 sm:$0xff]  }
  0x1a   : > { %v1237_v40 = vld [vmem:[%s1291_s24 + $0x70] ss:$8 sps:$4 sm:$0xff]  }
  0x1b   : > { %493 = vmatpush1.bf16.msra.mxu0 %v1187_v8  ;;  %1169 = vmatpush1.bf16.msra.mxu1 %v1187_v8  ;;  %v1238_v41 = vld [vmem:[%s1291_s24 + $0xf0] ss:$8 sps:$4 sm:$0xff]  }
  0x1c   : > { %494 = vmatprep.subr.bf16.mxu0 %v1247_v1  ;;  %1161 = vmatprep.subr.bf16.mxu1 %v1247_v1 }
  0x1f   : > { %495 = vmatpush1.bf16.msra.mxu0 %v1188_v9  ;;  %1170 = vmatpush1.bf16.msra.mxu1 %v1188_v9 }
  0x20   : > { %496 = vmatprep.subr.bf16.mxu0 %v1247_v1  ;;  %1162 = vmatprep.subr.bf16.mxu1 %v1247_v1 }
  0x23   : > { %497 = vmatpush1.bf16.msra.mxu0 %v1189_v10  ;;  %1171 = vmatpush1.bf16.msra.mxu1 %v1189_v10 }
  0x24   : > { %498 = vmatprep.subr.bf16.mxu0 %v1247_v1  ;;  %1163 = vmatprep.subr.bf16.mxu1 %v1247_v1 }
  0x27   : > { %499 = vmatpush1.bf16.msra.mxu0 %v1190_v11  ;;  %1172 = vmatpush1.bf16.msra.mxu1 %v1190_v11 }
  0x2a   : > { %515 = vmatmul.mubr.bf16.vlgmr.msra.gmra.mrb[0].mxu0 %v1191_v12  ;;  %579 = vmatmul.mubr.bf16.vlgmr.msra.gmra.mrb[0].mxu1 %v1194_v13 }
  0x2b   : > { %1073 = vmatprep.mubr.msk.bf16.mxu0 %vm433_vm0, %v1197_v14  ;;  %1081 = vmatprep.mubr.msk.bf16.mxu1 %vm433_vm0, %v1199_v15 }
  0x32   : > { %523 = vmatmul.mubr.bf16.gmra.mrb[4].mxu0 %v1201_v16  ;;  %587 = vmatmul.mubr.bf16.gmra.mrb[4].mxu1 %v1202_v17 }
  0x33   : > { %1074 = vmatprep.mubr.msk.bf16.mxu0 %vm433_vm0, %v1203_v18  ;;  %1082 = vmatprep.mubr.msk.bf16.mxu1 %vm433_vm0, %v1205_v19 }
  0x3a   : > { %531 = vmatmul.mubr.bf16.gmra.mrb[8].mxu0 %v1207_v20  ;;  %595 = vmatmul.mubr.bf16.gmra.mrb[8].mxu1 %v1208_v21 }
  0x3b   : > { %1075 = vmatprep.mubr.msk.bf16.mxu0 %vm433_vm0, %v1209_v22  ;;  %1083 = vmatprep.mubr.msk.bf16.mxu1 %vm433_vm0, %v1211_v23 }
  0x42   : > { %539 = vmatmul.mubr.bf16.gmra.mrb[12].mxu0 %v1213_v24  ;;  %603 = vmatmul.mubr.bf16.gmra.mrb[12].mxu1 %v1214_v25 }
  0x43   : > { %1076 = vmatprep.mubr.msk.bf16.mxu0 %vm433_vm0, %v1215_v26  ;;  %1084 = vmatprep.mubr.msk.bf16.mxu1 %vm433_vm0, %v1217_v27 }
  0x4a   : > { %547 = vmatmul.mubr.bf16.gmra.mrb[16].mxu0 %v1219_v28  ;;  %611 = vmatmul.mubr.bf16.gmra.mrb[16].mxu1 %v1220_v29 }
  0x4b   : > { %1077 = vmatprep.mubr.msk.bf16.mxu0 %vm433_vm0, %v1221_v30  ;;  %1085 = vmatprep.mubr.msk.bf16.mxu1 %vm433_vm0, %v1223_v31 }
  0x52   : > { %555 = vmatmul.mubr.bf16.gmra.mrb[20].mxu0 %v1225_v32  ;;  %619 = vmatmul.mubr.bf16.gmra.mrb[20].mxu1 %v1226_v33 }
  0x53   : > { %1078 = vmatprep.mubr.msk.bf16.mxu0 %vm433_vm0, %v1227_v34  ;;  %1086 = vmatprep.mubr.msk.bf16.mxu1 %vm433_vm0, %v1229_v35 }
  0x5a   : > { %563 = vmatmul.mubr.bf16.gmra.mrb[24].mxu0 %v1231_v36  ;;  %627 = vmatmul.mubr.bf16.gmra.mrb[24].mxu1 %v1232_v37 }
  0x5b   : > { %1079 = vmatprep.mubr.msk.bf16.mxu0 %vm433_vm0, %v1233_v38  ;;  %1087 = vmatprep.mubr.msk.bf16.mxu1 %vm433_vm0, %v1235_v39 }
  0x62   : > { %571 = vmatmul.mubr.bf16.gmra.mrb[28].mxu0 %v1237_v40  ;;  %635 = vmatmul.mubr.bf16.gmra.mrb[28].mxu1 %v1238_v41 }
  0xfd   : > { %v516_v43 = vpop.f32.mrb[0].mxu0  ;;  %v580_v44 = vpop.f32.mrb[0].mxu1 }
  0xfe   : > { %v517_v45 = vadd.f32 %v1362_v42, %v516_v43  ;;  %v581_v46 = vadd.f32 %v1362_v42, %v580_v44  ;;  %v518_v47 = vpop.f32.mrb[1].mxu0  ;;  %v582_v48 = vpop.f32.mrb[1].mxu1 }
  0xff   : > { %v519_v49 = vpop.f32.mrb[2].mxu0  ;;  %v583_v50 = vpop.f32.mrb[2].mxu1 }
 0x100   : > { %v643_v51 = vadd.f32 3.0, %v517_v45  ;;  %v659_v52 = vadd.f32 3.0, %v581_v46  ;;  %v520_v53 = vadd.f32 %v1362_v42, %v519_v49  ;;  %v584_v54 = vadd.f32 %v1362_v42, %v583_v50  ;;  %v521_v55 = vpop.f32.mrb[3].mxu0  ;;  %v585_v56 = vpop.f32.mrb[3].mxu1 }
 0x102   : > { %v675_v57 = vmax.f32 %v643_v51, 0.0  ;;  %v691_v58 = vmax.f32 %v659_v52, 0.0  ;;  %v644_v59 = vadd.f32 3.0, %v520_v53  ;;  %v660_v60 = vadd.f32 3.0, %v584_v54 }
 0x104   : > { %v707_v61 = vmin.f32 %v675_v57, 6.0  ;;  %v723_v62 = vmin.f32 %v691_v58, 6.0  ;;  %v676_v63 = vmax.f32 %v644_v59, 0.0  ;;  %v692_v0 = vmax.f32 %v660_v60, 0.0 }
 0x105   : > { %v524_v1 = vpop.f32.mrb[4].mxu0  ;;  %v588_v2 = vpop.f32.mrb[4].mxu1 }
 0x106   : > { %v739_v3 = vmul.f32 %v707_v61, %v517_v45  ;;  %v755_v4 = vmul.f32 %v723_v62, %v581_v46  ;;  %v708_v5 = vmin.f32 %v676_v63, 6.0  ;;  %v724_v6 = vmin.f32 %v692_v0, 6.0  ;;  %v526_v7 = vpop.f32.mrb[5].mxu0  ;;  %v590_v8 = vpop.f32.mrb[5].mxu1 }
 0x107   : > { %v525_v9 = vadd.f32 %v1362_v42, %v524_v1  ;;  %v589_v10 = vadd.f32 %v1362_v42, %v588_v2  ;;  %v527_v11 = vpop.f32.mrb[6].mxu0  ;;  %v591_v12 = vpop.f32.mrb[6].mxu1 }
 0x108   : > { %v771_v13 = vmul.f32 0.16666667, %v739_v3  ;;  %v787_v14 = vmul.f32 0.16666667, %v755_v4  ;;  %v740_v15 = vmul.f32 %v708_v5, %v520_v53  ;;  %v756_v16 = vmul.f32 %v724_v6, %v584_v54  ;;  %v529_v17 = vpop.f32.mrb[7].mxu0  ;;  %v593_v18 = vpop.f32.mrb[7].mxu1 }
 0x109   : > { %v645_v19 = vadd.f32 3.0, %v525_v9  ;;  %v661_v20 = vadd.f32 3.0, %v589_v10  ;;  %v528_v21 = vadd.f32 %v1362_v42, %v527_v11  ;;  %v592_v22 = vadd.f32 %v1362_v42, %v591_v12 }
 0x10a   : > { %v1123_v23 = vpack.c.bf16 %v771_v13, %v771_v13  ;;  %v1139_v24 = vpack.c.bf16 %v787_v14, %v787_v14  ;;  %v772_v25 = vmul.f32 0.16666667, %v740_v15  ;;  %v788_v26 = vmul.f32 0.16666667, %v756_v16 }
 0x10b   : > { %v677_v27 = vmax.f32 %v645_v19, 0.0  ;;  %v693_v28 = vmax.f32 %v661_v20, 0.0  ;;  %v646_v29 = vadd.f32 3.0, %v528_v21  ;;  %v662_v30 = vadd.f32 3.0, %v592_v22 }
 0x10c   : > { %932 = vst.msk [vmem:[%s1374_s16] sm:$0xf] %vm931_vm1, %v1123_v23  ;;  %948 = vst.msk [vmem:[%s1374_s16 + $0x40] sm:$0xf] %vm931_vm1, %v1139_v24  ;;  %v1124_v31 = vpack.c.bf16 %v772_v25, %v772_v25  ;;  %v1140_v32 = vpack.c.bf16 %v788_v26, %v788_v26 }
 0x10d   : > { %v709_v33 = vmin.f32 %v677_v27, 6.0  ;;  %v725_v34 = vmin.f32 %v693_v28, 6.0  ;;  %v678_v35 = vmax.f32 %v646_v29, 0.0  ;;  %v694_v36 = vmax.f32 %v662_v30, 0.0  ;;  %v532_v37 = vpop.f32.mrb[8].mxu0  ;;  %v596_v38 = vpop.f32.mrb[8].mxu1 }
 0x10e   : > { %933 = vst.msk [vmem:[%s1374_s16 + $0x4] sm:$0xf] %vm931_vm1, %v1124_v31  ;;  %949 = vst.msk [vmem:[%s1374_s16 + $0x44] sm:$0xf] %vm931_vm1, %v1140_v32  ;;  %v533_v39 = vadd.f32 %v1362_v42, %v532_v37  ;;  %v597_v40 = vadd.f32 %v1362_v42, %v596_v38  ;;  %v534_v41 = vpop.f32.mrb[9].mxu0  ;;  %v598_v43 = vpop.f32.mrb[9].mxu1 }
 0x10f   : > { %v741_v44 = vmul.f32 %v709_v33, %v525_v9  ;;  %v757_v45 = vmul.f32 %v725_v34, %v589_v10  ;;  %v710_v46 = vmin.f32 %v678_v35, 6.0  ;;  %v726_v47 = vmin.f32 %v694_v36, 6.0  ;;  %v535_v48 = vpop.f32.mrb[10].mxu0  ;;  %v599_v49 = vpop.f32.mrb[10].mxu1 }
 0x110   : > { %v647_v50 = vadd.f32 3.0, %v533_v39  ;;  %v663_v51 = vadd.f32 3.0, %v597_v40  ;;  %v536_v52 = vadd.f32 %v1362_v42, %v535_v48  ;;  %v600_v53 = vadd.f32 %v1362_v42, %v599_v49  ;;  %v537_v54 = vpop.f32.mrb[11].mxu0  ;;  %v601_v55 = vpop.f32.mrb[11].mxu1 }
 0x111   : > { %v773_v56 = vmul.f32 0.16666667, %v741_v44  ;;  %v789_v57 = vmul.f32 0.16666667, %v757_v45  ;;  %v742_v58 = vmul.f32 %v710_v46, %v528_v21  ;;  %v758_v59 = vmul.f32 %v726_v47, %v592_v22 }
 0x112   : > { %v679_v60 = vmax.f32 %v647_v50, 0.0  ;;  %v695_v61 = vmax.f32 %v663_v51, 0.0  ;;  %v648_v62 = vadd.f32 3.0, %v536_v52  ;;  %v664_v63 = vadd.f32 3.0, %v600_v53 }
 0x113   : > { %v1125_v0 = vpack.c.bf16 %v773_v56, %v773_v56  ;;  %v1141_v1 = vpack.c.bf16 %v789_v57, %v789_v57  ;;  %v774_v2 = vmul.f32 0.16666667, %v742_v58  ;;  %v790_v3 = vmul.f32 0.16666667, %v758_v59 }
 0x114   : > { %v711_v4 = vmin.f32 %v679_v60, 6.0  ;;  %v727_v5 = vmin.f32 %v695_v61, 6.0  ;;  %v680_v6 = vmax.f32 %v648_v62, 0.0  ;;  %v696_v7 = vmax.f32 %v664_v63, 0.0 }
 0x115   : > { %934 = vst.msk [vmem:[%s1374_s16 + $0x8] sm:$0xf] %vm931_vm1, %v1125_v0  ;;  %950 = vst.msk [vmem:[%s1374_s16 + $0x48] sm:$0xf] %vm931_vm1, %v1141_v1  ;;  %v1126_v8 = vpack.c.bf16 %v774_v2, %v774_v2  ;;  %v1142_v9 = vpack.c.bf16 %v790_v3, %v790_v3  ;;  %v540_v10 = vpop.f32.mrb[12].mxu0  ;;  %v604_v11 = vpop.f32.mrb[12].mxu1 }
 0x116   : > { %v743_v12 = vmul.f32 %v711_v4, %v533_v39  ;;  %v759_v13 = vmul.f32 %v727_v5, %v597_v40  ;;  %v712_v14 = vmin.f32 %v680_v6, 6.0  ;;  %v728_v15 = vmin.f32 %v696_v7, 6.0  ;;  %v542_v16 = vpop.f32.mrb[13].mxu0  ;;  %v606_v17 = vpop.f32.mrb[13].mxu1 }
 0x117   : > { %935 = vst.msk [vmem:[%s1374_s16 + $0xc] sm:$0xf] %vm931_vm1, %v1126_v8  ;;  %951 = vst.msk [vmem:[%s1374_s16 + $0x4c] sm:$0xf] %vm931_vm1, %v1142_v9  ;;  %v541_v18 = vadd.f32 %v1362_v42, %v540_v10  ;;  %v605_v19 = vadd.f32 %v1362_v42, %v604_v11  ;;  %v543_v20 = vpop.f32.mrb[14].mxu0  ;;  %v607_v21 = vpop.f32.mrb[14].mxu1 }
 0x118   : > { %v775_v22 = vmul.f32 0.16666667, %v743_v12  ;;  %v791_v23 = vmul.f32 0.16666667, %v759_v13  ;;  %v744_v24 = vmul.f32 %v712_v14, %v536_v52  ;;  %v760_v25 = vmul.f32 %v728_v15, %v600_v53  ;;  %v545_v26 = vpop.f32.mrb[15].mxu0  ;;  %v609_v27 = vpop.f32.mrb[15].mxu1 }
 0x119   : > { %v649_v28 = vadd.f32 3.0, %v541_v18  ;;  %v665_v29 = vadd.f32 3.0, %v605_v19  ;;  %v544_v30 = vadd.f32 %v1362_v42, %v543_v20  ;;  %v608_v31 = vadd.f32 %v1362_v42, %v607_v21 }
 0x11a   : > { %v1127_v32 = vpack.c.bf16 %v775_v22, %v775_v22  ;;  %v1143_v33 = vpack.c.bf16 %v791_v23, %v791_v23  ;;  %v776_v34 = vmul.f32 0.16666667, %v744_v24  ;;  %v792_v35 = vmul.f32 0.16666667, %v760_v25 }
 0x11b   : > { %v681_v36 = vmax.f32 %v649_v28, 0.0  ;;  %v697_v37 = vmax.f32 %v665_v29, 0.0  ;;  %v650_v38 = vadd.f32 3.0, %v544_v30  ;;  %v666_v39 = vadd.f32 3.0, %v608_v31 }
 0x11c   : > { %936 = vst.msk [vmem:[%s1374_s16 + $0x10] sm:$0xf] %vm931_vm1, %v1127_v32  ;;  %952 = vst.msk [vmem:[%s1374_s16 + $0x50] sm:$0xf] %vm931_vm1, %v1143_v33  ;;  %v1128_v40 = vpack.c.bf16 %v776_v34, %v776_v34  ;;  %v1144_v41 = vpack.c.bf16 %v792_v35, %v792_v35 }
 0x11d   : > { %v713_v43 = vmin.f32 %v681_v36, 6.0  ;;  %v729_v44 = vmin.f32 %v697_v37, 6.0  ;;  %v682_v45 = vmax.f32 %v650_v38, 0.0  ;;  %v698_v46 = vmax.f32 %v666_v39, 0.0  ;;  %v548_v47 = vpop.f32.mrb[16].mxu0  ;;  %v612_v48 = vpop.f32.mrb[16].mxu1 }
 0x11e   : > { %937 = vst.msk [vmem:[%s1374_s16 + $0x14] sm:$0xf] %vm931_vm1, %v1128_v40  ;;  %953 = vst.msk [vmem:[%s1374_s16 + $0x54] sm:$0xf] %vm931_vm1, %v1144_v41  ;;  %v549_v49 = vadd.f32 %v1362_v42, %v548_v47  ;;  %v613_v50 = vadd.f32 %v1362_v42, %v612_v48  ;;  %v550_v51 = vpop.f32.mrb[17].mxu0  ;;  %v614_v52 = vpop.f32.mrb[17].mxu1 }
 0x11f   : > { %v745_v53 = vmul.f32 %v713_v43, %v541_v18  ;;  %v761_v54 = vmul.f32 %v729_v44, %v605_v19  ;;  %v714_v55 = vmin.f32 %v682_v45, 6.0  ;;  %v730_v56 = vmin.f32 %v698_v46, 6.0  ;;  %v551_v57 = vpop.f32.mrb[18].mxu0  ;;  %v615_v58 = vpop.f32.mrb[18].mxu1 }
 0x120   : > { %v651_v59 = vadd.f32 3.0, %v549_v49  ;;  %v667_v60 = vadd.f32 3.0, %v613_v50  ;;  %v552_v61 = vadd.f32 %v1362_v42, %v551_v57  ;;  %v616_v62 = vadd.f32 %v1362_v42, %v615_v58  ;;  %v553_v63 = vpop.f32.mrb[19].mxu0  ;;  %v617_v0 = vpop.f32.mrb[19].mxu1 }
 0x121   : > { %v777_v1 = vmul.f32 0.16666667, %v745_v53  ;;  %v793_v2 = vmul.f32 0.16666667, %v761_v54  ;;  %v746_v3 = vmul.f32 %v714_v55, %v544_v30  ;;  %v762_v4 = vmul.f32 %v730_v56, %v608_v31 }
 0x122   : > { %v683_v5 = vmax.f32 %v651_v59, 0.0  ;;  %v699_v6 = vmax.f32 %v667_v60, 0.0  ;;  %v652_v7 = vadd.f32 3.0, %v552_v61  ;;  %v668_v8 = vadd.f32 3.0, %v616_v62 }
 0x123   : > { %v1129_v9 = vpack.c.bf16 %v777_v1, %v777_v1  ;;  %v1145_v10 = vpack.c.bf16 %v793_v2, %v793_v2  ;;  %v778_v11 = vmul.f32 0.16666667, %v746_v3  ;;  %v794_v12 = vmul.f32 0.16666667, %v762_v4 }
 0x124   : > { %v715_v13 = vmin.f32 %v683_v5, 6.0  ;;  %v731_v14 = vmin.f32 %v699_v6, 6.0  ;;  %v684_v15 = vmax.f32 %v652_v7, 0.0  ;;  %v700_v16 = vmax.f32 %v668_v8, 0.0 }
 0x125   : > { %938 = vst.msk [vmem:[%s1374_s16 + $0x18] sm:$0xf] %vm931_vm1, %v1129_v9  ;;  %954 = vst.msk [vmem:[%s1374_s16 + $0x58] sm:$0xf] %vm931_vm1, %v1145_v10  ;;  %v1130_v17 = vpack.c.bf16 %v778_v11, %v778_v11  ;;  %v1146_v18 = vpack.c.bf16 %v794_v12, %v794_v12  ;;  %v556_v19 = vpop.f32.mrb[20].mxu0  ;;  %v620_v20 = vpop.f32.mrb[20].mxu1 }
 0x126   : > { %v747_v21 = vmul.f32 %v715_v13, %v549_v49  ;;  %v763_v22 = vmul.f32 %v731_v14, %v613_v50  ;;  %v716_v23 = vmin.f32 %v684_v15, 6.0  ;;  %v732_v24 = vmin.f32 %v700_v16, 6.0  ;;  %v558_v25 = vpop.f32.mrb[21].mxu0  ;;  %v622_v26 = vpop.f32.mrb[21].mxu1 }
 0x127   : > { %939 = vst.msk [vmem:[%s1374_s16 + $0x1c] sm:$0xf] %vm931_vm1, %v1130_v17  ;;  %955 = vst.msk [vmem:[%s1374_s16 + $0x5c] sm:$0xf] %vm931_vm1, %v1146_v18  ;;  %v557_v27 = vadd.f32 %v1362_v42, %v556_v19  ;;  %v621_v28 = vadd.f32 %v1362_v42, %v620_v20  ;;  %v559_v29 = vpop.f32.mrb[22].mxu0  ;;  %v623_v30 = vpop.f32.mrb[22].mxu1 }
 0x128   : > { %v779_v31 = vmul.f32 0.16666667, %v747_v21  ;;  %v795_v32 = vmul.f32 0.16666667, %v763_v22  ;;  %v748_v33 = vmul.f32 %v716_v23, %v552_v61  ;;  %v764_v34 = vmul.f32 %v732_v24, %v616_v62  ;;  %v561_v35 = vpop.f32.mrb[23].mxu0  ;;  %v625_v36 = vpop.f32.mrb[23].mxu1 }
 0x129   : > { %v653_v37 = vadd.f32 3.0, %v557_v27  ;;  %v669_v38 = vadd.f32 3.0, %v621_v28  ;;  %v560_v39 = vadd.f32 %v1362_v42, %v559_v29  ;;  %v624_v40 = vadd.f32 %v1362_v42, %v623_v30 }
 0x12a   : > { %v1131_v41 = vpack.c.bf16 %v779_v31, %v779_v31  ;;  %v1147_v43 = vpack.c.bf16 %v795_v32, %v795_v32  ;;  %v780_v44 = vmul.f32 0.16666667, %v748_v33  ;;  %v796_v45 = vmul.f32 0.16666667, %v764_v34 }
 0x12b   : > { %v685_v46 = vmax.f32 %v653_v37, 0.0  ;;  %v701_v47 = vmax.f32 %v669_v38, 0.0  ;;  %v654_v48 = vadd.f32 3.0, %v560_v39  ;;  %v670_v49 = vadd.f32 3.0, %v624_v40 }
 0x12c   : > { %940 = vst.msk [vmem:[%s1374_s16 + $0x20] sm:$0xf] %vm931_vm1, %v1131_v41  ;;  %956 = vst.msk [vmem:[%s1374_s16 + $0x60] sm:$0xf] %vm931_vm1, %v1147_v43  ;;  %v1132_v50 = vpack.c.bf16 %v780_v44, %v780_v44  ;;  %v1148_v51 = vpack.c.bf16 %v796_v45, %v796_v45 }
 0x12d   : > { %v717_v52 = vmin.f32 %v685_v46, 6.0  ;;  %v733_v53 = vmin.f32 %v701_v47, 6.0  ;;  %v686_v54 = vmax.f32 %v654_v48, 0.0  ;;  %v702_v55 = vmax.f32 %v670_v49, 0.0  ;;  %v564_v56 = vpop.f32.mrb[24].mxu0  ;;  %v628_v57 = vpop.f32.mrb[24].mxu1 }
 0x12e   : > { %941 = vst.msk [vmem:[%s1374_s16 + $0x24] sm:$0xf] %vm931_vm1, %v1132_v50  ;;  %957 = vst.msk [vmem:[%s1374_s16 + $0x64] sm:$0xf] %vm931_vm1, %v1148_v51  ;;  %v565_v58 = vadd.f32 %v1362_v42, %v564_v56  ;;  %v629_v59 = vadd.f32 %v1362_v42, %v628_v57  ;;  %v566_v60 = vpop.f32.mrb[25].mxu0  ;;  %v630_v61 = vpop.f32.mrb[25].mxu1 }
 0x12f   : > { %v749_v62 = vmul.f32 %v717_v52, %v557_v27  ;;  %v765_v63 = vmul.f32 %v733_v53, %v621_v28  ;;  %v718_v0 = vmin.f32 %v686_v54, 6.0  ;;  %v734_v1 = vmin.f32 %v702_v55, 6.0  ;;  %v567_v2 = vpop.f32.mrb[26].mxu0  ;;  %v631_v3 = vpop.f32.mrb[26].mxu1 }
 0x130   : > { %v655_v4 = vadd.f32 3.0, %v565_v58  ;;  %v671_v5 = vadd.f32 3.0, %v629_v59  ;;  %v568_v6 = vadd.f32 %v1362_v42, %v567_v2  ;;  %v632_v7 = vadd.f32 %v1362_v42, %v631_v3  ;;  %v569_v8 = vpop.f32.mrb[27].mxu0  ;;  %v633_v9 = vpop.f32.mrb[27].mxu1 }
 0x131   : > { %v781_v10 = vmul.f32 0.16666667, %v749_v62  ;;  %v797_v11 = vmul.f32 0.16666667, %v765_v63  ;;  %v750_v12 = vmul.f32 %v718_v0, %v560_v39  ;;  %v766_v13 = vmul.f32 %v734_v1, %v624_v40 }
 0x132   : > { %v687_v14 = vmax.f32 %v655_v4, 0.0  ;;  %v703_v15 = vmax.f32 %v671_v5, 0.0  ;;  %v656_v16 = vadd.f32 3.0, %v568_v6  ;;  %v672_v17 = vadd.f32 3.0, %v632_v7 }
 0x133   : > { %v1133_v18 = vpack.c.bf16 %v781_v10, %v781_v10  ;;  %v1149_v19 = vpack.c.bf16 %v797_v11, %v797_v11  ;;  %v782_v20 = vmul.f32 0.16666667, %v750_v12  ;;  %v798_v21 = vmul.f32 0.16666667, %v766_v13 }
 0x134   : > { %v719_v22 = vmin.f32 %v687_v14, 6.0  ;;  %v735_v23 = vmin.f32 %v703_v15, 6.0  ;;  %v688_v24 = vmax.f32 %v656_v16, 0.0  ;;  %v704_v25 = vmax.f32 %v672_v17, 0.0 }
 0x135   : > { %942 = vst.msk [vmem:[%s1374_s16 + $0x28] sm:$0xf] %vm931_vm1, %v1133_v18  ;;  %958 = vst.msk [vmem:[%s1374_s16 + $0x68] sm:$0xf] %vm931_vm1, %v1149_v19  ;;  %v1134_v26 = vpack.c.bf16 %v782_v20, %v782_v20  ;;  %v1150_v27 = vpack.c.bf16 %v798_v21, %v798_v21  ;;  %v572_v28 = vpop.f32.mrb[28].mxu0  ;;  %v636_v29 = vpop.f32.mrb[28].mxu1 }
 0x136   : > { %v751_v30 = vmul.f32 %v719_v22, %v565_v58  ;;  %v767_v31 = vmul.f32 %v735_v23, %v629_v59  ;;  %v720_v32 = vmin.f32 %v688_v24, 6.0  ;;  %v736_v33 = vmin.f32 %v704_v25, 6.0  ;;  %v574_v34 = vpop.f32.mrb[29].mxu0  ;;  %v638_v35 = vpop.f32.mrb[29].mxu1 }
 0x137   : > { %943 = vst.msk [vmem:[%s1374_s16 + $0x2c] sm:$0xf] %vm931_vm1, %v1134_v26  ;;  %959 = vst.msk [vmem:[%s1374_s16 + $0x6c] sm:$0xf] %vm931_vm1, %v1150_v27  ;;  %v573_v36 = vadd.f32 %v1362_v42, %v572_v28  ;;  %v637_v37 = vadd.f32 %v1362_v42, %v636_v29  ;;  %v575_v38 = vpop.f32.mrb[30].mxu0  ;;  %v639_v39 = vpop.f32.mrb[30].mxu1 }
 0x138   : > { %v783_v40 = vmul.f32 0.16666667, %v751_v30  ;;  %v799_v41 = vmul.f32 0.16666667, %v767_v31  ;;  %v752_v43 = vmul.f32 %v720_v32, %v568_v6  ;;  %v768_v44 = vmul.f32 %v736_v33, %v632_v7  ;;  %v577_v45 = vpop.f32.mrb[31].mxu0  ;;  %v641_v46 = vpop.f32.mrb[31].mxu1 }
 0x139   : > { %v657_v47 = vadd.f32 3.0, %v573_v36  ;;  %v673_v48 = vadd.f32 3.0, %v637_v37  ;;  %v576_v49 = vadd.f32 %v1362_v42, %v575_v38  ;;  %v640_v50 = vadd.f32 %v1362_v42, %v639_v39 }
 0x13a   : > { %v1135_v51 = vpack.c.bf16 %v783_v40, %v783_v40  ;;  %v1151_v52 = vpack.c.bf16 %v799_v41, %v799_v41  ;;  %v784_v53 = vmul.f32 0.16666667, %v752_v43  ;;  %v800_v54 = vmul.f32 0.16666667, %v768_v44 }
 0x13b   : > { %v689_v55 = vmax.f32 %v657_v47, 0.0  ;;  %v705_v56 = vmax.f32 %v673_v48, 0.0  ;;  %v658_v57 = vadd.f32 3.0, %v576_v49  ;;  %v674_v58 = vadd.f32 3.0, %v640_v50 }
 0x13c   : > { %944 = vst.msk [vmem:[%s1374_s16 + $0x30] sm:$0xf] %vm931_vm1, %v1135_v51  ;;  %960 = vst.msk [vmem:[%s1374_s16 + $0x70] sm:$0xf] %vm931_vm1, %v1151_v52  ;;  %v1136_v59 = vpack.c.bf16 %v784_v53, %v784_v53  ;;  %v1152_v60 = vpack.c.bf16 %v800_v54, %v800_v54 }
 0x13d   : > { %v721_v61 = vmin.f32 %v689_v55, 6.0  ;;  %v737_v62 = vmin.f32 %v705_v56, 6.0  ;;  %v690_v63 = vmax.f32 %v658_v57, 0.0  ;;  %v706_v42 = vmax.f32 %v674_v58, 0.0 }
 0x13e   : > { %945 = vst.msk [vmem:[%s1374_s16 + $0x34] sm:$0xf] %vm931_vm1, %v1136_v59  ;;  %961 = vst.msk [vmem:[%s1374_s16 + $0x74] sm:$0xf] %vm931_vm1, %v1152_v60 }
 0x13f   : > { %v753_v0 = vmul.f32 %v721_v61, %v573_v36  ;;  %v769_v1 = vmul.f32 %v737_v62, %v637_v37  ;;  %v722_v2 = vmin.f32 %v690_v63, 6.0  ;;  %v738_v3 = vmin.f32 %v706_v42, 6.0 }
 0x141   : > { %v785_v4 = vmul.f32 0.16666667, %v753_v0  ;;  %v801_v5 = vmul.f32 0.16666667, %v769_v1  ;;  %v754_v6 = vmul.f32 %v722_v2, %v576_v49  ;;  %v770_v7 = vmul.f32 %v738_v3, %v640_v50 }
 0x143   : > { %v1137_v8 = vpack.c.bf16 %v785_v4, %v785_v4  ;;  %v1153_v9 = vpack.c.bf16 %v801_v5, %v801_v5  ;;  %v786_v10 = vmul.f32 0.16666667, %v754_v6  ;;  %v802_v11 = vmul.f32 0.16666667, %v770_v7 }
 0x145   : > { %946 = vst.msk [vmem:[%s1374_s16 + $0x38] sm:$0xf] %vm931_vm1, %v1137_v8  ;;  %962 = vst.msk [vmem:[%s1374_s16 + $0x78] sm:$0xf] %vm931_vm1, %v1153_v9  ;;  %v1138_v12 = vpack.c.bf16 %v786_v10, %v786_v10  ;;  %v1154_v13 = vpack.c.bf16 %v802_v11, %v802_v11 }
 0x147   : > { %947 = vst.msk [vmem:[%s1374_s16 + $0x3c] sm:$0xf] %vm931_vm1, %v1138_v12  ;;  %963 = vst.msk [vmem:[%s1374_s16 + $0x7c] sm:$0xf] %vm931_vm1, %v1154_v13 }
 0x148 PF: > { %s13_s12 = sadd.s32 1, %s1245_s12  }
 0x149   : > { %p10_p4 = scmp.ge.s32.totalorder %s13_s12, 4  }
 0x14b   :  { %12 = sbr.rel (!%p10_p4) target bundleno = 1 (0x1), region = 62 }

// kernel: custom_levit_forward.32
= control target key start
LH: loop header
LB: loop body
LE: loop exit
PB: predicated region body
PF: predicated region fallthrough
CT: control target
= control target key end

     0   :  { %vm318_vm0 = vcmask 261120   ;;  %vm681_vm1 = vcmask 519168   ;;  %s1202_s1 = inlined_call_operand.vmem [shape: bf16[288,64], index: 1, kind: input, shape index: {}]   ;;  %s1203_s0 = inlined_call_operand.vmem [shape: bf16[128,288], index: 0, kind: input, shape index: {}]   ;;  %s1204_s2 = inlined_call_operand.vmem [shape: f32[1,64], index: 2, kind: input, shape index: {}]   ;;  %s1205_s3 = inlined_call_operand.vmem [shape: bf16[128,64], index: 3, kind: output, shape index: {}]  }
   0x1   :  { %v895_v0 = vld [vmem:[%s1202_s1 + $0x40] sm:$0xff]   ;;  %v897_v2 = vld [vmem:[%s1202_s1 + $0x48] sm:$0xff]   ;;  %v899_v4 = vld [vmem:[%s1202_s1 + $0x50] sm:$0xff]  }
   0x2   :  { %v896_v1 = vld [vmem:[%s1202_s1] sm:$0xff]   ;;  %785 = vmatprep.subr.bf16.mxu0 %v895_v0  ;;  %879 = vmatprep.subr.bf16.mxu1 %v895_v0  ;;  %v898_v3 = vld [vmem:[%s1202_s1 + $0x8] sm:$0xff]   ;;  %v900_v5 = vld [vmem:[%s1202_s1 + $0x10] sm:$0xff]  }
   0x3   :  { %786 = vmatpush3.bf16.msra.mxu0 %v896_v1  ;;  %887 = vmatpush3.bf16.msra.mxu1 %v896_v1  ;;  %v901_v6 = vld [vmem:[%s1202_s1 + $0x58] sm:$0xff]   ;;  %v903_v8 = vld [vmem:[%s1202_s1 + $0x60] sm:$0xff]   ;;  %v905_v10 = vld [vmem:[%s1202_s1 + $0x68] sm:$0xff]  }
   0x4   :  { %787 = vmatprep.subr.bf16.mxu0 %v897_v2  ;;  %880 = vmatprep.subr.bf16.mxu1 %v897_v2  ;;  %v902_v7 = vld [vmem:[%s1202_s1 + $0x18] sm:$0xff]   ;;  %v904_v9 = vld [vmem:[%s1202_s1 + $0x20] sm:$0xff]   ;;  %v906_v13 = vld [vmem:[%s1202_s1 + $0x28] sm:$0xff]  }
   0x5   :  { %v913_v11 = vld [vmem:[%s1203_s0 + $0x4] ss:$12 sps:$4 sm:$0xff]   ;;  %v916_v12 = vld [vmem:[%s1203_s0 + $0x94] ss:$12 sps:$4 sm:$0xff]   ;;  %v909_v16 = vld [vmem:[%s1202_s1 + $0x78] sm:$0xff]  }
   0x6   :  { %v907_v14 = vld [vmem:[%s1202_s1 + $0x70] sm:$0xff]   ;;  %375 = vmatprep.mubr.bf16.mxu0 %v913_v11  ;;  %423 = vmatprep.mubr.bf16.mxu1 %v916_v12  ;;  %v910_v17 = vld [vmem:[%s1202_s1 + $0x38] sm:$0xff]   ;;  %v911_v18 = vld [vmem:[%s1203_s0] ss:$12 sps:$4 sm:$0xff]  }
   0x7   :  { %788 = vmatpush3.bf16.msra.mxu0 %v898_v3  ;;  %888 = vmatpush3.bf16.msra.mxu1 %v898_v3  ;;  %v908_v15 = vld [vmem:[%s1202_s1 + $0x30] sm:$0xff]   ;;  %v917_v19 = vld [vmem:[%s1202_s1 + $0x80] sm:$0xff]   ;;  %v918_v21 = vld [vmem:[%s1203_s0 + $0x1c] ss:$12 sps:$4 sm:$0xff]  }
   0x8   :  { %789 = vmatprep.subr.bf16.mxu0 %v899_v4  ;;  %881 = vmatprep.subr.bf16.mxu1 %v899_v4  ;;  %v914_v20 = vld [vmem:[%s1203_s0 + $0x90] ss:$12 sps:$4 sm:$0xff]   ;;  %v920_v22 = vld [vmem:[%s1203_s0 + $0xac] ss:$12 sps:$4 sm:$0xff]   ;;  %v923_v25 = vld [vmem:[%s1203_s0 + $0xa8] ss:$12 sps:$4 sm:$0xff]  }
   0x9   :  { %v924_v23 = vld [vmem:[%s1202_s1 + $0x88] sm:$0xff]   ;;  %v922_v24 = vld [vmem:[%s1203_s0 + $0x18] ss:$12 sps:$4 sm:$0xff]   ;;  %v925_v26 = vld [vmem:[%s1203_s0 + $0x34] ss:$12 sps:$4 sm:$0xff]  }
   0xa   :  { %v927_v27 = vld [vmem:[%s1203_s0 + $0x8] ss:$12 sps:$4 sm:$0xff]   ;;  %v928_v28 = vld [vmem:[%s1203_s0 + $0x30] ss:$12 sps:$4 sm:$0xff]   ;;  %v929_v29 = vld [vmem:[%s1203_s0 + $0x20] ss:$12 sps:$4 sm:$0xff]  }
   0xb   :  { %790 = vmatpush3.bf16.msra.mxu0 %v900_v5  ;;  %889 = vmatpush3.bf16.msra.mxu1 %v900_v5  ;;  %v930_v30 = vld [vmem:[%s1203_s0 + $0x4c] ss:$12 sps:$4 sm:$0xff]   ;;  %v933_v32 = vld [vmem:[%s1203_s0 + $0x48] ss:$12 sps:$4 sm:$0xff]   ;;  %v934_v33 = vld [vmem:[%s1203_s0 + $0x50] ss:$12 sps:$4 sm:$0xff]  }
   0xc   :  { %791 = vmatprep.subr.bf16.mxu0 %v901_v6  ;;  %882 = vmatprep.subr.bf16.mxu1 %v901_v6  ;;  %v932_v31 = vld [vmem:[%s1203_s0 + $0x38] ss:$12 sps:$4 sm:$0xff]   ;;  %v937_v35 = vld [vmem:[%s1203_s0 + $0x68] ss:$12 sps:$4 sm:$0xff]   ;;  %v938_v36 = vld [vmem:[%s1203_s0 + $0x60] ss:$12 sps:$4 sm:$0xff]  }
   0xd   :  { %v935_v34 = vld [vmem:[%s1203_s0 + $0x64] ss:$12 sps:$4 sm:$0xff]   ;;  %v939_v37 = vld [vmem:[%s1203_s0 + $0x80] ss:$12 sps:$4 sm:$0xff]   ;;  %v940_v38 = vld [vmem:[%s1203_s0 + $0x7c] ss:$12 sps:$4 sm:$0xff]  }
   0xe   :  { %v942_v39 = vld [vmem:[%s1203_s0 + $0x98] ss:$12 sps:$4 sm:$0xff]   ;;  %v944_v41 = vld [vmem:[%s1203_s0 + $0xb0] ss:$12 sps:$4 sm:$0xff]   ;;  %v1110_v2 = vld [vmem:[%s1204_s2] ss:$0 sm:$0xff] }
   0xf   :  { %792 = vmatpush3.bf16.msra.mxu0 %v902_v7  ;;  %890 = vmatpush3.bf16.msra.mxu1 %v902_v7  ;;  %v943_v40 = vld [vmem:[%s1203_s0 + $0x78] ss:$12 sps:$4 sm:$0xff]  }
  0x10   :  { %793 = vmatprep.subr.bf16.mxu0 %v903_v8  ;;  %883 = vmatprep.subr.bf16.mxu1 %v903_v8 }
  0x13   :  { %794 = vmatpush3.bf16.msra.mxu0 %v904_v9  ;;  %891 = vmatpush3.bf16.msra.mxu1 %v904_v9 }
  0x14   :  { %795 = vmatprep.subr.bf16.mxu0 %v905_v10  ;;  %884 = vmatprep.subr.bf16.mxu1 %v905_v10 }
  0x17   :  { %796 = vmatpush3.bf16.msra.mxu0 %v906_v13  ;;  %892 = vmatpush3.bf16.msra.mxu1 %v906_v13 }
  0x18   :  { %797 = vmatprep.subr.bf16.mxu0 %v907_v14  ;;  %885 = vmatprep.subr.bf16.mxu1 %v907_v14 }
  0x1b   :  { %798 = vmatpush3.bf16.msra.mxu0 %v908_v15  ;;  %893 = vmatpush3.bf16.msra.mxu1 %v908_v15 }
  0x1c   :  { %799 = vmatprep.subr.bf16.mxu0 %v909_v16  ;;  %886 = vmatprep.subr.bf16.mxu1 %v909_v16 }
  0x1f   :  { %800 = vmatpush3.bf16.msra.mxu0 %v910_v17  ;;  %894 = vmatpush3.bf16.msra.mxu1 %v910_v17 }
  0x20   :  { %859 = vmatprep.subr.bf16.mxu1 %v917_v19 }
  0x22   :  { %376 = vmatmul.mubr.bf16.vlgmr.msra.gmra.mrb[0].mxu0 %v911_v18  ;;  %424 = vmatmul.mubr.bf16.vlgmr.msra.gmra.mrb[0].mxu1 %v914_v20 }
  0x23   :  { %860 = vmatpush3.bf16.msra.mxu1 %v917_v19  ;;  %383 = vmatprep.mubr.bf16.mxu0 %v918_v21 }
  0x24   :  { %431 = vmatprep.mubr.bf16.mxu1 %v920_v22  ;;  %861 = vmatprep.subr.bf16.mxu1 %v924_v23 }
  0x27   :  { %862 = vmatpush3.bf16.msra.mxu1 %v924_v23 }
  0x2a   :  { %384 = vmatmul.mubr.bf16.gmra.mrb[4].mxu0 %v922_v24  ;;  %432 = vmatmul.mubr.bf16.gmra.mrb[4].mxu1 %v923_v25 }
  0x2b   :  { %391 = vmatprep.mubr.bf16.mxu0 %v925_v26  ;;  %863 = vmatprep.mubr.msk.bf16.mxu1 %vm318_vm0, %v927_v27 }
  0x32   :  { %392 = vmatmul.mubr.bf16.gmra.mrb[8].mxu0 %v928_v28  ;;  %864 = vmatmul.mubr.msk.bf16.vlgmr.msra.gmra.mrb[8].mxu1 %vm318_vm0, %v929_v29 }
  0x33   :  { %399 = vmatprep.mubr.bf16.mxu0 %v930_v30  ;;  %867 = vmatprep.mubr.msk.bf16.mxu1 %vm318_vm0, %v932_v31 }
  0x3a   :  { %400 = vmatmul.mubr.bf16.gmra.mrb[12].mxu0 %v933_v32  ;;  %868 = vmatmul.mubr.msk.bf16.gmra.mrb[12].mxu1 %vm318_vm0, %v934_v33 }
  0x3b   :  { %407 = vmatprep.mubr.bf16.mxu0 %v935_v34  ;;  %871 = vmatprep.mubr.msk.bf16.mxu1 %vm318_vm0, %v937_v35 }
  0x42   :  { %408 = vmatmul.mubr.bf16.gmra.mrb[16].mxu0 %v938_v36  ;;  %872 = vmatmul.mubr.msk.bf16.gmra.mrb[16].mxu1 %vm318_vm0, %v939_v37 }
  0x43   :  { %415 = vmatprep.mubr.bf16.mxu0 %v940_v38  ;;  %875 = vmatprep.mubr.msk.bf16.mxu1 %vm318_vm0, %v942_v39 }
  0x4a   :  { %416 = vmatmul.mubr.bf16.gmra.mrb[20].mxu0 %v943_v40  ;;  %876 = vmatmul.mubr.msk.bf16.gmra.mrb[20].mxu1 %vm318_vm0, %v944_v41 }
  0xf5   :  { %v801_v42 = vpop.f32.mrb[0].mxu0  ;;  %v837_v43 = vpop.f32.mrb[0].mxu1 }
  0xf6   :  { %v802_v44 = vpop.f32.mrb[1].mxu0  ;;  %v838_v45 = vpop.f32.mrb[1].mxu1 }
  0xf7   :  { %v803_v46 = vadd.f32 %v802_v44, %v801_v42  ;;  %v804_v47 = vpop.f32.mrb[2].mxu0  ;;  %v1099_v48 = vadd.f32 %v838_v45, %v837_v43  ;;  %v840_v49 = vpop.f32.mrb[2].mxu1 }
  0xf8   :  { %v805_v50 = vpop.f32.mrb[3].mxu0  ;;  %v841_v51 = vpop.f32.mrb[3].mxu1 }
  0xf9   :  { %v806_v52 = vadd.f32 %v805_v50, %v804_v47  ;;  %v1101_v53 = vadd.f32 %v841_v51, %v840_v49  ;;  %v378_v6 = vadd.f32 %v803_v46, %v1110_v2 }
  0xfb   :  { %v381_v15 = vadd.f32 %v806_v52, %v1110_v2 }
  0xfd   :  { %v807_v54 = vpop.f32.mrb[4].mxu0  ;;  %v843_v55 = vpop.f32.mrb[4].mxu1 }
  0xfe   :  { %v808_v56 = vpop.f32.mrb[5].mxu0  ;;  %v844_v57 = vpop.f32.mrb[5].mxu1 }
  0xff   :  { %v809_v58 = vadd.f32 %v808_v56, %v807_v54  ;;  %v810_v59 = vpop.f32.mrb[6].mxu0  ;;  %v1103_v60 = vadd.f32 %v844_v57, %v843_v55  ;;  %v846_v61 = vpop.f32.mrb[6].mxu1 }
 0x100   :  { %v811_v62 = vpop.f32.mrb[7].mxu0  ;;  %v847_v63 = vpop.f32.mrb[7].mxu1 }
 0x101   :  { %v812_v0 = vadd.f32 %v811_v62, %v810_v59  ;;  %v1105_v1 = vadd.f32 %v847_v63, %v846_v61  ;;  %v386_v3 = vadd.f32 %v809_v58, %v1110_v2 }
 0x103   :  { %v389_v10 = vadd.f32 %v812_v0, %v1110_v2 }
 0x105   :  { %v813_v4 = vpop.f32.mrb[8].mxu0  ;;  %v865_v5 = vpop.f32.mrb[8].mxu1 }
 0x106   :  { %v483_v7 = vadd.f32 %v865_v5, %v386_v3  ;;  %v814_v8 = vpop.f32.mrb[9].mxu0  ;;  %v474_v9 = vpop.f32.mrb[9].mxu1 }
 0x107   :  { %v815_v11 = vadd.f32 %v814_v8, %v813_v4  ;;  %v475_v12 = vadd.f32 %v474_v9, %v378_v6  ;;  %v816_v13 = vpop.f32.mrb[10].mxu0  ;;  %v866_v14 = vpop.f32.mrb[10].mxu1 }
 0x108   :  { %v539_v16 = vadd.f32 3.0, %v483_v7  ;;  %v486_v17 = vadd.f32 %v866_v14, %v389_v10  ;;  %v817_v18 = vpop.f32.mrb[11].mxu0  ;;  %v477_v19 = vpop.f32.mrb[11].mxu1 }
 0x109   :  { %v537_v20 = vadd.f32 3.0, %v475_v12  ;;  %v818_v21 = vadd.f32 %v817_v18, %v816_v13  ;;  %v478_v22 = vadd.f32 %v477_v19, %v381_v15  ;;  %v394_v33 = vadd.f32 %v815_v11, %v1110_v2 }
 0x10a   :  { %v555_v23 = vmax.f32 %v539_v16, 0.0  ;;  %v540_v24 = vadd.f32 3.0, %v486_v17 }
 0x10b   :  { %v553_v25 = vmax.f32 %v537_v20, 0.0  ;;  %v538_v26 = vadd.f32 3.0, %v478_v22  ;;  %v397_v47 = vadd.f32 %v818_v21, %v1110_v2 }
 0x10c   :  { %v571_v27 = vmin.f32 %v555_v23, 6.0  ;;  %v556_v28 = vmax.f32 %v540_v24, 0.0 }
 0x10d   :  { %v569_v29 = vmin.f32 %v553_v25, 6.0  ;;  %v554_v30 = vmax.f32 %v538_v26, 0.0  ;;  %v819_v31 = vpop.f32.mrb[12].mxu0  ;;  %v869_v32 = vpop.f32.mrb[12].mxu1 }
 0x10e   :  { %v587_v34 = vmul.f32 %v571_v27, %v483_v7  ;;  %v572_v35 = vmin.f32 %v556_v28, 6.0  ;;  %v820_v36 = vpop.f32.mrb[13].mxu0  ;;  %v490_v37 = vpop.f32.mrb[13].mxu1 }
 0x10f   :  { %v585_v38 = vmul.f32 %v569_v29, %v475_v12  ;;  %v570_v39 = vmin.f32 %v554_v30, 6.0  ;;  %v821_v40 = vadd.f32 %v820_v36, %v819_v31  ;;  %v491_v41 = vadd.f32 %v490_v37, %v394_v33  ;;  %v822_v42 = vpop.f32.mrb[14].mxu0  ;;  %v870_v43 = vpop.f32.mrb[14].mxu1 }
 0x110   :  { %v603_v44 = vmul.f32 0.16666667, %v587_v34  ;;  %v588_v45 = vmul.f32 %v572_v35, %v486_v17  ;;  %v823_v46 = vpop.f32.mrb[15].mxu0  ;;  %v493_v49 = vpop.f32.mrb[15].mxu1  ;;  %v434_v35 = vadd.f32 %v1103_v60, %v1110_v2  ;;  %v426_v36 = vadd.f32 %v1099_v48, %v1110_v2 }
 0x111   :  { %v601_v50 = vmul.f32 0.16666667, %v585_v38  ;;  %v586_v51 = vmul.f32 %v570_v39, %v478_v22  ;;  %v402_v52 = vadd.f32 %v821_v40, %v1110_v2  ;;  %v541_v54 = vadd.f32 3.0, %v491_v41 }
 0x112   :  { %v771_v55 = vpack.c.bf16 %v603_v44, %v603_v44  ;;  %v604_v56 = vmul.f32 0.16666667, %v588_v45  ;;  %v824_v57 = vadd.f32 %v823_v46, %v822_v42  ;;  %v494_v58 = vadd.f32 %v493_v49, %v397_v47 }
 0x113   :  { %v769_v59 = vpack.c.bf16 %v601_v50, %v601_v50  ;;  %v602_v61 = vmul.f32 0.16666667, %v586_v51  ;;  %v499_v62 = vadd.f32 %v869_v32, %v402_v52  ;;  %v557_v63 = vmax.f32 %v541_v54, 0.0 }
 0x114   :  { %684 = vst.msk [vmem:[%s1205_s3 + $0x8] sm:$0xf] %vm681_vm1, %v771_v55  ;;  %v772_v0 = vpack.c.bf16 %v604_v56, %v604_v56  ;;  %v405_v3 = vadd.f32 %v824_v57, %v1110_v2  ;;  %v542_v4 = vadd.f32 3.0, %v494_v58  ;;  %v429_v42 = vadd.f32 %v1101_v53, %v1110_v2 }
 0x115   :  { %682 = vst.msk [vmem:[%s1205_s3] sm:$0xf] %vm681_vm1, %v769_v59  ;;  %v770_v5 = vpack.c.bf16 %v602_v61, %v602_v61  ;;  %v543_v6 = vadd.f32 3.0, %v499_v62  ;;  %v573_v7 = vmin.f32 %v557_v63, 6.0  ;;  %v825_v8 = vpop.f32.mrb[16].mxu0  ;;  %v1128_v9 = vpop.f32.mrb[16].mxu1  ;;  %v437_v48 = vadd.f32 %v1105_v1, %v1110_v2 }
 0x116   :  { %685 = vst.msk [vmem:[%s1205_s3 + $0xc] sm:$0xf] %vm681_vm1, %v772_v0  ;;  %v502_v10 = vadd.f32 %v870_v43, %v405_v3  ;;  %v558_v11 = vmax.f32 %v542_v4, 0.0  ;;  %v826_v12 = vpop.f32.mrb[17].mxu0  ;;  %v506_v13 = vpop.f32.mrb[17].mxu1 }
 0x117   :  { %683 = vst.msk [vmem:[%s1205_s3 + $0x4] sm:$0xf] %vm681_vm1, %v770_v5  ;;  %v559_v14 = vmax.f32 %v543_v6, 0.0  ;;  %v589_v15 = vmul.f32 %v573_v7, %v491_v41  ;;  %v827_v16 = vadd.f32 %v826_v12, %v825_v8  ;;  %v828_v17 = vpop.f32.mrb[18].mxu0  ;;  %v1138_v18 = vpop.f32.mrb[18].mxu1 }
 0x118   :  { %v544_v19 = vadd.f32 3.0, %v502_v10  ;;  %v574_v20 = vmin.f32 %v558_v11, 6.0  ;;  %v829_v21 = vpop.f32.mrb[19].mxu0  ;;  %v509_v22 = vpop.f32.mrb[19].mxu1 }
 0x119   :  { %v575_v23 = vmin.f32 %v559_v14, 6.0  ;;  %v605_v24 = vmul.f32 0.16666667, %v589_v15  ;;  %v410_v25 = vadd.f32 %v827_v16, %v1110_v2  ;;  %v830_v26 = vadd.f32 %v829_v21, %v828_v17 }
 0x11a   :  { %v560_v27 = vmax.f32 %v544_v19, 0.0  ;;  %v590_v28 = vmul.f32 %v574_v20, %v494_v58 }
 0x11b   :  { %v591_v29 = vmul.f32 %v575_v23, %v499_v62  ;;  %v773_v30 = vpack.c.bf16 %v605_v24, %v605_v24  ;;  %v507_v31 = vadd.f32 %v506_v13, %v410_v25  ;;  %v413_v32 = vadd.f32 %v830_v26, %v1110_v2 }
 0x11c   :  { %v576_v33 = vmin.f32 %v560_v27, 6.0  ;;  %v606_v34 = vmul.f32 0.16666667, %v590_v28 }
 0x11d   :  { %v607_v37 = vmul.f32 0.16666667, %v591_v29  ;;  %686 = vst.msk [vmem:[%s1205_s3 + $0x10] sm:$0xf] %vm681_vm1, %v773_v30  ;;  %v545_v38 = vadd.f32 3.0, %v507_v31  ;;  %v510_v39 = vadd.f32 %v509_v22, %v413_v32  ;;  %v831_v40 = vpop.f32.mrb[20].mxu0 }
 0x11e   :  { %v877_v41 = vpop.f32.mrb[20].mxu1  ;;  %v592_v43 = vmul.f32 %v576_v33, %v502_v10  ;;  %v774_v44 = vpack.c.bf16 %v606_v34, %v606_v34  ;;  %v832_v60 = vpop.f32.mrb[21].mxu0 }
 0x11f   :  { %v531_v45 = vadd.f32 %v877_v41, %v434_v35  ;;  %v522_v46 = vpop.f32.mrb[21].mxu1  ;;  %v775_v47 = vpack.c.bf16 %v607_v37, %v607_v37  ;;  %v561_v49 = vmax.f32 %v545_v38, 0.0  ;;  %v546_v50 = vadd.f32 3.0, %v510_v39  ;;  %v834_v52 = vpop.f32.mrb[22].mxu0 }
 0x120   :  { %v833_v51 = vadd.f32 %v832_v60, %v831_v40  ;;  %v878_v54 = vpop.f32.mrb[22].mxu1  ;;  %v608_v55 = vmul.f32 0.16666667, %v592_v43  ;;  %687 = vst.msk [vmem:[%s1205_s3 + $0x14] sm:$0xf] %vm681_vm1, %v774_v44  ;;  %v523_v56 = vadd.f32 %v522_v46, %v426_v36  ;;  %v835_v58 = vpop.f32.mrb[23].mxu0 }
 0x121   :  { %v551_v53 = vadd.f32 3.0, %v531_v45  ;;  %v534_v57 = vadd.f32 %v878_v54, %v437_v48  ;;  %v525_v59 = vpop.f32.mrb[23].mxu1  ;;  %688 = vst.msk [vmem:[%s1205_s3 + $0x18] sm:$0xf] %vm681_vm1, %v775_v47  ;;  %v577_v1 = vmin.f32 %v561_v49, 6.0  ;;  %v562_v61 = vmax.f32 %v546_v50, 0.0 }
 0x122   :  { %v418_v62 = vadd.f32 %v833_v51, %v1110_v2  ;;  %v836_v63 = vadd.f32 %v835_v58, %v834_v52  ;;  %v776_v0 = vpack.c.bf16 %v608_v55, %v608_v55  ;;  %v549_v4 = vadd.f32 3.0, %v523_v56 }
 0x123   :  { %v567_v3 = vmax.f32 %v551_v53, 0.0  ;;  %v552_v5 = vadd.f32 3.0, %v534_v57  ;;  %v593_v6 = vmul.f32 %v577_v1, %v507_v31  ;;  %v578_v7 = vmin.f32 %v562_v61, 6.0 }
 0x124   :  { %v515_v8 = vadd.f32 %v1128_v9, %v418_v62  ;;  %v421_v10 = vadd.f32 %v836_v63, %v1110_v2  ;;  %689 = vst.msk [vmem:[%s1205_s3 + $0x1c] sm:$0xf] %vm681_vm1, %v776_v0  ;;  %v565_v12 = vmax.f32 %v549_v4, 0.0  ;;  %v526_v14 = vadd.f32 %v525_v59, %v429_v42 }
 0x125   :  { %v583_v11 = vmin.f32 %v567_v3, 6.0  ;;  %v568_v13 = vmax.f32 %v552_v5, 0.0  ;;  %v609_v15 = vmul.f32 0.16666667, %v593_v6  ;;  %v594_v16 = vmul.f32 %v578_v7, %v510_v39 }
 0x126   :  { %v547_v17 = vadd.f32 3.0, %v515_v8  ;;  %v518_v19 = vadd.f32 %v1138_v18, %v421_v10  ;;  %v581_v21 = vmin.f32 %v565_v12, 6.0  ;;  %v550_v9 = vadd.f32 3.0, %v526_v14 }
 0x127   :  { %v599_v20 = vmul.f32 %v583_v11, %v531_v45  ;;  %v584_v22 = vmin.f32 %v568_v13, 6.0  ;;  %v777_v23 = vpack.c.bf16 %v609_v15, %v609_v15  ;;  %v610_v2 = vmul.f32 0.16666667, %v594_v16 }
 0x128   :  { %v563_v24 = vmax.f32 %v547_v17, 0.0  ;;  %v548_v25 = vadd.f32 3.0, %v518_v19  ;;  %v597_v27 = vmul.f32 %v581_v21, %v523_v56  ;;  %v566_v29 = vmax.f32 %v550_v9, 0.0 }
 0x129   :  { %v615_v26 = vmul.f32 0.16666667, %v599_v20  ;;  %v600_v28 = vmul.f32 %v584_v22, %v534_v57  ;;  %690 = vst.msk [vmem:[%s1205_s3 + $0x20] sm:$0xf] %vm681_vm1, %v777_v23  ;;  %v778_v30 = vpack.c.bf16 %v610_v2, %v610_v2 }
 0x12a   :  { %v579_v31 = vmin.f32 %v563_v24, 6.0  ;;  %v564_v18 = vmax.f32 %v548_v25, 0.0  ;;  %v613_v33 = vmul.f32 0.16666667, %v597_v27  ;;  %v582_v35 = vmin.f32 %v566_v29, 6.0 }
 0x12b   :  { %v783_v32 = vpack.c.bf16 %v615_v26, %v615_v26  ;;  %v616_v34 = vmul.f32 0.16666667, %v600_v28  ;;  %691 = vst.msk [vmem:[%s1205_s3 + $0x24] sm:$0xf] %vm681_vm1, %v778_v30 }
 0x12c   :  { %v595_v36 = vmul.f32 %v579_v31, %v515_v8  ;;  %v580_v37 = vmin.f32 %v564_v18, 6.0  ;;  %v781_v38 = vpack.c.bf16 %v613_v33, %v613_v33  ;;  %v598_v40 = vmul.f32 %v582_v35, %v526_v14 }
 0x12d   :  { %696 = vst.msk [vmem:[%s1205_s3 + $0x38] sm:$0xf] %vm681_vm1, %v783_v32  ;;  %v784_v39 = vpack.c.bf16 %v616_v34, %v616_v34 }
 0x12e   :  { %v611_v41 = vmul.f32 0.16666667, %v595_v36  ;;  %v596_v42 = vmul.f32 %v580_v37, %v518_v19  ;;  %694 = vst.msk [vmem:[%s1205_s3 + $0x30] sm:$0xf] %vm681_vm1, %v781_v38  ;;  %v614_v43 = vmul.f32 0.16666667, %v598_v40 }
 0x12f   :  { %697 = vst.msk [vmem:[%s1205_s3 + $0x3c] sm:$0xf] %vm681_vm1, %v784_v39 }
 0x130   :  { %v779_v44 = vpack.c.bf16 %v611_v41, %v611_v41  ;;  %v612_v45 = vmul.f32 0.16666667, %v596_v42  ;;  %v782_v60 = vpack.c.bf16 %v614_v43, %v614_v43 }
 0x132   :  { %692 = vst.msk [vmem:[%s1205_s3 + $0x28] sm:$0xf] %vm681_vm1, %v779_v44  ;;  %v780_v46 = vpack.c.bf16 %v612_v45, %v612_v45  ;;  %695 = vst.msk [vmem:[%s1205_s3 + $0x34] sm:$0xf] %vm681_vm1, %v782_v60 }
 0x134   :  { %693 = vst.msk [vmem:[%s1205_s3 + $0x2c] sm:$0xf] %vm681_vm1, %v780_v46 }

// kernel: custom_levit_forward.33
= control target key start
LH: loop header
LB: loop body
LE: loop exit
PB: predicated region body
PF: predicated region fallthrough
CT: control target
= control target key end

     0   :  { %vm372_vm0 = vcmask 523264   ;;  %s880_s1 = inlined_call_operand.vmem [shape: bf16[576,128], index: 1, kind: input, shape index: {}]   ;;  %s881_s0 = inlined_call_operand.vmem [shape: bf16[32,576], index: 0, kind: input, shape index: {}]   ;;  %s882_s2 = inlined_call_operand.vmem [shape: f32[1,128], index: 2, kind: input, shape index: {}]   ;;  %s883_s3 = inlined_call_operand.vmem [shape: f32[32,128], index: 3, kind: output, shape index: {}]  }
   0x1   :  { %v657_v0 = vld [vmem:[%s880_s1 + $0x40] sm:$0xff]   ;;  %v661_v4 = vld [vmem:[%s880_s1 + $0x48] sm:$0xff]   ;;  %v665_v8 = vld [vmem:[%s880_s1 + $0x50] sm:$0xff]  }
   0x2   :  { %v658_v1 = vld [vmem:[%s880_s1] sm:$0xff]   ;;  %583 = vmatprep.subr.bf16.mxu0 %v657_v0  ;;  %v662_v5 = vld [vmem:[%s880_s1 + $0x8] sm:$0xff]   ;;  %v666_v9 = vld [vmem:[%s880_s1 + $0x10] sm:$0xff]  }
   0x3   :  { %v659_v2 = vld [vmem:[%s880_s1 + $0xc0] sm:$0xff]   ;;  %584 = vmatpush3.bf16.msra.mxu0 %v658_v1  ;;  %v663_v6 = vld [vmem:[%s880_s1 + $0xc8] sm:$0xff]   ;;  %v667_v10 = vld [vmem:[%s880_s1 + $0xd0] sm:$0xff]  }
   0x4   :  { %v660_v3 = vld [vmem:[%s880_s1 + $0x80] sm:$0xff]   ;;  %611 = vmatprep.subr.bf16.mxu1 %v659_v2  ;;  %585 = vmatprep.subr.bf16.mxu0 %v661_v4  ;;  %v664_v7 = vld [vmem:[%s880_s1 + $0x88] sm:$0xff]   ;;  %v668_v11 = vld [vmem:[%s880_s1 + $0x90] sm:$0xff]  }
   0x5   :  { %612 = vmatpush3.bf16.msra.mxu1 %v660_v3  ;;  %v669_v12 = vld [vmem:[%s880_s1 + $0x58] sm:$0xff]   ;;  %v673_v16 = vld [vmem:[%s880_s1 + $0x60] sm:$0xff]   ;;  %v677_v20 = vld [vmem:[%s880_s1 + $0x68] sm:$0xff]  }
   0x6   :  { %613 = vmatprep.subr.bf16.mxu1 %v663_v6  ;;  %v670_v13 = vld [vmem:[%s880_s1 + $0x18] sm:$0xff]   ;;  %v674_v17 = vld [vmem:[%s880_s1 + $0x20] sm:$0xff]   ;;  %v678_v21 = vld [vmem:[%s880_s1 + $0x28] sm:$0xff]  }
   0x7   :  { %586 = vmatpush3.bf16.msra.mxu0 %v662_v5  ;;  %v671_v14 = vld [vmem:[%s880_s1 + $0xd8] sm:$0xff]   ;;  %v675_v18 = vld [vmem:[%s880_s1 + $0xe0] sm:$0xff]   ;;  %v679_v22 = vld [vmem:[%s880_s1 + $0xe8] sm:$0xff]  }
   0x8   :  { %587 = vmatprep.subr.bf16.mxu0 %v665_v8  ;;  %v672_v15 = vld [vmem:[%s880_s1 + $0x98] sm:$0xff]   ;;  %v676_v19 = vld [vmem:[%s880_s1 + $0xa0] sm:$0xff]   ;;  %v680_v23 = vld [vmem:[%s880_s1 + $0xa8] sm:$0xff]  }
   0x9   :  { %614 = vmatpush3.bf16.msra.mxu1 %v664_v7  ;;  %v681_v24 = vld [vmem:[%s880_s1 + $0x70] sm:$0xff]   ;;  %v685_v28 = vld [vmem:[%s880_s1 + $0x78] sm:$0xff]   ;;  %v692_v34 = vld [vmem:[%s880_s1 + $0x100] sm:$0xff]  }
   0xa   :  { %615 = vmatprep.subr.bf16.mxu1 %v667_v10  ;;  %v682_v25 = vld [vmem:[%s880_s1 + $0x30] sm:$0xff]   ;;  %v686_v29 = vld [vmem:[%s880_s1 + $0x38] sm:$0xff]   ;;  %v695_v36 = vld [vmem:[%s881_s0 + $0xc] ss:$20 sps:$4 sm:$0xff]  }
   0xb   :  { %588 = vmatpush3.bf16.msra.mxu0 %v666_v9  ;;  %v683_v26 = vld [vmem:[%s880_s1 + $0xf0] sm:$0xff]   ;;  %v687_v30 = vld [vmem:[%s880_s1 + $0xf8] sm:$0xff]   ;;  %v696_v37 = vld [vmem:[%s880_s1 + $0x108] sm:$0xff]   ;;  %460 = vmatprep.mubr.bf16.mxu1 %v695_v36 }
   0xc   :  { %589 = vmatprep.subr.bf16.mxu0 %v669_v12  ;;  %v684_v27 = vld [vmem:[%s880_s1 + $0xb0] sm:$0xff]   ;;  %v690_v32 = vld [vmem:[%s881_s0 + $0x4] ss:$20 sps:$4 sm:$0xff]   ;;  %v693_v35 = vld [vmem:[%s881_s0 + $0x8] ss:$20 sps:$4 sm:$0xff]  }
   0xd   :  { %616 = vmatpush3.bf16.msra.mxu1 %v668_v11  ;;  %v688_v31 = vld [vmem:[%s881_s0] ss:$20 sps:$4 sm:$0xff]   ;;  %v691_v33 = vld [vmem:[%s880_s1 + $0xb8] sm:$0xff]   ;;  %411 = vmatprep.mubr.bf16.mxu0 %v690_v32  ;;  %v703_v42 = vld [vmem:[%s881_s0 + $0x30] ss:$20 sps:$4 sm:$0xff]  }
   0xe   :  { %617 = vmatprep.subr.bf16.mxu1 %v671_v14  ;;  %v697_v38 = vld [vmem:[%s881_s0 + $0x2c] ss:$20 sps:$4 sm:$0xff]   ;;  %v699_v39 = vld [vmem:[%s881_s0 + $0x28] ss:$20 sps:$4 sm:$0xff]   ;;  %v700_v40 = vld [vmem:[%s880_s1 + $0x110] sm:$0xff]  }
   0xf   :  { %590 = vmatpush3.bf16.msra.mxu0 %v670_v13  ;;  %v701_v41 = vld [vmem:[%s881_s0 + $0x34] ss:$20 sps:$4 sm:$0xff]   ;;  %v704_v43 = vld [vmem:[%s880_s1 + $0x118] sm:$0xff]   ;;  %v705_v44 = vld [vmem:[%s881_s0 + $0x10] ss:$20 sps:$4 sm:$0xff]  }
  0x10   :  { %591 = vmatprep.subr.bf16.mxu0 %v673_v16  ;;  %v706_v45 = vld [vmem:[%s881_s0 + $0x38] ss:$20 sps:$4 sm:$0xff]   ;;  %v534_v47 = vld [vmem:[%s882_s2] ss:$0 sm:$0xff] }
  0x11   :  { %618 = vmatpush3.bf16.msra.mxu1 %v672_v15 }
  0x12   :  { %619 = vmatprep.subr.bf16.mxu1 %v675_v18 }
  0x13   :  { %592 = vmatpush3.bf16.msra.mxu0 %v674_v17 }
  0x14   :  { %593 = vmatprep.subr.bf16.mxu0 %v677_v20 }
  0x15   :  { %620 = vmatpush3.bf16.msra.mxu1 %v676_v19 }
  0x16   :  { %621 = vmatprep.subr.bf16.mxu1 %v679_v22 }
  0x17   :  { %594 = vmatpush3.bf16.msra.mxu0 %v678_v21 }
  0x18   :  { %595 = vmatprep.subr.bf16.mxu0 %v681_v24 }
  0x19   :  { %622 = vmatpush3.bf16.msra.mxu1 %v680_v23 }
  0x1a   :  { %623 = vmatprep.subr.bf16.mxu1 %v683_v26 }
  0x1b   :  { %596 = vmatpush3.bf16.msra.mxu0 %v682_v25 }
  0x1c   :  { %597 = vmatprep.subr.bf16.mxu0 %v685_v28 }
  0x1d   :  { %624 = vmatpush3.bf16.msra.mxu1 %v684_v27 }
  0x1e   :  { %625 = vmatprep.subr.bf16.mxu1 %v687_v30 }
  0x1f   :  { %598 = vmatpush3.bf16.msra.mxu0 %v686_v29 }
  0x20   :  { %645 = vmatprep.subr.bf16.mxu0 %v692_v34 }
  0x21   :  { %626 = vmatpush3.bf16.msra.mxu1 %v691_v33 }
  0x22   :  { %412 = vmatmul.mubr.bf16.vlgmr.msra.gmra.mrb[0].mxu0 %v688_v31 }
  0x23   :  { %646 = vmatpush3.bf16.msra.mxu0 %v692_v34  ;;  %419 = vmatprep.mubr.bf16.mxu0 %v697_v38 }
  0x24   :  { %461 = vmatmul.mubr.bf16.vlgmr.msra.gmra.mrb[0].mxu1 %v693_v35  ;;  %647 = vmatprep.subr.bf16.mxu0 %v696_v37 }
  0x25   :  { %468 = vmatprep.mubr.bf16.mxu1 %v701_v41 }
  0x27   :  { %648 = vmatpush3.bf16.msra.mxu0 %v696_v37 }
  0x28   :  { %649 = vmatprep.subr.bf16.mxu0 %v700_v40 }
  0x2a   :  { %420 = vmatmul.mubr.bf16.gmra.mrb[4].mxu0 %v699_v39 }
  0x2b   :  { %653 = vmatprep.mubr.msk.bf16.mxu0 %vm372_vm0, %v705_v44  ;;  %650 = vmatpush3.bf16.msra.mxu0 %v700_v40 }
  0x2c   :  { %469 = vmatmul.mubr.bf16.gmra.mrb[4].mxu1 %v703_v42  ;;  %651 = vmatprep.subr.bf16.mxu0 %v704_v43 }
  0x2f   :  { %652 = vmatpush3.bf16.msra.mxu0 %v704_v43 }
  0x32   :  { %654 = vmatmul.mubr.msk.bf16.vlgmr.msra.gmra.mrb[8].mxu0 %vm372_vm0, %v706_v45 }
  0xf5   :  { %v599_v46 = vpop.f32.mrb[0].mxu0 }
  0xf6   :  { %v600_v48 = vpop.f32.mrb[1].mxu0 }
  0xf7   :  { %v601_v49 = vadd.f32 %v600_v48, %v599_v46  ;;  %v602_v50 = vpop.f32.mrb[2].mxu0  ;;  %v627_v51 = vpop.f32.mrb[0].mxu1 }
  0xf8   :  { %v603_v52 = vpop.f32.mrb[3].mxu0  ;;  %v628_v55 = vpop.f32.mrb[1].mxu1 }
  0xf9   :  { %v414_v53 = vadd.f32 %v601_v49, %v534_v47  ;;  %v604_v54 = vadd.f32 %v603_v52, %v602_v50  ;;  %v629_v56 = vadd.f32 %v628_v55, %v627_v51  ;;  %v630_v57 = vpop.f32.mrb[2].mxu1 }
  0xfa   :  { %v631_v59 = vpop.f32.mrb[3].mxu1 }
  0xfb   :  { %v417_v58 = vadd.f32 %v604_v54, %v534_v47  ;;  %v632_v60 = vadd.f32 %v631_v59, %v630_v57  ;;  %v463_v61 = vadd.f32 %v629_v56, %v414_v53 }
  0xfd   :  { %v605_v62 = vpop.f32.mrb[4].mxu0  ;;  %v466_v0 = vadd.f32 %v632_v60, %v417_v58 }
  0xfe   :  { %v606_v63 = vpop.f32.mrb[5].mxu0 }
  0xff   :  { %v607_v1 = vadd.f32 %v606_v63, %v605_v62  ;;  %v608_v2 = vpop.f32.mrb[6].mxu0  ;;  %v633_v3 = vpop.f32.mrb[4].mxu1 }
 0x100   :  { %v609_v4 = vpop.f32.mrb[7].mxu0  ;;  %v634_v7 = vpop.f32.mrb[5].mxu1 }
 0x101   :  { %v422_v5 = vadd.f32 %v607_v1, %v534_v47  ;;  %v610_v6 = vadd.f32 %v609_v4, %v608_v2  ;;  %v635_v8 = vadd.f32 %v634_v7, %v633_v3  ;;  %v636_v9 = vpop.f32.mrb[6].mxu1 }
 0x102   :  { %v637_v11 = vpop.f32.mrb[7].mxu1 }
 0x103   :  { %v425_v10 = vadd.f32 %v610_v6, %v534_v47  ;;  %v638_v12 = vadd.f32 %v637_v11, %v636_v9  ;;  %v471_v13 = vadd.f32 %v635_v8, %v422_v5 }
 0x105   :  { %v655_v14 = vpop.f32.mrb[8].mxu0  ;;  %v474_v15 = vadd.f32 %v638_v12, %v425_v10 }
 0x106   :  { %v520_v16 = vadd.f32 %v655_v14, %v471_v13  ;;  %v511_v17 = vpop.f32.mrb[9].mxu0 }
 0x107   :  { %v512_v18 = vadd.f32 %v511_v17, %v463_v61  ;;  %v656_v19 = vpop.f32.mrb[10].mxu0 }
 0x108   :  { %528 = vst [vmem:[%s883_s3 + $0x10] sm:$0xff] %v520_v16  ;;  %v523_v20 = vadd.f32 %v656_v19, %v474_v15  ;;  %v514_v21 = vpop.f32.mrb[11].mxu0 }
 0x109   :  { %526 = vst [vmem:[%s883_s3] sm:$0xff] %v512_v18  ;;  %v515_v22 = vadd.f32 %v514_v21, %v466_v0 }
 0x10a   :  { %529 = vst [vmem:[%s883_s3 + $0x18] sm:$0xff] %v523_v20 }
 0x10b   :  { %527 = vst [vmem:[%s883_s3 + $0x8] sm:$0xff] %v515_v22 }

// kernel: custom_levit_forward.34
= control target key start
LH: loop header
LB: loop body
LE: loop exit
PB: predicated region body
PF: predicated region fallthrough
CT: control target
= control target key end

     0   :  { %v293_v1 = vmov 0   ;;  %v37_v19 = vlaneseq  ;;  %s383_s1 = inlined_call_operand.vmem [shape: bf16[128,256], index: 1, kind: input, shape index: {}]   ;;  %s384_s0 = inlined_call_operand.vmem [shape: bf16[32,128], index: 0, kind: input, shape index: {}]   ;;  %s385_s2 = inlined_call_operand.vmem [shape: f32[1,256], index: 2, kind: input, shape index: {}]   ;;  %s386_s3 = inlined_call_operand.vmem [shape: bf16[32,256], index: 3, kind: output, shape index: {}]  }
   0x1   :  { %v267_v0 = vld [vmem:[%s383_s1 + $0x4] ss:$8 sps:$4 sm:$0xff]   ;;  %171 = vmatprep.mubr.bf16.mxu0 %v293_v1  ;;  %181 = vmatprep.mubr.bf16.mxu1 %v293_v1  ;;  %v269_v2 = vld [vmem:[%s383_s1] ss:$8 sps:$4 sm:$0xff]   ;;  %v270_v3 = vld [vmem:[%s383_s1 + $0x14] ss:$8 sps:$4 sm:$0xff]  }
   0x2   :  { %139 = vmatprep.subr.bf16.mxu0 %v267_v0  ;;  %250 = vmatprep.subr.bf16.mxu1 %v267_v0  ;;  %v272_v4 = vld [vmem:[%s383_s1 + $0x10] ss:$8 sps:$4 sm:$0xff]   ;;  %v273_v5 = vld [vmem:[%s383_s1 + $0x24] ss:$8 sps:$4 sm:$0xff]   ;;  %v275_v6 = vld [vmem:[%s383_s1 + $0x20] ss:$8 sps:$4 sm:$0xff]  }
   0x3   :  { %140 = vmatpush1.bf16.msra.mxu0 %v269_v2  ;;  %258 = vmatpush1.bf16.msra.mxu1 %v269_v2  ;;  %v276_v7 = vld [vmem:[%s383_s1 + $0x34] ss:$8 sps:$4 sm:$0xff]   ;;  %v278_v8 = vld [vmem:[%s383_s1 + $0x30] ss:$8 sps:$4 sm:$0xff]   ;;  %v279_v9 = vld [vmem:[%s383_s1 + $0x44] ss:$8 sps:$4 sm:$0xff]  }
   0x4   :  { %141 = vmatprep.subr.bf16.mxu0 %v270_v3  ;;  %251 = vmatprep.subr.bf16.mxu1 %v270_v3  ;;  %v281_v10 = vld [vmem:[%s383_s1 + $0x40] ss:$8 sps:$4 sm:$0xff]   ;;  %v282_v11 = vld [vmem:[%s383_s1 + $0x54] ss:$8 sps:$4 sm:$0xff]   ;;  %v284_v12 = vld [vmem:[%s383_s1 + $0x50] ss:$8 sps:$4 sm:$0xff]  }
   0x5   :  { %v285_v13 = vld [vmem:[%s383_s1 + $0x64] ss:$8 sps:$4 sm:$0xff]   ;;  %v287_v14 = vld [vmem:[%s383_s1 + $0x60] ss:$8 sps:$4 sm:$0xff]   ;;  %v288_v15 = vld [vmem:[%s383_s1 + $0x74] ss:$8 sps:$4 sm:$0xff]  }
   0x6   :  { %v290_v16 = vld [vmem:[%s383_s1 + $0x70] ss:$8 sps:$4 sm:$0xff]   ;;  %v291_v17 = vld [vmem:[%s384_s0] sm:$0xff]   ;;  %v292_v18 = vld [vmem:[%s384_s0 + $0x8] sm:$0xff]   ;;  %v38_v20 = vshrl.u32 %v37_v19, 7 }
   0x7   :  { %142 = vmatpush1.bf16.msra.mxu0 %v272_v4  ;;  %259 = vmatpush1.bf16.msra.mxu1 %v272_v4  ;;  %v35_v22 = vld [vmem:[%s385_s2] sm:$0x3] }
   0x8   :  { %143 = vmatprep.subr.bf16.mxu0 %v273_v5  ;;  %252 = vmatprep.subr.bf16.mxu1 %v273_v5  ;;  %v39_v21 = vsub.s32 0, %v38_v20  ;;  %v43_v23 = vsub.s32 1, %v38_v20 }
   0xa   :  { %v40_v24 = vrot.slane %v35_v22, %v39_v21  ;;  %v44_v25 = vrot.slane %v35_v22, %v43_v23 }
   0xb   :  { %144 = vmatpush1.bf16.msra.mxu0 %v275_v6  ;;  %260 = vmatpush1.bf16.msra.mxu1 %v275_v6 }
   0xc   :  { %145 = vmatprep.subr.bf16.mxu0 %v276_v7  ;;  %253 = vmatprep.subr.bf16.mxu1 %v276_v7 }
   0xf   :  { %146 = vmatpush1.bf16.msra.mxu0 %v278_v8  ;;  %261 = vmatpush1.bf16.msra.mxu1 %v278_v8 }
  0x10   :  { %147 = vmatprep.subr.bf16.mxu0 %v279_v9  ;;  %254 = vmatprep.subr.bf16.mxu1 %v279_v9 }
  0x13   :  { %148 = vmatpush1.bf16.msra.mxu0 %v281_v10  ;;  %262 = vmatpush1.bf16.msra.mxu1 %v281_v10 }
  0x14   :  { %149 = vmatprep.subr.bf16.mxu0 %v282_v11  ;;  %255 = vmatprep.subr.bf16.mxu1 %v282_v11 }
  0x17   :  { %150 = vmatpush1.bf16.msra.mxu0 %v284_v12  ;;  %263 = vmatpush1.bf16.msra.mxu1 %v284_v12 }
  0x18   :  { %151 = vmatprep.subr.bf16.mxu0 %v285_v13  ;;  %256 = vmatprep.subr.bf16.mxu1 %v285_v13 }
  0x1b   :  { %152 = vmatpush1.bf16.msra.mxu0 %v287_v14  ;;  %264 = vmatpush1.bf16.msra.mxu1 %v287_v14 }
  0x1c   :  { %153 = vmatprep.subr.bf16.mxu0 %v288_v15  ;;  %257 = vmatprep.subr.bf16.mxu1 %v288_v15 }
  0x1f   :  { %154 = vmatpush1.bf16.msra.mxu0 %v290_v16  ;;  %265 = vmatpush1.bf16.msra.mxu1 %v290_v16 }
  0x22   :  { %172 = vmatmul.mubr.bf16.vlgmr.msra.gmra.mrb[0].mxu0 %v291_v17  ;;  %182 = vmatmul.mubr.bf16.vlgmr.msra.gmra.mrb[0].mxu1 %v292_v18 }
  0xf5   :  { %v173_v26 = vpop.f32.mrb[0].mxu0  ;;  %v183_v27 = vpop.f32.mrb[0].mxu1 }
  0xf6   :  { %v174_v28 = vadd.f32 %v173_v26, %v40_v24  ;;  %v184_v29 = vadd.f32 %v183_v27, %v40_v24  ;;  %v175_v30 = vpop.f32.mrb[1].mxu0  ;;  %v185_v31 = vpop.f32.mrb[1].mxu1 }
  0xf7   :  { %v176_v32 = vadd.f32 %v175_v30, %v44_v25  ;;  %v186_v33 = vadd.f32 %v185_v31, %v44_v25  ;;  %v177_v34 = vpop.f32.mrb[2].mxu0  ;;  %v187_v35 = vpop.f32.mrb[2].mxu1 }
  0xf8   :  { %v178_v36 = vadd.f32 %v177_v34, %v40_v24  ;;  %v188_v37 = vadd.f32 %v187_v35, %v40_v24  ;;  %v179_v38 = vpop.f32.mrb[3].mxu0  ;;  %v189_v39 = vpop.f32.mrb[3].mxu1 }
  0xf9   :  { %v246_v40 = vpack.c.bf16 %v176_v32, %v174_v28  ;;  %v248_v41 = vpack.c.bf16 %v186_v33, %v184_v29  ;;  %v180_v42 = vadd.f32 %v179_v38, %v44_v25  ;;  %v190_v43 = vadd.f32 %v189_v39, %v44_v25 }
  0xfb   :  { %216 = vst [vmem:[%s386_s3] sm:$0xff] %v246_v40  ;;  %218 = vst [vmem:[%s386_s3 + $0x10] sm:$0xff] %v248_v41  ;;  %v247_v44 = vpack.c.bf16 %v180_v42, %v178_v36  ;;  %v249_v45 = vpack.c.bf16 %v190_v43, %v188_v37 }
  0xfd   :  { %217 = vst [vmem:[%s386_s3 + $0x8] sm:$0xff] %v247_v44  ;;  %219 = vst [vmem:[%s386_s3 + $0x18] sm:$0xff] %v249_v45 }

// kernel: custom_levit_forward.35
= control target key start
LH: loop header
LB: loop body
LE: loop exit
PB: predicated region body
PF: predicated region fallthrough
CT: control target
= control target key end

     0   :  { %vm84_vm0 = vcmask 130048   ;;  %v1506_v0 = vmov 0.0   ;;  %vm1507_vm1 = vmmov 0   ;;  %vm1227_vm2 = vcmask 261120   ;;  %s1937_s1 = inlined_call_operand.vmem [shape: bf16[8,16,16], index: 1, kind: input, shape index: {}]   ;;  %s1938_s0 = inlined_call_operand.vmem [shape: bf16[8,16,16], index: 0, kind: input, shape index: {}]   ;;  %s1939_s3 = inlined_call_operand.vmem [shape: f32[4,16,16], index: 3, kind: input, shape index: {}]   ;;  %s1940_s2 = inlined_call_operand.vmem [shape: bf16[8,16,32], index: 2, kind: input, shape index: {}]   ;;  %s1941_s4 = inlined_call_operand.vmem [shape: f32[8,16,32], index: 4, kind: output, shape index: {}]  }
   0x1   :  { %1320 = vmatprep.subr.bf16.mxu0 %v1506_v0  ;;  %1326 = vmatprep.subr.bf16.mxu1 %v1506_v0  ;;  %v1418_v1 = vld [vmem:[%s1937_s1] sm:$0xff]   ;;  %v1419_v2 = vld [vmem:[%s1937_s1 + $0x8] sm:$0xff]   ;;  %v1422_v5 = vld [vmem:[%s1937_s1 + $0x10] sm:$0xff]  }
   0x2   :  { %1322 = vmatprep.mubr.msk.bf16.mxu0 %vm1507_vm1, %v1506_v0  ;;  %1328 = vmatprep.mubr.msk.bf16.mxu1 %vm1507_vm1, %v1506_v0  ;;  %v89_v3 = vsel %vm84_vm0, %v1418_v1, 0  ;;  %v146_v4 = vsel %vm84_vm0, %v1419_v2, 0  ;;  %v1423_v6 = vld [vmem:[%s1937_s1 + $0x18] sm:$0xff]   ;;  %v1420_v7 = vld [vmem:[%s1938_s0] sm:$0xff]   ;;  %v1421_v8 = vld [vmem:[%s1938_s0 + $0x8] sm:$0xff]   ;;  %v203_v9 = vsel %vm84_vm0, %v1422_v5, 0 }
   0x3   :  { %1321 = vmatpush3.bf16.xpose.msra.mxu0 %v89_v3  ;;  %1327 = vmatpush3.bf16.xpose.msra.mxu1 %v146_v4  ;;  %v260_v10 = vsel %vm84_vm0, %v1423_v6, 0  ;;  %v1425_v11 = vld [vmem:[%s1937_s1 + $0x20] sm:$0xff]   ;;  %v1427_v12 = vld [vmem:[%s1937_s1 + $0x28] sm:$0xff]   ;;  %v1424_v13 = vld [vmem:[%s1938_s0 + $0x10] sm:$0xff]  }
   0x4   :  { %1332 = vmatprep.subr.bf16.mxu0 %v1506_v0  ;;  %1338 = vmatprep.subr.bf16.mxu1 %v1506_v0  ;;  %v1426_v14 = vld [vmem:[%s1938_s0 + $0x18] sm:$0xff]   ;;  %v317_v15 = vsel %vm84_vm0, %v1425_v11, 0  ;;  %v374_v16 = vsel %vm84_vm0, %v1427_v12, 0  ;;  %v1429_v17 = vld [vmem:[%s1937_s1 + $0x30] sm:$0xff]   ;;  %v1428_v19 = vld [vmem:[%s1938_s0 + $0x20] sm:$0xff]  }
   0x5   :  { %v1431_v18 = vld [vmem:[%s1937_s1 + $0x38] sm:$0xff]   ;;  %v1430_v20 = vld [vmem:[%s1938_s0 + $0x28] sm:$0xff]   ;;  %v431_v21 = vsel %vm84_vm0, %v1429_v17, 0  ;;  %v1432_v23 = vld [vmem:[%s1938_s0 + $0x30] sm:$0xff]  }
   0x6   :  { %v488_v22 = vsel %vm84_vm0, %v1431_v18, 0  ;;  %v1433_v24 = vld [vmem:[%s1938_s0 + $0x38] sm:$0xff]   ;;  %v1630_v26 = vld [vmem:[%s1939_s3] sm:$0xff]  ;;  %v1635_v30 = vld [vmem:[%s1939_s3 + $0x10] sm:$0xff] }
   0x7   :  { %v67_v34 = vld [vmem:[%s1939_s3 + $0x8] sm:$0xff]  ;;  %v69_v39 = vld [vmem:[%s1939_s3 + $0x18] sm:$0xff]  ;;  %v1662_v49 = vld [vmem:[%s1939_s3 + $0x20] sm:$0xff] }
   0x8   :  { %v72_v54 = vld [vmem:[%s1939_s3 + $0x30] sm:$0xff]  ;;  %v71_v58 = vld [vmem:[%s1939_s3 + $0x28] sm:$0xff]  ;;  %v73_v63 = vld [vmem:[%s1939_s3 + $0x38] sm:$0xff] }
   0xa   :  { %1323 = vmatmul.mubr.msk.bf16.vlgmr.msra.gmra.mrb[0].mxu0 %vm84_vm0, %v1420_v7  ;;  %1329 = vmatmul.mubr.msk.bf16.vlgmr.msra.gmra.mrb[0].mxu1 %vm84_vm0, %v1421_v8 }
   0xb   :  { %1333 = vmatpush3.bf16.xpose.msra.mxu0 %v203_v9  ;;  %1339 = vmatpush3.bf16.xpose.msra.mxu1 %v260_v10 }
   0xc   :  { %1334 = vmatprep.mubr.msk.bf16.mxu0 %vm1507_vm1, %v1506_v0  ;;  %1344 = vmatprep.subr.bf16.mxu0 %v1506_v0 }
   0xd   :  { %1340 = vmatprep.mubr.msk.bf16.mxu1 %vm1507_vm1, %v1506_v0  ;;  %1350 = vmatprep.subr.bf16.mxu1 %v1506_v0 }
  0x12   :  { %1335 = vmatmul.mubr.msk.bf16.vlgmr.msra.gmra.mrb[4].mxu0 %vm84_vm0, %v1424_v13  ;;  %1341 = vmatmul.mubr.msk.bf16.vlgmr.msra.gmra.mrb[4].mxu1 %vm84_vm0, %v1426_v14 }
  0x13   :  { %1345 = vmatpush3.bf16.xpose.msra.mxu0 %v317_v15  ;;  %1351 = vmatpush3.bf16.xpose.msra.mxu1 %v374_v16 }
  0x14   :  { %1346 = vmatprep.mubr.msk.bf16.mxu0 %vm1507_vm1, %v1506_v0  ;;  %1356 = vmatprep.subr.bf16.mxu0 %v1506_v0 }
  0x15   :  { %1352 = vmatprep.mubr.msk.bf16.mxu1 %vm1507_vm1, %v1506_v0  ;;  %1362 = vmatprep.subr.bf16.mxu1 %v1506_v0 }
  0x1a   :  { %1347 = vmatmul.mubr.msk.bf16.vlgmr.msra.gmra.mrb[8].mxu0 %vm84_vm0, %v1428_v19  ;;  %1353 = vmatmul.mubr.msk.bf16.vlgmr.msra.gmra.mrb[8].mxu1 %vm84_vm0, %v1430_v20 }
  0x1b   :  { %1357 = vmatpush3.bf16.xpose.msra.mxu0 %v431_v21  ;;  %1363 = vmatpush3.bf16.xpose.msra.mxu1 %v488_v22 }
  0x1c   :  { %1358 = vmatprep.mubr.msk.bf16.mxu0 %vm1507_vm1, %v1506_v0  ;;  %1364 = vmatprep.mubr.msk.bf16.mxu1 %vm1507_vm1, %v1506_v0 }
  0x1d   :  { %1368 = vmatprep.subr.bf16.mxu0 %v1506_v0  ;;  %1374 = vmatprep.subr.bf16.mxu1 %v1506_v0 }
  0x22   :  { %1359 = vmatmul.mubr.msk.bf16.vlgmr.msra.gmra.mrb[12].mxu0 %vm84_vm0, %v1432_v23  ;;  %1365 = vmatmul.mubr.msk.bf16.vlgmr.msra.gmra.mrb[12].mxu1 %vm84_vm0, %v1433_v24 }
  0x23   :  { %1370 = vmatprep.mubr.msk.bf16.mxu0 %vm1507_vm1, %v1506_v0  ;;  %1376 = vmatprep.mubr.msk.bf16.mxu1 %vm1507_vm1, %v1506_v0 }
  0xdd   :  { %v125_v25 = vpop.f32.mrb[0].mxu0  ;;  %v182_v28 = vpop.f32.mrb[0].mxu1 }
  0xde   :  { %v531_v27 = vmul.f32 0.25, %v125_v25  ;;  %v1324_v29 = vpop.f32.mrb[1].mxu0  ;;  %v533_v31 = vmul.f32 0.25, %v182_v28  ;;  %v1330_v33 = vpop.f32.mrb[1].mxu1 }
  0xdf   :  { %v128_v32 = vpop.f32.mrb[2].mxu0  ;;  %v185_v37 = vpop.f32.mrb[2].mxu1 }
  0xe0   :  { %v532_v35 = vmul.f32 0.25, %v128_v32  ;;  %v1325_v36 = vpop.f32.mrb[3].mxu0  ;;  %v1641_v38 = vadd.f32 %v531_v27, %v1630_v26  ;;  %v534_v40 = vmul.f32 0.25, %v185_v37  ;;  %v1331_v41 = vpop.f32.mrb[3].mxu1  ;;  %v1647_v42 = vadd.f32 %v533_v31, %v1635_v30 }
  0xe2   :  { %v563_v43 = vsel %vm84_vm0, %v1641_v38, -inf  ;;  %v1651_v44 = vadd.f32 %v532_v35, %v67_v34  ;;  %v569_v45 = vsel %vm84_vm0, %v1647_v42, -inf  ;;  %v1655_v46 = vadd.f32 %v534_v40, %v69_v39 }
  0xe3   :  { %564 = vmax.xlane.f32.xlu0 %v563_v43  ;;  %570 = vmax.xlane.f32.xlu1 %v569_v45 }
  0xe4   :  { %v572_v48 = vsel %vm84_vm0, %v1655_v46, -inf  ;;  %v566_v52 = vsel %vm84_vm0, %v1651_v44, -inf }
  0xe5   :  { %v239_v47 = vpop.f32.mrb[4].mxu0  ;;  %v296_v53 = vpop.f32.mrb[4].mxu1 }
  0xe6   :  { %v535_v50 = vmul.f32 0.25, %v239_v47  ;;  %v1336_v51 = vpop.f32.mrb[5].mxu0  ;;  %v537_v56 = vmul.f32 0.25, %v296_v53  ;;  %v1342_v57 = vpop.f32.mrb[5].mxu1 }
  0xe7   :  { %567 = vmax.xlane.f32.xlu0 %v566_v52  ;;  %v242_v55 = vpop.f32.mrb[6].mxu0  ;;  %573 = vmax.xlane.f32.xlu1 %v572_v48  ;;  %v299_v61 = vpop.f32.mrb[6].mxu1 }
  0xe8   :  { %v536_v59 = vmul.f32 0.25, %v242_v55  ;;  %v1337_v60 = vpop.f32.mrb[7].mxu0  ;;  %v1673_v62 = vadd.f32 %v535_v50, %v1662_v49  ;;  %v538_v1 = vmul.f32 0.25, %v299_v61  ;;  %v1343_v2 = vpop.f32.mrb[7].mxu1  ;;  %v1678_v3 = vadd.f32 %v537_v56, %v72_v54 }
  0xea   :  { %v575_v4 = vsel %vm84_vm0, %v1673_v62, -inf  ;;  %v1682_v5 = vadd.f32 %v536_v59, %v71_v58  ;;  %v1684_v6 = vadd.f32 %v538_v1, %v73_v63  ;;  %v581_v8 = vsel %vm84_vm0, %v1678_v3, -inf }
  0xeb   :  { %576 = vmax.xlane.f32.xlu0 %v575_v4 }
  0xec   :  { %v578_v7 = vsel %vm84_vm0, %v1682_v5, -inf  ;;  %v584_v13 = vsel %vm84_vm0, %v1684_v6, -inf }
  0xed   :  { %579 = vmax.xlane.f32.xlu1 %v578_v7  ;;  %v353_v9 = vpop.f32.mrb[8].mxu0  ;;  %v410_v12 = vpop.f32.mrb[8].mxu1 }
  0xee   :  { %v539_v10 = vmul.f32 0.25, %v353_v9  ;;  %v1348_v11 = vpop.f32.mrb[9].mxu0  ;;  %v541_v15 = vmul.f32 0.25, %v410_v12  ;;  %v1354_v16 = vpop.f32.mrb[9].mxu1 }
  0xef   :  { %582 = vmax.xlane.f32.xlu0 %v581_v8  ;;  %v356_v14 = vpop.f32.mrb[10].mxu0  ;;  %v413_v19 = vpop.f32.mrb[10].mxu1 }
  0xf0   :  { %v540_v17 = vmul.f32 0.25, %v356_v14  ;;  %v1349_v18 = vpop.f32.mrb[11].mxu0  ;;  %v1693_v20 = vadd.f32 %v539_v10, %v1630_v26  ;;  %v542_v21 = vmul.f32 0.25, %v413_v19  ;;  %v1355_v22 = vpop.f32.mrb[11].mxu1  ;;  %v1696_v23 = vadd.f32 %v541_v15, %v1635_v30 }
  0xf1   :  { %585 = vmax.xlane.f32.xlu1 %v584_v13 }
  0xf2   :  { %v587_v24 = vsel %vm84_vm0, %v1693_v20, -inf  ;;  %v1700_v25 = vadd.f32 %v540_v17, %v67_v34  ;;  %v1702_v27 = vadd.f32 %v542_v21, %v69_v39  ;;  %v593_v26 = vsel %vm84_vm0, %v1696_v23, -inf }
  0xf3   :  { %588 = vmax.xlane.f32.xlu0 %v587_v24 }
  0xf4   :  { %v590_v28 = vsel %vm84_vm0, %v1700_v25, -inf  ;;  %v596_v33 = vsel %vm84_vm0, %v1702_v27, -inf }
  0xf5   :  { %591 = vmax.xlane.f32.xlu1 %v590_v28  ;;  %v467_v29 = vpop.f32.mrb[12].mxu0  ;;  %v524_v30 = vpop.f32.mrb[12].mxu1 }
  0xf6   :  { %v543_v31 = vmul.f32 0.25, %v467_v29  ;;  %v1360_v32 = vpop.f32.mrb[13].mxu0  ;;  %v545_v35 = vmul.f32 0.25, %v524_v30  ;;  %v1366_v36 = vpop.f32.mrb[13].mxu1 }
  0xf7   :  { %594 = vmax.xlane.f32.xlu0 %v593_v26  ;;  %v470_v34 = vpop.f32.mrb[14].mxu0  ;;  %v527_v40 = vpop.f32.mrb[14].mxu1 }
  0xf8   :  { %v544_v37 = vmul.f32 0.25, %v470_v34  ;;  %v1361_v39 = vpop.f32.mrb[15].mxu0  ;;  %v1711_v41 = vadd.f32 %v543_v31, %v1662_v49  ;;  %v546_v43 = vmul.f32 0.25, %v527_v40  ;;  %v1367_v45 = vpop.f32.mrb[15].mxu1  ;;  %v1713_v47 = vadd.f32 %v545_v35, %v72_v54 }
  0xf9   :  { %597 = vmax.xlane.f32.xlu1 %v596_v33 }
  0xfa   :  { %v599_v48 = vsel %vm84_vm0, %v1711_v41, -inf  ;;  %v1717_v50 = vadd.f32 %v544_v37, %v71_v58  ;;  %v1719_v51 = vadd.f32 %v546_v43, %v73_v63  ;;  %v605_v49 = vsel %vm84_vm0, %v1713_v47, -inf }
  0xfb   :  { %600 = vmax.xlane.f32.xlu0 %v599_v48 }
  0xfc   :  { %v602_v52 = vsel %vm84_vm0, %v1717_v50, -inf  ;;  %v608_v53 = vsel %vm84_vm0, %v1719_v51, -inf }
  0xfd   :  { %603 = vmax.xlane.f32.xlu1 %v602_v52 }
  0xff   :  { %606 = vmax.xlane.f32.xlu0 %v605_v49 }
 0x101   :  { %609 = vmax.xlane.f32.xlu1 %v608_v53 }
 0x170   :  { %v565_v54 = vpop.xlane.xlu0 %564  ;;  %v571_v55 = vpop.xlane.xlu1 %570 }
 0x171   :  { %v611_v56 = vsub.f32 %v1641_v38, %v565_v54  ;;  %v613_v57 = vsub.f32 %v1647_v42, %v571_v55 }
 0x173   :  { %v627_v58 = vmul.f32 1.442695, %v611_v56  ;;  %v631_v59 = vmul.f32 1.442695, %v613_v57 }
 0x174   :  { %v568_v60 = vpop.xlane.xlu0 %567  ;;  %v574_v61 = vpop.xlane.xlu1 %573 }
 0x175   :  { %1442 = vpow2.f32 %v627_v58  ;;  %v612_v63 = vsub.f32 %v1651_v44, %v568_v60  ;;  %v614_v1 = vsub.f32 %v1655_v46, %v574_v61 }
 0x176   :  { %1444 = vpow2.f32 %v631_v59 }
 0x177   :  { %v629_v2 = vmul.f32 1.442695, %v612_v63  ;;  %v633_v4 = vmul.f32 1.442695, %v614_v1 }
 0x178   :  { %v577_v7 = vpop.xlane.xlu0 %576 }
 0x179   :  { %1446 = vpow2.f32 %v629_v2  ;;  %v615_v8 = vsub.f32 %v1673_v62, %v577_v7 }
 0x17a   :  { %v580_v9 = vpop.xlane.xlu1 %579  ;;  %1448 = vpow2.f32 %v633_v4 }
 0x17b   :  { %v635_v38 = vmul.f32 1.442695, %v615_v8  ;;  %v616_v42 = vsub.f32 %v1682_v5, %v580_v9 }
 0x17c   :  { %v583_v10 = vpop.xlane.xlu0 %582 }
 0x17d   :  { %1450 = vpow2.f32 %v635_v38  ;;  %v637_v11 = vmul.f32 1.442695, %v616_v42  ;;  %v617_v12 = vsub.f32 %v1678_v3, %v583_v10  ;;  %v1434_v10 = vld [vmem:[%s1940_s2] sm:$0xff]  }
 0x17e   :  { %v586_v44 = vpop.xlane.xlu1 %585  ;;  %1369 = vmatpush3.bf16.msra.mxu0 %v1434_v10 }
 0x17f   :  { %v1734_v13 = vpop.eup %1442  ;;  %1452 = vpow2.f32 %v637_v11  ;;  %v639_v46 = vmul.f32 1.442695, %v617_v12  ;;  %v618_v14 = vsub.f32 %v1684_v6, %v586_v44  ;;  %1380 = vmatprep.subr.bf16.mxu0 %v1506_v0  ;;  %v1435_v11 = vld [vmem:[%s1940_s2 + $0x8] sm:$0xff]  }
 0x180   :  { %v589_v15 = vpop.xlane.xlu0 %588  ;;  %v659_v62 = vsel %vm84_vm0, %v1734_v13, 0.0  ;;  %v1739_v16 = vpop.eup %1444  ;;  %1375 = vmatpush3.bf16.msra.mxu1 %v1435_v11 }
 0x181   :  { %1454 = vpow2.f32 %v639_v46  ;;  %v641_v5 = vmul.f32 1.442695, %v618_v14  ;;  %v619_v17 = vsub.f32 %v1693_v20, %v589_v15  ;;  %660 = vadd.xlane.f32.xlu0 %v659_v62  ;;  %v665_v6 = vsel %vm84_vm0, %v1739_v16, 0.0  ;;  %1386 = vmatprep.subr.bf16.mxu1 %v1506_v0 }
 0x182   :  { %v592_v18 = vpop.xlane.xlu1 %591 }
 0x183   :  { %v1742_v3 = vpop.eup %1446  ;;  %1456 = vpow2.f32 %v641_v5  ;;  %v643_v19 = vmul.f32 1.442695, %v619_v17  ;;  %v620_v21 = vsub.f32 %v1700_v25, %v592_v18 }
 0x184   :  { %v595_v22 = vpop.xlane.xlu0 %594  ;;  %v662_v24 = vsel %vm84_vm0, %v1742_v3, 0.0  ;;  %v1749_v28 = vpop.eup %1448 }
 0x185   :  { %1458 = vpow2.f32 %v643_v19  ;;  %v645_v26 = vmul.f32 1.442695, %v620_v21  ;;  %v621_v20 = vsub.f32 %v1696_v23, %v595_v22  ;;  %666 = vadd.xlane.f32.xlu0 %v665_v6  ;;  %663 = vadd.xlane.f32.xlu1 %v662_v24  ;;  %v668_v34 = vsel %vm84_vm0, %v1749_v28, 0.0 }
 0x186   :  { %v598_v29 = vpop.xlane.xlu1 %597 }
 0x187   :  { %v1752_v31 = vpop.eup %1450  ;;  %1460 = vpow2.f32 %v645_v26  ;;  %v647_v25 = vmul.f32 1.442695, %v621_v20  ;;  %v622_v32 = vsub.f32 %v1702_v27, %v598_v29  ;;  %v1436_v26 = vld [vmem:[%s1940_s2 + $0x10] sm:$0xff]  }
 0x188   :  { %v601_v30 = vpop.xlane.xlu0 %600  ;;  %v671_v33 = vsel %vm84_vm0, %v1752_v31, 0.0 }
 0x189   :  { %v1759_v35 = vpop.eup %1452  ;;  %1462 = vpow2.f32 %v647_v25  ;;  %v649_v23 = vmul.f32 1.442695, %v622_v32  ;;  %v623_v36 = vsub.f32 %v1711_v41, %v601_v30  ;;  %672 = vadd.xlane.f32.xlu0 %v671_v33  ;;  %669 = vadd.xlane.f32.xlu1 %v668_v34 }
 0x18a   :  { %v604_v37 = vpop.xlane.xlu1 %603  ;;  %v674_v48 = vsel %vm84_vm0, %v1759_v35, 0.0 }
 0x18b   :  { %v1762_v39 = vpop.eup %1454  ;;  %1464 = vpow2.f32 %v649_v23  ;;  %v651_v27 = vmul.f32 1.442695, %v623_v36  ;;  %v624_v40 = vsub.f32 %v1717_v50, %v604_v37 }
 0x18c   :  { %v607_v43 = vpop.xlane.xlu0 %606  ;;  %v677_v45 = vsel %vm84_vm0, %v1762_v39, 0.0 }
 0x18d   :  { %v1769_v52 = vpop.eup %1456  ;;  %1466 = vpow2.f32 %v651_v27  ;;  %v653_v41 = vmul.f32 1.442695, %v624_v40  ;;  %v625_v49 = vsub.f32 %v1713_v47, %v607_v43  ;;  %678 = vadd.xlane.f32.xlu0 %v677_v45  ;;  %675 = vadd.xlane.f32.xlu1 %v674_v48  ;;  %v1438_v40 = vld [vmem:[%s1940_s2 + $0x20] sm:$0xff]  }
 0x18e   :  { %v610_v53 = vpop.xlane.xlu1 %609  ;;  %v680_v57 = vsel %vm84_vm0, %v1769_v52, 0.0 }
 0x18f   :  { %v1772_v54 = vpop.eup %1458  ;;  %1468 = vpow2.f32 %v653_v41  ;;  %v655_v50 = vmul.f32 1.442695, %v625_v49  ;;  %v626_v55 = vsub.f32 %v1719_v51, %v610_v53  ;;  %v1439_v53 = vld [vmem:[%s1940_s2 + $0x28] sm:$0xff]  }
 0x190   :  { %v683_v56 = vsel %vm84_vm0, %v1772_v54, 0.0 }
 0x191   :  { %v1779_v58 = vpop.eup %1460  ;;  %1470 = vpow2.f32 %v655_v50  ;;  %v657_v59 = vmul.f32 1.442695, %v626_v55  ;;  %684 = vadd.xlane.f32.xlu0 %v683_v56  ;;  %681 = vadd.xlane.f32.xlu1 %v680_v57 }
 0x192   :  { %v686_v51 = vsel %vm84_vm0, %v1779_v58, 0.0 }
 0x193   :  { %v1781_v47 = vpop.eup %1462  ;;  %1472 = vpow2.f32 %v657_v59  ;;  %v1440_v59 = vld [vmem:[%s1940_s2 + $0x30] sm:$0xff]  }
 0x194   :  { %v689_v60 = vsel %vm84_vm0, %v1781_v47, 0.0 }
 0x195   :  { %v1787_v61 = vpop.eup %1464  ;;  %690 = vadd.xlane.f32.xlu0 %v689_v60  ;;  %687 = vadd.xlane.f32.xlu1 %v686_v51 }
 0x196   :  { %v692_v2 = vsel %vm84_vm0, %v1787_v61, 0.0 }
 0x197   :  { %v1789_v63 = vpop.eup %1466 }
 0x198   :  { %v695_v1 = vsel %vm84_vm0, %v1789_v63, 0.0 }
 0x199   :  { %v1795_v4 = vpop.eup %1468  ;;  %696 = vadd.xlane.f32.xlu0 %v695_v1  ;;  %693 = vadd.xlane.f32.xlu1 %v692_v2  ;;  %v1441_v2 = vld [vmem:[%s1940_s2 + $0x38] sm:$0xff]  }
 0x19a   :  { %v698_v9 = vsel %vm84_vm0, %v1795_v4, 0.0 }
 0x19b   :  { %v1797_v7 = vpop.eup %1470 }
 0x19c   :  { %v701_v8 = vsel %vm84_vm0, %v1797_v7, 0.0 }
 0x19d   :  { %v1803_v38 = vpop.eup %1472  ;;  %702 = vadd.xlane.f32.xlu0 %v701_v8  ;;  %699 = vadd.xlane.f32.xlu1 %v698_v9 }
 0x19e   :  { %v704_v42 = vsel %vm84_vm0, %v1803_v38, 0.0 }
 0x1a1   :  { %705 = vadd.xlane.f32.xlu1 %v704_v42 }
 0x20e   :  { %v661_v12 = vpop.xlane.xlu0 %660 }
 0x20f   :  { %1474 = vrcp.f32 %v661_v12 }
 0x212   :  { %v667_v44 = vpop.xlane.xlu0 %666  ;;  %v664_v46 = vpop.xlane.xlu1 %663 }
 0x213   :  { %1476 = vrcp.f32 %v664_v46 }
 0x214   :  { %1478 = vrcp.f32 %v667_v44 }
 0x216   :  { %v673_v14 = vpop.xlane.xlu0 %672  ;;  %v670_v15 = vpop.xlane.xlu1 %669 }
 0x217   :  { %1480 = vrcp.f32 %v670_v15 }
 0x218   :  { %1482 = vrcp.f32 %v673_v14 }
 0x219   :  { %v1475_v17 = vpop.eup %1474 }
 0x21a   :  { %v679_v62 = vpop.xlane.xlu0 %678  ;;  %v676_v5 = vpop.xlane.xlu1 %675  ;;  %v723_v22 = vmul.f32 %v1475_v17, %v1734_v13 }
 0x21b   :  { %1484 = vrcp.f32 %v676_v5 }
 0x21c   :  { %1486 = vrcp.f32 %v679_v62 }
 0x21d   :  { %v1477_v18 = vpop.eup %1476 }
 0x21e   :  { %v685_v19 = vpop.xlane.xlu0 %684  ;;  %v682_v21 = vpop.xlane.xlu1 %681  ;;  %v724_v6 = vmul.f32 %v1477_v18, %v1742_v3  ;;  %v1437_v3 = vld [vmem:[%s1940_s2 + $0x18] sm:$0xff]  }
 0x21f   :  { %v1479_v24 = vpop.eup %1478  ;;  %1488 = vrcp.f32 %v682_v21 }
 0x220   :  { %v739_v20 = vpack.c.bf16 %v724_v6, %v723_v22  ;;  %1490 = vrcp.f32 %v685_v19  ;;  %v725_v30 = vmul.f32 %v1479_v24, %v1739_v16 }
 0x221   :  { %v1481_v29 = vpop.eup %1480 }
 0x222   :  { %v691_v25 = vpop.xlane.xlu0 %690  ;;  %v688_v32 = vpop.xlane.xlu1 %687  ;;  %v726_v33 = vmul.f32 %v1481_v29, %v1749_v28  ;;  %1371 = vmatmul.mubr.msk.bf16.vlgmr.msra.gmra.mrb[16].mxu0 %vm84_vm0, %v739_v20 }
 0x223   :  { %v1483_v13 = vpop.eup %1482  ;;  %1492 = vrcp.f32 %v688_v32  ;;  %1381 = vmatpush3.bf16.msra.mxu0 %v1436_v26  ;;  %1382 = vmatprep.mubr.msk.bf16.mxu0 %vm1507_vm1, %v1506_v0 }
 0x224   :  { %v740_v34 = vpack.c.bf16 %v726_v33, %v725_v30  ;;  %1392 = vmatprep.subr.bf16.mxu0 %v1506_v0  ;;  %1494 = vrcp.f32 %v691_v25  ;;  %v727_v28 = vmul.f32 %v1483_v13, %v1752_v31 }
 0x225   :  { %v1485_v23 = vpop.eup %1484 }
 0x226   :  { %v697_v16 = vpop.xlane.xlu0 %696  ;;  %v694_v36 = vpop.xlane.xlu1 %693  ;;  %v728_v37 = vmul.f32 %v1485_v23, %v1759_v35  ;;  %1377 = vmatmul.mubr.msk.bf16.vlgmr.msra.gmra.mrb[16].mxu1 %vm84_vm0, %v740_v34 }
 0x227   :  { %v1487_v27 = vpop.eup %1486  ;;  %1387 = vmatpush3.bf16.msra.mxu1 %v1437_v3  ;;  %1496 = vrcp.f32 %v694_v36  ;;  %1388 = vmatprep.mubr.msk.bf16.mxu1 %vm1507_vm1, %v1506_v0 }
 0x228   :  { %v741_v43 = vpack.c.bf16 %v728_v37, %v727_v28  ;;  %1398 = vmatprep.subr.bf16.mxu1 %v1506_v0  ;;  %1498 = vrcp.f32 %v697_v16  ;;  %v729_v35 = vmul.f32 %v1487_v27, %v1762_v39 }
 0x229   :  { %v1489_v45 = vpop.eup %1488 }
 0x22a   :  { %v703_v31 = vpop.xlane.xlu0 %702  ;;  %v700_v48 = vpop.xlane.xlu1 %699  ;;  %v730_v41 = vmul.f32 %v1489_v45, %v1769_v52  ;;  %1383 = vmatmul.mubr.msk.bf16.vlgmr.msra.gmra.mrb[20].mxu0 %vm84_vm0, %v741_v43 }
 0x22b   :  { %v1491_v49 = vpop.eup %1490  ;;  %1500 = vrcp.f32 %v700_v48  ;;  %1393 = vmatpush3.bf16.msra.mxu0 %v1438_v40  ;;  %1394 = vmatprep.mubr.msk.bf16.mxu0 %vm1507_vm1, %v1506_v0 }
 0x22c   :  { %1502 = vrcp.f32 %v703_v31  ;;  %v742_v50 = vpack.c.bf16 %v730_v41, %v729_v35  ;;  %1404 = vmatprep.subr.bf16.mxu0 %v1506_v0  ;;  %v731_v52 = vmul.f32 %v1491_v49, %v1772_v54 }
 0x22d   :  { %v1493_v55 = vpop.eup %1492 }
 0x22e   :  { %v706_v39 = vpop.xlane.xlu1 %705  ;;  %v732_v56 = vmul.f32 %v1493_v55, %v1779_v58  ;;  %1389 = vmatmul.mubr.msk.bf16.vlgmr.msra.gmra.mrb[20].mxu1 %vm84_vm0, %v742_v50  ;;  %v1495_v57 = vpop.eup %1494 }
 0x22f   :  { %1504 = vrcp.f32 %v706_v39  ;;  %1399 = vmatpush3.bf16.msra.mxu1 %v1439_v53  ;;  %1400 = vmatprep.mubr.msk.bf16.mxu1 %vm1507_vm1, %v1506_v0  ;;  %v733_v54 = vmul.f32 %v1495_v57, %v1781_v47 }
 0x230   :  { %v743_v60 = vpack.c.bf16 %v732_v56, %v731_v52  ;;  %1410 = vmatprep.subr.bf16.mxu1 %v1506_v0 }
 0x231   :  { %v1497_v51 = vpop.eup %1496 }
 0x232   :  { %v734_v58 = vmul.f32 %v1497_v51, %v1787_v61  ;;  %1395 = vmatmul.mubr.msk.bf16.vlgmr.msra.gmra.mrb[24].mxu0 %vm84_vm0, %v743_v60  ;;  %v1499_v1 = vpop.eup %1498 }
 0x233   :  { %1405 = vmatpush3.bf16.msra.mxu0 %v1440_v59  ;;  %1406 = vmatprep.mubr.msk.bf16.mxu0 %vm1507_vm1, %v1506_v0  ;;  %v735_v10 = vmul.f32 %v1499_v1, %v1789_v63 }
 0x234   :  { %v744_v8 = vpack.c.bf16 %v734_v58, %v733_v54 }
 0x235   :  { %v1501_v9 = vpop.eup %1500 }
 0x236   :  { %v1503_v42 = vpop.eup %1502  ;;  %v736_v47 = vmul.f32 %v1501_v9, %v1795_v4  ;;  %1401 = vmatmul.mubr.msk.bf16.vlgmr.msra.gmra.mrb[24].mxu1 %vm84_vm0, %v744_v8 }
 0x237   :  { %1411 = vmatpush3.bf16.msra.mxu1 %v1441_v2  ;;  %1412 = vmatprep.mubr.msk.bf16.mxu1 %vm1507_vm1, %v1506_v0  ;;  %v737_v12 = vmul.f32 %v1503_v42, %v1797_v7 }
 0x238   :  { %v745_v11 = vpack.c.bf16 %v736_v47, %v735_v10 }
 0x239   :  { %v1505_v61 = vpop.eup %1504 }
 0x23a   :  { %v738_v44 = vmul.f32 %v1505_v61, %v1803_v38  ;;  %1407 = vmatmul.mubr.msk.bf16.vlgmr.msra.gmra.mrb[28].mxu0 %vm84_vm0, %v745_v11 }
 0x23c   :  { %v746_v46 = vpack.c.bf16 %v738_v44, %v737_v12 }
 0x23e   :  { %1413 = vmatmul.mubr.msk.bf16.vlgmr.msra.gmra.mrb[28].mxu1 %vm84_vm0, %v746_v46 }
 0x2f5   :  { %v790_v63 = vpop.f32.mrb[16].mxu0 }
 0x2f6   :  { %v1147_v14 = vadd.f32 3.0, %v790_v63  ;;  %v1372_v4 = vpop.f32.mrb[17].mxu0 }
 0x2f7   :  { %v793_v15 = vpop.f32.mrb[18].mxu0 }
 0x2f8   :  { %v1163_v62 = vmax.f32 %v1147_v14, 0.0  ;;  %v1148_v5 = vadd.f32 3.0, %v793_v15  ;;  %v1373_v17 = vpop.f32.mrb[19].mxu0 }
 0x2f9   :  { %v840_v18 = vpop.f32.mrb[16].mxu1 }
 0x2fa   :  { %v1179_v0 = vmin.f32 %v1163_v62, 6.0  ;;  %v1164_v19 = vmax.f32 %v1148_v5, 0.0  ;;  %v1149_v21 = vadd.f32 3.0, %v840_v18  ;;  %v1378_v22 = vpop.f32.mrb[17].mxu1 }
 0x2fb   :  { %v843_v7 = vpop.f32.mrb[18].mxu1 }
 0x2fc   :  { %v1195_v6 = vmul.f32 %v1179_v0, %v790_v63  ;;  %v1180_v38 = vmin.f32 %v1164_v19, 6.0  ;;  %v1165_v24 = vmax.f32 %v1149_v21, 0.0  ;;  %v1150_v26 = vadd.f32 3.0, %v843_v7  ;;  %v1379_v20 = vpop.f32.mrb[19].mxu1 }
 0x2fd   :  { %v890_v29 = vpop.f32.mrb[20].mxu0 }
 0x2fe   :  { %v1211_v25 = vmul.f32 0.16666667, %v1195_v6  ;;  %v1196_v32 = vmul.f32 %v1180_v38, %v793_v15  ;;  %v1181_v30 = vmin.f32 %v1165_v24, 6.0  ;;  %v1166_v33 = vmax.f32 %v1150_v26, 0.0  ;;  %v1384_v13 = vpop.f32.mrb[21].mxu0 }
 0x2ff   :  { %v1151_v3 = vadd.f32 3.0, %v890_v29  ;;  %v893_v34 = vpop.f32.mrb[22].mxu0 }
 0x300   :  { %1228 = vst.msk [vmem:[%s1941_s4] sm:$0xff] %vm1227_vm2, %v1211_v25  ;;  %v1212_v23 = vmul.f32 0.16666667, %v1196_v32  ;;  %v1197_v16 = vmul.f32 %v1181_v30, %v840_v18  ;;  %v1182_v36 = vmin.f32 %v1166_v33, 6.0  ;;  %v1152_v28 = vadd.f32 3.0, %v893_v34  ;;  %v1385_v37 = vpop.f32.mrb[23].mxu0 }
 0x301   :  { %v1167_v27 = vmax.f32 %v1151_v3, 0.0  ;;  %v940_v40 = vpop.f32.mrb[20].mxu1 }
 0x302   :  { %1229 = vst.msk [vmem:[%s1941_s4 + $0x8] sm:$0xff] %vm1227_vm2, %v1212_v23  ;;  %v1213_v43 = vmul.f32 0.16666667, %v1197_v16  ;;  %v1198_v45 = vmul.f32 %v1182_v36, %v843_v7  ;;  %v1168_v31 = vmax.f32 %v1152_v28, 0.0  ;;  %v1153_v48 = vadd.f32 3.0, %v940_v40  ;;  %v1390_v35 = vpop.f32.mrb[21].mxu1 }
 0x303   :  { %v1183_v41 = vmin.f32 %v1167_v27, 6.0  ;;  %v943_v49 = vpop.f32.mrb[22].mxu1 }
 0x304   :  { %1230 = vst.msk [vmem:[%s1941_s4 + $0x10] sm:$0xff] %vm1227_vm2, %v1213_v43  ;;  %v1214_v53 = vmul.f32 0.16666667, %v1198_v45  ;;  %v1184_v50 = vmin.f32 %v1168_v31, 6.0  ;;  %v1169_v55 = vmax.f32 %v1153_v48, 0.0  ;;  %v1154_v39 = vadd.f32 3.0, %v943_v49 }
 0x305   :  { %v1391_v52 = vpop.f32.mrb[23].mxu1  ;;  %v1199_v56 = vmul.f32 %v1183_v41, %v890_v29  ;;  %v990_v57 = vpop.f32.mrb[24].mxu0 }
 0x306   :  { %1231 = vst.msk [vmem:[%s1941_s4 + $0x18] sm:$0xff] %vm1227_vm2, %v1214_v53  ;;  %v1200_v59 = vmul.f32 %v1184_v50, %v893_v34  ;;  %v1185_v60 = vmin.f32 %v1169_v55, 6.0  ;;  %v1170_v51 = vmax.f32 %v1154_v39, 0.0  ;;  %v1155_v54 = vadd.f32 3.0, %v990_v57  ;;  %v1396_v58 = vpop.f32.mrb[25].mxu0 }
 0x307   :  { %v1215_v1 = vmul.f32 0.16666667, %v1199_v56  ;;  %v993_v2 = vpop.f32.mrb[26].mxu0 }
 0x308   :  { %v1216_v8 = vmul.f32 0.16666667, %v1200_v59  ;;  %v1201_v9 = vmul.f32 %v1185_v60, %v940_v40  ;;  %v1186_v42 = vmin.f32 %v1170_v51, 6.0  ;;  %v1171_v10 = vmax.f32 %v1155_v54, 0.0  ;;  %v1397_v47 = vpop.f32.mrb[27].mxu0 }
 0x309   :  { %1232 = vst.msk [vmem:[%s1941_s4 + $0x20] sm:$0xff] %vm1227_vm2, %v1215_v1  ;;  %v1156_v61 = vadd.f32 3.0, %v993_v2  ;;  %v1040_v11 = vpop.f32.mrb[24].mxu1 }
 0x30a   :  { %1233 = vst.msk [vmem:[%s1941_s4 + $0x28] sm:$0xff] %vm1227_vm2, %v1216_v8  ;;  %v1217_v12 = vmul.f32 0.16666667, %v1201_v9  ;;  %v1202_v44 = vmul.f32 %v1186_v42, %v943_v49  ;;  %v1187_v46 = vmin.f32 %v1171_v10, 6.0  ;;  %v1157_v63 = vadd.f32 3.0, %v1040_v11  ;;  %v1402_v14 = vpop.f32.mrb[25].mxu1 }
 0x30b   :  { %v1172_v4 = vmax.f32 %v1156_v61, 0.0  ;;  %v1043_v15 = vpop.f32.mrb[26].mxu1 }
 0x30c   :  { %1234 = vst.msk [vmem:[%s1941_s4 + $0x30] sm:$0xff] %vm1227_vm2, %v1217_v12  ;;  %v1218_v62 = vmul.f32 0.16666667, %v1202_v44  ;;  %v1203_v5 = vmul.f32 %v1187_v46, %v990_v57  ;;  %v1173_v17 = vmax.f32 %v1157_v63, 0.0  ;;  %v1158_v18 = vadd.f32 3.0, %v1043_v15  ;;  %v1403_v0 = vpop.f32.mrb[27].mxu1 }
 0x30d   :  { %v1188_v19 = vmin.f32 %v1172_v4, 6.0  ;;  %v1090_v21 = vpop.f32.mrb[28].mxu0 }
 0x30e   :  { %1235 = vst.msk [vmem:[%s1941_s4 + $0x38] sm:$0xff] %vm1227_vm2, %v1218_v62  ;;  %v1219_v22 = vmul.f32 0.16666667, %v1203_v5  ;;  %v1189_v7 = vmin.f32 %v1173_v17, 6.0  ;;  %v1174_v6 = vmax.f32 %v1158_v18, 0.0  ;;  %v1159_v38 = vadd.f32 3.0, %v1090_v21 }
 0x30f   :  { %v1408_v24 = vpop.f32.mrb[29].mxu0  ;;  %v1204_v26 = vmul.f32 %v1188_v19, %v993_v2 }
 0x310   :  { %v1093_v20 = vpop.f32.mrb[30].mxu0  ;;  %1236 = vst.msk [vmem:[%s1941_s4 + $0x40] sm:$0xff] %vm1227_vm2, %v1219_v22  ;;  %v1205_v29 = vmul.f32 %v1189_v7, %v1040_v11  ;;  %v1190_v25 = vmin.f32 %v1174_v6, 6.0  ;;  %v1175_v32 = vmax.f32 %v1159_v38, 0.0 }
 0x311   :  { %v1160_v30 = vadd.f32 3.0, %v1093_v20  ;;  %v1409_v33 = vpop.f32.mrb[31].mxu0  ;;  %v1220_v13 = vmul.f32 0.16666667, %v1204_v26  ;;  %v1140_v3 = vpop.f32.mrb[28].mxu1 }
 0x312   :  { %v1221_v34 = vmul.f32 0.16666667, %v1205_v29  ;;  %v1206_v23 = vmul.f32 %v1190_v25, %v1043_v15  ;;  %v1191_v16 = vmin.f32 %v1175_v32, 6.0  ;;  %v1414_v28 = vpop.f32.mrb[29].mxu1  ;;  %v1161_v37 = vadd.f32 3.0, %v1140_v3 }
 0x313   :  { %v1176_v36 = vmax.f32 %v1160_v30, 0.0  ;;  %1237 = vst.msk [vmem:[%s1941_s4 + $0x48] sm:$0xff] %vm1227_vm2, %v1220_v13  ;;  %v1143_v27 = vpop.f32.mrb[30].mxu1 }
 0x314   :  { %1238 = vst.msk [vmem:[%s1941_s4 + $0x50] sm:$0xff] %vm1227_vm2, %v1221_v34  ;;  %v1222_v40 = vmul.f32 0.16666667, %v1206_v23  ;;  %v1207_v43 = vmul.f32 %v1191_v16, %v1090_v21  ;;  %v1162_v31 = vadd.f32 3.0, %v1143_v27  ;;  %v1415_v48 = vpop.f32.mrb[31].mxu1  ;;  %v1177_v35 = vmax.f32 %v1161_v37, 0.0 }
 0x315   :  { %v1192_v45 = vmin.f32 %v1176_v36, 6.0 }
 0x316   :  { %1239 = vst.msk [vmem:[%s1941_s4 + $0x58] sm:$0xff] %vm1227_vm2, %v1222_v40  ;;  %v1223_v41 = vmul.f32 0.16666667, %v1207_v43  ;;  %v1178_v53 = vmax.f32 %v1162_v31, 0.0  ;;  %v1193_v50 = vmin.f32 %v1177_v35, 6.0 }
 0x317   :  { %v1208_v49 = vmul.f32 %v1192_v45, %v1093_v20 }
 0x318   :  { %1240 = vst.msk [vmem:[%s1941_s4 + $0x60] sm:$0xff] %vm1227_vm2, %v1223_v41  ;;  %v1194_v39 = vmin.f32 %v1178_v53, 6.0  ;;  %v1209_v52 = vmul.f32 %v1193_v50, %v1140_v3 }
 0x319   :  { %v1224_v55 = vmul.f32 0.16666667, %v1208_v49 }
 0x31a   :  { %v1210_v56 = vmul.f32 %v1194_v39, %v1143_v27  ;;  %v1225_v57 = vmul.f32 0.16666667, %v1209_v52 }
 0x31b   :  { %1241 = vst.msk [vmem:[%s1941_s4 + $0x68] sm:$0xff] %vm1227_vm2, %v1224_v55 }
 0x31c   :  { %v1226_v59 = vmul.f32 0.16666667, %v1210_v56  ;;  %1242 = vst.msk [vmem:[%s1941_s4 + $0x70] sm:$0xff] %vm1227_vm2, %v1225_v57 }
 0x31e   :  { %1243 = vst.msk [vmem:[%s1941_s4 + $0x78] sm:$0xff] %vm1227_vm2, %v1226_v59 }

// kernel: custom_levit_forward.36
= control target key start
LH: loop header
LB: loop body
LE: loop exit
PB: predicated region body
PF: predicated region fallthrough
CT: control target
= control target key end

     0   :  { %s303_s1 = inlined_call_operand.vmem [shape: bf16[128,128], index: 1, kind: input, shape index: {}]   ;;  %s304_s0 = inlined_call_operand.vmem [shape: bf16[32,128], index: 0, kind: input, shape index: {}]   ;;  %s305_s2 = inlined_call_operand.vmem [shape: f32[1,128], index: 2, kind: input, shape index: {}]   ;;  %s306_s3 = inlined_call_operand.vmem [shape: f32[32,128], index: 3, kind: input, shape index: {}]   ;;  %s307_s4 = inlined_call_operand.vmem [shape: f32[32,128], index: 4, kind: output, shape index: {}]  }
   0x1   :  { %v211_v0 = vld [vmem:[%s303_s1] sm:$0xff]   ;;  %v212_v1 = vld [vmem:[%s303_s1 + $0x8] sm:$0xff]   ;;  %v213_v2 = vld [vmem:[%s303_s1 + $0x10] sm:$0xff]  }
   0x2   :  { %191 = vmatprep.subr.bf16.mxu0 %v211_v0  ;;  %v214_v3 = vld [vmem:[%s303_s1 + $0x18] sm:$0xff]   ;;  %v219_v4 = vld [vmem:[%s304_s0] sm:$0xff]   ;;  %v216_v6 = vld [vmem:[%s303_s1 + $0x28] sm:$0xff]  }
   0x3   :  { %192 = vmatpush3.bf16.msra.mxu0 %v211_v0  ;;  %207 = vmatprep.mubr.bf16.mxu0 %v219_v4  ;;  %v215_v5 = vld [vmem:[%s303_s1 + $0x20] sm:$0xff]   ;;  %v217_v7 = vld [vmem:[%s303_s1 + $0x30] sm:$0xff]   ;;  %v218_v8 = vld [vmem:[%s303_s1 + $0x38] sm:$0xff]  }
   0x4   :  { %193 = vmatprep.subr.bf16.mxu0 %v212_v1  ;;  %v220_v9 = vld [vmem:[%s304_s0 + $0x8] sm:$0xff]   ;;  %v170_v10 = vld [vmem:[%s305_s2] ss:$0 sm:$0xff]  ;;  %v156_v12 = vld [vmem:[%s306_s3 + $0x10] sm:$0xff] }
   0x5   :  { %v154_v15 = vld [vmem:[%s306_s3] sm:$0xff]  ;;  %v157_v18 = vld [vmem:[%s306_s3 + $0x18] sm:$0xff]  ;;  %v155_v22 = vld [vmem:[%s306_s3 + $0x8] sm:$0xff] }
   0x7   :  { %194 = vmatpush3.bf16.msra.mxu0 %v212_v1 }
   0x8   :  { %195 = vmatprep.subr.bf16.mxu0 %v213_v2 }
   0xb   :  { %196 = vmatpush3.bf16.msra.mxu0 %v213_v2 }
   0xc   :  { %197 = vmatprep.subr.bf16.mxu0 %v214_v3 }
   0xf   :  { %198 = vmatpush3.bf16.msra.mxu0 %v214_v3 }
  0x10   :  { %199 = vmatprep.subr.bf16.mxu0 %v215_v5 }
  0x13   :  { %200 = vmatpush3.bf16.msra.mxu0 %v215_v5 }
  0x14   :  { %201 = vmatprep.subr.bf16.mxu0 %v216_v6 }
  0x17   :  { %202 = vmatpush3.bf16.msra.mxu0 %v216_v6 }
  0x18   :  { %203 = vmatprep.subr.bf16.mxu0 %v217_v7 }
  0x1b   :  { %204 = vmatpush3.bf16.msra.mxu0 %v217_v7 }
  0x1c   :  { %205 = vmatprep.subr.bf16.mxu0 %v218_v8 }
  0x1f   :  { %206 = vmatpush3.bf16.msra.mxu0 %v218_v8 }
  0x22   :  { %208 = vmatmul.mubr.bf16.vlgmr.msra.gmra.mrb[0].mxu0 %v220_v9 }
  0xf5   :  { %v209_v11 = vpop.f32.mrb[0].mxu0 }
  0xf6   :  { %v148_v13 = vadd.f32 %v209_v11, %v170_v10  ;;  %v139_v14 = vpop.f32.mrb[1].mxu0 }
  0xf7   :  { %v140_v16 = vadd.f32 %v170_v10, %v139_v14  ;;  %v210_v17 = vpop.f32.mrb[2].mxu0 }
  0xf8   :  { %v160_v19 = vadd.f32 %v156_v12, %v148_v13  ;;  %v151_v20 = vadd.f32 %v210_v17, %v170_v10  ;;  %v142_v21 = vpop.f32.mrb[3].mxu0 }
  0xf9   :  { %v158_v23 = vadd.f32 %v154_v15, %v140_v16  ;;  %v143_v24 = vadd.f32 %v170_v10, %v142_v21 }
  0xfa   :  { %164 = vst [vmem:[%s307_s4 + $0x10] sm:$0xff] %v160_v19  ;;  %v161_v25 = vadd.f32 %v157_v18, %v151_v20 }
  0xfb   :  { %162 = vst [vmem:[%s307_s4] sm:$0xff] %v158_v23  ;;  %v159_v26 = vadd.f32 %v155_v22, %v143_v24 }
  0xfc   :  { %165 = vst [vmem:[%s307_s4 + $0x18] sm:$0xff] %v161_v25 }
  0xfd   :  { %163 = vst [vmem:[%s307_s4 + $0x8] sm:$0xff] %v159_v26 }

// kernel: custom_levit_forward.37
= control target key start
LH: loop header
LB: loop body
LE: loop exit
PB: predicated region body
PF: predicated region fallthrough
CT: control target
= control target key end

     0   :  { %v333_v1 = vmov 0   ;;  %v37_v19 = vlaneseq  ;;  %s423_s1 = inlined_call_operand.vmem [shape: bf16[128,256], index: 1, kind: input, shape index: {}]   ;;  %s424_s0 = inlined_call_operand.vmem [shape: bf16[32,128], index: 0, kind: input, shape index: {}]   ;;  %s425_s2 = inlined_call_operand.vmem [shape: f32[1,256], index: 2, kind: input, shape index: {}]   ;;  %s426_s3 = inlined_call_operand.vmem [shape: bf16[32,256], index: 3, kind: output, shape index: {}]  }
   0x1   :  { %v307_v0 = vld [vmem:[%s423_s1 + $0x4] ss:$8 sps:$4 sm:$0xff]   ;;  %171 = vmatprep.mubr.bf16.mxu0 %v333_v1  ;;  %181 = vmatprep.mubr.bf16.mxu1 %v333_v1  ;;  %v309_v2 = vld [vmem:[%s423_s1] ss:$8 sps:$4 sm:$0xff]   ;;  %v310_v3 = vld [vmem:[%s423_s1 + $0x14] ss:$8 sps:$4 sm:$0xff]  }
   0x2   :  { %139 = vmatprep.subr.bf16.mxu0 %v307_v0  ;;  %290 = vmatprep.subr.bf16.mxu1 %v307_v0  ;;  %v312_v4 = vld [vmem:[%s423_s1 + $0x10] ss:$8 sps:$4 sm:$0xff]   ;;  %v313_v5 = vld [vmem:[%s423_s1 + $0x24] ss:$8 sps:$4 sm:$0xff]   ;;  %v315_v6 = vld [vmem:[%s423_s1 + $0x20] ss:$8 sps:$4 sm:$0xff]  }
   0x3   :  { %140 = vmatpush1.bf16.msra.mxu0 %v309_v2  ;;  %298 = vmatpush1.bf16.msra.mxu1 %v309_v2  ;;  %v316_v7 = vld [vmem:[%s423_s1 + $0x34] ss:$8 sps:$4 sm:$0xff]   ;;  %v318_v8 = vld [vmem:[%s423_s1 + $0x30] ss:$8 sps:$4 sm:$0xff]   ;;  %v319_v9 = vld [vmem:[%s423_s1 + $0x44] ss:$8 sps:$4 sm:$0xff]  }
   0x4   :  { %141 = vmatprep.subr.bf16.mxu0 %v310_v3  ;;  %291 = vmatprep.subr.bf16.mxu1 %v310_v3  ;;  %v321_v10 = vld [vmem:[%s423_s1 + $0x40] ss:$8 sps:$4 sm:$0xff]   ;;  %v322_v11 = vld [vmem:[%s423_s1 + $0x54] ss:$8 sps:$4 sm:$0xff]   ;;  %v324_v12 = vld [vmem:[%s423_s1 + $0x50] ss:$8 sps:$4 sm:$0xff]  }
   0x5   :  { %v325_v13 = vld [vmem:[%s423_s1 + $0x64] ss:$8 sps:$4 sm:$0xff]   ;;  %v327_v14 = vld [vmem:[%s423_s1 + $0x60] ss:$8 sps:$4 sm:$0xff]   ;;  %v328_v15 = vld [vmem:[%s423_s1 + $0x74] ss:$8 sps:$4 sm:$0xff]  }
   0x6   :  { %v330_v16 = vld [vmem:[%s423_s1 + $0x70] ss:$8 sps:$4 sm:$0xff]   ;;  %v331_v17 = vld [vmem:[%s424_s0] sm:$0xff]   ;;  %v332_v18 = vld [vmem:[%s424_s0 + $0x8] sm:$0xff]   ;;  %v38_v20 = vshrl.u32 %v37_v19, 7 }
   0x7   :  { %142 = vmatpush1.bf16.msra.mxu0 %v312_v4  ;;  %299 = vmatpush1.bf16.msra.mxu1 %v312_v4  ;;  %v35_v22 = vld [vmem:[%s425_s2] sm:$0x3] }
   0x8   :  { %143 = vmatprep.subr.bf16.mxu0 %v313_v5  ;;  %292 = vmatprep.subr.bf16.mxu1 %v313_v5  ;;  %v39_v21 = vsub.s32 0, %v38_v20  ;;  %v43_v23 = vsub.s32 1, %v38_v20 }
   0xa   :  { %v40_v24 = vrot.slane %v35_v22, %v39_v21  ;;  %v44_v25 = vrot.slane %v35_v22, %v43_v23 }
   0xb   :  { %144 = vmatpush1.bf16.msra.mxu0 %v315_v6  ;;  %300 = vmatpush1.bf16.msra.mxu1 %v315_v6 }
   0xc   :  { %145 = vmatprep.subr.bf16.mxu0 %v316_v7  ;;  %293 = vmatprep.subr.bf16.mxu1 %v316_v7 }
   0xf   :  { %146 = vmatpush1.bf16.msra.mxu0 %v318_v8  ;;  %301 = vmatpush1.bf16.msra.mxu1 %v318_v8 }
  0x10   :  { %147 = vmatprep.subr.bf16.mxu0 %v319_v9  ;;  %294 = vmatprep.subr.bf16.mxu1 %v319_v9 }
  0x13   :  { %148 = vmatpush1.bf16.msra.mxu0 %v321_v10  ;;  %302 = vmatpush1.bf16.msra.mxu1 %v321_v10 }
  0x14   :  { %149 = vmatprep.subr.bf16.mxu0 %v322_v11  ;;  %295 = vmatprep.subr.bf16.mxu1 %v322_v11 }
  0x17   :  { %150 = vmatpush1.bf16.msra.mxu0 %v324_v12  ;;  %303 = vmatpush1.bf16.msra.mxu1 %v324_v12 }
  0x18   :  { %151 = vmatprep.subr.bf16.mxu0 %v325_v13  ;;  %296 = vmatprep.subr.bf16.mxu1 %v325_v13 }
  0x1b   :  { %152 = vmatpush1.bf16.msra.mxu0 %v327_v14  ;;  %304 = vmatpush1.bf16.msra.mxu1 %v327_v14 }
  0x1c   :  { %153 = vmatprep.subr.bf16.mxu0 %v328_v15  ;;  %297 = vmatprep.subr.bf16.mxu1 %v328_v15 }
  0x1f   :  { %154 = vmatpush1.bf16.msra.mxu0 %v330_v16  ;;  %305 = vmatpush1.bf16.msra.mxu1 %v330_v16 }
  0x22   :  { %172 = vmatmul.mubr.bf16.vlgmr.msra.gmra.mrb[0].mxu0 %v331_v17  ;;  %182 = vmatmul.mubr.bf16.vlgmr.msra.gmra.mrb[0].mxu1 %v332_v18 }
  0xf5   :  { %v173_v26 = vpop.f32.mrb[0].mxu0  ;;  %v183_v27 = vpop.f32.mrb[0].mxu1 }
  0xf6   :  { %v174_v28 = vadd.f32 %v173_v26, %v40_v24  ;;  %v184_v29 = vadd.f32 %v183_v27, %v40_v24  ;;  %v175_v30 = vpop.f32.mrb[1].mxu0  ;;  %v185_v31 = vpop.f32.mrb[1].mxu1 }
  0xf7   :  { %v176_v32 = vadd.f32 %v175_v30, %v44_v25  ;;  %v186_v33 = vadd.f32 %v185_v31, %v44_v25  ;;  %v177_v34 = vpop.f32.mrb[2].mxu0  ;;  %v187_v35 = vpop.f32.mrb[2].mxu1 }
  0xf8   :  { %v192_v36 = vadd.f32 3.0, %v174_v28  ;;  %v196_v37 = vadd.f32 3.0, %v184_v29  ;;  %v178_v38 = vadd.f32 %v177_v34, %v40_v24  ;;  %v188_v39 = vadd.f32 %v187_v35, %v40_v24  ;;  %v179_v40 = vpop.f32.mrb[3].mxu0  ;;  %v189_v41 = vpop.f32.mrb[3].mxu1 }
  0xf9   :  { %v193_v42 = vadd.f32 3.0, %v176_v32  ;;  %v197_v43 = vadd.f32 3.0, %v186_v33  ;;  %v180_v44 = vadd.f32 %v179_v40, %v44_v25  ;;  %v190_v45 = vadd.f32 %v189_v41, %v44_v25 }
  0xfa   :  { %v200_v46 = vmax.f32 %v192_v36, 0.0  ;;  %v204_v47 = vmax.f32 %v196_v37, 0.0  ;;  %v194_v48 = vadd.f32 3.0, %v178_v38  ;;  %v198_v49 = vadd.f32 3.0, %v188_v39 }
  0xfb   :  { %v201_v50 = vmax.f32 %v193_v42, 0.0  ;;  %v205_v51 = vmax.f32 %v197_v43, 0.0  ;;  %v195_v52 = vadd.f32 3.0, %v180_v44  ;;  %v199_v53 = vadd.f32 3.0, %v190_v45 }
  0xfc   :  { %v208_v54 = vmin.f32 %v200_v46, 6.0  ;;  %v212_v55 = vmin.f32 %v204_v47, 6.0  ;;  %v202_v56 = vmax.f32 %v194_v48, 0.0  ;;  %v206_v57 = vmax.f32 %v198_v49, 0.0 }
  0xfd   :  { %v209_v58 = vmin.f32 %v201_v50, 6.0  ;;  %v213_v59 = vmin.f32 %v205_v51, 6.0  ;;  %v203_v60 = vmax.f32 %v195_v52, 0.0  ;;  %v207_v61 = vmax.f32 %v199_v53, 0.0 }
  0xfe   :  { %v216_v62 = vmul.f32 %v208_v54, %v174_v28  ;;  %v220_v63 = vmul.f32 %v212_v55, %v184_v29  ;;  %v210_v0 = vmin.f32 %v202_v56, 6.0  ;;  %v214_v1 = vmin.f32 %v206_v57, 6.0 }
  0xff   :  { %v217_v2 = vmul.f32 %v209_v58, %v176_v32  ;;  %v221_v3 = vmul.f32 %v213_v59, %v186_v33  ;;  %v211_v4 = vmin.f32 %v203_v60, 6.0  ;;  %v215_v5 = vmin.f32 %v207_v61, 6.0 }
 0x100   :  { %v224_v6 = vmul.f32 0.16666667, %v216_v62  ;;  %v228_v7 = vmul.f32 0.16666667, %v220_v63  ;;  %v218_v8 = vmul.f32 %v210_v0, %v178_v38  ;;  %v222_v9 = vmul.f32 %v214_v1, %v188_v39 }
 0x101   :  { %v225_v10 = vmul.f32 0.16666667, %v217_v2  ;;  %v229_v11 = vmul.f32 0.16666667, %v221_v3  ;;  %v219_v12 = vmul.f32 %v211_v4, %v180_v44  ;;  %v223_v13 = vmul.f32 %v215_v5, %v190_v45 }
 0x102   :  { %v226_v14 = vmul.f32 0.16666667, %v218_v8  ;;  %v230_v15 = vmul.f32 0.16666667, %v222_v9 }
 0x103   :  { %v286_v16 = vpack.c.bf16 %v225_v10, %v224_v6  ;;  %v288_v17 = vpack.c.bf16 %v229_v11, %v228_v7  ;;  %v227_v18 = vmul.f32 0.16666667, %v219_v12  ;;  %v231_v19 = vmul.f32 0.16666667, %v223_v13 }
 0x105   :  { %256 = vst [vmem:[%s426_s3] sm:$0xff] %v286_v16  ;;  %258 = vst [vmem:[%s426_s3 + $0x10] sm:$0xff] %v288_v17  ;;  %v287_v20 = vpack.c.bf16 %v227_v18, %v226_v14  ;;  %v289_v21 = vpack.c.bf16 %v231_v19, %v230_v15 }
 0x107   :  { %257 = vst [vmem:[%s426_s3 + $0x8] sm:$0xff] %v287_v20  ;;  %259 = vst [vmem:[%s426_s3 + $0x18] sm:$0xff] %v289_v21 }

// kernel: custom_levit_forward.38
= control target key start
LH: loop header
LB: loop body
LE: loop exit
PB: predicated region body
PF: predicated region fallthrough
CT: control target
= control target key end

     0   :  { %s441_s1 = inlined_call_operand.vmem [shape: bf16[256,128], index: 1, kind: input, shape index: {}]   ;;  %s442_s0 = inlined_call_operand.vmem [shape: bf16[32,256], index: 0, kind: input, shape index: {}]   ;;  %s443_s2 = inlined_call_operand.vmem [shape: f32[1,128], index: 2, kind: input, shape index: {}]   ;;  %s444_s3 = inlined_call_operand.vmem [shape: f32[32,128], index: 3, kind: input, shape index: {}]   ;;  %s445_s4 = inlined_call_operand.vmem [shape: f32[32,128], index: 4, kind: output, shape index: {}]  }
   0x1   :  { %v307_v0 = vld [vmem:[%s441_s1 + $0x40] sm:$0xff]   ;;  %v309_v2 = vld [vmem:[%s441_s1 + $0x48] sm:$0xff]   ;;  %v311_v4 = vld [vmem:[%s441_s1 + $0x50] sm:$0xff]  }
   0x2   :  { %v308_v1 = vld [vmem:[%s441_s1] sm:$0xff]   ;;  %263 = vmatprep.subr.bf16.mxu0 %v307_v0  ;;  %291 = vmatprep.subr.bf16.mxu1 %v307_v0  ;;  %v310_v3 = vld [vmem:[%s441_s1 + $0x8] sm:$0xff]   ;;  %v312_v5 = vld [vmem:[%s441_s1 + $0x10] sm:$0xff]  }
   0x3   :  { %264 = vmatpush3.bf16.msra.mxu0 %v308_v1  ;;  %299 = vmatpush3.bf16.msra.mxu1 %v308_v1  ;;  %v313_v6 = vld [vmem:[%s441_s1 + $0x58] sm:$0xff]   ;;  %v315_v8 = vld [vmem:[%s441_s1 + $0x60] sm:$0xff]   ;;  %v317_v10 = vld [vmem:[%s441_s1 + $0x68] sm:$0xff]  }
   0x4   :  { %265 = vmatprep.subr.bf16.mxu0 %v309_v2  ;;  %292 = vmatprep.subr.bf16.mxu1 %v309_v2  ;;  %v314_v7 = vld [vmem:[%s441_s1 + $0x18] sm:$0xff]   ;;  %v316_v9 = vld [vmem:[%s441_s1 + $0x20] sm:$0xff]   ;;  %v318_v13 = vld [vmem:[%s441_s1 + $0x28] sm:$0xff]  }
   0x5   :  { %v325_v11 = vld [vmem:[%s442_s0 + $0x4] ss:$8 sps:$4 sm:$0xff]   ;;  %v328_v12 = vld [vmem:[%s442_s0 + $0x14] ss:$8 sps:$4 sm:$0xff]   ;;  %v323_v18 = vld [vmem:[%s442_s0] ss:$8 sps:$4 sm:$0xff]  }
   0x6   :  { %v319_v14 = vld [vmem:[%s441_s1 + $0x70] sm:$0xff]   ;;  %209 = vmatprep.mubr.bf16.mxu0 %v325_v11  ;;  %217 = vmatprep.mubr.bf16.mxu1 %v328_v12  ;;  %v321_v16 = vld [vmem:[%s441_s1 + $0x78] sm:$0xff]   ;;  %v242_v22 = vld [vmem:[%s443_s2] ss:$0 sm:$0xff] }
   0x7   :  { %266 = vmatpush3.bf16.msra.mxu0 %v310_v3  ;;  %300 = vmatpush3.bf16.msra.mxu1 %v310_v3  ;;  %v320_v15 = vld [vmem:[%s441_s1 + $0x30] sm:$0xff]   ;;  %v322_v17 = vld [vmem:[%s441_s1 + $0x38] sm:$0xff]   ;;  %v226_v29 = vld [vmem:[%s444_s3] sm:$0xff] }
   0x8   :  { %267 = vmatprep.subr.bf16.mxu0 %v311_v4  ;;  %293 = vmatprep.subr.bf16.mxu1 %v311_v4  ;;  %v326_v19 = vld [vmem:[%s442_s0 + $0x10] ss:$8 sps:$4 sm:$0xff]   ;;  %v227_v37 = vld [vmem:[%s444_s3 + $0x8] sm:$0xff] }
   0x9   :  { %v228_v30 = vld [vmem:[%s444_s3 + $0x10] sm:$0xff]  ;;  %v229_v38 = vld [vmem:[%s444_s3 + $0x18] sm:$0xff] }
   0xb   :  { %268 = vmatpush3.bf16.msra.mxu0 %v312_v5  ;;  %301 = vmatpush3.bf16.msra.mxu1 %v312_v5 }
   0xc   :  { %269 = vmatprep.subr.bf16.mxu0 %v313_v6  ;;  %294 = vmatprep.subr.bf16.mxu1 %v313_v6 }
   0xf   :  { %270 = vmatpush3.bf16.msra.mxu0 %v314_v7  ;;  %302 = vmatpush3.bf16.msra.mxu1 %v314_v7 }
  0x10   :  { %271 = vmatprep.subr.bf16.mxu0 %v315_v8  ;;  %295 = vmatprep.subr.bf16.mxu1 %v315_v8 }
  0x13   :  { %272 = vmatpush3.bf16.msra.mxu0 %v316_v9  ;;  %303 = vmatpush3.bf16.msra.mxu1 %v316_v9 }
  0x14   :  { %273 = vmatprep.subr.bf16.mxu0 %v317_v10  ;;  %296 = vmatprep.subr.bf16.mxu1 %v317_v10 }
  0x17   :  { %274 = vmatpush3.bf16.msra.mxu0 %v318_v13  ;;  %304 = vmatpush3.bf16.msra.mxu1 %v318_v13 }
  0x18   :  { %275 = vmatprep.subr.bf16.mxu0 %v319_v14  ;;  %297 = vmatprep.subr.bf16.mxu1 %v319_v14 }
  0x1b   :  { %276 = vmatpush3.bf16.msra.mxu0 %v320_v15  ;;  %305 = vmatpush3.bf16.msra.mxu1 %v320_v15 }
  0x1c   :  { %277 = vmatprep.subr.bf16.mxu0 %v321_v16  ;;  %298 = vmatprep.subr.bf16.mxu1 %v321_v16 }
  0x1f   :  { %278 = vmatpush3.bf16.msra.mxu0 %v322_v17  ;;  %306 = vmatpush3.bf16.msra.mxu1 %v322_v17 }
  0x22   :  { %210 = vmatmul.mubr.bf16.vlgmr.msra.gmra.mrb[0].mxu0 %v323_v18  ;;  %218 = vmatmul.mubr.bf16.vlgmr.msra.gmra.mrb[0].mxu1 %v326_v19 }
  0xf5   :  { %v279_v20 = vpop.f32.mrb[0].mxu0  ;;  %v285_v21 = vpop.f32.mrb[0].mxu1 }
  0xf6   :  { %v280_v23 = vpop.f32.mrb[1].mxu0  ;;  %v286_v24 = vpop.f32.mrb[1].mxu1 }
  0xf7   :  { %v281_v25 = vadd.f32 %v280_v23, %v279_v20  ;;  %v287_v26 = vadd.f32 %v286_v24, %v285_v21  ;;  %v282_v27 = vpop.f32.mrb[2].mxu0  ;;  %v288_v28 = vpop.f32.mrb[2].mxu1 }
  0xf8   :  { %v283_v31 = vpop.f32.mrb[3].mxu0  ;;  %v289_v32 = vpop.f32.mrb[3].mxu1 }
  0xf9   :  { %v212_v33 = vadd.f32 %v281_v25, %v242_v22  ;;  %v220_v34 = vadd.f32 %v287_v26, %v242_v22  ;;  %v284_v35 = vadd.f32 %v283_v31, %v282_v27  ;;  %v290_v36 = vadd.f32 %v289_v32, %v288_v28 }
  0xfb   :  { %v230_v39 = vadd.f32 %v226_v29, %v212_v33  ;;  %v232_v40 = vadd.f32 %v228_v30, %v220_v34  ;;  %v215_v41 = vadd.f32 %v284_v35, %v242_v22  ;;  %v223_v42 = vadd.f32 %v290_v36, %v242_v22 }
  0xfd   :  { %234 = vst [vmem:[%s445_s4] sm:$0xff] %v230_v39  ;;  %236 = vst [vmem:[%s445_s4 + $0x10] sm:$0xff] %v232_v40  ;;  %v231_v43 = vadd.f32 %v227_v37, %v215_v41  ;;  %v233_v44 = vadd.f32 %v229_v38, %v223_v42 }
  0xff   :  { %235 = vst [vmem:[%s445_s4 + $0x8] sm:$0xff] %v231_v43  ;;  %237 = vst [vmem:[%s445_s4 + $0x18] sm:$0xff] %v233_v44 }

// kernel: custom_levit_forward.54
= control target key start
LH: loop header
LB: loop body
LE: loop exit
PB: predicated region body
PF: predicated region fallthrough
CT: control target
= control target key end

     0   :  { %v704_v1 = vmov 0   ;;  %v69_v43 = vlaneseq  ;;  %s894_s1 = inlined_call_operand.vmem [shape: bf16[128,640], index: 1, kind: input, shape index: {}]   ;;  %s895_s0 = inlined_call_operand.vmem [shape: bf16[32,128], index: 0, kind: input, shape index: {}]   ;;  %s896_s2 = inlined_call_operand.vmem [shape: f32[1,640], index: 2, kind: input, shape index: {}]   ;;  %s897_s3 = inlined_call_operand.vmem [shape: bf16[32,640], index: 3, kind: output, shape index: {}]  }
   0x1   :  { %v646_v0 = vld [vmem:[%s894_s1 + $0x4] ss:$20 sps:$4 sm:$0xff]   ;;  %346 = vmatprep.mubr.bf16.mxu0 %v704_v1  ;;  %399 = vmatprep.mubr.bf16.mxu1 %v704_v1  ;;  %v648_v2 = vld [vmem:[%s894_s1] ss:$20 sps:$4 sm:$0xff]   ;;  %v651_v4 = vld [vmem:[%s894_s1 + $0x28] ss:$20 sps:$4 sm:$0xff]  }
   0x2   :  { %314 = vmatprep.subr.bf16.mxu0 %v646_v0  ;;  %v649_v3 = vld [vmem:[%s894_s1 + $0x2c] ss:$20 sps:$4 sm:$0xff]   ;;  %v652_v5 = vld [vmem:[%s894_s1 + $0x54] ss:$20 sps:$4 sm:$0xff]   ;;  %v654_v6 = vld [vmem:[%s894_s1 + $0x50] ss:$20 sps:$4 sm:$0xff]  }
   0x3   :  { %315 = vmatpush1.bf16.msra.mxu0 %v648_v2  ;;  %v655_v7 = vld [vmem:[%s894_s1 + $0x7c] ss:$20 sps:$4 sm:$0xff]   ;;  %v664_v8 = vld [vmem:[%s894_s1 + $0xc] ss:$20 sps:$4 sm:$0xff]   ;;  %v670_v11 = vld [vmem:[%s894_s1 + $0x34] ss:$20 sps:$4 sm:$0xff]  }
   0x4   :  { %316 = vmatprep.subr.bf16.mxu0 %v649_v3  ;;  %v666_v9 = vld [vmem:[%s894_s1 + $0x8] ss:$20 sps:$4 sm:$0xff]   ;;  %v657_v10 = vld [vmem:[%s894_s1 + $0x78] ss:$20 sps:$4 sm:$0xff]   ;;  %367 = vmatprep.subr.bf16.mxu1 %v664_v8  ;;  %v672_v12 = vld [vmem:[%s894_s1 + $0x30] ss:$20 sps:$4 sm:$0xff]  }
   0x5   :  { %368 = vmatpush1.bf16.msra.mxu1 %v666_v9  ;;  %v658_v13 = vld [vmem:[%s894_s1 + $0xa4] ss:$20 sps:$4 sm:$0xff]   ;;  %v660_v14 = vld [vmem:[%s894_s1 + $0xa0] ss:$20 sps:$4 sm:$0xff]   ;;  %v676_v15 = vld [vmem:[%s894_s1 + $0x5c] ss:$20 sps:$4 sm:$0xff]  }
   0x6   :  { %369 = vmatprep.subr.bf16.mxu1 %v670_v11  ;;  %v678_v16 = vld [vmem:[%s894_s1 + $0x58] ss:$20 sps:$4 sm:$0xff]   ;;  %v663_v18 = vld [vmem:[%s894_s1 + $0xc8] ss:$20 sps:$4 sm:$0xff]   ;;  %v683_v21 = vld [vmem:[%s894_s1 + $0x80] ss:$20 sps:$4 sm:$0xff]  }
   0x7   :  { %317 = vmatpush1.bf16.msra.mxu0 %v651_v4  ;;  %v661_v17 = vld [vmem:[%s894_s1 + $0xcc] ss:$20 sps:$4 sm:$0xff]   ;;  %v681_v19 = vld [vmem:[%s894_s1 + $0x84] ss:$20 sps:$4 sm:$0xff]   ;;  %v667_v20 = vld [vmem:[%s894_s1 + $0xf4] ss:$20 sps:$4 sm:$0xff]  }
   0x8   :  { %318 = vmatprep.subr.bf16.mxu0 %v652_v5  ;;  %v685_v22 = vld [vmem:[%s894_s1 + $0xac] ss:$20 sps:$4 sm:$0xff]   ;;  %v669_v23 = vld [vmem:[%s894_s1 + $0xf0] ss:$20 sps:$4 sm:$0xff]   ;;  %v687_v24 = vld [vmem:[%s894_s1 + $0xa8] ss:$20 sps:$4 sm:$0xff]  }
   0x9   :  { %370 = vmatpush1.bf16.msra.mxu1 %v672_v12  ;;  %v673_v25 = vld [vmem:[%s894_s1 + $0x11c] ss:$20 sps:$4 sm:$0xff]   ;;  %v689_v26 = vld [vmem:[%s894_s1 + $0xd4] ss:$20 sps:$4 sm:$0xff]   ;;  %v675_v27 = vld [vmem:[%s894_s1 + $0x118] ss:$20 sps:$4 sm:$0xff]  }
   0xa   :  { %371 = vmatprep.subr.bf16.mxu1 %v676_v15  ;;  %v680_v28 = vld [vmem:[%s894_s1 + $0x10] ss:$20 sps:$4 sm:$0xff]   ;;  %v695_v32 = vld [vmem:[%s894_s1 + $0xf8] ss:$20 sps:$4 sm:$0xff]   ;;  %v699_v35 = vld [vmem:[%s894_s1 + $0x120] ss:$20 sps:$4 sm:$0xff]  }
   0xb   :  { %319 = vmatpush1.bf16.msra.mxu0 %v654_v6  ;;  %v691_v29 = vld [vmem:[%s894_s1 + $0xd0] ss:$20 sps:$4 sm:$0xff]   ;;  %v684_v33 = vld [vmem:[%s894_s1 + $0x38] ss:$20 sps:$4 sm:$0xff]   ;;  %v688_v36 = vld [vmem:[%s894_s1 + $0x60] ss:$20 sps:$4 sm:$0xff]  }
   0xc   :  { %320 = vmatprep.subr.bf16.mxu0 %v655_v7  ;;  %v693_v30 = vld [vmem:[%s894_s1 + $0xfc] ss:$20 sps:$4 sm:$0xff]   ;;  %v679_v31 = vld [vmem:[%s895_s0] sm:$0xff]   ;;  %v701_v37 = vld [vmem:[%s895_s0 + $0x8] sm:$0xff]   ;;  %v70_v44 = vshrl.u32 %v69_v43, 7 }
   0xd   :  { %372 = vmatpush1.bf16.msra.mxu1 %v678_v16  ;;  %v697_v34 = vld [vmem:[%s894_s1 + $0x124] ss:$20 sps:$4 sm:$0xff]   ;;  %v692_v38 = vld [vmem:[%s894_s1 + $0x88] ss:$20 sps:$4 sm:$0xff]   ;;  %v702_v41 = vld [vmem:[%s894_s1 + $0x100] ss:$20 sps:$4 sm:$0xff]  }
   0xe   :  { %373 = vmatprep.subr.bf16.mxu1 %v681_v19  ;;  %v696_v39 = vld [vmem:[%s894_s1 + $0xb0] ss:$20 sps:$4 sm:$0xff]   ;;  %v700_v40 = vld [vmem:[%s894_s1 + $0xd8] ss:$20 sps:$4 sm:$0xff]   ;;  %v703_v42 = vld [vmem:[%s894_s1 + $0x128] ss:$20 sps:$4 sm:$0xff]  }
   0xf   :  { %321 = vmatpush1.bf16.msra.mxu0 %v657_v10  ;;  %v71_v45 = vsub.s32 0, %v70_v44  ;;  %v67_v46 = vld [vmem:[%s896_s2] sm:$0x1f]  ;;  %v75_v47 = vsub.s32 1, %v70_v44  ;;  %v79_v53 = vsub.s32 2, %v70_v44  ;;  %v83_v56 = vsub.s32 3, %v70_v44 }
  0x10   :  { %322 = vmatprep.subr.bf16.mxu0 %v658_v13 }
  0x11   :  { %374 = vmatpush1.bf16.msra.mxu1 %v683_v21  ;;  %v72_v48 = vrot.slane %v67_v46, %v71_v45  ;;  %v76_v49 = vrot.slane %v67_v46, %v75_v47  ;;  %v80_v61 = vrot.slane %v67_v46, %v79_v53  ;;  %v84_v63 = vrot.slane %v67_v46, %v83_v56 }
  0x12   :  { %375 = vmatprep.subr.bf16.mxu1 %v685_v22 }
  0x13   :  { %323 = vmatpush1.bf16.msra.mxu0 %v660_v14 }
  0x14   :  { %324 = vmatprep.subr.bf16.mxu0 %v661_v17 }
  0x15   :  { %376 = vmatpush1.bf16.msra.mxu1 %v687_v24 }
  0x16   :  { %377 = vmatprep.subr.bf16.mxu1 %v689_v26 }
  0x17   :  { %325 = vmatpush1.bf16.msra.mxu0 %v663_v18 }
  0x18   :  { %326 = vmatprep.subr.bf16.mxu0 %v667_v20 }
  0x19   :  { %378 = vmatpush1.bf16.msra.mxu1 %v691_v29 }
  0x1a   :  { %379 = vmatprep.subr.bf16.mxu1 %v693_v30  ;;  %v87_v30 = vsub.s32 4, %v70_v44 }
  0x1b   :  { %327 = vmatpush1.bf16.msra.mxu0 %v669_v23 }
  0x1c   :  { %328 = vmatprep.subr.bf16.mxu0 %v673_v25 }
  0x1d   :  { %380 = vmatpush1.bf16.msra.mxu1 %v695_v32 }
  0x1e   :  { %381 = vmatprep.subr.bf16.mxu1 %v697_v34 }
  0x1f   :  { %329 = vmatpush1.bf16.msra.mxu0 %v675_v27 }
  0x20   :  { %625 = vmatprep.subr.bf16.mxu0 %v680_v28 }
  0x21   :  { %382 = vmatpush1.bf16.msra.mxu1 %v699_v35 }
  0x22   :  { %347 = vmatmul.mubr.bf16.vlgmr.msra.gmra.mrb[0].mxu0 %v679_v31 }
  0x23   :  { %626 = vmatpush3.bf16.msra.mxu0 %v680_v28  ;;  %356 = vmatprep.mubr.bf16.mxu0 %v704_v1 }
  0x24   :  { %627 = vmatprep.subr.bf16.mxu0 %v684_v33  ;;  %400 = vmatmul.mubr.bf16.vlgmr.msra.gmra.mrb[0].mxu1 %v679_v31 }
  0x25   :  { %409 = vmatprep.mubr.bf16.mxu1 %v704_v1 }
  0x27   :  { %628 = vmatpush3.bf16.msra.mxu0 %v684_v33 }
  0x28   :  { %629 = vmatprep.subr.bf16.mxu0 %v688_v36 }
  0x2a   :  { %357 = vmatmul.mubr.bf16.gmra.mrb[4].mxu0 %v701_v37 }
  0x2b   :  { %630 = vmatpush3.bf16.msra.mxu0 %v688_v36  ;;  %641 = vmatprep.mubr.bf16.mxu0 %v679_v31  ;;  %v88_v31 = vrot.slane %v67_v46, %v87_v30 }
  0x2c   :  { %631 = vmatprep.subr.bf16.mxu0 %v692_v38  ;;  %410 = vmatmul.mubr.bf16.gmra.mrb[4].mxu1 %v701_v37 }
  0x2f   :  { %632 = vmatpush3.bf16.msra.mxu0 %v692_v38 }
  0x30   :  { %633 = vmatprep.subr.bf16.mxu0 %v696_v39 }
  0x33   :  { %634 = vmatpush3.bf16.msra.mxu0 %v696_v39 }
  0x34   :  { %635 = vmatprep.subr.bf16.mxu0 %v700_v40 }
  0x37   :  { %636 = vmatpush3.bf16.msra.mxu0 %v700_v40 }
  0x38   :  { %637 = vmatprep.subr.bf16.mxu0 %v702_v41 }
  0x3b   :  { %638 = vmatpush3.bf16.msra.mxu0 %v702_v41 }
  0x3c   :  { %639 = vmatprep.subr.bf16.mxu0 %v703_v42 }
  0x3f   :  { %640 = vmatpush3.bf16.msra.mxu0 %v703_v42 }
  0x42   :  { %642 = vmatmul.mubr.bf16.vlgmr.msra.gmra.mrb[8].mxu0 %v701_v37 }
  0xf5   :  { %v348_v50 = vpop.f32.mrb[0].mxu0 }
  0xf6   :  { %v349_v51 = vadd.f32 %v348_v50, %v72_v48  ;;  %v350_v52 = vpop.f32.mrb[1].mxu0 }
  0xf7   :  { %v351_v54 = vadd.f32 %v350_v52, %v76_v49  ;;  %v352_v55 = vpop.f32.mrb[2].mxu0  ;;  %v401_v1 = vpop.f32.mrb[0].mxu1 }
  0xf8   :  { %v353_v57 = vadd.f32 %v352_v55, %v72_v48  ;;  %v354_v58 = vpop.f32.mrb[3].mxu0  ;;  %v402_v3 = vadd.f32 %v401_v1, %v80_v61  ;;  %v403_v5 = vpop.f32.mrb[1].mxu1 }
  0xf9   :  { %v603_v59 = vpack.c.bf16 %v351_v54, %v349_v51  ;;  %v355_v60 = vadd.f32 %v354_v58, %v76_v49  ;;  %v404_v7 = vadd.f32 %v403_v5, %v84_v63  ;;  %v405_v9 = vpop.f32.mrb[2].mxu1 }
  0xfa   :  { %v406_v11 = vadd.f32 %v405_v9, %v80_v61  ;;  %v407_v13 = vpop.f32.mrb[3].mxu1 }
  0xfb   :  { %533 = vst [vmem:[%s897_s3] sm:$0xff] %v603_v59  ;;  %v606_v62 = vpack.c.bf16 %v355_v60, %v353_v57  ;;  %v604_v15 = vpack.c.bf16 %v404_v7, %v402_v3  ;;  %v408_v17 = vadd.f32 %v407_v13, %v84_v63 }
  0xfd   :  { %536 = vst [vmem:[%s897_s3 + $0x14] sm:$0xff] %v606_v62  ;;  %v358_v0 = vpop.f32.mrb[4].mxu0  ;;  %534 = vst [vmem:[%s897_s3 + $0x8] sm:$0xff] %v604_v15  ;;  %v607_v19 = vpack.c.bf16 %v408_v17, %v406_v11 }
  0xfe   :  { %v359_v2 = vadd.f32 %v358_v0, %v72_v48  ;;  %v360_v4 = vpop.f32.mrb[5].mxu0 }
  0xff   :  { %v361_v6 = vadd.f32 %v360_v4, %v76_v49  ;;  %v362_v8 = vpop.f32.mrb[6].mxu0  ;;  %537 = vst [vmem:[%s897_s3 + $0x1c] sm:$0xff] %v607_v19  ;;  %v411_v20 = vpop.f32.mrb[4].mxu1 }
 0x100   :  { %v363_v10 = vadd.f32 %v362_v8, %v72_v48  ;;  %v364_v12 = vpop.f32.mrb[7].mxu0  ;;  %v412_v21 = vadd.f32 %v411_v20, %v80_v61  ;;  %v413_v22 = vpop.f32.mrb[5].mxu1 }
 0x101   :  { %v609_v14 = vpack.c.bf16 %v361_v6, %v359_v2  ;;  %v365_v16 = vadd.f32 %v364_v12, %v76_v49  ;;  %v414_v23 = vadd.f32 %v413_v22, %v84_v63  ;;  %v415_v24 = vpop.f32.mrb[6].mxu1 }
 0x102   :  { %v416_v25 = vadd.f32 %v415_v24, %v80_v61  ;;  %v417_v26 = vpop.f32.mrb[7].mxu1 }
 0x103   :  { %539 = vst [vmem:[%s897_s3 + $0x28] sm:$0xff] %v609_v14  ;;  %v612_v18 = vpack.c.bf16 %v365_v16, %v363_v10  ;;  %v610_v27 = vpack.c.bf16 %v414_v23, %v412_v21  ;;  %v418_v28 = vadd.f32 %v417_v26, %v84_v63 }
 0x105   :  { %542 = vst [vmem:[%s897_s3 + $0x3c] sm:$0xff] %v612_v18  ;;  %540 = vst [vmem:[%s897_s3 + $0x30] sm:$0xff] %v610_v27  ;;  %v613_v29 = vpack.c.bf16 %v418_v28, %v416_v25 }
 0x107   :  { %543 = vst [vmem:[%s897_s3 + $0x44] sm:$0xff] %v613_v29 }
 0x115   :  { %v643_v32 = vpop.f32.mrb[8].mxu0 }
 0x116   :  { %v463_v33 = vadd.f32 %v643_v32, %v88_v31  ;;  %v454_v34 = vpop.f32.mrb[9].mxu0 }
 0x117   :  { %v455_v35 = vadd.f32 %v454_v34, %v88_v31  ;;  %v644_v36 = vpop.f32.mrb[10].mxu0 }
 0x118   :  { %v611_v37 = vpack.c.bf16 %v463_v33, %v463_v33  ;;  %v466_v38 = vadd.f32 %v644_v36, %v88_v31  ;;  %v457_v39 = vpop.f32.mrb[11].mxu0 }
 0x119   :  { %v605_v40 = vpack.c.bf16 %v455_v35, %v455_v35  ;;  %v458_v41 = vadd.f32 %v457_v39, %v88_v31 }
 0x11a   :  { %541 = vst [vmem:[%s897_s3 + $0x38] sm:$0xf] %v611_v37  ;;  %v614_v42 = vpack.c.bf16 %v466_v38, %v466_v38 }
 0x11b   :  { %535 = vst [vmem:[%s897_s3 + $0x10] sm:$0xf] %v605_v40  ;;  %v608_v43 = vpack.c.bf16 %v458_v41, %v458_v41 }
 0x11c   :  { %544 = vst [vmem:[%s897_s3 + $0x4c] sm:$0xf] %v614_v42 }
 0x11d   :  { %538 = vst [vmem:[%s897_s3 + $0x24] sm:$0xf] %v608_v43 }

// kernel: custom_levit_forward.55
= control target key start
LH: loop header
LB: loop body
LE: loop exit
PB: predicated region body
PF: predicated region fallthrough
CT: control target
= control target key end

     0   :  { %vm111_vm0 = vcmask 130048   ;;  %v2451_v0 = vmov 0.0   ;;  %vm2452_vm1 = vmmov 0   ;;  %vm955_vm2 = vcmask 125952   ;;  %s3046_s1 = inlined_call_operand.vmem [shape: bf16[16,16,16], index: 1, kind: input, shape index: {}]   ;;  %s3047_s0 = inlined_call_operand.vmem [shape: bf16[16,4,16], index: 0, kind: input, shape index: {}]   ;;  %s3048_s3 = inlined_call_operand.vmem [shape: f32[8,4,16], index: 3, kind: input, shape index: {}]   ;;  %s3049_s2 = inlined_call_operand.vmem [shape: bf16[16,16,64], index: 2, kind: input, shape index: {}]   ;;  %s3050_s4 = inlined_call_operand.vmem [shape: f32[16,4,64], index: 4, kind: output, shape index: {}]  }
   0x1   :  { %2161 = vmatprep.subr.bf16.mxu0 %v2451_v0  ;;  %2167 = vmatprep.subr.bf16.mxu1 %v2451_v0  ;;  %v2355_v1 = vld [vmem:[%s3046_s1] sm:$0xff]   ;;  %v2356_v2 = vld [vmem:[%s3046_s1 + $0x8] sm:$0xff]   ;;  %v2357_v5 = vld [vmem:[%s3046_s1 + $0x10] sm:$0xff]   ;;  %vm2012_vm3 = vcmask 519168  }
   0x2   :  { %2163 = vmatprep.mubr.msk.bf16.mxu0 %vm2452_vm1, %v2451_v0  ;;  %2169 = vmatprep.mubr.msk.bf16.mxu1 %vm2452_vm1, %v2451_v0  ;;  %v116_v3 = vsel %vm111_vm0, %v2355_v1, 0  ;;  %v167_v4 = vsel %vm111_vm0, %v2356_v2, 0  ;;  %v2358_v6 = vld [vmem:[%s3046_s1 + $0x18] sm:$0xff]   ;;  %v18_v7 = vld [vmem:[%s3047_s0] sm:$0x3]  ;;  %v218_v9 = vsel %vm111_vm0, %v2357_v5, 0 }
   0x3   :  { %2162 = vmatpush3.bf16.xpose.msra.mxu0 %v116_v3  ;;  %2168 = vmatpush3.bf16.xpose.msra.mxu1 %v167_v4  ;;  %v19_v8 = vld [vmem:[%s3047_s0 + $0x2] sm:$0x3]  ;;  %v269_v10 = vsel %vm111_vm0, %v2358_v6, 0  ;;  %v2360_v12 = vld [vmem:[%s3046_s1 + $0x28] sm:$0xff]   ;;  %v20_v13 = vld [vmem:[%s3047_s0 + $0x4] sm:$0x3] }
   0x4   :  { %2173 = vmatprep.subr.bf16.mxu0 %v2451_v0  ;;  %2179 = vmatprep.subr.bf16.mxu1 %v2451_v0  ;;  %v2359_v11 = vld [vmem:[%s3046_s1 + $0x20] sm:$0xff]   ;;  %v371_v16 = vsel %vm111_vm0, %v2360_v12, 0  ;;  %v2361_v17 = vld [vmem:[%s3046_s1 + $0x30] sm:$0xff]   ;;  %v2362_v18 = vld [vmem:[%s3046_s1 + $0x38] sm:$0xff]  }
   0x5   :  { %v21_v14 = vld [vmem:[%s3047_s0 + $0x6] sm:$0x3]  ;;  %v320_v15 = vsel %vm111_vm0, %v2359_v11, 0  ;;  %v22_v19 = vld [vmem:[%s3047_s0 + $0x8] sm:$0x3]  ;;  %v422_v21 = vsel %vm111_vm0, %v2361_v17, 0 }
   0x6   :  { %v23_v20 = vld [vmem:[%s3047_s0 + $0xa] sm:$0x3]  ;;  %v473_v22 = vsel %vm111_vm0, %v2362_v18, 0  ;;  %v2363_v23 = vld [vmem:[%s3046_s1 + $0x40] sm:$0xff]   ;;  %v24_v25 = vld [vmem:[%s3047_s0 + $0xc] sm:$0x3] }
   0x7   :  { %v2364_v24 = vld [vmem:[%s3046_s1 + $0x48] sm:$0xff]   ;;  %v524_v27 = vsel %vm111_vm0, %v2363_v23, 0  ;;  %v2365_v29 = vld [vmem:[%s3046_s1 + $0x50] sm:$0xff]   ;;  %v2366_v30 = vld [vmem:[%s3046_s1 + $0x58] sm:$0xff]  }
   0x8   :  { %v25_v26 = vld [vmem:[%s3047_s0 + $0xe] sm:$0x3]  ;;  %v575_v28 = vsel %vm111_vm0, %v2364_v24, 0  ;;  %v26_v31 = vld [vmem:[%s3047_s0 + $0x10] sm:$0x3]  ;;  %v626_v33 = vsel %vm111_vm0, %v2365_v29, 0 }
   0x9   :  { %v27_v32 = vld [vmem:[%s3047_s0 + $0x12] sm:$0x3]  ;;  %v677_v34 = vsel %vm111_vm0, %v2366_v30, 0  ;;  %v2367_v35 = vld [vmem:[%s3046_s1 + $0x60] sm:$0xff]   ;;  %v2368_v36 = vld [vmem:[%s3046_s1 + $0x68] sm:$0xff]  }
   0xa   :  { %2164 = vmatmul.mubr.msk.bf16.vlgmr.msra.gmra.mrb[0].mxu0 %vm111_vm0, %v18_v7  ;;  %2170 = vmatmul.mubr.msk.bf16.vlgmr.msra.gmra.mrb[0].mxu1 %vm111_vm0, %v19_v8  ;;  %v28_v37 = vld [vmem:[%s3047_s0 + $0x14] sm:$0x3]  ;;  %v29_v38 = vld [vmem:[%s3047_s0 + $0x16] sm:$0x3]  ;;  %v728_v39 = vsel %vm111_vm0, %v2367_v35, 0  ;;  %v779_v40 = vsel %vm111_vm0, %v2368_v36, 0 }
   0xb   :  { %2174 = vmatpush3.bf16.xpose.msra.mxu0 %v218_v9  ;;  %2180 = vmatpush3.bf16.xpose.msra.mxu1 %v269_v10  ;;  %v2369_v41 = vld [vmem:[%s3046_s1 + $0x70] sm:$0xff]   ;;  %v2370_v42 = vld [vmem:[%s3046_s1 + $0x78] sm:$0xff]   ;;  %v2663_v50 = vld [vmem:[%s3048_s3] sm:$0xf] }
   0xc   :  { %2175 = vmatprep.mubr.msk.bf16.mxu0 %vm2452_vm1, %v2451_v0  ;;  %2181 = vmatprep.mubr.msk.bf16.mxu1 %vm2452_vm1, %v2451_v0  ;;  %v30_v43 = vld [vmem:[%s3047_s0 + $0x18] sm:$0x3]  ;;  %v31_v44 = vld [vmem:[%s3047_s0 + $0x1a] sm:$0x3]  ;;  %v830_v45 = vsel %vm111_vm0, %v2369_v41, 0  ;;  %v881_v46 = vsel %vm111_vm0, %v2370_v42, 0 }
   0xd   :  { %2185 = vmatprep.subr.bf16.mxu0 %v2451_v0  ;;  %2191 = vmatprep.subr.bf16.mxu1 %v2451_v0  ;;  %v32_v47 = vld [vmem:[%s3047_s0 + $0x1c] sm:$0x3]  ;;  %v33_v48 = vld [vmem:[%s3047_s0 + $0x1e] sm:$0x3]  ;;  %v2668_v54 = vld [vmem:[%s3048_s3 + $0x4] sm:$0xf] }
   0xe   :  { %v2683_v3 = vld [vmem:[%s3048_s3 + $0x8] sm:$0xf]  ;;  %v2688_v7 = vld [vmem:[%s3048_s3 + $0xc] sm:$0xf]  ;;  %v2708_v23 = vld [vmem:[%s3048_s3 + $0x14] sm:$0xf] }
   0xf   :  { %v2723_v35 = vld [vmem:[%s3048_s3 + $0x18] sm:$0xf] }
  0x12   :  { %2176 = vmatmul.mubr.msk.bf16.vlgmr.msra.gmra.mrb[4].mxu0 %vm111_vm0, %v20_v13  ;;  %2182 = vmatmul.mubr.msk.bf16.vlgmr.msra.gmra.mrb[4].mxu1 %vm111_vm0, %v21_v14 }
  0x13   :  { %2186 = vmatpush3.bf16.xpose.msra.mxu0 %v320_v15  ;;  %2192 = vmatpush3.bf16.xpose.msra.mxu1 %v371_v16 }
  0x14   :  { %2187 = vmatprep.mubr.msk.bf16.mxu0 %vm2452_vm1, %v2451_v0  ;;  %2193 = vmatprep.mubr.msk.bf16.mxu1 %vm2452_vm1, %v2451_v0 }
  0x15   :  { %2197 = vmatprep.subr.bf16.mxu0 %v2451_v0  ;;  %2203 = vmatprep.subr.bf16.mxu1 %v2451_v0 }
  0x1a   :  { %2188 = vmatmul.mubr.msk.bf16.vlgmr.msra.gmra.mrb[8].mxu0 %vm111_vm0, %v22_v19  ;;  %2194 = vmatmul.mubr.msk.bf16.vlgmr.msra.gmra.mrb[8].mxu1 %vm111_vm0, %v23_v20  ;;  %v2703_v19 = vld [vmem:[%s3048_s3 + $0x10] sm:$0xf] }
  0x1b   :  { %2198 = vmatpush3.bf16.xpose.msra.mxu0 %v422_v21  ;;  %2204 = vmatpush3.bf16.xpose.msra.mxu1 %v473_v22 }
  0x1c   :  { %2199 = vmatprep.mubr.msk.bf16.mxu0 %vm2452_vm1, %v2451_v0  ;;  %2205 = vmatprep.mubr.msk.bf16.mxu1 %vm2452_vm1, %v2451_v0 }
  0x1d   :  { %2209 = vmatprep.subr.bf16.mxu0 %v2451_v0  ;;  %2215 = vmatprep.subr.bf16.mxu1 %v2451_v0 }
  0x22   :  { %2200 = vmatmul.mubr.msk.bf16.vlgmr.msra.gmra.mrb[12].mxu0 %vm111_vm0, %v24_v25  ;;  %2206 = vmatmul.mubr.msk.bf16.vlgmr.msra.gmra.mrb[12].mxu1 %vm111_vm0, %v25_v26 }
  0x23   :  { %2210 = vmatpush3.bf16.xpose.msra.mxu0 %v524_v27  ;;  %2216 = vmatpush3.bf16.xpose.msra.mxu1 %v575_v28 }
  0x24   :  { %2211 = vmatprep.mubr.msk.bf16.mxu0 %vm2452_vm1, %v2451_v0  ;;  %2217 = vmatprep.mubr.msk.bf16.mxu1 %vm2452_vm1, %v2451_v0 }
  0x25   :  { %2221 = vmatprep.subr.bf16.mxu0 %v2451_v0  ;;  %2227 = vmatprep.subr.bf16.mxu1 %v2451_v0 }
  0x2a   :  { %2212 = vmatmul.mubr.msk.bf16.vlgmr.msra.gmra.mrb[16].mxu0 %vm111_vm0, %v26_v31  ;;  %2218 = vmatmul.mubr.msk.bf16.vlgmr.msra.gmra.mrb[16].mxu1 %vm111_vm0, %v27_v32 }
  0x2b   :  { %2222 = vmatpush3.bf16.xpose.msra.mxu0 %v626_v33  ;;  %2228 = vmatpush3.bf16.xpose.msra.mxu1 %v677_v34 }
  0x2c   :  { %2223 = vmatprep.mubr.msk.bf16.mxu0 %vm2452_vm1, %v2451_v0  ;;  %2229 = vmatprep.mubr.msk.bf16.mxu1 %vm2452_vm1, %v2451_v0 }
  0x2d   :  { %2233 = vmatprep.subr.bf16.mxu0 %v2451_v0  ;;  %2239 = vmatprep.subr.bf16.mxu1 %v2451_v0 }
  0x32   :  { %2224 = vmatmul.mubr.msk.bf16.vlgmr.msra.gmra.mrb[20].mxu0 %vm111_vm0, %v28_v37  ;;  %2230 = vmatmul.mubr.msk.bf16.vlgmr.msra.gmra.mrb[20].mxu1 %vm111_vm0, %v29_v38 }
  0x33   :  { %2234 = vmatpush3.bf16.xpose.msra.mxu0 %v728_v39  ;;  %2240 = vmatpush3.bf16.xpose.msra.mxu1 %v779_v40  ;;  %v2728_v39 = vld [vmem:[%s3048_s3 + $0x1c] sm:$0xf] }
  0x34   :  { %2235 = vmatprep.mubr.msk.bf16.mxu0 %vm2452_vm1, %v2451_v0  ;;  %2241 = vmatprep.mubr.msk.bf16.mxu1 %vm2452_vm1, %v2451_v0 }
  0x35   :  { %2245 = vmatprep.subr.bf16.mxu0 %v2451_v0  ;;  %2251 = vmatprep.subr.bf16.mxu1 %v2451_v0 }
  0x3a   :  { %2236 = vmatmul.mubr.msk.bf16.vlgmr.msra.gmra.mrb[24].mxu0 %vm111_vm0, %v30_v43  ;;  %2242 = vmatmul.mubr.msk.bf16.vlgmr.msra.gmra.mrb[24].mxu1 %vm111_vm0, %v31_v44 }
  0x3b   :  { %2246 = vmatpush3.bf16.xpose.msra.mxu0 %v830_v45  ;;  %2252 = vmatpush3.bf16.xpose.msra.mxu1 %v881_v46 }
  0x3c   :  { %2247 = vmatprep.mubr.msk.bf16.mxu0 %vm2452_vm1, %v2451_v0  ;;  %2253 = vmatprep.mubr.msk.bf16.mxu1 %vm2452_vm1, %v2451_v0 }
  0x3d   :  { %2257 = vmatprep.subr.bf16.mxu0 %v2451_v0  ;;  %2263 = vmatprep.subr.bf16.mxu1 %v2451_v0 }
  0x42   :  { %2248 = vmatmul.mubr.msk.bf16.vlgmr.msra.gmra.mrb[28].mxu0 %vm111_vm0, %v32_v47  ;;  %2254 = vmatmul.mubr.msk.bf16.vlgmr.msra.gmra.mrb[28].mxu1 %vm111_vm0, %v33_v48 }
  0x43   :  { %2259 = vmatprep.mubr.msk.bf16.mxu0 %vm2452_vm1, %v2451_v0  ;;  %2265 = vmatprep.mubr.msk.bf16.mxu1 %vm2452_vm1, %v2451_v0 }
  0xdd   :  { %v152_v49 = vpop.f32.mrb[0].mxu0  ;;  %v203_v53 = vpop.f32.mrb[0].mxu1 }
  0xde   :  { %v923_v51 = vmul.f32 0.25, %v152_v49  ;;  %v2165_v52 = vpop.f32.mrb[1].mxu0  ;;  %v924_v56 = vmul.f32 0.25, %v203_v53  ;;  %v2171_v57 = vpop.f32.mrb[1].mxu1 }
  0xdf   :  { %v155_v55 = vpop.f32.mrb[2].mxu0  ;;  %v206_v59 = vpop.f32.mrb[2].mxu1 }
  0xe0   :  { %v2166_v58 = vpop.f32.mrb[3].mxu0  ;;  %v2671_v60 = vadd.f32 %v923_v51, %v2663_v50  ;;  %v2172_v61 = vpop.f32.mrb[3].mxu1  ;;  %v2674_v62 = vadd.f32 %v924_v56, %v2668_v54 }
  0xe2   :  { %v956_v63 = vsel %vm955_vm2, %v2671_v60, -inf  ;;  %v959_v1 = vsel %vm955_vm2, %v2674_v62, -inf }
  0xe3   :  { %957 = vmax.xlane.f32.xlu0 %v956_v63 }
  0xe5   :  { %v254_v2 = vpop.f32.mrb[4].mxu0  ;;  %v305_v6 = vpop.f32.mrb[4].mxu1 }
  0xe6   :  { %v925_v4 = vmul.f32 0.25, %v254_v2  ;;  %v2177_v5 = vpop.f32.mrb[5].mxu0  ;;  %v926_v8 = vmul.f32 0.25, %v305_v6  ;;  %v2183_v10 = vpop.f32.mrb[5].mxu1 }
  0xe7   :  { %960 = vmax.xlane.f32.xlu0 %v959_v1  ;;  %v257_v9 = vpop.f32.mrb[6].mxu0  ;;  %v308_v12 = vpop.f32.mrb[6].mxu1 }
  0xe8   :  { %v2178_v11 = vpop.f32.mrb[7].mxu0  ;;  %v2691_v13 = vadd.f32 %v925_v4, %v2683_v3  ;;  %v2184_v14 = vpop.f32.mrb[7].mxu1  ;;  %v2694_v15 = vadd.f32 %v926_v8, %v2688_v7 }
  0xea   :  { %v962_v16 = vsel %vm955_vm2, %v2691_v13, -inf  ;;  %v965_v17 = vsel %vm955_vm2, %v2694_v15, -inf }
  0xeb   :  { %963 = vmax.xlane.f32.xlu1 %v962_v16 }
  0xed   :  { %v356_v18 = vpop.f32.mrb[8].mxu0  ;;  %v407_v21 = vpop.f32.mrb[8].mxu1 }
  0xee   :  { %v927_v20 = vmul.f32 0.25, %v356_v18  ;;  %v2189_v22 = vpop.f32.mrb[9].mxu0  ;;  %v928_v24 = vmul.f32 0.25, %v407_v21  ;;  %v2195_v25 = vpop.f32.mrb[9].mxu1 }
  0xef   :  { %966 = vmax.xlane.f32.xlu1 %v965_v17  ;;  %v359_v26 = vpop.f32.mrb[10].mxu0  ;;  %v410_v27 = vpop.f32.mrb[10].mxu1 }
  0xf0   :  { %v2190_v28 = vpop.f32.mrb[11].mxu0  ;;  %v2711_v29 = vadd.f32 %v927_v20, %v2703_v19  ;;  %v2196_v30 = vpop.f32.mrb[11].mxu1  ;;  %v2714_v31 = vadd.f32 %v928_v24, %v2708_v23 }
  0xf2   :  { %v968_v32 = vsel %vm955_vm2, %v2711_v29, -inf  ;;  %v971_v33 = vsel %vm955_vm2, %v2714_v31, -inf }
  0xf3   :  { %969 = vmax.xlane.f32.xlu0 %v968_v32  ;;  %972 = vmax.xlane.f32.xlu1 %v971_v33 }
  0xf5   :  { %v458_v34 = vpop.f32.mrb[12].mxu0  ;;  %v509_v37 = vpop.f32.mrb[12].mxu1 }
  0xf6   :  { %v929_v36 = vmul.f32 0.25, %v458_v34  ;;  %v2201_v38 = vpop.f32.mrb[13].mxu0  ;;  %v930_v40 = vmul.f32 0.25, %v509_v37  ;;  %v2207_v41 = vpop.f32.mrb[13].mxu1 }
  0xf7   :  { %v461_v42 = vpop.f32.mrb[14].mxu0  ;;  %v512_v43 = vpop.f32.mrb[14].mxu1 }
  0xf8   :  { %v2202_v44 = vpop.f32.mrb[15].mxu0  ;;  %v2731_v45 = vadd.f32 %v929_v36, %v2723_v35  ;;  %v2208_v46 = vpop.f32.mrb[15].mxu1  ;;  %v2734_v47 = vadd.f32 %v930_v40, %v2728_v39 }
  0xfa   :  { %v974_v48 = vsel %vm955_vm2, %v2731_v45, -inf  ;;  %v977_v49 = vsel %vm955_vm2, %v2734_v47, -inf }
  0xfb   :  { %975 = vmax.xlane.f32.xlu0 %v974_v48  ;;  %978 = vmax.xlane.f32.xlu1 %v977_v49 }
  0xfd   :  { %v560_v51 = vpop.f32.mrb[16].mxu0  ;;  %v611_v53 = vpop.f32.mrb[16].mxu1 }
  0xfe   :  { %v931_v52 = vmul.f32 0.25, %v560_v51  ;;  %v2213_v55 = vpop.f32.mrb[17].mxu0  ;;  %v932_v56 = vmul.f32 0.25, %v611_v53  ;;  %v2219_v57 = vpop.f32.mrb[17].mxu1 }
  0xff   :  { %v563_v58 = vpop.f32.mrb[18].mxu0  ;;  %v614_v59 = vpop.f32.mrb[18].mxu1 }
 0x100   :  { %v2214_v61 = vpop.f32.mrb[19].mxu0  ;;  %v2741_v63 = vadd.f32 %v931_v52, %v2663_v50  ;;  %v2220_v1 = vpop.f32.mrb[19].mxu1  ;;  %v2744_v2 = vadd.f32 %v932_v56, %v2668_v54 }
 0x102   :  { %v980_v4 = vsel %vm955_vm2, %v2741_v63, -inf  ;;  %v983_v5 = vsel %vm955_vm2, %v2744_v2, -inf }
 0x103   :  { %981 = vmax.xlane.f32.xlu0 %v980_v4  ;;  %984 = vmax.xlane.f32.xlu1 %v983_v5 }
 0x105   :  { %v662_v6 = vpop.f32.mrb[20].mxu0  ;;  %v713_v9 = vpop.f32.mrb[20].mxu1 }
 0x106   :  { %v933_v8 = vmul.f32 0.25, %v662_v6  ;;  %v2225_v10 = vpop.f32.mrb[21].mxu0  ;;  %v934_v11 = vmul.f32 0.25, %v713_v9  ;;  %v2231_v12 = vpop.f32.mrb[21].mxu1 }
 0x107   :  { %v665_v50 = vpop.f32.mrb[22].mxu0  ;;  %v716_v14 = vpop.f32.mrb[22].mxu1 }
 0x108   :  { %v2226_v16 = vpop.f32.mrb[23].mxu0  ;;  %v2751_v54 = vadd.f32 %v933_v8, %v2683_v3  ;;  %v2232_v17 = vpop.f32.mrb[23].mxu1  ;;  %v2754_v18 = vadd.f32 %v934_v11, %v2688_v7 }
 0x10a   :  { %v986_v20 = vsel %vm955_vm2, %v2751_v54, -inf  ;;  %v989_v21 = vsel %vm955_vm2, %v2754_v18, -inf }
 0x10b   :  { %987 = vmax.xlane.f32.xlu0 %v986_v20  ;;  %990 = vmax.xlane.f32.xlu1 %v989_v21 }
 0x10d   :  { %v764_v22 = vpop.f32.mrb[24].mxu0  ;;  %v815_v25 = vpop.f32.mrb[24].mxu1 }
 0x10e   :  { %v935_v24 = vmul.f32 0.25, %v764_v22  ;;  %v2237_v26 = vpop.f32.mrb[25].mxu0  ;;  %v936_v27 = vmul.f32 0.25, %v815_v25  ;;  %v2243_v28 = vpop.f32.mrb[25].mxu1 }
 0x10f   :  { %v767_v3 = vpop.f32.mrb[26].mxu0  ;;  %v818_v30 = vpop.f32.mrb[26].mxu1 }
 0x110   :  { %v2238_v32 = vpop.f32.mrb[27].mxu0  ;;  %v2761_v7 = vadd.f32 %v935_v24, %v2703_v19  ;;  %v2244_v33 = vpop.f32.mrb[27].mxu1  ;;  %v2764_v34 = vadd.f32 %v936_v27, %v2708_v23 }
 0x112   :  { %v992_v36 = vsel %vm955_vm2, %v2761_v7, -inf  ;;  %v995_v37 = vsel %vm955_vm2, %v2764_v34, -inf }
 0x113   :  { %993 = vmax.xlane.f32.xlu0 %v992_v36  ;;  %996 = vmax.xlane.f32.xlu1 %v995_v37 }
 0x115   :  { %v866_v38 = vpop.f32.mrb[28].mxu0  ;;  %v917_v41 = vpop.f32.mrb[28].mxu1 }
 0x116   :  { %v937_v40 = vmul.f32 0.25, %v866_v38  ;;  %v2249_v42 = vpop.f32.mrb[29].mxu0  ;;  %v938_v43 = vmul.f32 0.25, %v917_v41  ;;  %v2255_v44 = vpop.f32.mrb[29].mxu1 }
 0x117   :  { %v869_v19 = vpop.f32.mrb[30].mxu0  ;;  %v920_v46 = vpop.f32.mrb[30].mxu1  ;;  %v2371_v44 = vld [vmem:[%s3049_s2] sm:$0xff]  }
 0x118   :  { %v2250_v48 = vpop.f32.mrb[31].mxu0  ;;  %v2771_v23 = vadd.f32 %v937_v40, %v2723_v35  ;;  %v2256_v49 = vpop.f32.mrb[31].mxu1  ;;  %v2774_v51 = vadd.f32 %v938_v43, %v2728_v39  ;;  %2258 = vmatpush3.bf16.msra.mxu0 %v2371_v44  ;;  %v2377_v44 = vld [vmem:[%s3049_s2 + $0x30] sm:$0xff]  }
 0x119   :  { %2269 = vmatprep.subr.bf16.mxu0 %v2451_v0 }
 0x11a   :  { %v998_v52 = vsel %vm955_vm2, %v2771_v23, -inf  ;;  %v1001_v53 = vsel %vm955_vm2, %v2774_v51, -inf }
 0x11b   :  { %999 = vmax.xlane.f32.xlu0 %v998_v52  ;;  %1002 = vmax.xlane.f32.xlu1 %v1001_v53 }
 0x170   :  { %v958_v55 = vpop.xlane.xlu0 %957 }
 0x171   :  { %v1004_v56 = vsub.f32 %v2671_v60, %v958_v55 }
 0x173   :  { %v1020_v57 = vmul.f32 1.442695, %v1004_v56 }
 0x174   :  { %v961_v58 = vpop.xlane.xlu0 %960 }
 0x175   :  { %2387 = vpow2.f32 %v1020_v57  ;;  %v1005_v35 = vsub.f32 %v2674_v62, %v961_v58 }
 0x177   :  { %v1022_v59 = vmul.f32 1.442695, %v1005_v35 }
 0x178   :  { %v964_v61 = vpop.xlane.xlu1 %963 }
 0x179   :  { %2389 = vpow2.f32 %v1022_v59  ;;  %v1006_v39 = vsub.f32 %v2691_v13, %v964_v61 }
 0x17b   :  { %v1024_v1 = vmul.f32 1.442695, %v1006_v39 }
 0x17c   :  { %v967_v4 = vpop.xlane.xlu1 %966 }
 0x17d   :  { %2391 = vpow2.f32 %v1024_v1  ;;  %v1007_v5 = vsub.f32 %v2694_v15, %v967_v4 }
 0x17f   :  { %v2784_v6 = vpop.eup %2387  ;;  %v1026_v8 = vmul.f32 1.442695, %v1007_v5 }
 0x180   :  { %v970_v9 = vpop.xlane.xlu0 %969  ;;  %v1052_v60 = vsel %vm955_vm2, %v2784_v6, 0.0  ;;  %v973_v10 = vpop.xlane.xlu1 %972 }
 0x181   :  { %2393 = vpow2.f32 %v1026_v8  ;;  %v1008_v62 = vsub.f32 %v2711_v29, %v970_v9  ;;  %1053 = vadd.xlane.f32.xlu0 %v1052_v60  ;;  %v1009_v11 = vsub.f32 %v2714_v31, %v973_v10 }
 0x183   :  { %v2790_v13 = vpop.eup %2389  ;;  %v1028_v12 = vmul.f32 1.442695, %v1008_v62  ;;  %v1030_v50 = vmul.f32 1.442695, %v1009_v11 }
 0x184   :  { %v1055_v15 = vsel %vm955_vm2, %v2790_v13, 0.0 }
 0x185   :  { %2395 = vpow2.f32 %v1028_v12  ;;  %1056 = vadd.xlane.f32.xlu1 %v1055_v15 }
 0x186   :  { %2397 = vpow2.f32 %v1030_v50 }
 0x187   :  { %v2794_v14 = vpop.eup %2391 }
 0x188   :  { %v976_v16 = vpop.xlane.xlu0 %975  ;;  %v1058_v17 = vsel %vm955_vm2, %v2794_v14, 0.0  ;;  %v979_v29 = vpop.xlane.xlu1 %978 }
 0x189   :  { %v1010_v20 = vsub.f32 %v2731_v45, %v976_v16  ;;  %1059 = vadd.xlane.f32.xlu0 %v1058_v17  ;;  %v1011_v31 = vsub.f32 %v2734_v47, %v979_v29 }
 0x18b   :  { %v2800_v21 = vpop.eup %2393  ;;  %v1032_v22 = vmul.f32 1.442695, %v1010_v20  ;;  %v1034_v24 = vmul.f32 1.442695, %v1011_v31 }
 0x18c   :  { %v1061_v25 = vsel %vm955_vm2, %v2800_v21, 0.0 }
 0x18d   :  { %2399 = vpow2.f32 %v1032_v22  ;;  %1062 = vadd.xlane.f32.xlu1 %v1061_v25  ;;  %v2373_v22 = vld [vmem:[%s3049_s2 + $0x10] sm:$0xff]  }
 0x18e   :  { %2401 = vpow2.f32 %v1034_v24 }
 0x18f   :  { %v2804_v26 = vpop.eup %2395 }
 0x190   :  { %v2806_v27 = vpop.eup %2397  ;;  %v982_v28 = vpop.xlane.xlu0 %981  ;;  %v1064_v45 = vsel %vm955_vm2, %v2804_v26, 0.0 }
 0x191   :  { %v985_v3 = vpop.xlane.xlu1 %984  ;;  %v1012_v47 = vsub.f32 %v2741_v63, %v982_v28  ;;  %v1067_v30 = vsel %vm955_vm2, %v2806_v27, 0.0  ;;  %1065 = vadd.xlane.f32.xlu0 %v1064_v45 }
 0x192   :  { %v1013_v32 = vsub.f32 %v2744_v2, %v985_v3  ;;  %1068 = vadd.xlane.f32.xlu1 %v1067_v30 }
 0x193   :  { %v1036_v33 = vmul.f32 1.442695, %v1012_v47 }
 0x194   :  { %v1038_v36 = vmul.f32 1.442695, %v1013_v32  ;;  %v2375_v32 = vld [vmem:[%s3049_s2 + $0x20] sm:$0xff]  }
 0x195   :  { %2403 = vpow2.f32 %v1036_v33 }
 0x196   :  { %2405 = vpow2.f32 %v1038_v36 }
 0x197   :  { %v2814_v37 = vpop.eup %2399 }
 0x198   :  { %v2816_v38 = vpop.eup %2401  ;;  %v988_v40 = vpop.xlane.xlu0 %987  ;;  %v1070_v41 = vsel %vm955_vm2, %v2814_v37, 0.0 }
 0x199   :  { %v991_v63 = vpop.xlane.xlu1 %990  ;;  %v1014_v42 = vsub.f32 %v2751_v54, %v988_v40  ;;  %v1073_v43 = vsel %vm955_vm2, %v2816_v38, 0.0  ;;  %1071 = vadd.xlane.f32.xlu0 %v1070_v41  ;;  %v2372_v54 = vld [vmem:[%s3049_s2 + $0x8] sm:$0xff]  }
 0x19a   :  { %v1015_v2 = vsub.f32 %v2754_v18, %v991_v63  ;;  %1074 = vadd.xlane.f32.xlu1 %v1073_v43  ;;  %2264 = vmatpush3.bf16.msra.mxu1 %v2372_v54  ;;  %v2376_v63 = vld [vmem:[%s3049_s2 + $0x28] sm:$0xff]  }
 0x19b   :  { %v1040_v19 = vmul.f32 1.442695, %v1014_v42  ;;  %2275 = vmatprep.subr.bf16.mxu1 %v2451_v0 }
 0x19c   :  { %v1042_v46 = vmul.f32 1.442695, %v1015_v2 }
 0x19d   :  { %2407 = vpow2.f32 %v1040_v19 }
 0x19e   :  { %2409 = vpow2.f32 %v1042_v46 }
 0x19f   :  { %v2831_v48 = vpop.eup %2403 }
 0x1a0   :  { %v2833_v49 = vpop.eup %2405  ;;  %v994_v18 = vpop.xlane.xlu0 %993  ;;  %v1076_v52 = vsel %vm955_vm2, %v2831_v48, 0.0 }
 0x1a1   :  { %v997_v53 = vpop.xlane.xlu1 %996  ;;  %v1016_v55 = vsub.f32 %v2761_v7, %v994_v18  ;;  %v1079_v56 = vsel %vm955_vm2, %v2833_v49, 0.0  ;;  %1077 = vadd.xlane.f32.xlu0 %v1076_v52 }
 0x1a2   :  { %v1017_v57 = vsub.f32 %v2764_v34, %v997_v53  ;;  %1080 = vadd.xlane.f32.xlu1 %v1079_v56  ;;  %v2379_v56 = vld [vmem:[%s3049_s2 + $0x40] sm:$0xff]  }
 0x1a3   :  { %v1044_v58 = vmul.f32 1.442695, %v1016_v55 }
 0x1a4   :  { %v1046_v35 = vmul.f32 1.442695, %v1017_v57 }
 0x1a5   :  { %2411 = vpow2.f32 %v1044_v58 }
 0x1a6   :  { %2413 = vpow2.f32 %v1046_v35 }
 0x1a7   :  { %v2842_v59 = vpop.eup %2407 }
 0x1a8   :  { %v2844_v61 = vpop.eup %2409  ;;  %v1000_v39 = vpop.xlane.xlu0 %999  ;;  %v1082_v7 = vsel %vm955_vm2, %v2842_v59, 0.0 }
 0x1a9   :  { %v1003_v1 = vpop.xlane.xlu1 %1002  ;;  %v1018_v4 = vsub.f32 %v2771_v23, %v1000_v39  ;;  %v1085_v5 = vsel %vm955_vm2, %v2844_v61, 0.0  ;;  %1083 = vadd.xlane.f32.xlu0 %v1082_v7 }
 0x1aa   :  { %v1019_v34 = vsub.f32 %v2774_v51, %v1003_v1  ;;  %1086 = vadd.xlane.f32.xlu1 %v1085_v5  ;;  %v2381_v5 = vld [vmem:[%s3049_s2 + $0x50] sm:$0xff]  }
 0x1ab   :  { %v1048_v8 = vmul.f32 1.442695, %v1018_v4 }
 0x1ac   :  { %v1050_v9 = vmul.f32 1.442695, %v1019_v34 }
 0x1ad   :  { %2415 = vpow2.f32 %v1048_v8 }
 0x1ae   :  { %2417 = vpow2.f32 %v1050_v9 }
 0x1af   :  { %v2852_v60 = vpop.eup %2411 }
 0x1b0   :  { %v2854_v10 = vpop.eup %2413  ;;  %v1088_v62 = vsel %vm955_vm2, %v2852_v60, 0.0 }
 0x1b1   :  { %v1091_v23 = vsel %vm955_vm2, %v2854_v10, 0.0  ;;  %1089 = vadd.xlane.f32.xlu0 %v1088_v62 }
 0x1b2   :  { %1092 = vadd.xlane.f32.xlu1 %v1091_v23 }
 0x1b7   :  { %v2860_v11 = vpop.eup %2415 }
 0x1b8   :  { %v2862_v51 = vpop.eup %2417  ;;  %v1094_v12 = vsel %vm955_vm2, %v2860_v11, 0.0 }
 0x1b9   :  { %v1097_v50 = vsel %vm955_vm2, %v2862_v51, 0.0  ;;  %1095 = vadd.xlane.f32.xlu0 %v1094_v12 }
 0x1ba   :  { %1098 = vadd.xlane.f32.xlu1 %v1097_v50 }
 0x20e   :  { %v1054_v15 = vpop.xlane.xlu0 %1053 }
 0x20f   :  { %2419 = vrcp.f32 %v1054_v15  ;;  %v2383_v15 = vld [vmem:[%s3049_s2 + $0x60] sm:$0xff]  }
 0x212   :  { %v1057_v16 = vpop.xlane.xlu1 %1056 }
 0x213   :  { %2421 = vrcp.f32 %v1057_v16 }
 0x216   :  { %v1060_v17 = vpop.xlane.xlu0 %1059 }
 0x217   :  { %2423 = vrcp.f32 %v1060_v17 }
 0x219   :  { %v2420_v29 = vpop.eup %2419 }
 0x21a   :  { %v1116_v20 = vmul.f32 %v2420_v29, %v2784_v6  ;;  %v1063_v31 = vpop.xlane.xlu1 %1062  ;;  %v2374_v6 = vld [vmem:[%s3049_s2 + $0x18] sm:$0xff]  }
 0x21b   :  { %2425 = vrcp.f32 %v1063_v31 }
 0x21c   :  { %v1132_v24 = vpack.c.bf16 %v1116_v20, %v1116_v20 }
 0x21d   :  { %v2422_v25 = vpop.eup %2421 }
 0x21e   :  { %v1117_v28 = vmul.f32 %v2422_v25, %v2790_v13  ;;  %2260 = vmatmul.mubr.msk.bf16.vlgmr.msra.gmra.mrb[32].mxu0 %vm111_vm0, %v1132_v24  ;;  %v1066_v45 = vpop.xlane.xlu0 %1065  ;;  %v2385_v25 = vld [vmem:[%s3049_s2 + $0x70] sm:$0xff]  }
 0x21f   :  { %v1069_v3 = vpop.xlane.xlu1 %1068  ;;  %2427 = vrcp.f32 %v1066_v45  ;;  %2270 = vmatpush3.bf16.msra.mxu0 %v2373_v22  ;;  %2271 = vmatprep.mubr.msk.bf16.mxu0 %vm2452_vm1, %v2451_v0 }
 0x220   :  { %2429 = vrcp.f32 %v1069_v3  ;;  %v1133_v47 = vpack.c.bf16 %v1117_v28, %v1117_v28  ;;  %2281 = vmatprep.subr.bf16.mxu0 %v2451_v0 }
 0x221   :  { %v2424_v30 = vpop.eup %2423 }
 0x222   :  { %v1118_v13 = vmul.f32 %v2424_v30, %v2794_v14  ;;  %2266 = vmatmul.mubr.msk.bf16.vlgmr.msra.gmra.mrb[32].mxu1 %vm111_vm0, %v1133_v47 }
 0x223   :  { %2276 = vmatpush3.bf16.msra.mxu1 %v2374_v6  ;;  %2277 = vmatprep.mubr.msk.bf16.mxu1 %vm2452_vm1, %v2451_v0 }
 0x224   :  { %v1134_v33 = vpack.c.bf16 %v1118_v13, %v1118_v13  ;;  %2287 = vmatprep.subr.bf16.mxu1 %v2451_v0 }
 0x225   :  { %v2426_v36 = vpop.eup %2425 }
 0x226   :  { %v1119_v40 = vmul.f32 %v2426_v36, %v2800_v21  ;;  %2272 = vmatmul.mubr.msk.bf16.vlgmr.msra.gmra.mrb[36].mxu0 %vm111_vm0, %v1134_v33  ;;  %v1072_v41 = vpop.xlane.xlu0 %1071 }
 0x227   :  { %v1075_v14 = vpop.xlane.xlu1 %1074  ;;  %2431 = vrcp.f32 %v1072_v41  ;;  %2282 = vmatpush3.bf16.msra.mxu0 %v2375_v32  ;;  %2283 = vmatprep.mubr.msk.bf16.mxu0 %vm2452_vm1, %v2451_v0 }
 0x228   :  { %2433 = vrcp.f32 %v1075_v14  ;;  %v1135_v42 = vpack.c.bf16 %v1119_v40, %v1119_v40  ;;  %2293 = vmatprep.subr.bf16.mxu0 %v2451_v0 }
 0x229   :  { %v2428_v43 = vpop.eup %2427 }
 0x22a   :  { %v2430_v2 = vpop.eup %2429  ;;  %v1120_v21 = vmul.f32 %v2428_v43, %v2804_v26  ;;  %2278 = vmatmul.mubr.msk.bf16.vlgmr.msra.gmra.mrb[36].mxu1 %vm111_vm0, %v1135_v42  ;;  %v2378_v26 = vld [vmem:[%s3049_s2 + $0x38] sm:$0xff]  }
 0x22b   :  { %2288 = vmatpush3.bf16.msra.mxu1 %v2376_v63  ;;  %2289 = vmatprep.mubr.msk.bf16.mxu1 %vm2452_vm1, %v2451_v0  ;;  %v1121_v19 = vmul.f32 %v2430_v2, %v2806_v27 }
 0x22c   :  { %v1136_v46 = vpack.c.bf16 %v1120_v21, %v1120_v21  ;;  %2299 = vmatprep.subr.bf16.mxu1 %v2451_v0 }
 0x22d   :  { %v1137_v52 = vpack.c.bf16 %v1121_v19, %v1121_v19 }
 0x22e   :  { %2284 = vmatmul.mubr.msk.bf16.vlgmr.msra.gmra.mrb[40].mxu0 %vm111_vm0, %v1136_v46  ;;  %v1078_v54 = vpop.xlane.xlu0 %1077 }
 0x22f   :  { %v1081_v18 = vpop.xlane.xlu1 %1080  ;;  %2435 = vrcp.f32 %v1078_v54  ;;  %2294 = vmatpush3.bf16.msra.mxu0 %v2377_v44  ;;  %2295 = vmatprep.mubr.msk.bf16.mxu0 %vm2452_vm1, %v2451_v0 }
 0x230   :  { %2437 = vrcp.f32 %v1081_v18  ;;  %2305 = vmatprep.subr.bf16.mxu0 %v2451_v0 }
 0x231   :  { %v2432_v27 = vpop.eup %2431 }
 0x232   :  { %v2434_v53 = vpop.eup %2433  ;;  %v1122_v55 = vmul.f32 %v2432_v27, %v2814_v37  ;;  %2290 = vmatmul.mubr.msk.bf16.vlgmr.msra.gmra.mrb[40].mxu1 %vm111_vm0, %v1137_v52  ;;  %v2380_v37 = vld [vmem:[%s3049_s2 + $0x48] sm:$0xff]  }
 0x233   :  { %2300 = vmatpush3.bf16.msra.mxu1 %v2378_v26  ;;  %2301 = vmatprep.mubr.msk.bf16.mxu1 %vm2452_vm1, %v2451_v0  ;;  %v1123_v57 = vmul.f32 %v2434_v53, %v2816_v38 }
 0x234   :  { %v1138_v58 = vpack.c.bf16 %v1122_v55, %v1122_v55  ;;  %2311 = vmatprep.subr.bf16.mxu1 %v2451_v0 }
 0x235   :  { %v1139_v7 = vpack.c.bf16 %v1123_v57, %v1123_v57 }
 0x236   :  { %2296 = vmatmul.mubr.msk.bf16.vlgmr.msra.gmra.mrb[44].mxu0 %vm111_vm0, %v1138_v58  ;;  %v1084_v35 = vpop.xlane.xlu0 %1083 }
 0x237   :  { %v1087_v39 = vpop.xlane.xlu1 %1086  ;;  %2439 = vrcp.f32 %v1084_v35  ;;  %2306 = vmatpush3.bf16.msra.mxu0 %v2379_v56  ;;  %2307 = vmatprep.mubr.msk.bf16.mxu0 %vm2452_vm1, %v2451_v0 }
 0x238   :  { %2441 = vrcp.f32 %v1087_v39  ;;  %2317 = vmatprep.subr.bf16.mxu0 %v2451_v0 }
 0x239   :  { %v2436_v38 = vpop.eup %2435 }
 0x23a   :  { %v2438_v1 = vpop.eup %2437  ;;  %v1124_v4 = vmul.f32 %v2436_v38, %v2831_v48  ;;  %2302 = vmatmul.mubr.msk.bf16.vlgmr.msra.gmra.mrb[44].mxu1 %vm111_vm0, %v1139_v7  ;;  %v2382_v48 = vld [vmem:[%s3049_s2 + $0x58] sm:$0xff]  }
 0x23b   :  { %2312 = vmatpush3.bf16.msra.mxu1 %v2380_v37  ;;  %2313 = vmatprep.mubr.msk.bf16.mxu1 %vm2452_vm1, %v2451_v0  ;;  %v1125_v34 = vmul.f32 %v2438_v1, %v2833_v49 }
 0x23c   :  { %v1140_v8 = vpack.c.bf16 %v1124_v4, %v1124_v4  ;;  %2323 = vmatprep.subr.bf16.mxu1 %v2451_v0 }
 0x23d   :  { %v1141_v23 = vpack.c.bf16 %v1125_v34, %v1125_v34 }
 0x23e   :  { %2308 = vmatmul.mubr.msk.bf16.vlgmr.msra.gmra.mrb[48].mxu0 %vm111_vm0, %v1140_v8  ;;  %v1090_v9 = vpop.xlane.xlu0 %1089 }
 0x23f   :  { %v1093_v62 = vpop.xlane.xlu1 %1092  ;;  %2443 = vrcp.f32 %v1090_v9  ;;  %2318 = vmatpush3.bf16.msra.mxu0 %v2381_v5  ;;  %2319 = vmatprep.mubr.msk.bf16.mxu0 %vm2452_vm1, %v2451_v0 }
 0x240   :  { %2445 = vrcp.f32 %v1093_v62  ;;  %2329 = vmatprep.subr.bf16.mxu0 %v2451_v0 }
 0x241   :  { %v2440_v49 = vpop.eup %2439 }
 0x242   :  { %v2442_v12 = vpop.eup %2441  ;;  %v1126_v50 = vmul.f32 %v2440_v49, %v2842_v59  ;;  %2314 = vmatmul.mubr.msk.bf16.vlgmr.msra.gmra.mrb[48].mxu1 %vm111_vm0, %v1141_v23  ;;  %v2384_v59 = vld [vmem:[%s3049_s2 + $0x68] sm:$0xff]  }
 0x243   :  { %2324 = vmatpush3.bf16.msra.mxu1 %v2382_v48  ;;  %2325 = vmatprep.mubr.msk.bf16.mxu1 %vm2452_vm1, %v2451_v0  ;;  %v1127_v16 = vmul.f32 %v2442_v12, %v2844_v61 }
 0x244   :  { %v1142_v17 = vpack.c.bf16 %v1126_v50, %v1126_v50  ;;  %2335 = vmatprep.subr.bf16.mxu1 %v2451_v0 }
 0x245   :  { %v1143_v31 = vpack.c.bf16 %v1127_v16, %v1127_v16 }
 0x246   :  { %2320 = vmatmul.mubr.msk.bf16.vlgmr.msra.gmra.mrb[52].mxu0 %vm111_vm0, %v1142_v17  ;;  %v1096_v29 = vpop.xlane.xlu0 %1095 }
 0x247   :  { %v1099_v20 = vpop.xlane.xlu1 %1098  ;;  %2447 = vrcp.f32 %v1096_v29  ;;  %2330 = vmatpush3.bf16.msra.mxu0 %v2383_v15  ;;  %2331 = vmatprep.mubr.msk.bf16.mxu0 %vm2452_vm1, %v2451_v0 }
 0x248   :  { %2449 = vrcp.f32 %v1099_v20  ;;  %2341 = vmatprep.subr.bf16.mxu0 %v2451_v0 }
 0x249   :  { %v2444_v61 = vpop.eup %2443 }
 0x24a   :  { %v2446_v22 = vpop.eup %2445  ;;  %v1128_v24 = vmul.f32 %v2444_v61, %v2852_v60  ;;  %2326 = vmatmul.mubr.msk.bf16.vlgmr.msra.gmra.mrb[52].mxu1 %vm111_vm0, %v1143_v31  ;;  %v2386_v60 = vld [vmem:[%s3049_s2 + $0x78] sm:$0xff]  }
 0x24b   :  { %2336 = vmatpush3.bf16.msra.mxu1 %v2384_v59  ;;  %2337 = vmatprep.mubr.msk.bf16.mxu1 %vm2452_vm1, %v2451_v0  ;;  %v1129_v28 = vmul.f32 %v2446_v22, %v2854_v10 }
 0x24c   :  { %v1144_v45 = vpack.c.bf16 %v1128_v24, %v1128_v24  ;;  %2347 = vmatprep.subr.bf16.mxu1 %v2451_v0 }
 0x24d   :  { %v1145_v3 = vpack.c.bf16 %v1129_v28, %v1129_v28 }
 0x24e   :  { %2332 = vmatmul.mubr.msk.bf16.vlgmr.msra.gmra.mrb[56].mxu0 %vm111_vm0, %v1144_v45 }
 0x24f   :  { %2342 = vmatpush3.bf16.msra.mxu0 %v2385_v25  ;;  %2343 = vmatprep.mubr.msk.bf16.mxu0 %vm2452_vm1, %v2451_v0 }
 0x251   :  { %v2448_v6 = vpop.eup %2447 }
 0x252   :  { %v2450_v47 = vpop.eup %2449  ;;  %v1130_v30 = vmul.f32 %v2448_v6, %v2860_v11  ;;  %2338 = vmatmul.mubr.msk.bf16.vlgmr.msra.gmra.mrb[56].mxu1 %vm111_vm0, %v1145_v3 }
 0x253   :  { %2348 = vmatpush3.bf16.msra.mxu1 %v2386_v60  ;;  %2349 = vmatprep.mubr.msk.bf16.mxu1 %vm2452_vm1, %v2451_v0  ;;  %v1131_v10 = vmul.f32 %v2450_v47, %v2862_v51 }
 0x254   :  { %v1146_v13 = vpack.c.bf16 %v1130_v30, %v1130_v30 }
 0x255   :  { %v1147_v32 = vpack.c.bf16 %v1131_v10, %v1131_v10 }
 0x256   :  { %2344 = vmatmul.mubr.msk.bf16.vlgmr.msra.gmra.mrb[60].mxu0 %vm111_vm0, %v1146_v13 }
 0x25a   :  { %2350 = vmatmul.mubr.msk.bf16.vlgmr.msra.gmra.mrb[60].mxu1 %vm111_vm0, %v1147_v32 }
 0x2f1   :  { %v1191_v33 = vpop.f32.mrb[32].mxu0 }
 0x2f2   :  { %v1932_v36 = vadd.f32 3.0, %v1191_v33  ;;  %v2261_v40 = vpop.f32.mrb[33].mxu0 }
 0x2f3   :  { %v1194_v41 = vpop.f32.mrb[34].mxu0 }
 0x2f4   :  { %v1948_v14 = vmax.f32 %v1932_v36, 0.0  ;;  %v2262_v11 = vpop.f32.mrb[35].mxu0 }
 0x2f5   :  { %v1240_v63 = vpop.f32.mrb[32].mxu1 }
 0x2f6   :  { %v1964_v42 = vmin.f32 %v1948_v14, 6.0  ;;  %v1933_v43 = vadd.f32 3.0, %v1240_v63  ;;  %v2267_v2 = vpop.f32.mrb[33].mxu1 }
 0x2f7   :  { %v1243_v21 = vpop.f32.mrb[34].mxu1 }
 0x2f8   :  { %v1980_v0 = vmul.f32 %v1964_v42, %v1191_v33  ;;  %v1949_v44 = vmax.f32 %v1933_v43, 0.0  ;;  %v2268_v51 = vpop.f32.mrb[35].mxu1 }
 0x2f9   :  { %v1289_v19 = vpop.f32.mrb[36].mxu0 }
 0x2fa   :  { %v1996_v46 = vmul.f32 0.16666667, %v1980_v0  ;;  %v1965_v54 = vmin.f32 %v1949_v44, 6.0  ;;  %v1934_v18 = vadd.f32 3.0, %v1289_v19  ;;  %v2273_v26 = vpop.f32.mrb[37].mxu0 }
 0x2fb   :  { %v1292_v52 = vpop.f32.mrb[38].mxu0 }
 0x2fc   :  { %2013 = vst.msk [vmem:[%s3050_s4] sm:$0xf] %vm2012_vm3, %v1996_v46  ;;  %v1981_v27 = vmul.f32 %v1965_v54, %v1240_v63  ;;  %v1950_v53 = vmax.f32 %v1934_v18, 0.0  ;;  %v2274_v55 = vpop.f32.mrb[39].mxu0 }
 0x2fd   :  { %v1338_v56 = vpop.f32.mrb[36].mxu1 }
 0x2fe   :  { %v1997_v57 = vmul.f32 0.16666667, %v1981_v27  ;;  %v1966_v58 = vmin.f32 %v1950_v53, 6.0  ;;  %v1935_v35 = vadd.f32 3.0, %v1338_v56  ;;  %v2279_v39 = vpop.f32.mrb[37].mxu1 }
 0x2ff   :  { %v1341_v37 = vpop.f32.mrb[38].mxu1 }
 0x300   :  { %2014 = vst.msk [vmem:[%s3050_s4 + $0x4] sm:$0xf] %vm2012_vm3, %v1997_v57  ;;  %v1982_v7 = vmul.f32 %v1966_v58, %v1289_v19  ;;  %v1951_v38 = vmax.f32 %v1935_v35, 0.0  ;;  %v2280_v1 = vpop.f32.mrb[39].mxu1 }
 0x301   :  { %v1387_v4 = vpop.f32.mrb[40].mxu0 }
 0x302   :  { %v1998_v5 = vmul.f32 0.16666667, %v1982_v7  ;;  %v1967_v34 = vmin.f32 %v1951_v38, 6.0  ;;  %v1936_v8 = vadd.f32 3.0, %v1387_v4  ;;  %v2285_v9 = vpop.f32.mrb[41].mxu0 }
 0x303   :  { %v1390_v62 = vpop.f32.mrb[42].mxu0 }
 0x304   :  { %2015 = vst.msk [vmem:[%s3050_s4 + $0x8] sm:$0xf] %vm2012_vm3, %v1998_v5  ;;  %v1983_v48 = vmul.f32 %v1967_v34, %v1338_v56  ;;  %v1952_v23 = vmax.f32 %v1936_v8, 0.0  ;;  %v2286_v49 = vpop.f32.mrb[43].mxu0 }
 0x305   :  { %v1436_v12 = vpop.f32.mrb[40].mxu1 }
 0x306   :  { %v1999_v50 = vmul.f32 0.16666667, %v1983_v48  ;;  %v1968_v15 = vmin.f32 %v1952_v23, 6.0  ;;  %v1937_v16 = vadd.f32 3.0, %v1436_v12  ;;  %v2291_v17 = vpop.f32.mrb[41].mxu1 }
 0x307   :  { %v1439_v29 = vpop.f32.mrb[42].mxu1 }
 0x308   :  { %2016 = vst.msk [vmem:[%s3050_s4 + $0xc] sm:$0xf] %vm2012_vm3, %v1999_v50  ;;  %v1984_v20 = vmul.f32 %v1968_v15, %v1387_v4  ;;  %v1953_v59 = vmax.f32 %v1937_v16, 0.0  ;;  %v2292_v31 = vpop.f32.mrb[43].mxu1 }
 0x309   :  { %v1485_v61 = vpop.f32.mrb[44].mxu0 }
 0x30a   :  { %v2000_v22 = vmul.f32 0.16666667, %v1984_v20  ;;  %v1969_v24 = vmin.f32 %v1953_v59, 6.0  ;;  %v1938_v25 = vadd.f32 3.0, %v1485_v61  ;;  %v2297_v28 = vpop.f32.mrb[45].mxu0 }
 0x30b   :  { %v1488_v45 = vpop.f32.mrb[46].mxu0 }
 0x30c   :  { %2017 = vst.msk [vmem:[%s3050_s4 + $0x10] sm:$0xf] %vm2012_vm3, %v2000_v22  ;;  %v1985_v60 = vmul.f32 %v1969_v24, %v1436_v12  ;;  %v1954_v3 = vmax.f32 %v1938_v25, 0.0  ;;  %v2298_v6 = vpop.f32.mrb[47].mxu0 }
 0x30d   :  { %v1534_v47 = vpop.f32.mrb[44].mxu1 }
 0x30e   :  { %v2001_v30 = vmul.f32 0.16666667, %v1985_v60  ;;  %v1970_v10 = vmin.f32 %v1954_v3, 6.0  ;;  %v1939_v13 = vadd.f32 3.0, %v1534_v47  ;;  %v2303_v32 = vpop.f32.mrb[45].mxu1 }
 0x30f   :  { %v1537_v33 = vpop.f32.mrb[46].mxu1 }
 0x310   :  { %2018 = vst.msk [vmem:[%s3050_s4 + $0x14] sm:$0xf] %vm2012_vm3, %v2001_v30  ;;  %v1986_v36 = vmul.f32 %v1970_v10, %v1485_v61  ;;  %v1955_v40 = vmax.f32 %v1939_v13, 0.0  ;;  %v2304_v41 = vpop.f32.mrb[47].mxu1 }
 0x311   :  { %v1583_v14 = vpop.f32.mrb[48].mxu0 }
 0x312   :  { %v2002_v11 = vmul.f32 0.16666667, %v1986_v36  ;;  %v1971_v63 = vmin.f32 %v1955_v40, 6.0  ;;  %v1940_v42 = vadd.f32 3.0, %v1583_v14  ;;  %v2309_v43 = vpop.f32.mrb[49].mxu0 }
 0x313   :  { %v1586_v2 = vpop.f32.mrb[50].mxu0 }
 0x314   :  { %2019 = vst.msk [vmem:[%s3050_s4 + $0x18] sm:$0xf] %vm2012_vm3, %v2002_v11  ;;  %v1987_v21 = vmul.f32 %v1971_v63, %v1534_v47  ;;  %v1956_v0 = vmax.f32 %v1940_v42, 0.0  ;;  %v2310_v44 = vpop.f32.mrb[51].mxu0 }
 0x315   :  { %v1632_v51 = vpop.f32.mrb[48].mxu1 }
 0x316   :  { %v2003_v19 = vmul.f32 0.16666667, %v1987_v21  ;;  %v1972_v46 = vmin.f32 %v1956_v0, 6.0  ;;  %v1941_v54 = vadd.f32 3.0, %v1632_v51  ;;  %v2315_v18 = vpop.f32.mrb[49].mxu1 }
 0x317   :  { %v1635_v26 = vpop.f32.mrb[50].mxu1 }
 0x318   :  { %2020 = vst.msk [vmem:[%s3050_s4 + $0x1c] sm:$0xf] %vm2012_vm3, %v2003_v19  ;;  %v1988_v52 = vmul.f32 %v1972_v46, %v1583_v14  ;;  %v1957_v27 = vmax.f32 %v1941_v54, 0.0  ;;  %v2316_v53 = vpop.f32.mrb[51].mxu1 }
 0x319   :  { %v1681_v55 = vpop.f32.mrb[52].mxu0 }
 0x31a   :  { %v2004_v56 = vmul.f32 0.16666667, %v1988_v52  ;;  %v1973_v57 = vmin.f32 %v1957_v27, 6.0  ;;  %v1942_v58 = vadd.f32 3.0, %v1681_v55  ;;  %v2321_v35 = vpop.f32.mrb[53].mxu0 }
 0x31b   :  { %v1684_v39 = vpop.f32.mrb[54].mxu0 }
 0x31c   :  { %2021 = vst.msk [vmem:[%s3050_s4 + $0x20] sm:$0xf] %vm2012_vm3, %v2004_v56  ;;  %v1989_v37 = vmul.f32 %v1973_v57, %v1632_v51  ;;  %v1958_v7 = vmax.f32 %v1942_v58, 0.0  ;;  %v2322_v38 = vpop.f32.mrb[55].mxu0 }
 0x31d   :  { %v1730_v1 = vpop.f32.mrb[52].mxu1 }
 0x31e   :  { %v2005_v4 = vmul.f32 0.16666667, %v1989_v37  ;;  %v1974_v5 = vmin.f32 %v1958_v7, 6.0  ;;  %v1943_v34 = vadd.f32 3.0, %v1730_v1  ;;  %v2327_v8 = vpop.f32.mrb[53].mxu1 }
 0x31f   :  { %v1733_v9 = vpop.f32.mrb[54].mxu1 }
 0x320   :  { %2022 = vst.msk [vmem:[%s3050_s4 + $0x24] sm:$0xf] %vm2012_vm3, %v2005_v4  ;;  %v1990_v62 = vmul.f32 %v1974_v5, %v1681_v55  ;;  %v1959_v48 = vmax.f32 %v1943_v34, 0.0  ;;  %v2328_v23 = vpop.f32.mrb[55].mxu1 }
 0x321   :  { %v1779_v49 = vpop.f32.mrb[56].mxu0 }
 0x322   :  { %v2006_v12 = vmul.f32 0.16666667, %v1990_v62  ;;  %v1975_v50 = vmin.f32 %v1959_v48, 6.0  ;;  %v1944_v15 = vadd.f32 3.0, %v1779_v49  ;;  %v2333_v16 = vpop.f32.mrb[57].mxu0 }
 0x323   :  { %v1782_v17 = vpop.f32.mrb[58].mxu0 }
 0x324   :  { %2023 = vst.msk [vmem:[%s3050_s4 + $0x28] sm:$0xf] %vm2012_vm3, %v2006_v12  ;;  %v1991_v29 = vmul.f32 %v1975_v50, %v1730_v1  ;;  %v1960_v20 = vmax.f32 %v1944_v15, 0.0  ;;  %v2334_v59 = vpop.f32.mrb[59].mxu0 }
 0x325   :  { %v1828_v31 = vpop.f32.mrb[56].mxu1 }
 0x326   :  { %v2007_v61 = vmul.f32 0.16666667, %v1991_v29  ;;  %v1976_v22 = vmin.f32 %v1960_v20, 6.0  ;;  %v1945_v24 = vadd.f32 3.0, %v1828_v31  ;;  %v2339_v25 = vpop.f32.mrb[57].mxu1 }
 0x327   :  { %v1831_v28 = vpop.f32.mrb[58].mxu1 }
 0x328   :  { %2024 = vst.msk [vmem:[%s3050_s4 + $0x2c] sm:$0xf] %vm2012_vm3, %v2007_v61  ;;  %v1992_v45 = vmul.f32 %v1976_v22, %v1779_v49  ;;  %v1961_v60 = vmax.f32 %v1945_v24, 0.0  ;;  %v2340_v3 = vpop.f32.mrb[59].mxu1 }
 0x329   :  { %v1877_v6 = vpop.f32.mrb[60].mxu0 }
 0x32a   :  { %v2008_v47 = vmul.f32 0.16666667, %v1992_v45  ;;  %v1977_v30 = vmin.f32 %v1961_v60, 6.0  ;;  %v1946_v10 = vadd.f32 3.0, %v1877_v6  ;;  %v2345_v13 = vpop.f32.mrb[61].mxu0 }
 0x32b   :  { %v1880_v32 = vpop.f32.mrb[62].mxu0 }
 0x32c   :  { %2025 = vst.msk [vmem:[%s3050_s4 + $0x30] sm:$0xf] %vm2012_vm3, %v2008_v47  ;;  %v1993_v33 = vmul.f32 %v1977_v30, %v1828_v31  ;;  %v1962_v36 = vmax.f32 %v1946_v10, 0.0  ;;  %v2346_v40 = vpop.f32.mrb[63].mxu0 }
 0x32d   :  { %v1926_v41 = vpop.f32.mrb[60].mxu1 }
 0x32e   :  { %v2009_v14 = vmul.f32 0.16666667, %v1993_v33  ;;  %v1978_v11 = vmin.f32 %v1962_v36, 6.0  ;;  %v1947_v63 = vadd.f32 3.0, %v1926_v41  ;;  %v2351_v42 = vpop.f32.mrb[61].mxu1 }
 0x32f   :  { %v1929_v43 = vpop.f32.mrb[62].mxu1 }
 0x330   :  { %2026 = vst.msk [vmem:[%s3050_s4 + $0x34] sm:$0xf] %vm2012_vm3, %v2009_v14  ;;  %v1994_v2 = vmul.f32 %v1978_v11, %v1877_v6  ;;  %v1963_v21 = vmax.f32 %v1947_v63, 0.0  ;;  %v2352_v0 = vpop.f32.mrb[63].mxu1 }
 0x332   :  { %v2010_v44 = vmul.f32 0.16666667, %v1994_v2  ;;  %v1979_v51 = vmin.f32 %v1963_v21, 6.0 }
 0x334   :  { %2027 = vst.msk [vmem:[%s3050_s4 + $0x38] sm:$0xf] %vm2012_vm3, %v2010_v44  ;;  %v1995_v19 = vmul.f32 %v1979_v51, %v1926_v41 }
 0x336   :  { %v2011_v46 = vmul.f32 0.16666667, %v1995_v19 }
 0x338   :  { %2028 = vst.msk [vmem:[%s3050_s4 + $0x3c] sm:$0xf] %vm2012_vm3, %v2011_v46 }

// kernel: custom_levit_forward.56
= control target key start
LH: loop header
LB: loop body
LE: loop exit
PB: predicated region body
PF: predicated region fallthrough
CT: control target
= control target key end

     0   :  { %vm74_vm0 = vcmask 130048   ;;  %v2229_v0 = vmov 0.0   ;;  %vm2230_vm1 = vmmov 0   ;;  %vm843_vm2 = vcmask 27648   ;;  %s2882_s1 = inlined_call_operand.vmem [shape: bf16[16,4,16], index: 1, kind: input, shape index: {}]   ;;  %s2883_s0 = inlined_call_operand.vmem [shape: bf16[16,4,16], index: 0, kind: input, shape index: {}]   ;;  %s2884_s3 = inlined_call_operand.vmem [shape: f32[8,4,4], index: 3, kind: input, shape index: {}]   ;;  %s2885_s2 = inlined_call_operand.vmem [shape: bf16[16,4,32], index: 2, kind: input, shape index: {}]   ;;  %s2886_s4 = inlined_call_operand.vmem [shape: f32[16,4,32], index: 4, kind: output, shape index: {}]  }
   0x1   :  { %1971 = vmatprep.subr.bf16.mxu0 %v2229_v0  ;;  %1977 = vmatprep.subr.bf16.mxu1 %v2229_v0  ;;  %v34_v1 = vld [vmem:[%s2882_s1] sm:$0x3]  ;;  %v35_v2 = vld [vmem:[%s2882_s1 + $0x2] sm:$0x3]  ;;  %v36_v5 = vld [vmem:[%s2882_s1 + $0x4] sm:$0x3] }
   0x2   :  { %v79_v3 = vsel %vm74_vm0, %v34_v1, 0  ;;  %v125_v4 = vsel %vm74_vm0, %v35_v2, 0  ;;  %1973 = vmatprep.mubr.msk.bf16.mxu0 %vm2230_vm1, %v2229_v0  ;;  %1979 = vmatprep.mubr.msk.bf16.mxu1 %vm2230_vm1, %v2229_v0  ;;  %v37_v6 = vld [vmem:[%s2882_s1 + $0x6] sm:$0x3]  ;;  %v18_v7 = vld [vmem:[%s2883_s0] sm:$0x3] }
   0x3   :  { %1972 = vmatpush3.bf16.xpose.msra.mxu0 %v79_v3  ;;  %1978 = vmatpush3.bf16.xpose.msra.mxu1 %v125_v4  ;;  %v19_v8 = vld [vmem:[%s2883_s0 + $0x2] sm:$0x3]  ;;  %v171_v9 = vsel %vm74_vm0, %v36_v5, 0  ;;  %v217_v10 = vsel %vm74_vm0, %v37_v6, 0  ;;  %v38_v11 = vld [vmem:[%s2882_s1 + $0x8] sm:$0x3] }
   0x4   :  { %1983 = vmatprep.subr.bf16.mxu0 %v2229_v0  ;;  %1989 = vmatprep.subr.bf16.mxu1 %v2229_v0  ;;  %v39_v12 = vld [vmem:[%s2882_s1 + $0xa] sm:$0x3]  ;;  %v20_v13 = vld [vmem:[%s2883_s0 + $0x4] sm:$0x3]  ;;  %v21_v14 = vld [vmem:[%s2883_s0 + $0x6] sm:$0x3] }
   0x5   :  { %v263_v15 = vsel %vm74_vm0, %v38_v11, 0  ;;  %v309_v16 = vsel %vm74_vm0, %v39_v12, 0  ;;  %v40_v17 = vld [vmem:[%s2882_s1 + $0xc] sm:$0x3]  ;;  %v41_v18 = vld [vmem:[%s2882_s1 + $0xe] sm:$0x3] }
   0x6   :  { %v22_v19 = vld [vmem:[%s2883_s0 + $0x8] sm:$0x3]  ;;  %v23_v20 = vld [vmem:[%s2883_s0 + $0xa] sm:$0x3]  ;;  %v355_v21 = vsel %vm74_vm0, %v40_v17, 0  ;;  %v401_v22 = vsel %vm74_vm0, %v41_v18, 0 }
   0x7   :  { %v42_v23 = vld [vmem:[%s2882_s1 + $0x10] sm:$0x3]  ;;  %v43_v24 = vld [vmem:[%s2882_s1 + $0x12] sm:$0x3]  ;;  %v24_v25 = vld [vmem:[%s2883_s0 + $0xc] sm:$0x3] }
   0x8   :  { %v25_v26 = vld [vmem:[%s2883_s0 + $0xe] sm:$0x3]  ;;  %v447_v27 = vsel %vm74_vm0, %v42_v23, 0  ;;  %v493_v28 = vsel %vm74_vm0, %v43_v24, 0  ;;  %v44_v29 = vld [vmem:[%s2882_s1 + $0x14] sm:$0x3] }
   0x9   :  { %v45_v30 = vld [vmem:[%s2882_s1 + $0x16] sm:$0x3]  ;;  %v26_v31 = vld [vmem:[%s2883_s0 + $0x10] sm:$0x3]  ;;  %v27_v32 = vld [vmem:[%s2883_s0 + $0x12] sm:$0x3] }
   0xa   :  { %1974 = vmatmul.mubr.msk.bf16.vlgmr.msra.gmra.mrb[0].mxu0 %vm74_vm0, %v18_v7  ;;  %1980 = vmatmul.mubr.msk.bf16.vlgmr.msra.gmra.mrb[0].mxu1 %vm74_vm0, %v19_v8  ;;  %v539_v33 = vsel %vm74_vm0, %v44_v29, 0  ;;  %v585_v34 = vsel %vm74_vm0, %v45_v30, 0  ;;  %v46_v35 = vld [vmem:[%s2882_s1 + $0x18] sm:$0x3]  ;;  %v47_v36 = vld [vmem:[%s2882_s1 + $0x1a] sm:$0x3] }
   0xb   :  { %1984 = vmatpush3.bf16.xpose.msra.mxu0 %v171_v9  ;;  %1990 = vmatpush3.bf16.xpose.msra.mxu1 %v217_v10  ;;  %v28_v37 = vld [vmem:[%s2883_s0 + $0x14] sm:$0x3]  ;;  %v29_v38 = vld [vmem:[%s2883_s0 + $0x16] sm:$0x3]  ;;  %v631_v39 = vsel %vm74_vm0, %v46_v35, 0  ;;  %v677_v40 = vsel %vm74_vm0, %v47_v36, 0 }
   0xc   :  { %1985 = vmatprep.mubr.msk.bf16.mxu0 %vm2230_vm1, %v2229_v0  ;;  %1991 = vmatprep.mubr.msk.bf16.mxu1 %vm2230_vm1, %v2229_v0  ;;  %v48_v41 = vld [vmem:[%s2882_s1 + $0x1c] sm:$0x3]  ;;  %v49_v42 = vld [vmem:[%s2882_s1 + $0x1e] sm:$0x3]  ;;  %v30_v43 = vld [vmem:[%s2883_s0 + $0x18] sm:$0x3] }
   0xd   :  { %1995 = vmatprep.subr.bf16.mxu0 %v2229_v0  ;;  %2001 = vmatprep.subr.bf16.mxu1 %v2229_v0  ;;  %v31_v44 = vld [vmem:[%s2883_s0 + $0x1a] sm:$0x3]  ;;  %v723_v45 = vsel %vm74_vm0, %v48_v41, 0  ;;  %v769_v46 = vsel %vm74_vm0, %v49_v42, 0  ;;  %v32_v47 = vld [vmem:[%s2883_s0 + $0x1c] sm:$0x3] }
   0xe   :  { %v33_v48 = vld [vmem:[%s2883_s0 + $0x1e] sm:$0x3]  ;;  %v2441_v51 = vld [vmem:[%s2884_s3] sm:$0xf]  ;;  %v2446_v52 = vld [vmem:[%s2884_s3 + $0x4] sm:$0xf] }
   0xf   :  { %v2461_v4 = vld [vmem:[%s2884_s3 + $0x8] sm:$0xf]  ;;  %v2466_v5 = vld [vmem:[%s2884_s3 + $0xc] sm:$0xf]  ;;  %v2501_v36 = vld [vmem:[%s2884_s3 + $0x1c] sm:$0xf] }
  0x10   :  { %vm1040_vm3 = vcmask 1041408   ;;  %vm1036_vm4 = vcmask 31744   ;;  %vm1854_vm5 = vcmask 257024  }
  0x12   :  { %1986 = vmatmul.mubr.msk.bf16.vlgmr.msra.gmra.mrb[4].mxu0 %vm74_vm0, %v20_v13  ;;  %1992 = vmatmul.mubr.msk.bf16.vlgmr.msra.gmra.mrb[4].mxu1 %vm74_vm0, %v21_v14 }
  0x13   :  { %1996 = vmatpush3.bf16.xpose.msra.mxu0 %v263_v15  ;;  %2002 = vmatpush3.bf16.xpose.msra.mxu1 %v309_v16 }
  0x14   :  { %1997 = vmatprep.mubr.msk.bf16.mxu0 %vm2230_vm1, %v2229_v0  ;;  %2003 = vmatprep.mubr.msk.bf16.mxu1 %vm2230_vm1, %v2229_v0 }
  0x15   :  { %2007 = vmatprep.subr.bf16.mxu0 %v2229_v0  ;;  %2013 = vmatprep.subr.bf16.mxu1 %v2229_v0 }
  0x1a   :  { %1998 = vmatmul.mubr.msk.bf16.vlgmr.msra.gmra.mrb[8].mxu0 %vm74_vm0, %v22_v19  ;;  %2004 = vmatmul.mubr.msk.bf16.vlgmr.msra.gmra.mrb[8].mxu1 %vm74_vm0, %v23_v20  ;;  %v2481_v20 = vld [vmem:[%s2884_s3 + $0x14] sm:$0xf] }
  0x1b   :  { %2008 = vmatpush3.bf16.xpose.msra.mxu0 %v355_v21  ;;  %2014 = vmatpush3.bf16.xpose.msra.mxu1 %v401_v22  ;;  %v2486_v21 = vld [vmem:[%s2884_s3 + $0x10] sm:$0xf] }
  0x1c   :  { %2009 = vmatprep.mubr.msk.bf16.mxu0 %vm2230_vm1, %v2229_v0  ;;  %2015 = vmatprep.mubr.msk.bf16.mxu1 %vm2230_vm1, %v2229_v0 }
  0x1d   :  { %2019 = vmatprep.subr.bf16.mxu0 %v2229_v0  ;;  %2025 = vmatprep.subr.bf16.mxu1 %v2229_v0 }
  0x22   :  { %2010 = vmatmul.mubr.msk.bf16.vlgmr.msra.gmra.mrb[12].mxu0 %vm74_vm0, %v24_v25  ;;  %2016 = vmatmul.mubr.msk.bf16.vlgmr.msra.gmra.mrb[12].mxu1 %vm74_vm0, %v25_v26 }
  0x23   :  { %2020 = vmatpush3.bf16.xpose.msra.mxu0 %v447_v27  ;;  %2026 = vmatpush3.bf16.xpose.msra.mxu1 %v493_v28 }
  0x24   :  { %2021 = vmatprep.mubr.msk.bf16.mxu0 %vm2230_vm1, %v2229_v0  ;;  %2027 = vmatprep.mubr.msk.bf16.mxu1 %vm2230_vm1, %v2229_v0 }
  0x25   :  { %2031 = vmatprep.subr.bf16.mxu0 %v2229_v0  ;;  %2037 = vmatprep.subr.bf16.mxu1 %v2229_v0 }
  0x2a   :  { %2022 = vmatmul.mubr.msk.bf16.vlgmr.msra.gmra.mrb[16].mxu0 %vm74_vm0, %v26_v31  ;;  %2028 = vmatmul.mubr.msk.bf16.vlgmr.msra.gmra.mrb[16].mxu1 %vm74_vm0, %v27_v32 }
  0x2b   :  { %2032 = vmatpush3.bf16.xpose.msra.mxu0 %v539_v33  ;;  %2038 = vmatpush3.bf16.xpose.msra.mxu1 %v585_v34 }
  0x2c   :  { %2033 = vmatprep.mubr.msk.bf16.mxu0 %vm2230_vm1, %v2229_v0  ;;  %2039 = vmatprep.mubr.msk.bf16.mxu1 %vm2230_vm1, %v2229_v0 }
  0x2d   :  { %2043 = vmatprep.subr.bf16.mxu0 %v2229_v0  ;;  %2049 = vmatprep.subr.bf16.mxu1 %v2229_v0 }
  0x32   :  { %2034 = vmatmul.mubr.msk.bf16.vlgmr.msra.gmra.mrb[20].mxu0 %vm74_vm0, %v28_v37  ;;  %2040 = vmatmul.mubr.msk.bf16.vlgmr.msra.gmra.mrb[20].mxu1 %vm74_vm0, %v29_v38  ;;  %v2506_v37 = vld [vmem:[%s2884_s3 + $0x18] sm:$0xf] }
  0x33   :  { %2044 = vmatpush3.bf16.xpose.msra.mxu0 %v631_v39  ;;  %2050 = vmatpush3.bf16.xpose.msra.mxu1 %v677_v40 }
  0x34   :  { %2045 = vmatprep.mubr.msk.bf16.mxu0 %vm2230_vm1, %v2229_v0  ;;  %2051 = vmatprep.mubr.msk.bf16.mxu1 %vm2230_vm1, %v2229_v0 }
  0x35   :  { %2055 = vmatprep.subr.bf16.mxu0 %v2229_v0  ;;  %2061 = vmatprep.subr.bf16.mxu1 %v2229_v0 }
  0x3a   :  { %2046 = vmatmul.mubr.msk.bf16.vlgmr.msra.gmra.mrb[24].mxu0 %vm74_vm0, %v30_v43  ;;  %2052 = vmatmul.mubr.msk.bf16.vlgmr.msra.gmra.mrb[24].mxu1 %vm74_vm0, %v31_v44 }
  0x3b   :  { %2056 = vmatpush3.bf16.xpose.msra.mxu0 %v723_v45  ;;  %2062 = vmatpush3.bf16.xpose.msra.mxu1 %v769_v46 }
  0x3c   :  { %2057 = vmatprep.mubr.msk.bf16.mxu0 %vm2230_vm1, %v2229_v0  ;;  %2063 = vmatprep.mubr.msk.bf16.mxu1 %vm2230_vm1, %v2229_v0 }
  0x3d   :  { %2067 = vmatprep.subr.bf16.mxu0 %v2229_v0  ;;  %2073 = vmatprep.subr.bf16.mxu1 %v2229_v0 }
  0x42   :  { %2058 = vmatmul.mubr.msk.bf16.vlgmr.msra.gmra.mrb[28].mxu0 %vm74_vm0, %v32_v47  ;;  %2064 = vmatmul.mubr.msk.bf16.vlgmr.msra.gmra.mrb[28].mxu1 %vm74_vm0, %v33_v48 }
  0x43   :  { %2069 = vmatprep.mubr.msk.bf16.mxu0 %vm2230_vm1, %v2229_v0  ;;  %2075 = vmatprep.mubr.msk.bf16.mxu1 %vm2230_vm1, %v2229_v0 }
  0xdd   :  { %v115_v49 = vpop.f32.mrb[0].mxu0  ;;  %v161_v50 = vpop.f32.mrb[0].mxu1 }
  0xde   :  { %v811_v53 = vmul.f32 0.25, %v115_v49  ;;  %v1975_v54 = vpop.f32.mrb[1].mxu0  ;;  %v812_v55 = vmul.f32 0.25, %v161_v50  ;;  %v1981_v56 = vpop.f32.mrb[1].mxu1 }
  0xdf   :  { %v118_v57 = vpop.f32.mrb[2].mxu0  ;;  %v164_v58 = vpop.f32.mrb[2].mxu1 }
  0xe0   :  { %v1976_v59 = vpop.f32.mrb[3].mxu0  ;;  %v1982_v60 = vpop.f32.mrb[3].mxu1  ;;  %v2449_v61 = vadd.f32 %v811_v53, %v2441_v51  ;;  %v2452_v62 = vadd.f32 %v812_v55, %v2446_v52 }
  0xe2   :  { %v844_v63 = vsel %vm843_vm2, %v2449_v61, -inf  ;;  %v847_v1 = vsel %vm843_vm2, %v2452_v62, -inf }
  0xe3   :  { %845 = vmax.xlane.f32.xlu0 %v844_v63 }
  0xe5   :  { %v207_v2 = vpop.f32.mrb[4].mxu0  ;;  %v253_v3 = vpop.f32.mrb[4].mxu1 }
  0xe6   :  { %v813_v6 = vmul.f32 0.25, %v207_v2  ;;  %v1987_v7 = vpop.f32.mrb[5].mxu0  ;;  %v814_v8 = vmul.f32 0.25, %v253_v3  ;;  %v1993_v9 = vpop.f32.mrb[5].mxu1 }
  0xe7   :  { %848 = vmax.xlane.f32.xlu0 %v847_v1  ;;  %v210_v10 = vpop.f32.mrb[6].mxu0  ;;  %v256_v11 = vpop.f32.mrb[6].mxu1 }
  0xe8   :  { %v1988_v12 = vpop.f32.mrb[7].mxu0  ;;  %v1994_v13 = vpop.f32.mrb[7].mxu1  ;;  %v2469_v14 = vadd.f32 %v813_v6, %v2461_v4  ;;  %v2472_v15 = vadd.f32 %v814_v8, %v2466_v5 }
  0xea   :  { %v850_v16 = vsel %vm843_vm2, %v2469_v14, -inf  ;;  %v853_v17 = vsel %vm843_vm2, %v2472_v15, -inf }
  0xeb   :  { %851 = vmax.xlane.f32.xlu1 %v850_v16 }
  0xed   :  { %v299_v18 = vpop.f32.mrb[8].mxu0  ;;  %v345_v19 = vpop.f32.mrb[8].mxu1 }
  0xee   :  { %v815_v22 = vmul.f32 0.25, %v299_v18  ;;  %v816_v23 = vmul.f32 0.25, %v345_v19  ;;  %v1999_v24 = vpop.f32.mrb[9].mxu0  ;;  %v2005_v25 = vpop.f32.mrb[9].mxu1 }
  0xef   :  { %854 = vmax.xlane.f32.xlu1 %v853_v17  ;;  %v302_v26 = vpop.f32.mrb[10].mxu0  ;;  %v348_v27 = vpop.f32.mrb[10].mxu1 }
  0xf0   :  { %v2000_v28 = vpop.f32.mrb[11].mxu0  ;;  %v2006_v29 = vpop.f32.mrb[11].mxu1  ;;  %v2489_v30 = vadd.f32 %v816_v23, %v2481_v20  ;;  %v2492_v31 = vadd.f32 %v815_v22, %v2486_v21 }
  0xf2   :  { %v859_v32 = vsel %vm843_vm2, %v2489_v30, -inf  ;;  %v856_v33 = vsel %vm843_vm2, %v2492_v31, -inf }
  0xf3   :  { %860 = vmax.xlane.f32.xlu1 %v859_v32  ;;  %857 = vmax.xlane.f32.xlu0 %v856_v33 }
  0xf5   :  { %v391_v34 = vpop.f32.mrb[12].mxu0  ;;  %v437_v35 = vpop.f32.mrb[12].mxu1 }
  0xf6   :  { %v817_v38 = vmul.f32 0.25, %v391_v34  ;;  %v818_v39 = vmul.f32 0.25, %v437_v35  ;;  %v2011_v40 = vpop.f32.mrb[13].mxu0  ;;  %v2017_v41 = vpop.f32.mrb[13].mxu1 }
  0xf7   :  { %v394_v42 = vpop.f32.mrb[14].mxu0  ;;  %v440_v43 = vpop.f32.mrb[14].mxu1 }
  0xf8   :  { %v2012_v44 = vpop.f32.mrb[15].mxu0  ;;  %v2018_v45 = vpop.f32.mrb[15].mxu1  ;;  %v2509_v46 = vadd.f32 %v818_v39, %v2501_v36  ;;  %v2512_v47 = vadd.f32 %v817_v38, %v2506_v37 }
  0xfa   :  { %v865_v48 = vsel %vm843_vm2, %v2509_v46, -inf  ;;  %v862_v49 = vsel %vm843_vm2, %v2512_v47, -inf }
  0xfb   :  { %866 = vmax.xlane.f32.xlu1 %v865_v48  ;;  %863 = vmax.xlane.f32.xlu0 %v862_v49 }
  0xfd   :  { %v483_v50 = vpop.f32.mrb[16].mxu0  ;;  %v529_v53 = vpop.f32.mrb[16].mxu1 }
  0xfe   :  { %v819_v54 = vmul.f32 0.25, %v483_v50  ;;  %v820_v55 = vmul.f32 0.25, %v529_v53  ;;  %v2023_v56 = vpop.f32.mrb[17].mxu0  ;;  %v2029_v57 = vpop.f32.mrb[17].mxu1 }
  0xff   :  { %v486_v58 = vpop.f32.mrb[18].mxu0  ;;  %v532_v59 = vpop.f32.mrb[18].mxu1 }
 0x100   :  { %v2024_v60 = vpop.f32.mrb[19].mxu0  ;;  %v2030_v63 = vpop.f32.mrb[19].mxu1  ;;  %v2519_v1 = vadd.f32 %v820_v55, %v2446_v52  ;;  %v2522_v2 = vadd.f32 %v819_v54, %v2441_v51 }
 0x102   :  { %v871_v3 = vsel %vm843_vm2, %v2519_v1, -inf  ;;  %v868_v6 = vsel %vm843_vm2, %v2522_v2, -inf }
 0x103   :  { %872 = vmax.xlane.f32.xlu1 %v871_v3  ;;  %869 = vmax.xlane.f32.xlu0 %v868_v6 }
 0x105   :  { %v575_v7 = vpop.f32.mrb[20].mxu0  ;;  %v621_v8 = vpop.f32.mrb[20].mxu1 }
 0x106   :  { %v821_v9 = vmul.f32 0.25, %v575_v7  ;;  %v822_v10 = vmul.f32 0.25, %v621_v8  ;;  %v2035_v11 = vpop.f32.mrb[21].mxu0  ;;  %v2041_v12 = vpop.f32.mrb[21].mxu1 }
 0x107   :  { %v578_v13 = vpop.f32.mrb[22].mxu0  ;;  %v624_v52 = vpop.f32.mrb[22].mxu1 }
 0x108   :  { %v2036_v16 = vpop.f32.mrb[23].mxu0  ;;  %v2042_v17 = vpop.f32.mrb[23].mxu1  ;;  %v2529_v51 = vadd.f32 %v822_v10, %v2466_v5  ;;  %v2532_v18 = vadd.f32 %v821_v9, %v2461_v4 }
 0x10a   :  { %v877_v19 = vsel %vm843_vm2, %v2529_v51, -inf  ;;  %v874_v22 = vsel %vm843_vm2, %v2532_v18, -inf }
 0x10b   :  { %878 = vmax.xlane.f32.xlu1 %v877_v19  ;;  %875 = vmax.xlane.f32.xlu0 %v874_v22 }
 0x10d   :  { %v667_v23 = vpop.f32.mrb[24].mxu0  ;;  %v713_v24 = vpop.f32.mrb[24].mxu1 }
 0x10e   :  { %v823_v25 = vmul.f32 0.25, %v667_v23  ;;  %v824_v26 = vmul.f32 0.25, %v713_v24  ;;  %v2047_v27 = vpop.f32.mrb[25].mxu0  ;;  %v2053_v28 = vpop.f32.mrb[25].mxu1 }
 0x10f   :  { %v670_v29 = vpop.f32.mrb[26].mxu0  ;;  %v716_v5 = vpop.f32.mrb[26].mxu1 }
 0x110   :  { %v2048_v32 = vpop.f32.mrb[27].mxu0  ;;  %v2054_v33 = vpop.f32.mrb[27].mxu1  ;;  %v2539_v4 = vadd.f32 %v824_v26, %v2481_v20  ;;  %v2542_v34 = vadd.f32 %v823_v25, %v2486_v21 }
 0x112   :  { %v883_v35 = vsel %vm843_vm2, %v2539_v4, -inf  ;;  %v880_v38 = vsel %vm843_vm2, %v2542_v34, -inf }
 0x113   :  { %884 = vmax.xlane.f32.xlu1 %v883_v35  ;;  %881 = vmax.xlane.f32.xlu0 %v880_v38 }
 0x115   :  { %v759_v39 = vpop.f32.mrb[28].mxu0  ;;  %v805_v40 = vpop.f32.mrb[28].mxu1 }
 0x116   :  { %v825_v41 = vmul.f32 0.25, %v759_v39  ;;  %v826_v42 = vmul.f32 0.25, %v805_v40  ;;  %v2059_v43 = vpop.f32.mrb[29].mxu0  ;;  %v2065_v44 = vpop.f32.mrb[29].mxu1 }
 0x117   :  { %v762_v45 = vpop.f32.mrb[30].mxu0  ;;  %v808_v20 = vpop.f32.mrb[30].mxu1  ;;  %v50_v44 = vld [vmem:[%s2885_s2] sm:$0x3] }
 0x118   :  { %v2060_v48 = vpop.f32.mrb[31].mxu0  ;;  %v2066_v49 = vpop.f32.mrb[31].mxu1  ;;  %v2549_v21 = vadd.f32 %v826_v42, %v2501_v36  ;;  %v2552_v50 = vadd.f32 %v825_v41, %v2506_v37 }
 0x119   :  { %v1042_v48 = vsel %vm1040_vm3, %v50_v44, 0 }
 0x11a   :  { %v889_v53 = vsel %vm843_vm2, %v2549_v21, -inf  ;;  %v886_v54 = vsel %vm843_vm2, %v2552_v50, -inf  ;;  %2068 = vmatpush3.bf16.msra.mxu0 %v1042_v48  ;;  %v64_v48 = vld [vmem:[%s2885_s2 + $0x1c] sm:$0x3] }
 0x11b   :  { %890 = vmax.xlane.f32.xlu1 %v889_v53  ;;  %887 = vmax.xlane.f32.xlu0 %v886_v54 }
 0x11c   :  { %2079 = vmatprep.subr.bf16.mxu0 %v2229_v0 }
 0x170   :  { %v846_v55 = vpop.xlane.xlu0 %845 }
 0x171   :  { %v892_v56 = vsub.f32 %v2449_v61, %v846_v55 }
 0x173   :  { %v908_v57 = vmul.f32 1.442695, %v892_v56 }
 0x174   :  { %v849_v58 = vpop.xlane.xlu0 %848 }
 0x175   :  { %2165 = vpow2.f32 %v908_v57  ;;  %v893_v36 = vsub.f32 %v2452_v62, %v849_v58 }
 0x177   :  { %v910_v59 = vmul.f32 1.442695, %v893_v36 }
 0x178   :  { %v852_v60 = vpop.xlane.xlu1 %851 }
 0x179   :  { %2167 = vpow2.f32 %v910_v59  ;;  %v894_v37 = vsub.f32 %v2469_v14, %v852_v60  ;;  %v52_v59 = vld [vmem:[%s2885_s2 + $0x4] sm:$0x3] }
 0x17b   :  { %v912_v63 = vmul.f32 1.442695, %v894_v37 }
 0x17c   :  { %v855_v3 = vpop.xlane.xlu1 %854 }
 0x17d   :  { %2169 = vpow2.f32 %v912_v63  ;;  %v895_v6 = vsub.f32 %v2472_v15, %v855_v3  ;;  %v2626_v63 = vsel %vm1040_vm3, %v52_v59, 0 }
 0x17f   :  { %v2562_v7 = vpop.eup %2165  ;;  %v914_v8 = vmul.f32 1.442695, %v895_v6 }
 0x180   :  { %v861_v9 = vpop.xlane.xlu1 %860  ;;  %v858_v61 = vpop.xlane.xlu0 %857  ;;  %v940_v10 = vsel %vm843_vm2, %v2562_v7, 0.0 }
 0x181   :  { %2171 = vpow2.f32 %v914_v8  ;;  %v897_v62 = vsub.f32 %v2489_v30, %v861_v9  ;;  %v896_v11 = vsub.f32 %v2492_v31, %v858_v61  ;;  %941 = vadd.xlane.f32.xlu0 %v940_v10 }
 0x183   :  { %v2568_v14 = vpop.eup %2167  ;;  %v918_v12 = vmul.f32 1.442695, %v897_v62  ;;  %v916_v13 = vmul.f32 1.442695, %v896_v11 }
 0x184   :  { %v943_v15 = vsel %vm843_vm2, %v2568_v14, 0.0 }
 0x185   :  { %2173 = vpow2.f32 %v918_v12  ;;  %944 = vadd.xlane.f32.xlu1 %v943_v15  ;;  %v54_v12 = vld [vmem:[%s2885_s2 + $0x8] sm:$0x3] }
 0x186   :  { %2175 = vpow2.f32 %v916_v13 }
 0x187   :  { %v2572_v52 = vpop.eup %2169 }
 0x188   :  { %v867_v16 = vpop.xlane.xlu1 %866  ;;  %v864_v17 = vpop.xlane.xlu0 %863  ;;  %v946_v30 = vsel %vm843_vm2, %v2572_v52, 0.0 }
 0x189   :  { %v899_v31 = vsub.f32 %v2509_v46, %v867_v16  ;;  %v898_v19 = vsub.f32 %v2512_v47, %v864_v17  ;;  %947 = vadd.xlane.f32.xlu0 %v946_v30  ;;  %v2648_v16 = vsel %vm1040_vm3, %v54_v12, 0 }
 0x18b   :  { %v2578_v22 = vpop.eup %2171  ;;  %v922_v23 = vmul.f32 1.442695, %v899_v31  ;;  %v920_v24 = vmul.f32 1.442695, %v898_v19 }
 0x18c   :  { %v949_v25 = vsel %vm843_vm2, %v2578_v22, 0.0 }
 0x18d   :  { %2177 = vpow2.f32 %v922_v23  ;;  %950 = vadd.xlane.f32.xlu1 %v949_v25  ;;  %v56_v23 = vld [vmem:[%s2885_s2 + $0xc] sm:$0x3]  ;;  %v57_v25 = vld [vmem:[%s2885_s2 + $0xe] sm:$0x3] }
 0x18e   :  { %2179 = vpow2.f32 %v920_v24  ;;  %v2668_v24 = vsel %vm1040_vm3, %v56_v23, 0 }
 0x18f   :  { %v2582_v26 = vpop.eup %2173 }
 0x190   :  { %v2584_v27 = vpop.eup %2175  ;;  %v873_v28 = vpop.xlane.xlu1 %872  ;;  %v955_v46 = vsel %vm843_vm2, %v2582_v26, 0.0 }
 0x191   :  { %v870_v29 = vpop.xlane.xlu0 %869  ;;  %v901_v47 = vsub.f32 %v2519_v1, %v873_v28  ;;  %956 = vadd.xlane.f32.xlu1 %v955_v46  ;;  %v952_v32 = vsel %vm843_vm2, %v2584_v27, 0.0 }
 0x192   :  { %v900_v5 = vsub.f32 %v2522_v2, %v870_v29  ;;  %953 = vadd.xlane.f32.xlu0 %v952_v32  ;;  %v2676_v29 = vsel %vm1040_vm3, %v57_v25, 0  ;;  %v58_v32 = vld [vmem:[%s2885_s2 + $0x10] sm:$0x3] }
 0x193   :  { %v926_v33 = vmul.f32 1.442695, %v901_v47 }
 0x194   :  { %v924_v35 = vmul.f32 1.442695, %v900_v5 }
 0x195   :  { %2181 = vpow2.f32 %v926_v33  ;;  %v2688_v33 = vsel %vm1040_vm3, %v58_v32, 0 }
 0x196   :  { %2183 = vpow2.f32 %v924_v35  ;;  %v59_v35 = vld [vmem:[%s2885_s2 + $0x12] sm:$0x3] }
 0x197   :  { %v2592_v38 = vpop.eup %2177 }
 0x198   :  { %v2594_v39 = vpop.eup %2179  ;;  %v879_v40 = vpop.xlane.xlu1 %878  ;;  %v961_v1 = vsel %vm843_vm2, %v2592_v38, 0.0 }
 0x199   :  { %v876_v41 = vpop.xlane.xlu0 %875  ;;  %v903_v2 = vsub.f32 %v2529_v51, %v879_v40  ;;  %962 = vadd.xlane.f32.xlu1 %v961_v1  ;;  %v958_v43 = vsel %vm843_vm2, %v2594_v39, 0.0  ;;  %v51_v51 = vld [vmem:[%s2885_s2 + $0x2] sm:$0x3]  ;;  %v2694_v40 = vsel %vm1040_vm3, %v59_v35, 0 }
 0x19a   :  { %v902_v42 = vsub.f32 %v2532_v18, %v876_v41  ;;  %959 = vadd.xlane.f32.xlu0 %v958_v43  ;;  %v1088_v49 = vsel %vm1040_vm3, %v51_v51, 0  ;;  %v60_v41 = vld [vmem:[%s2885_s2 + $0x14] sm:$0x3]  ;;  %v62_v43 = vld [vmem:[%s2885_s2 + $0x18] sm:$0x3]  ;;  %v2724_v51 = vsel %vm1040_vm3, %v64_v48, 0 }
 0x19b   :  { %v930_v45 = vmul.f32 1.442695, %v903_v2  ;;  %2074 = vmatpush3.bf16.msra.mxu1 %v1088_v49  ;;  %v2700_v1 = vsel %vm1040_vm3, %v60_v41, 0  ;;  %v61_v2 = vld [vmem:[%s2885_s2 + $0x16] sm:$0x3]  ;;  %v2712_v44 = vsel %vm1040_vm3, %v62_v43, 0 }
 0x19c   :  { %v928_v20 = vmul.f32 1.442695, %v902_v42  ;;  %2085 = vmatprep.subr.bf16.mxu1 %v2229_v0  ;;  %v2706_v42 = vsel %vm1040_vm3, %v61_v2, 0  ;;  %v65_v49 = vld [vmem:[%s2885_s2 + $0x1e] sm:$0x3] }
 0x19d   :  { %2185 = vpow2.f32 %v930_v45  ;;  %v63_v45 = vld [vmem:[%s2885_s2 + $0x1a] sm:$0x3] }
 0x19e   :  { %2187 = vpow2.f32 %v928_v20  ;;  %v2718_v20 = vsel %vm1040_vm3, %v63_v45, 0 }
 0x19f   :  { %v2610_v18 = vpop.eup %2181 }
 0x1a0   :  { %v2613_v53 = vpop.eup %2183  ;;  %v885_v54 = vpop.xlane.xlu1 %884  ;;  %v967_v56 = vsel %vm843_vm2, %v2610_v18, 0.0 }
 0x1a1   :  { %v882_v55 = vpop.xlane.xlu0 %881  ;;  %v905_v57 = vsub.f32 %v2539_v4, %v885_v54  ;;  %968 = vadd.xlane.f32.xlu1 %v967_v56  ;;  %v964_v36 = vsel %vm843_vm2, %v2613_v53, 0.0  ;;  %v53_v4 = vld [vmem:[%s2885_s2 + $0x6] sm:$0x3]  ;;  %v2730_v54 = vsel %vm1040_vm3, %v65_v49, 0 }
 0x1a2   :  { %v904_v58 = vsub.f32 %v2542_v34, %v882_v55  ;;  %965 = vadd.xlane.f32.xlu0 %v964_v36  ;;  %v2634_v3 = vsel %vm1040_vm3, %v53_v4, 0 }
 0x1a3   :  { %v934_v60 = vmul.f32 1.442695, %v905_v57 }
 0x1a4   :  { %v932_v37 = vmul.f32 1.442695, %v904_v58 }
 0x1a5   :  { %2189 = vpow2.f32 %v934_v60 }
 0x1a6   :  { %2191 = vpow2.f32 %v932_v37 }
 0x1a7   :  { %v2631_v34 = vpop.eup %2185 }
 0x1a8   :  { %v2636_v6 = vpop.eup %2187  ;;  %v891_v8 = vpop.xlane.xlu1 %890  ;;  %v973_v61 = vsel %vm843_vm2, %v2631_v34, 0.0 }
 0x1a9   :  { %v888_v9 = vpop.xlane.xlu0 %887  ;;  %v907_v10 = vsub.f32 %v2549_v21, %v891_v8  ;;  %974 = vadd.xlane.f32.xlu1 %v973_v61  ;;  %v970_v11 = vsel %vm843_vm2, %v2636_v6, 0.0  ;;  %v55_v21 = vld [vmem:[%s2885_s2 + $0xa] sm:$0x3] }
 0x1aa   :  { %v906_v62 = vsub.f32 %v2552_v50, %v888_v9  ;;  %971 = vadd.xlane.f32.xlu0 %v970_v11  ;;  %v2656_v17 = vsel %vm1040_vm3, %v55_v21, 0 }
 0x1ab   :  { %v938_v13 = vmul.f32 1.442695, %v907_v10 }
 0x1ac   :  { %v936_v15 = vmul.f32 1.442695, %v906_v62 }
 0x1ad   :  { %2193 = vpow2.f32 %v938_v13 }
 0x1ae   :  { %2195 = vpow2.f32 %v936_v15 }
 0x1af   :  { %v2653_v50 = vpop.eup %2189 }
 0x1b0   :  { %v2658_v30 = vpop.eup %2191  ;;  %v979_v31 = vsel %vm843_vm2, %v2653_v50, 0.0 }
 0x1b1   :  { %980 = vadd.xlane.f32.xlu1 %v979_v31  ;;  %v976_v19 = vsel %vm843_vm2, %v2658_v30, 0.0 }
 0x1b2   :  { %977 = vadd.xlane.f32.xlu0 %v976_v19 }
 0x1b7   :  { %v2673_v28 = vpop.eup %2193 }
 0x1b8   :  { %v2678_v46 = vpop.eup %2195  ;;  %v985_v47 = vsel %vm843_vm2, %v2673_v28, 0.0 }
 0x1b9   :  { %986 = vadd.xlane.f32.xlu1 %v985_v47  ;;  %v982_v5 = vsel %vm843_vm2, %v2678_v46, 0.0 }
 0x1ba   :  { %983 = vadd.xlane.f32.xlu0 %v982_v5 }
 0x20e   :  { %v942_v55 = vpop.xlane.xlu0 %941 }
 0x20f   :  { %2197 = vrcp.f32 %v942_v55 }
 0x212   :  { %v945_v56 = vpop.xlane.xlu1 %944 }
 0x213   :  { %2199 = vrcp.f32 %v945_v56 }
 0x216   :  { %v948_v57 = vpop.xlane.xlu0 %947 }
 0x217   :  { %2201 = vrcp.f32 %v948_v57 }
 0x219   :  { %v2198_v58 = vpop.eup %2197 }
 0x21a   :  { %v1004_v36 = vmul.f32 %v2198_v58, %v2562_v7  ;;  %v951_v59 = vpop.xlane.xlu1 %950 }
 0x21b   :  { %2203 = vrcp.f32 %v951_v59 }
 0x21c   :  { %v1020_v60 = vpack.c.bf16 %v1004_v36, %v1004_v36 }
 0x21d   :  { %v2200_v37 = vpop.eup %2199 }
 0x21e   :  { %v1005_v4 = vmul.f32 %v2200_v37, %v2568_v14  ;;  %v957_v8 = vpop.xlane.xlu1 %956  ;;  %2070 = vmatmul.mubr.msk.bf16.vlgmr.msra.gmra.mrb[32].mxu0 %vm1036_vm4, %v1020_v60 }
 0x21f   :  { %2205 = vrcp.f32 %v957_v8  ;;  %v954_v9 = vpop.xlane.xlu0 %953  ;;  %2080 = vmatpush3.bf16.msra.mxu0 %v2626_v63  ;;  %2081 = vmatprep.mubr.msk.bf16.mxu0 %vm2230_vm1, %v2229_v0 }
 0x220   :  { %2207 = vrcp.f32 %v954_v9  ;;  %v1021_v61 = vpack.c.bf16 %v1005_v4, %v1005_v4  ;;  %2091 = vmatprep.subr.bf16.mxu0 %v2229_v0 }
 0x221   :  { %v2202_v7 = vpop.eup %2201 }
 0x222   :  { %v1006_v10 = vmul.f32 %v2202_v7, %v2572_v52  ;;  %2076 = vmatmul.mubr.msk.bf16.vlgmr.msra.gmra.mrb[32].mxu1 %vm1036_vm4, %v1021_v61 }
 0x223   :  { %2086 = vmatpush3.bf16.msra.mxu1 %v2634_v3  ;;  %2087 = vmatprep.mubr.msk.bf16.mxu1 %vm2230_vm1, %v2229_v0 }
 0x224   :  { %v1022_v14 = vpack.c.bf16 %v1006_v10, %v1006_v10  ;;  %2097 = vmatprep.subr.bf16.mxu1 %v2229_v0 }
 0x225   :  { %v2204_v63 = vpop.eup %2203 }
 0x226   :  { %v1007_v62 = vmul.f32 %v2204_v63, %v2578_v22  ;;  %v963_v11 = vpop.xlane.xlu1 %962  ;;  %2082 = vmatmul.mubr.msk.bf16.vlgmr.msra.gmra.mrb[36].mxu0 %vm1036_vm4, %v1022_v14 }
 0x227   :  { %2209 = vrcp.f32 %v963_v11  ;;  %v960_v12 = vpop.xlane.xlu0 %959  ;;  %2092 = vmatpush3.bf16.msra.mxu0 %v2648_v16  ;;  %2093 = vmatprep.mubr.msk.bf16.mxu0 %vm2230_vm1, %v2229_v0 }
 0x228   :  { %2211 = vrcp.f32 %v960_v12  ;;  %v1023_v52 = vpack.c.bf16 %v1007_v62, %v1007_v62  ;;  %2103 = vmatprep.subr.bf16.mxu0 %v2229_v0 }
 0x229   :  { %v2206_v3 = vpop.eup %2205 }
 0x22a   :  { %v2208_v13 = vpop.eup %2207  ;;  %2088 = vmatmul.mubr.msk.bf16.vlgmr.msra.gmra.mrb[36].mxu1 %vm1036_vm4, %v1023_v52  ;;  %v1009_v15 = vmul.f32 %v2206_v3, %v2582_v26 }
 0x22b   :  { %v1008_v22 = vmul.f32 %v2208_v13, %v2584_v27  ;;  %2098 = vmatpush3.bf16.msra.mxu1 %v2656_v17  ;;  %2099 = vmatprep.mubr.msk.bf16.mxu1 %vm2230_vm1, %v2229_v0 }
 0x22c   :  { %2109 = vmatprep.subr.bf16.mxu1 %v2229_v0  ;;  %v1025_v19 = vpack.c.bf16 %v1009_v15, %v1009_v15 }
 0x22d   :  { %v1024_v16 = vpack.c.bf16 %v1008_v22, %v1008_v22 }
 0x22e   :  { %v969_v21 = vpop.xlane.xlu1 %968 }
 0x22f   :  { %2213 = vrcp.f32 %v969_v21  ;;  %2094 = vmatmul.mubr.msk.bf16.vlgmr.msra.gmra.mrb[40].mxu0 %vm1036_vm4, %v1024_v16  ;;  %v966_v31 = vpop.xlane.xlu0 %965 }
 0x230   :  { %2215 = vrcp.f32 %v966_v31  ;;  %2104 = vmatpush3.bf16.msra.mxu0 %v2668_v24  ;;  %2105 = vmatprep.mubr.msk.bf16.mxu0 %vm2230_vm1, %v2229_v0 }
 0x231   :  { %v2210_v27 = vpop.eup %2209  ;;  %2115 = vmatprep.subr.bf16.mxu0 %v2229_v0 }
 0x232   :  { %v2212_v17 = vpop.eup %2211  ;;  %2100 = vmatmul.mubr.msk.bf16.vlgmr.msra.gmra.mrb[40].mxu1 %vm1036_vm4, %v1025_v19  ;;  %v1011_v23 = vmul.f32 %v2210_v27, %v2592_v38 }
 0x233   :  { %v1010_v26 = vmul.f32 %v2212_v17, %v2594_v39  ;;  %2110 = vmatpush3.bf16.msra.mxu1 %v2676_v29  ;;  %2111 = vmatprep.mubr.msk.bf16.mxu1 %vm2230_vm1, %v2229_v0 }
 0x234   :  { %2121 = vmatprep.subr.bf16.mxu1 %v2229_v0  ;;  %v1027_v5 = vpack.c.bf16 %v1011_v23, %v1011_v23 }
 0x235   :  { %v1026_v24 = vpack.c.bf16 %v1010_v26, %v1010_v26 }
 0x236   :  { %v975_v25 = vpop.xlane.xlu1 %974 }
 0x237   :  { %2217 = vrcp.f32 %v975_v25  ;;  %2106 = vmatmul.mubr.msk.bf16.vlgmr.msra.gmra.mrb[44].mxu0 %vm1036_vm4, %v1026_v24  ;;  %v972_v47 = vpop.xlane.xlu0 %971 }
 0x238   :  { %2219 = vrcp.f32 %v972_v47  ;;  %2116 = vmatpush3.bf16.msra.mxu0 %v2688_v33  ;;  %2117 = vmatprep.mubr.msk.bf16.mxu0 %vm2230_vm1, %v2229_v0 }
 0x239   :  { %v2214_v39 = vpop.eup %2213  ;;  %2127 = vmatprep.subr.bf16.mxu0 %v2229_v0 }
 0x23a   :  { %v2216_v29 = vpop.eup %2215  ;;  %2112 = vmatmul.mubr.msk.bf16.vlgmr.msra.gmra.mrb[44].mxu1 %vm1036_vm4, %v1027_v5  ;;  %v1013_v32 = vmul.f32 %v2214_v39, %v2610_v18 }
 0x23b   :  { %v1012_v38 = vmul.f32 %v2216_v29, %v2613_v53  ;;  %2122 = vmatpush3.bf16.msra.mxu1 %v2694_v40  ;;  %2123 = vmatprep.mubr.msk.bf16.mxu1 %vm2230_vm1, %v2229_v0 }
 0x23c   :  { %2133 = vmatprep.subr.bf16.mxu1 %v2229_v0  ;;  %v1029_v2 = vpack.c.bf16 %v1013_v32, %v1013_v32 }
 0x23d   :  { %v1028_v33 = vpack.c.bf16 %v1012_v38, %v1012_v38 }
 0x23e   :  { %v981_v35 = vpop.xlane.xlu1 %980 }
 0x23f   :  { %2221 = vrcp.f32 %v981_v35  ;;  %2118 = vmatmul.mubr.msk.bf16.vlgmr.msra.gmra.mrb[48].mxu0 %vm1036_vm4, %v1028_v33  ;;  %v978_v41 = vpop.xlane.xlu0 %977 }
 0x240   :  { %2223 = vrcp.f32 %v978_v41  ;;  %2128 = vmatpush3.bf16.msra.mxu0 %v2700_v1  ;;  %2129 = vmatprep.mubr.msk.bf16.mxu0 %vm2230_vm1, %v2229_v0 }
 0x241   :  { %v2218_v53 = vpop.eup %2217  ;;  %2139 = vmatprep.subr.bf16.mxu0 %v2229_v0 }
 0x242   :  { %v2220_v40 = vpop.eup %2219  ;;  %2124 = vmatmul.mubr.msk.bf16.vlgmr.msra.gmra.mrb[48].mxu1 %vm1036_vm4, %v1029_v2  ;;  %v1015_v43 = vmul.f32 %v2218_v53, %v2631_v34 }
 0x243   :  { %v1014_v18 = vmul.f32 %v2220_v40, %v2636_v6  ;;  %2134 = vmatpush3.bf16.msra.mxu1 %v2706_v42  ;;  %2135 = vmatprep.mubr.msk.bf16.mxu1 %vm2230_vm1, %v2229_v0 }
 0x244   :  { %2145 = vmatprep.subr.bf16.mxu1 %v2229_v0  ;;  %v1031_v49 = vpack.c.bf16 %v1015_v43, %v1015_v43 }
 0x245   :  { %v1030_v1 = vpack.c.bf16 %v1014_v18, %v1014_v18 }
 0x246   :  { %v987_v45 = vpop.xlane.xlu1 %986 }
 0x247   :  { %2225 = vrcp.f32 %v987_v45  ;;  %2130 = vmatmul.mubr.msk.bf16.vlgmr.msra.gmra.mrb[52].mxu0 %vm1036_vm4, %v1030_v1  ;;  %v984_v48 = vpop.xlane.xlu0 %983 }
 0x248   :  { %2227 = vrcp.f32 %v984_v48  ;;  %2140 = vmatpush3.bf16.msra.mxu0 %v2712_v44  ;;  %2141 = vmatprep.mubr.msk.bf16.mxu0 %vm2230_vm1, %v2229_v0 }
 0x249   :  { %v2222_v6 = vpop.eup %2221  ;;  %2151 = vmatprep.subr.bf16.mxu0 %v2229_v0 }
 0x24a   :  { %v2224_v42 = vpop.eup %2223  ;;  %2136 = vmatmul.mubr.msk.bf16.vlgmr.msra.gmra.mrb[52].mxu1 %vm1036_vm4, %v1031_v49  ;;  %v1017_v55 = vmul.f32 %v2222_v6, %v2653_v50 }
 0x24b   :  { %v1016_v34 = vmul.f32 %v2224_v42, %v2658_v30  ;;  %2146 = vmatpush3.bf16.msra.mxu1 %v2718_v20  ;;  %2147 = vmatprep.mubr.msk.bf16.mxu1 %vm2230_vm1, %v2229_v0 }
 0x24c   :  { %2157 = vmatprep.subr.bf16.mxu1 %v2229_v0  ;;  %v1033_v56 = vpack.c.bf16 %v1017_v55, %v1017_v55 }
 0x24d   :  { %v1032_v44 = vpack.c.bf16 %v1016_v34, %v1016_v34 }
 0x24f   :  { %2142 = vmatmul.mubr.msk.bf16.vlgmr.msra.gmra.mrb[56].mxu0 %vm1036_vm4, %v1032_v44 }
 0x250   :  { %2152 = vmatpush3.bf16.msra.mxu0 %v2724_v51  ;;  %2153 = vmatprep.mubr.msk.bf16.mxu0 %vm2230_vm1, %v2229_v0 }
 0x251   :  { %v2226_v57 = vpop.eup %2225 }
 0x252   :  { %v2228_v30 = vpop.eup %2227  ;;  %2148 = vmatmul.mubr.msk.bf16.vlgmr.msra.gmra.mrb[56].mxu1 %vm1036_vm4, %v1033_v56  ;;  %v1019_v50 = vmul.f32 %v2226_v57, %v2673_v28 }
 0x253   :  { %v1018_v20 = vmul.f32 %v2228_v30, %v2678_v46  ;;  %2158 = vmatpush3.bf16.msra.mxu1 %v2730_v54  ;;  %2159 = vmatprep.mubr.msk.bf16.mxu1 %vm2230_vm1, %v2229_v0 }
 0x254   :  { %v1035_v51 = vpack.c.bf16 %v1019_v50, %v1019_v50 }
 0x255   :  { %v1034_v58 = vpack.c.bf16 %v1018_v20, %v1018_v20 }
 0x257   :  { %2154 = vmatmul.mubr.msk.bf16.vlgmr.msra.gmra.mrb[60].mxu0 %vm1036_vm4, %v1034_v58 }
 0x25a   :  { %2160 = vmatmul.mubr.msk.bf16.vlgmr.msra.gmra.mrb[60].mxu1 %vm1036_vm4, %v1035_v51 }
 0x2f1   :  { %v1078_v36 = vpop.f32.mrb[32].mxu0 }
 0x2f2   :  { %v1774_v59 = vadd.f32 3.0, %v1078_v36  ;;  %v2071_v60 = vpop.f32.mrb[33].mxu0 }
 0x2f3   :  { %v1081_v37 = vpop.f32.mrb[34].mxu0 }
 0x2f4   :  { %v1790_v4 = vmax.f32 %v1774_v59, 0.0  ;;  %v2072_v8 = vpop.f32.mrb[35].mxu0 }
 0x2f5   :  { %v1124_v46 = vpop.f32.mrb[32].mxu1 }
 0x2f6   :  { %v1806_v9 = vmin.f32 %v1790_v4, 6.0  ;;  %v1775_v54 = vadd.f32 3.0, %v1124_v46  ;;  %v2077_v61 = vpop.f32.mrb[33].mxu1 }
 0x2f7   :  { %v1127_v7 = vpop.f32.mrb[34].mxu1 }
 0x2f8   :  { %v1822_v0 = vmul.f32 %v1806_v9, %v1078_v36  ;;  %v1791_v10 = vmax.f32 %v1775_v54, 0.0  ;;  %v2078_v28 = vpop.f32.mrb[35].mxu1 }
 0x2f9   :  { %v1170_v14 = vpop.f32.mrb[36].mxu0 }
 0x2fa   :  { %v1838_v63 = vmul.f32 0.16666667, %v1822_v0  ;;  %v1807_v62 = vmin.f32 %v1791_v10, 6.0  ;;  %v1776_v11 = vadd.f32 3.0, %v1170_v14  ;;  %v2083_v12 = vpop.f32.mrb[37].mxu0 }
 0x2fb   :  { %v1173_v52 = vpop.f32.mrb[38].mxu0 }
 0x2fc   :  { %1855 = vst.msk [vmem:[%s2886_s4] sm:$0xf] %vm1854_vm5, %v1838_v63  ;;  %v1823_v3 = vmul.f32 %v1807_v62, %v1124_v46  ;;  %v1792_v13 = vmax.f32 %v1776_v11, 0.0  ;;  %v2084_v22 = vpop.f32.mrb[39].mxu0 }
 0x2fd   :  { %v1216_v15 = vpop.f32.mrb[36].mxu1 }
 0x2fe   :  { %v1839_v16 = vmul.f32 0.16666667, %v1823_v3  ;;  %v1808_v21 = vmin.f32 %v1792_v13, 6.0  ;;  %v1777_v31 = vadd.f32 3.0, %v1216_v15  ;;  %v2089_v19 = vpop.f32.mrb[37].mxu1 }
 0x2ff   :  { %v1219_v27 = vpop.f32.mrb[38].mxu1 }
 0x300   :  { %1856 = vst.msk [vmem:[%s2886_s4 + $0x4] sm:$0xf] %vm1854_vm5, %v1839_v16  ;;  %v1824_v17 = vmul.f32 %v1808_v21, %v1170_v14  ;;  %v1793_v26 = vmax.f32 %v1777_v31, 0.0  ;;  %v2090_v23 = vpop.f32.mrb[39].mxu1 }
 0x302   :  { %v1840_v24 = vmul.f32 0.16666667, %v1824_v17  ;;  %v1809_v25 = vmin.f32 %v1793_v26, 6.0  ;;  %v1262_v47 = vpop.f32.mrb[40].mxu0 }
 0x303   :  { %v1778_v5 = vadd.f32 3.0, %v1262_v47  ;;  %v2095_v39 = vpop.f32.mrb[41].mxu0 }
 0x304   :  { %1857 = vst.msk [vmem:[%s2886_s4 + $0x8] sm:$0xf] %vm1854_vm5, %v1840_v24  ;;  %v1825_v29 = vmul.f32 %v1809_v25, %v1216_v15  ;;  %v1265_v38 = vpop.f32.mrb[42].mxu0 }
 0x305   :  { %v1794_v32 = vmax.f32 %v1778_v5, 0.0  ;;  %v2096_v33 = vpop.f32.mrb[43].mxu0  ;;  %v1308_v35 = vpop.f32.mrb[40].mxu1 }
 0x306   :  { %v1841_v41 = vmul.f32 0.16666667, %v1825_v29  ;;  %v1779_v2 = vadd.f32 3.0, %v1308_v35  ;;  %v2101_v53 = vpop.f32.mrb[41].mxu1 }
 0x307   :  { %v1810_v40 = vmin.f32 %v1794_v32, 6.0  ;;  %v1311_v18 = vpop.f32.mrb[42].mxu1 }
 0x308   :  { %1858 = vst.msk [vmem:[%s2886_s4 + $0xc] sm:$0xf] %vm1854_vm5, %v1841_v41  ;;  %v1795_v43 = vmax.f32 %v1779_v2, 0.0  ;;  %v2102_v1 = vpop.f32.mrb[43].mxu1 }
 0x309   :  { %v1826_v45 = vmul.f32 %v1810_v40, %v1262_v47 }
 0x30a   :  { %v1811_v48 = vmin.f32 %v1795_v43, 6.0  ;;  %v1354_v49 = vpop.f32.mrb[44].mxu0 }
 0x30b   :  { %v1842_v6 = vmul.f32 0.16666667, %v1826_v45  ;;  %v1780_v42 = vadd.f32 3.0, %v1354_v49  ;;  %v2107_v34 = vpop.f32.mrb[45].mxu0 }
 0x30c   :  { %v1827_v55 = vmul.f32 %v1811_v48, %v1308_v35  ;;  %v1357_v44 = vpop.f32.mrb[46].mxu0 }
 0x30d   :  { %1859 = vst.msk [vmem:[%s2886_s4 + $0x10] sm:$0xf] %vm1854_vm5, %v1842_v6  ;;  %v1796_v56 = vmax.f32 %v1780_v42, 0.0  ;;  %v2108_v57 = vpop.f32.mrb[47].mxu0  ;;  %v1400_v30 = vpop.f32.mrb[44].mxu1 }
 0x30e   :  { %v1843_v20 = vmul.f32 0.16666667, %v1827_v55  ;;  %v1781_v50 = vadd.f32 3.0, %v1400_v30  ;;  %v2113_v58 = vpop.f32.mrb[45].mxu1 }
 0x30f   :  { %v1812_v51 = vmin.f32 %v1796_v56, 6.0  ;;  %v1403_v36 = vpop.f32.mrb[46].mxu1 }
 0x310   :  { %1860 = vst.msk [vmem:[%s2886_s4 + $0x14] sm:$0xf] %vm1854_vm5, %v1843_v20  ;;  %v1797_v59 = vmax.f32 %v1781_v50, 0.0  ;;  %v2114_v60 = vpop.f32.mrb[47].mxu1 }
 0x311   :  { %v1828_v37 = vmul.f32 %v1812_v51, %v1354_v49 }
 0x312   :  { %v1813_v4 = vmin.f32 %v1797_v59, 6.0  ;;  %v1446_v8 = vpop.f32.mrb[48].mxu0 }
 0x313   :  { %v1844_v46 = vmul.f32 0.16666667, %v1828_v37  ;;  %v1782_v9 = vadd.f32 3.0, %v1446_v8  ;;  %v2119_v54 = vpop.f32.mrb[49].mxu0 }
 0x314   :  { %v1829_v61 = vmul.f32 %v1813_v4, %v1400_v30  ;;  %v1449_v7 = vpop.f32.mrb[50].mxu0 }
 0x315   :  { %1861 = vst.msk [vmem:[%s2886_s4 + $0x18] sm:$0xf] %vm1854_vm5, %v1844_v46  ;;  %v1798_v0 = vmax.f32 %v1782_v9, 0.0  ;;  %v2120_v10 = vpop.f32.mrb[51].mxu0  ;;  %v1492_v28 = vpop.f32.mrb[48].mxu1 }
 0x316   :  { %v1845_v14 = vmul.f32 0.16666667, %v1829_v61  ;;  %v1783_v63 = vadd.f32 3.0, %v1492_v28  ;;  %v2125_v62 = vpop.f32.mrb[49].mxu1 }
 0x317   :  { %v1814_v11 = vmin.f32 %v1798_v0, 6.0  ;;  %v1495_v12 = vpop.f32.mrb[50].mxu1 }
 0x318   :  { %1862 = vst.msk [vmem:[%s2886_s4 + $0x1c] sm:$0xf] %vm1854_vm5, %v1845_v14  ;;  %v1799_v52 = vmax.f32 %v1783_v63, 0.0  ;;  %v2126_v3 = vpop.f32.mrb[51].mxu1 }
 0x319   :  { %v1830_v13 = vmul.f32 %v1814_v11, %v1446_v8 }
 0x31a   :  { %v1815_v22 = vmin.f32 %v1799_v52, 6.0  ;;  %v1538_v15 = vpop.f32.mrb[52].mxu0 }
 0x31b   :  { %v1846_v16 = vmul.f32 0.16666667, %v1830_v13  ;;  %v1784_v21 = vadd.f32 3.0, %v1538_v15  ;;  %v2131_v31 = vpop.f32.mrb[53].mxu0 }
 0x31c   :  { %v1831_v19 = vmul.f32 %v1815_v22, %v1492_v28  ;;  %v1541_v27 = vpop.f32.mrb[54].mxu0 }
 0x31d   :  { %1863 = vst.msk [vmem:[%s2886_s4 + $0x20] sm:$0xf] %vm1854_vm5, %v1846_v16  ;;  %v1800_v17 = vmax.f32 %v1784_v21, 0.0  ;;  %v2132_v26 = vpop.f32.mrb[55].mxu0  ;;  %v1584_v23 = vpop.f32.mrb[52].mxu1 }
 0x31e   :  { %v1847_v24 = vmul.f32 0.16666667, %v1831_v19  ;;  %v1785_v25 = vadd.f32 3.0, %v1584_v23  ;;  %v2137_v47 = vpop.f32.mrb[53].mxu1 }
 0x31f   :  { %v1816_v5 = vmin.f32 %v1800_v17, 6.0  ;;  %v1587_v39 = vpop.f32.mrb[54].mxu1 }
 0x320   :  { %1864 = vst.msk [vmem:[%s2886_s4 + $0x24] sm:$0xf] %vm1854_vm5, %v1847_v24  ;;  %v1801_v29 = vmax.f32 %v1785_v25, 0.0  ;;  %v2138_v38 = vpop.f32.mrb[55].mxu1 }
 0x321   :  { %v1832_v32 = vmul.f32 %v1816_v5, %v1538_v15 }
 0x322   :  { %v1817_v33 = vmin.f32 %v1801_v29, 6.0  ;;  %v1630_v35 = vpop.f32.mrb[56].mxu0 }
 0x323   :  { %v1848_v41 = vmul.f32 0.16666667, %v1832_v32  ;;  %v1786_v2 = vadd.f32 3.0, %v1630_v35  ;;  %v2143_v53 = vpop.f32.mrb[57].mxu0 }
 0x324   :  { %v1833_v40 = vmul.f32 %v1817_v33, %v1584_v23  ;;  %v1633_v18 = vpop.f32.mrb[58].mxu0 }
 0x325   :  { %1865 = vst.msk [vmem:[%s2886_s4 + $0x28] sm:$0xf] %vm1854_vm5, %v1848_v41  ;;  %v1802_v43 = vmax.f32 %v1786_v2, 0.0  ;;  %v2144_v1 = vpop.f32.mrb[59].mxu0  ;;  %v1676_v45 = vpop.f32.mrb[56].mxu1 }
 0x326   :  { %v1849_v48 = vmul.f32 0.16666667, %v1833_v40  ;;  %v1787_v49 = vadd.f32 3.0, %v1676_v45  ;;  %v2149_v6 = vpop.f32.mrb[57].mxu1 }
 0x327   :  { %v1818_v42 = vmin.f32 %v1802_v43, 6.0  ;;  %v1679_v34 = vpop.f32.mrb[58].mxu1 }
 0x328   :  { %1866 = vst.msk [vmem:[%s2886_s4 + $0x2c] sm:$0xf] %vm1854_vm5, %v1849_v48  ;;  %v1803_v55 = vmax.f32 %v1787_v49, 0.0  ;;  %v2150_v44 = vpop.f32.mrb[59].mxu1 }
 0x329   :  { %v1834_v56 = vmul.f32 %v1818_v42, %v1630_v35 }
 0x32a   :  { %v1819_v57 = vmin.f32 %v1803_v55, 6.0  ;;  %v1722_v30 = vpop.f32.mrb[60].mxu0 }
 0x32b   :  { %v1850_v20 = vmul.f32 0.16666667, %v1834_v56  ;;  %v1788_v50 = vadd.f32 3.0, %v1722_v30  ;;  %v2155_v58 = vpop.f32.mrb[61].mxu0 }
 0x32c   :  { %v1835_v51 = vmul.f32 %v1819_v57, %v1676_v45  ;;  %v1725_v36 = vpop.f32.mrb[62].mxu0 }
 0x32d   :  { %1867 = vst.msk [vmem:[%s2886_s4 + $0x30] sm:$0xf] %vm1854_vm5, %v1850_v20  ;;  %v1804_v59 = vmax.f32 %v1788_v50, 0.0  ;;  %v2156_v60 = vpop.f32.mrb[63].mxu0  ;;  %v1768_v37 = vpop.f32.mrb[60].mxu1 }
 0x32e   :  { %v1851_v4 = vmul.f32 0.16666667, %v1835_v51  ;;  %v1789_v8 = vadd.f32 3.0, %v1768_v37  ;;  %v2161_v46 = vpop.f32.mrb[61].mxu1 }
 0x32f   :  { %v1820_v9 = vmin.f32 %v1804_v59, 6.0  ;;  %v1771_v54 = vpop.f32.mrb[62].mxu1 }
 0x330   :  { %1868 = vst.msk [vmem:[%s2886_s4 + $0x34] sm:$0xf] %vm1854_vm5, %v1851_v4  ;;  %v1805_v61 = vmax.f32 %v1789_v8, 0.0  ;;  %v2162_v7 = vpop.f32.mrb[63].mxu1 }
 0x331   :  { %v1836_v0 = vmul.f32 %v1820_v9, %v1722_v30 }
 0x332   :  { %v1821_v10 = vmin.f32 %v1805_v61, 6.0 }
 0x333   :  { %v1852_v28 = vmul.f32 0.16666667, %v1836_v0 }
 0x334   :  { %v1837_v14 = vmul.f32 %v1821_v10, %v1768_v37 }
 0x335   :  { %1869 = vst.msk [vmem:[%s2886_s4 + $0x38] sm:$0xf] %vm1854_vm5, %v1852_v28 }
 0x336   :  { %v1853_v63 = vmul.f32 0.16666667, %v1837_v14 }
 0x338   :  { %1870 = vst.msk [vmem:[%s2886_s4 + $0x3c] sm:$0xf] %vm1854_vm5, %v1853_v63 }

</bundles_post_ra>
